<compile_context>
chip_gen: v7x
topology: tpu7x:2x2x1
jax: 0.10.0
libtpu: 0.0.40
codegen_flags: <defaults>
</compile_context>

<pallas_src>
import jax
import jax.numpy as jnp
from jax import lax
from jax.experimental import pallas as pl
from jax.experimental.pallas import tpu as pltpu


# ----------------------------------------------------------------------------
# Pallas kernel: Bt images per grid step, all four branches fused in VMEM.
# ----------------------------------------------------------------------------
def mfa2_kernel(x_ref,
                wh_ref, bh_ref,    # fused 1x1 head [t3|t4|b1]: [Cin,144] bf16, [1,144] f32
                w2_ref, b2_ref,    # pool-branch 1x1:           [Cin,32]  bf16, [1,32]  f32
                wb_ref, bb_ref,    # merged (1x3 | 1x7):        [7*128,96] bf16, [1,96] f32
                wc_ref, bc_ref,    # merged (3x1 | 7x1):        [7*96,80]  bf16, [1,80] f32
                o_ref,             # [Bt, H, W, 128] f32
                wpad_ref,          # [Bt, H, W+6, 128] bf16, zero halo (shared t3|t4)
                hpad_ref):         # [Bt, H+6, W, 96]  bf16, zero halo (shared y3|y4)
    x = x_ref[...]                                     # [Bt, H, W, Cin] f32
    Bt, H, W, Cin = x.shape
    n = Bt * H * W

    def mm_bias_relu(a2d, w_ref, b_ref):
        # bf16 MXU matmul, f32 accumulation; bias + ReLU stay f32 on the VPU.
        a = a2d if a2d.dtype == jnp.bfloat16 else a2d.astype(jnp.bfloat16)
        y = jnp.dot(a, w_ref[...], preferred_element_type=jnp.float32)
        return jnp.maximum(y + b_ref[...], 0.0)

    # ---- halo-only init, every step (each TensorCore owns its scratch copy) ----
    zw = jnp.zeros((Bt, H, 3, 128), jnp.bfloat16)
    wpad_ref[:, :, 0:3, :] = zw
    wpad_ref[:, :, W + 3:W + 6, :] = zw
    zh = jnp.zeros((Bt, 3, W, 96), jnp.bfloat16)
    hpad_ref[:, 0:3, :, :] = zh
    hpad_ref[:, H + 3:H + 6, :, :] = zh

    x2d = x.reshape(n, Cin)

    # ---- fused 1x1 head, lane-aligned order: [t3(64) | t4(64) | o1(16)] ----
    head = mm_bias_relu(x2d, wh_ref, bh_ref)           # [n, 144] f32
    o1 = head[:, 128:144]                              # [n, 16]  (starts on a vreg boundary)
    t34 = head[:, 0:128]                               # [n, 128] lane-aligned, no extraction

    # ---- block2: separable 3x3 "same" max pool straight from x (no pad scratch) ----
    def maxpool3(a, axis):
        m = a.shape[axis]
        if m == 1:
            return a
        pm = jnp.maximum(lax.slice_in_dim(a, 0, m - 1, axis=axis),
                         lax.slice_in_dim(a, 1, m, axis=axis))
        if m == 2:
            return jnp.concatenate([pm, pm], axis=axis)
        first = lax.slice_in_dim(pm, 0, 1, axis=axis)
        mid = jnp.maximum(lax.slice_in_dim(pm, 0, m - 2, axis=axis),
                          lax.slice_in_dim(pm, 1, m - 1, axis=axis))
        last = lax.slice_in_dim(pm, m - 2, m - 1, axis=axis)
        return jnp.concatenate([first, mid, last], axis=axis)

    pooled = maxpool3(maxpool3(x, 2), 1)               # [Bt, H, W, Cin] f32 (VPU, f32)
    o2 = mm_bias_relu(pooled.reshape(n, Cin), w2_ref, b2_ref)     # [n, 32]

    # ---- merged block3/4, conv along W: t34(128) --(1x3|1x7)--> y34(96) ----
    wpad_ref[:, :, 3:3 + W, :] = t34.astype(jnp.bfloat16).reshape(Bt, H, W, 128)
    cols_w = jnp.concatenate(
        [wpad_ref[:, :, k:k + W, :] for k in range(7)], axis=-1).reshape(n, 7 * 128)
    y34 = mm_bias_relu(cols_w, wb_ref, bb_ref)          # [n, 96] f32  ([y3|y4])

    # ---- merged block3/4, conv along H: y34(96) --(3x1|7x1)--> o34(80) ----
    hpad_ref[:, 3:3 + H, :, :] = y34.astype(jnp.bfloat16).reshape(Bt, H, W, 96)
    cols_h = jnp.concatenate(
        [hpad_ref[:, k:k + H, :, :] for k in range(7)], axis=-1).reshape(n, 7 * 96)
    o34 = mm_bias_relu(cols_h, wc_ref, bc_ref)          # [n, 80] f32  ([o3(32)|o4(48)])

    # ---- single lane-dense 128-wide output store (o1|o2|o3|o4) ----
    out = jnp.concatenate([o1, o2, o34], axis=-1)       # [n, 128] f32
    o_ref[...] = out.reshape(Bt, H, W, 128)


# ----------------------------------------------------------------------------
# Parameters (deterministic), with BatchNorm folded into the conv (eval mode).
# ----------------------------------------------------------------------------
_CONV_SPECS = {
    "b1":  ("in", 16, 1, 1),
    "b2":  ("in", 32, 1, 1),
    "b3a": ("in", 64, 1, 1),
    "b3b": (64, 48, 1, 3),
    "b3c": (48, 32, 3, 1),
    "b4a": ("in", 64, 1, 1),
    "b4b": (64, 48, 1, 7),
    "b4c": (48, 48, 7, 1),
}


def _make_folded_conv_bn(key, cin, cout, kh, kw):
    k1, k2, k3, k4, k5, k6 = jax.random.split(key, 6)
    w = 0.1 * jax.random.normal(k1, (cout, cin, kh, kw), jnp.float32)
    b = 0.1 * jax.random.normal(k2, (cout,), jnp.float32)
    gamma = 1.0 + 0.1 * jax.random.normal(k3, (cout,), jnp.float32)
    beta = 0.1 * jax.random.normal(k4, (cout,), jnp.float32)
    mean = 0.1 * jax.random.normal(k5, (cout,), jnp.float32)
    var = jnp.abs(jax.random.normal(k6, (cout,), jnp.float32)) + 0.5
    scale = gamma / jnp.sqrt(var + 1e-5)
    w_eff = w * scale[:, None, None, None]
    b_eff = (b - mean) * scale + beta
    return w_eff, b_eff


def init_params(key, in_channels):
    params = {}
    keys = jax.random.split(key, len(_CONV_SPECS))
    for k_, (name, (ci, co, kh, kw)) in zip(keys, _CONV_SPECS.items()):
        ci = in_channels if ci == "in" else ci
        params[name] = _make_folded_conv_bn(k_, ci, co, kh, kw)
    return params


def _to_kernel_layout(w_oihw):
    # OIHW -> 1x1: [C, O]; (1,K)/(K,1): tap-major [K*C, O]
    o, c, kh, kw = w_oihw.shape
    if kh == 1 and kw == 1:
        return jnp.transpose(w_oihw[:, :, 0, 0], (1, 0))
    if kh == 1:
        w = jnp.transpose(w_oihw[:, :, 0, :], (2, 1, 0))
    else:
        w = jnp.transpose(w_oihw[:, :, :, 0], (2, 1, 0))
    return w.reshape(w.shape[0] * w.shape[1], w.shape[2])


def _prepare_weights(params):
    def kl(name):
        w, b = params[name]
        return _to_kernel_layout(w), b

    w1, b1 = kl("b1")
    w2, b2 = kl("b2")
    w3a, b3a = kl("b3a")
    w3b, b3b = kl("b3b")
    w3c, b3c = kl("b3c")
    w4a, b4a = kl("b4a")
    w4b, b4b = kl("b4b")
    w4c, b4c = kl("b4c")

    # fused 1x1 head, lane-aligned output order [t3(64) | t4(64) | o1(16)]
    wh = jnp.concatenate([w3a, w4a, w1], axis=1)                  # [Cin, 144]
    bh = jnp.concatenate([b3a, b4a, b1])

    # merged (1x3 | 1x7) along W: rows tap-major over the 128-ch [t3|t4] input.
    # taps read wpad at offset (k - 3); the 3-tap branch only has taps k=2,3,4.
    wb = jnp.zeros((7 * 128, 96), jnp.float32)
    for k in range(7):
        if 2 <= k <= 4:
            wb = wb.at[k * 128:k * 128 + 64, 0:48].set(
                w3b[(k - 2) * 64:(k - 1) * 64, :])
        wb = wb.at[k * 128 + 64:(k + 1) * 128, 48:96].set(
            w4b[k * 64:(k + 1) * 64, :])
    bb = jnp.concatenate([b3b, b4b])

    # merged (3x1 | 7x1) along H: rows tap-major over the 96-ch [y3|y4] input.
    wc = jnp.zeros((7 * 96, 80), jnp.float32)
    for k in range(7):
        if 2 <= k <= 4:
            wc = wc.at[k * 96:k * 96 + 48, 0:32].set(
                w3c[(k - 2) * 48:(k - 1) * 48, :])
        wc = wc.at[k * 96 + 48:(k + 1) * 96, 32:80].set(
            w4c[k * 48:(k + 1) * 48, :])
    bc = jnp.concatenate([b3c, b4c])

    def _w16(w):
        return w.astype(jnp.bfloat16)

    def _b32(b):
        return b.reshape(1, -1).astype(jnp.float32)

    return [_w16(wh), _b32(bh), _w16(w2), _b32(b2),
            _w16(wb), _b32(bb), _w16(wc), _b32(bc)]


# ----------------------------------------------------------------------------
# VMEM accounting (physical (8/16,128)-tile padding) and batch-tile selection.
# ----------------------------------------------------------------------------
def _round_up(v, m):
    return (v + m - 1) // m * m


def _padded_bytes(shape, itemsize):
    # Physical VMEM footprint: last dim -> 128 lanes, second-minor -> 8 (f32)
    # or 16 (bf16) sublanes.
    sub = 8 if itemsize >= 4 else 16
    lead = 1
    for d in shape[:-2]:
        lead *= d
    return lead * _round_up(shape[-2], sub) * _round_up(shape[-1], 128) * itemsize


def _footprint_bytes(bt, H, W, Cin):
    n = bt * H * W
    total = 0
    # double-buffered pipeline blocks (input x, output o)
    total += 2 * _padded_bytes((bt, H, W, Cin), 4)
    total += 2 * _padded_bytes((bt, H, W, 128), 4)
    # persistent scratch (bf16 pad buffers)
    total += _padded_bytes((bt, H, W + 6, 128), 2)
    total += _padded_bytes((bt, H + 6, W, 96), 2)
    # dominant in-kernel temporaries
    total += _padded_bytes((n, 144), 4)            # head
    total += 3 * _padded_bytes((n, Cin), 4)        # pool temporaries
    total += _padded_bytes((n, 7 * 128), 2)        # W-conv im2col (bf16)
    total += _padded_bytes((n, 7 * 96), 2)         # H-conv im2col (bf16)
    total += 2 * _padded_bytes((n, 128), 4)        # y34 / output assembly
    # weights + biases (double-buffered, Bt-independent)
    total += 2 * (_padded_bytes((Cin, 144), 2) + _padded_bytes((Cin, 32), 2) +
                  _padded_bytes((7 * 128, 96), 2) + _padded_bytes((7 * 96, 80), 2) +
                  4 * _padded_bytes((1, 144), 4))
    return total


def _chip_config():
    cap = None
    try:
        cap = int(getattr(pltpu.get_tpu_info(), "vmem_capacity_bytes", 0)) or None
    except Exception:
        cap = None
    kind = ""
    try:
        kind = jax.devices()[0].device_kind.lower()
    except Exception:
        pass
    two_tc = "7" in kind               # v7x: 2 TensorCores / chip, 64 MiB VMEM / TC
    if cap is None:
        # unknown chip: assume the smallest per-core VMEM to stay safe
        cap = (64 << 20) if (two_tc or not kind) else (128 << 20)
    if cap <= (64 << 20):              # v7x-class
        budget, limit = 24 << 20, 40 << 20
    else:                              # v5e / v6e (128 MiB physical VMEM)
        budget, limit = 48 << 20, 80 << 20
    return budget, limit, cap, two_tc


def _pick_batch_tile(B, H, W, Cin, budget, two_tc):
    divisors = [d for d in range(1, B + 1) if B % d == 0]
    feasible = [d for d in divisors if _footprint_bytes(d, H, W, Cin) <= budget]
    if not feasible:
        feasible = [1]
    if two_tc:
        # prefer an even number of grid steps so both TensorCores get equal work
        even = [d for d in feasible if (B // d) % 2 == 0]
        if even:
            return max(even)
    return max(feasible)               # single-TC: biggest block, fewest steps


# ----------------------------------------------------------------------------
# Wrappers.
# ----------------------------------------------------------------------------
def mfa2_pallas_nhwc(x_nhwc, params):
    B, H, W, Cin = x_nhwc.shape
    flat = _prepare_weights(params)
    budget, limit, cap, two_tc = _chip_config()
    bt = _pick_batch_tile(B, H, W, Cin, budget, two_tc)
    fp = _footprint_bytes(bt, H, W, Cin)
    vmem_limit = int(min(max(limit, fp + (16 << 20)), cap * 7 // 8))

    in_specs = [pl.BlockSpec((bt, H, W, Cin), lambda b: (b, 0, 0, 0))]
    in_specs += [pl.BlockSpec(a.shape, lambda b: (0, 0)) for a in flat]
    out_specs = pl.BlockSpec((bt, H, W, 128), lambda b: (b, 0, 0, 0))
    scratch = [
        pltpu.VMEM((bt, H, W + 6, 128), jnp.bfloat16),   # shared t3|t4 pad (zero halo)
        pltpu.VMEM((bt, H + 6, W, 96), jnp.bfloat16),    # shared y3|y4 pad (zero halo)
    ]

    return pl.pallas_call(
        mfa2_kernel,
        out_shape=jax.ShapeDtypeStruct((B, H, W, 128), jnp.float32),
        grid_spec=pltpu.PrefetchScalarGridSpec(
            num_scalar_prefetch=0,
            grid=(B // bt,),
            in_specs=in_specs,
            out_specs=out_specs,
            scratch_shapes=scratch,
        ),
        compiler_params=pltpu.CompilerParams(
            dimension_semantics=("parallel",),
            vmem_limit_bytes=vmem_limit),
    )(x_nhwc.astype(jnp.float32), *flat)


@jax.jit
def mfa2_pallas(x_nchw, params):
    # NCHW public API (matches the PyTorch module). NHWC callers should use
    # mfa2_pallas_nhwc and skip both transposes (they ~double HBM traffic).
    x = jnp.transpose(x_nchw, (0, 2, 3, 1)).astype(jnp.float32)
    y = mfa2_pallas_nhwc(x, params)
    return jnp.transpose(y, (0, 3, 1, 2))


# ----------------------------------------------------------------------------
# Pure-JAX reference (same folded params, exact precision) for verification.
# ----------------------------------------------------------------------------
def mfa2_ref(x, params):
    def cbr(inp, name, ph, pw):
        w, b = params[name]
        y = lax.conv_general_dilated(
            inp, w, (1, 1), ((ph, ph), (pw, pw)),
            dimension_numbers=("NCHW", "OIHW", "NCHW"),
            precision=lax.Precision.HIGHEST)
        return jax.nn.relu(y + b[None, :, None, None])

    x1 = cbr(x, "b1", 0, 0)
    xp = lax.reduce_window(x, -jnp.inf, lax.max, (1, 1, 3, 3), (1, 1, 1, 1),
                           ((0, 0), (0, 0), (1, 1), (1, 1)))
    x2 = cbr(xp, "b2", 0, 0)
    x3 = cbr(cbr(cbr(x, "b3a", 0, 0), "b3b", 0, 1), "b3c", 1, 0)
    x4 = cbr(cbr(cbr(x, "b4a", 0, 0), "b4b", 0, 3), "b4c", 3, 0)
    return jnp.concatenate([x1, x2, x3, x4], axis=1)


if __name__ == "__main__":
    B, Cin, H, W = 2, 4, 16, 16
    key = jax.random.PRNGKey(0)
    kx, kp = jax.random.split(key)
    x = jax.random.normal(kx, (B, Cin, H, W), jnp.float32)
    params = init_params(kp, Cin)

    out = jax.block_until_ready(mfa2_pallas(x, params))
    assert out.shape == (B, 128, H, W), out.shape

    ref = jax.block_until_ready(mfa2_ref(x, params))
    err = float(jnp.max(jnp.abs(out - ref)))
    # bf16 MXU matmuls (f32 accumulation) vs exact-precision reference.
    assert err < 3e-2, f"max abs err {err}"

    print("KERNEL_OK")
</pallas_src>

<mosaic_0001>
module attributes {stable_mosaic.version = 11 : i64} {
  func.func @mfa2_kernel(%arg0: i32, %arg1: memref<2x16x16x4xf32, #tpu.memory_space<vmem>>, %arg2: memref<4x144xbf16, #tpu.memory_space<vmem>>, %arg3: memref<1x144xf32, #tpu.memory_space<vmem>>, %arg4: memref<4x32xbf16, #tpu.memory_space<vmem>>, %arg5: memref<1x32xf32, #tpu.memory_space<vmem>>, %arg6: memref<896x96xbf16, #tpu.memory_space<vmem>>, %arg7: memref<1x96xf32, #tpu.memory_space<vmem>>, %arg8: memref<672x80xbf16, #tpu.memory_space<vmem>>, %arg9: memref<1x80xf32, #tpu.memory_space<vmem>>, %arg10: memref<2x16x16x128xf32, #tpu.memory_space<vmem>>, %arg11: memref<2x16x22x128xbf16, #tpu.memory_space<vmem>>, %arg12: memref<2x22x16x96xbf16, #tpu.memory_space<vmem>>) attributes {dimension_semantics = [#tpu.dimension_semantics<parallel>], iteration_bounds = array<i64: 1>, scalar_prefetch = 0 : i64, scratch_operands = 2 : i64, tpu.core_type = #tpu.core_type<tc>, window_params = [{transform_indices = @transform_0, window_bounds = array<i64: 2, 16, 16, 4>}, {pipeline_mode = #tpu.pipeline_mode<synchronous>, transform_indices = @transform_1, window_bounds = array<i64: 4, 144>}, {pipeline_mode = #tpu.pipeline_mode<synchronous>, transform_indices = @transform_2, window_bounds = array<i64: 1, 144>}, {pipeline_mode = #tpu.pipeline_mode<synchronous>, transform_indices = @transform_3, window_bounds = array<i64: 4, 32>}, {pipeline_mode = #tpu.pipeline_mode<synchronous>, transform_indices = @transform_4, window_bounds = array<i64: 1, 32>}, {pipeline_mode = #tpu.pipeline_mode<synchronous>, transform_indices = @transform_5, window_bounds = array<i64: 896, 96>}, {pipeline_mode = #tpu.pipeline_mode<synchronous>, transform_indices = @transform_6, window_bounds = array<i64: 1, 96>}, {pipeline_mode = #tpu.pipeline_mode<synchronous>, transform_indices = @transform_7, window_bounds = array<i64: 672, 80>}, {pipeline_mode = #tpu.pipeline_mode<synchronous>, transform_indices = @transform_8, window_bounds = array<i64: 1, 80>}, {transform_indices = @transform_9, window_bounds = array<i64: 2, 16, 16, 128>}]} {
    %c0 = arith.constant 0 : index
    %c0_0 = arith.constant 0 : index
    %c0_1 = arith.constant 0 : index
    %c0_2 = arith.constant 0 : index
    %0 = vector.load %arg1[%c0, %c0_0, %c0_1, %c0_2] : memref<2x16x16x4xf32, #tpu.memory_space<vmem>>, vector<2x16x16x4xf32>
    %cst = arith.constant 0.000000e+00 : bf16
    %1 = vector.broadcast %cst : bf16 to vector<2x16x3x128xbf16>
    %c0_3 = arith.constant 0 : index
    %c0_4 = arith.constant 0 : index
    %c0_5 = arith.constant 0 : index
    %c0_6 = arith.constant 0 : index
    %2 = vector.load %arg11[%c0_3, %c0_4, %c0_5, %c0_6] : memref<2x16x22x128xbf16, #tpu.memory_space<vmem>>, vector<2x16x3x128xbf16>
    tpu.vector_store %arg11[%c0_3, %c0_4, %c0_5, %c0_6], %1 {strides = array<i32>} : memref<2x16x22x128xbf16, #tpu.memory_space<vmem>>, vector<2x16x3x128xbf16>,
    %c0_7 = arith.constant 0 : index
    %c0_8 = arith.constant 0 : index
    %c19 = arith.constant 19 : index
    %c0_9 = arith.constant 0 : index
    %3 = vector.load %arg11[%c0_7, %c0_8, %c19, %c0_9] : memref<2x16x22x128xbf16, #tpu.memory_space<vmem>>, vector<2x16x3x128xbf16>
    tpu.vector_store %arg11[%c0_7, %c0_8, %c19, %c0_9], %1 {strides = array<i32>} : memref<2x16x22x128xbf16, #tpu.memory_space<vmem>>, vector<2x16x3x128xbf16>,
    %cst_10 = arith.constant 0.000000e+00 : bf16
    %4 = vector.broadcast %cst_10 : bf16 to vector<2x3x16x96xbf16>
    %c0_11 = arith.constant 0 : index
    %c0_12 = arith.constant 0 : index
    %c0_13 = arith.constant 0 : index
    %c0_14 = arith.constant 0 : index
    %5 = vector.load %arg12[%c0_11, %c0_12, %c0_13, %c0_14] : memref<2x22x16x96xbf16, #tpu.memory_space<vmem>>, vector<2x3x16x96xbf16>
    tpu.vector_store %arg12[%c0_11, %c0_12, %c0_13, %c0_14], %4 {strides = array<i32>} : memref<2x22x16x96xbf16, #tpu.memory_space<vmem>>, vector<2x3x16x96xbf16>,
    %c0_15 = arith.constant 0 : index
    %c19_16 = arith.constant 19 : index
    %c0_17 = arith.constant 0 : index
    %c0_18 = arith.constant 0 : index
    %6 = vector.load %arg12[%c0_15, %c19_16, %c0_17, %c0_18] : memref<2x22x16x96xbf16, #tpu.memory_space<vmem>>, vector<2x3x16x96xbf16>
    tpu.vector_store %arg12[%c0_15, %c19_16, %c0_17, %c0_18], %4 {strides = array<i32>} : memref<2x22x16x96xbf16, #tpu.memory_space<vmem>>, vector<2x3x16x96xbf16>,
    %7 = vector.shape_cast %0 : vector<2x16x16x4xf32> to vector<512x4xf32>
    %8 = arith.truncf %7 : vector<512x4xf32> to vector<512x4xbf16>
    %c0_19 = arith.constant 0 : index
    %c0_20 = arith.constant 0 : index
    %9 = vector.load %arg2[%c0_19, %c0_20] : memref<4x144xbf16, #tpu.memory_space<vmem>>, vector<4x144xbf16>
    %cst_21 = arith.constant dense<0.000000e+00> : vector<512x144xf32>
    %10 = tpu.matmul %8, %9, %cst_21 {dimension_numbers = #tpu.dot_dimension_numbers<[1], [0], [0], [1], [0, 0, 1, 1], [], []>} : vector<512x4xbf16>, vector<4x144xbf16>, vector<512x144xf32> -> vector<512x144xf32>
    %c0_22 = arith.constant 0 : index
    %c0_23 = arith.constant 0 : index
    %11 = vector.load %arg3[%c0_22, %c0_23] : memref<1x144xf32, #tpu.memory_space<vmem>>, vector<1x144xf32>
    %12 = vector.broadcast %11 : vector<1x144xf32> to vector<512x144xf32>
    %13 = arith.addf %10, %12 : vector<512x144xf32>
    %cst_24 = arith.constant 0.000000e+00 : f32
    %14 = vector.broadcast %cst_24 : f32 to vector<512x144xf32>
    %15 = arith.maximumf %13, %14 : vector<512x144xf32>
    %16 = vector.extract_strided_slice %15 {offsets = [0, 128], sizes = [512, 16], strides = [1, 1]} : vector<512x144xf32> to vector<512x16xf32>
    %17 = vector.extract_strided_slice %15 {offsets = [0, 0], sizes = [512, 128], strides = [1, 1]} : vector<512x144xf32> to vector<512x128xf32>
    %18 = vector.extract_strided_slice %0 {offsets = [0, 0, 0, 0], sizes = [2, 16, 15, 4], strides = [1, 1, 1, 1]} : vector<2x16x16x4xf32> to vector<2x16x15x4xf32>
    %19 = vector.extract_strided_slice %0 {offsets = [0, 0, 1, 0], sizes = [2, 16, 15, 4], strides = [1, 1, 1, 1]} : vector<2x16x16x4xf32> to vector<2x16x15x4xf32>
    %20 = arith.maximumf %18, %19 : vector<2x16x15x4xf32>
    %21 = vector.extract_strided_slice %20 {offsets = [0, 0, 0, 0], sizes = [2, 16, 1, 4], strides = [1, 1, 1, 1]} : vector<2x16x15x4xf32> to vector<2x16x1x4xf32>
    %22 = vector.extract_strided_slice %20 {offsets = [0, 0, 0, 0], sizes = [2, 16, 14, 4], strides = [1, 1, 1, 1]} : vector<2x16x15x4xf32> to vector<2x16x14x4xf32>
    %23 = vector.extract_strided_slice %20 {offsets = [0, 0, 1, 0], sizes = [2, 16, 14, 4], strides = [1, 1, 1, 1]} : vector<2x16x15x4xf32> to vector<2x16x14x4xf32>
    %24 = arith.maximumf %22, %23 : vector<2x16x14x4xf32>
    %25 = vector.extract_strided_slice %20 {offsets = [0, 0, 14, 0], sizes = [2, 16, 1, 4], strides = [1, 1, 1, 1]} : vector<2x16x15x4xf32> to vector<2x16x1x4xf32>
    %26 = tpu.concatenate %21, %24, %25 in 2 : vector<2x16x1x4xf32>, vector<2x16x14x4xf32>, vector<2x16x1x4xf32> -> vector<2x16x16x4xf32>
    %27 = vector.extract_strided_slice %26 {offsets = [0, 0, 0, 0], sizes = [2, 15, 16, 4], strides = [1, 1, 1, 1]} : vector<2x16x16x4xf32> to vector<2x15x16x4xf32>
    %28 = vector.extract_strided_slice %26 {offsets = [0, 1, 0, 0], sizes = [2, 15, 16, 4], strides = [1, 1, 1, 1]} : vector<2x16x16x4xf32> to vector<2x15x16x4xf32>
    %29 = arith.maximumf %27, %28 : vector<2x15x16x4xf32>
    %30 = vector.extract_strided_slice %29 {offsets = [0, 0, 0, 0], sizes = [2, 1, 16, 4], strides = [1, 1, 1, 1]} : vector<2x15x16x4xf32> to vector<2x1x16x4xf32>
    %31 = vector.extract_strided_slice %29 {offsets = [0, 0, 0, 0], sizes = [2, 14, 16, 4], strides = [1, 1, 1, 1]} : vector<2x15x16x4xf32> to vector<2x14x16x4xf32>
    %32 = vector.extract_strided_slice %29 {offsets = [0, 1, 0, 0], sizes = [2, 14, 16, 4], strides = [1, 1, 1, 1]} : vector<2x15x16x4xf32> to vector<2x14x16x4xf32>
    %33 = arith.maximumf %31, %32 : vector<2x14x16x4xf32>
    %34 = vector.extract_strided_slice %29 {offsets = [0, 14, 0, 0], sizes = [2, 1, 16, 4], strides = [1, 1, 1, 1]} : vector<2x15x16x4xf32> to vector<2x1x16x4xf32>
    %35 = tpu.concatenate %30, %33, %34 in 1 : vector<2x1x16x4xf32>, vector<2x14x16x4xf32>, vector<2x1x16x4xf32> -> vector<2x16x16x4xf32>
    %36 = vector.shape_cast %35 : vector<2x16x16x4xf32> to vector<512x4xf32>
    %37 = arith.truncf %36 : vector<512x4xf32> to vector<512x4xbf16>
    %c0_25 = arith.constant 0 : index
    %c0_26 = arith.constant 0 : index
    %38 = vector.load %arg4[%c0_25, %c0_26] : memref<4x32xbf16, #tpu.memory_space<vmem>>, vector<4x32xbf16>
    %cst_27 = arith.constant dense<0.000000e+00> : vector<512x32xf32>
    %39 = tpu.matmul %37, %38, %cst_27 {dimension_numbers = #tpu.dot_dimension_numbers<[1], [0], [0], [1], [0, 0, 1, 1], [], []>} : vector<512x4xbf16>, vector<4x32xbf16>, vector<512x32xf32> -> vector<512x32xf32>
    %c0_28 = arith.constant 0 : index
    %c0_29 = arith.constant 0 : index
    %40 = vector.load %arg5[%c0_28, %c0_29] : memref<1x32xf32, #tpu.memory_space<vmem>>, vector<1x32xf32>
    %41 = vector.broadcast %40 : vector<1x32xf32> to vector<512x32xf32>
    %42 = arith.addf %39, %41 : vector<512x32xf32>
    %cst_30 = arith.constant 0.000000e+00 : f32
    %43 = vector.broadcast %cst_30 : f32 to vector<512x32xf32>
    %44 = arith.maximumf %42, %43 : vector<512x32xf32>
    %45 = arith.truncf %17 : vector<512x128xf32> to vector<512x128xbf16>
    %46 = vector.shape_cast %45 : vector<512x128xbf16> to vector<2x16x16x128xbf16>
    %c0_31 = arith.constant 0 : index
    %c0_32 = arith.constant 0 : index
    %c3 = arith.constant 3 : index
    %c0_33 = arith.constant 0 : index
    %47 = vector.load %arg11[%c0_31, %c0_32, %c3, %c0_33] : memref<2x16x22x128xbf16, #tpu.memory_space<vmem>>, vector<2x16x16x128xbf16>
    tpu.vector_store %arg11[%c0_31, %c0_32, %c3, %c0_33], %46 {strides = array<i32>} : memref<2x16x22x128xbf16, #tpu.memory_space<vmem>>, vector<2x16x16x128xbf16>,
    %c0_34 = arith.constant 0 : index
    %c0_35 = arith.constant 0 : index
    %c0_36 = arith.constant 0 : index
    %c0_37 = arith.constant 0 : index
    %48 = vector.load %arg11[%c0_34, %c0_35, %c0_36, %c0_37] : memref<2x16x22x128xbf16, #tpu.memory_space<vmem>>, vector<2x16x16x128xbf16>
    %c0_38 = arith.constant 0 : index
    %c0_39 = arith.constant 0 : index
    %c1 = arith.constant 1 : index
    %c0_40 = arith.constant 0 : index
    %49 = vector.load %arg11[%c0_38, %c0_39, %c1, %c0_40] : memref<2x16x22x128xbf16, #tpu.memory_space<vmem>>, vector<2x16x16x128xbf16>
    %c0_41 = arith.constant 0 : index
    %c0_42 = arith.constant 0 : index
    %c2 = arith.constant 2 : index
    %c0_43 = arith.constant 0 : index
    %50 = vector.load %arg11[%c0_41, %c0_42, %c2, %c0_43] : memref<2x16x22x128xbf16, #tpu.memory_space<vmem>>, vector<2x16x16x128xbf16>
    %c0_44 = arith.constant 0 : index
    %c0_45 = arith.constant 0 : index
    %c3_46 = arith.constant 3 : index
    %c0_47 = arith.constant 0 : index
    %51 = vector.load %arg11[%c0_44, %c0_45, %c3_46, %c0_47] : memref<2x16x22x128xbf16, #tpu.memory_space<vmem>>, vector<2x16x16x128xbf16>
    %c0_48 = arith.constant 0 : index
    %c0_49 = arith.constant 0 : index
    %c4 = arith.constant 4 : index
    %c0_50 = arith.constant 0 : index
    %52 = vector.load %arg11[%c0_48, %c0_49, %c4, %c0_50] : memref<2x16x22x128xbf16, #tpu.memory_space<vmem>>, vector<2x16x16x128xbf16>
    %c0_51 = arith.constant 0 : index
    %c0_52 = arith.constant 0 : index
    %c5 = arith.constant 5 : index
    %c0_53 = arith.constant 0 : index
    %53 = vector.load %arg11[%c0_51, %c0_52, %c5, %c0_53] : memref<2x16x22x128xbf16, #tpu.memory_space<vmem>>, vector<2x16x16x128xbf16>
    %c0_54 = arith.constant 0 : index
    %c0_55 = arith.constant 0 : index
    %c6 = arith.constant 6 : index
    %c0_56 = arith.constant 0 : index
    %54 = vector.load %arg11[%c0_54, %c0_55, %c6, %c0_56] : memref<2x16x22x128xbf16, #tpu.memory_space<vmem>>, vector<2x16x16x128xbf16>
    %55 = tpu.concatenate %48, %49, %50, %51, %52, %53, %54 in 3 : vector<2x16x16x128xbf16>, vector<2x16x16x128xbf16>, vector<2x16x16x128xbf16>, vector<2x16x16x128xbf16>, vector<2x16x16x128xbf16>, vector<2x16x16x128xbf16>, vector<2x16x16x128xbf16> -> vector<2x16x16x896xbf16>
    %56 = vector.shape_cast %55 : vector<2x16x16x896xbf16> to vector<512x896xbf16>
    %c0_57 = arith.constant 0 : index
    %c0_58 = arith.constant 0 : index
    %57 = vector.load %arg6[%c0_57, %c0_58] : memref<896x96xbf16, #tpu.memory_space<vmem>>, vector<896x96xbf16>
    %cst_59 = arith.constant dense<0.000000e+00> : vector<512x96xf32>
    %58 = tpu.matmul %56, %57, %cst_59 {dimension_numbers = #tpu.dot_dimension_numbers<[1], [0], [0], [1], [0, 0, 1, 1], [], []>} : vector<512x896xbf16>, vector<896x96xbf16>, vector<512x96xf32> -> vector<512x96xf32>
    %c0_60 = arith.constant 0 : index
    %c0_61 = arith.constant 0 : index
    %59 = vector.load %arg7[%c0_60, %c0_61] : memref<1x96xf32, #tpu.memory_space<vmem>>, vector<1x96xf32>
    %60 = vector.broadcast %59 : vector<1x96xf32> to vector<512x96xf32>
    %61 = arith.addf %58, %60 : vector<512x96xf32>
    %cst_62 = arith.constant 0.000000e+00 : f32
    %62 = vector.broadcast %cst_62 : f32 to vector<512x96xf32>
    %63 = arith.maximumf %61, %62 : vector<512x96xf32>
    %64 = arith.truncf %63 : vector<512x96xf32> to vector<512x96xbf16>
    %65 = vector.shape_cast %64 : vector<512x96xbf16> to vector<2x16x16x96xbf16>
    %c0_63 = arith.constant 0 : index
    %c3_64 = arith.constant 3 : index
    %c0_65 = arith.constant 0 : index
    %c0_66 = arith.constant 0 : index
    %66 = vector.load %arg12[%c0_63, %c3_64, %c0_65, %c0_66] : memref<2x22x16x96xbf16, #tpu.memory_space<vmem>>, vector<2x16x16x96xbf16>
    tpu.vector_store %arg12[%c0_63, %c3_64, %c0_65, %c0_66], %65 {strides = array<i32>} : memref<2x22x16x96xbf16, #tpu.memory_space<vmem>>, vector<2x16x16x96xbf16>,
    %c0_67 = arith.constant 0 : index
    %c0_68 = arith.constant 0 : index
    %c0_69 = arith.constant 0 : index
    %c0_70 = arith.constant 0 : index
    %67 = vector.load %arg12[%c0_67, %c0_68, %c0_69, %c0_70] : memref<2x22x16x96xbf16, #tpu.memory_space<vmem>>, vector<2x16x16x96xbf16>
    %c0_71 = arith.constant 0 : index
    %c1_72 = arith.constant 1 : index
    %c0_73 = arith.constant 0 : index
    %c0_74 = arith.constant 0 : index
    %68 = vector.load %arg12[%c0_71, %c1_72, %c0_73, %c0_74] : memref<2x22x16x96xbf16, #tpu.memory_space<vmem>>, vector<2x16x16x96xbf16>
    %c0_75 = arith.constant 0 : index
    %c2_76 = arith.constant 2 : index
    %c0_77 = arith.constant 0 : index
    %c0_78 = arith.constant 0 : index
    %69 = vector.load %arg12[%c0_75, %c2_76, %c0_77, %c0_78] : memref<2x22x16x96xbf16, #tpu.memory_space<vmem>>, vector<2x16x16x96xbf16>
    %c0_79 = arith.constant 0 : index
    %c3_80 = arith.constant 3 : index
    %c0_81 = arith.constant 0 : index
    %c0_82 = arith.constant 0 : index
    %70 = vector.load %arg12[%c0_79, %c3_80, %c0_81, %c0_82] : memref<2x22x16x96xbf16, #tpu.memory_space<vmem>>, vector<2x16x16x96xbf16>
    %c0_83 = arith.constant 0 : index
    %c4_84 = arith.constant 4 : index
    %c0_85 = arith.constant 0 : index
    %c0_86 = arith.constant 0 : index
    %71 = vector.load %arg12[%c0_83, %c4_84, %c0_85, %c0_86] : memref<2x22x16x96xbf16, #tpu.memory_space<vmem>>, vector<2x16x16x96xbf16>
    %c0_87 = arith.constant 0 : index
    %c5_88 = arith.constant 5 : index
    %c0_89 = arith.constant 0 : index
    %c0_90 = arith.constant 0 : index
    %72 = vector.load %arg12[%c0_87, %c5_88, %c0_89, %c0_90] : memref<2x22x16x96xbf16, #tpu.memory_space<vmem>>, vector<2x16x16x96xbf16>
    %c0_91 = arith.constant 0 : index
    %c6_92 = arith.constant 6 : index
    %c0_93 = arith.constant 0 : index
    %c0_94 = arith.constant 0 : index
    %73 = vector.load %arg12[%c0_91, %c6_92, %c0_93, %c0_94] : memref<2x22x16x96xbf16, #tpu.memory_space<vmem>>, vector<2x16x16x96xbf16>
    %74 = tpu.concatenate %67, %68, %69, %70, %71, %72, %73 in 3 : vector<2x16x16x96xbf16>, vector<2x16x16x96xbf16>, vector<2x16x16x96xbf16>, vector<2x16x16x96xbf16>, vector<2x16x16x96xbf16>, vector<2x16x16x96xbf16>, vector<2x16x16x96xbf16> -> vector<2x16x16x672xbf16>
    %75 = vector.shape_cast %74 : vector<2x16x16x672xbf16> to vector<512x672xbf16>
    %c0_95 = arith.constant 0 : index
    %c0_96 = arith.constant 0 : index
    %76 = vector.load %arg8[%c0_95, %c0_96] : memref<672x80xbf16, #tpu.memory_space<vmem>>, vector<672x80xbf16>
    %cst_97 = arith.constant dense<0.000000e+00> : vector<512x80xf32>
    %77 = tpu.matmul %75, %76, %cst_97 {dimension_numbers = #tpu.dot_dimension_numbers<[1], [0], [0], [1], [0, 0, 1, 1], [], []>} : vector<512x672xbf16>, vector<672x80xbf16>, vector<512x80xf32> -> vector<512x80xf32>
    %c0_98 = arith.constant 0 : index
    %c0_99 = arith.constant 0 : index
    %78 = vector.load %arg9[%c0_98, %c0_99] : memref<1x80xf32, #tpu.memory_space<vmem>>, vector<1x80xf32>
    %79 = vector.broadcast %78 : vector<1x80xf32> to vector<512x80xf32>
    %80 = arith.addf %77, %79 : vector<512x80xf32>
    %cst_100 = arith.constant 0.000000e+00 : f32
    %81 = vector.broadcast %cst_100 : f32 to vector<512x80xf32>
    %82 = arith.maximumf %80, %81 : vector<512x80xf32>
    %83 = tpu.concatenate %16, %44, %82 in 1 : vector<512x16xf32>, vector<512x32xf32>, vector<512x80xf32> -> vector<512x128xf32>
    %84 = vector.shape_cast %83 : vector<512x128xf32> to vector<2x16x16x128xf32>
    %c0_101 = arith.constant 0 : index
    %c0_102 = arith.constant 0 : index
    %c0_103 = arith.constant 0 : index
    %c0_104 = arith.constant 0 : index
    %85 = vector.load %arg10[%c0_101, %c0_102, %c0_103, %c0_104] : memref<2x16x16x128xf32, #tpu.memory_space<vmem>>, vector<2x16x16x128xf32>
    tpu.vector_store %arg10[%c0_101, %c0_102, %c0_103, %c0_104], %84 {strides = array<i32>} : memref<2x16x16x128xf32, #tpu.memory_space<vmem>>, vector<2x16x16x128xf32>,
    return
  }
  func.func @transform_0(%arg0: i32) -> (i32, i32, i32, i32) {
    %c0_i32 = arith.constant 0 : i32
    %c0_i32_0 = arith.constant 0 : i32
    %c0_i32_1 = arith.constant 0 : i32
    %c0_i32_2 = arith.constant 0 : i32
    return %arg0, %c0_i32, %c0_i32_0, %c0_i32_1 : i32, i32, i32, i32
  }
  func.func @transform_1(%arg0: i32) -> (i32, i32) {
    %c0_i32 = arith.constant 0 : i32
    %c0_i32_0 = arith.constant 0 : i32
    %c0_i32_1 = arith.constant 0 : i32
    return %c0_i32, %c0_i32_0 : i32, i32
  }
  func.func @transform_2(%arg0: i32) -> (i32, i32) {
    %c0_i32 = arith.constant 0 : i32
    %c0_i32_0 = arith.constant 0 : i32
    %c0_i32_1 = arith.constant 0 : i32
    return %c0_i32, %c0_i32_0 : i32, i32
  }
  func.func @transform_3(%arg0: i32) -> (i32, i32) {
    %c0_i32 = arith.constant 0 : i32
    %c0_i32_0 = arith.constant 0 : i32
    %c0_i32_1 = arith.constant 0 : i32
    return %c0_i32, %c0_i32_0 : i32, i32
  }
  func.func @transform_4(%arg0: i32) -> (i32, i32) {
    %c0_i32 = arith.constant 0 : i32
    %c0_i32_0 = arith.constant 0 : i32
    %c0_i32_1 = arith.constant 0 : i32
    return %c0_i32, %c0_i32_0 : i32, i32
  }
  func.func @transform_5(%arg0: i32) -> (i32, i32) {
    %c0_i32 = arith.constant 0 : i32
    %c0_i32_0 = arith.constant 0 : i32
    %c0_i32_1 = arith.constant 0 : i32
    return %c0_i32, %c0_i32_0 : i32, i32
  }
  func.func @transform_6(%arg0: i32) -> (i32, i32) {
    %c0_i32 = arith.constant 0 : i32
    %c0_i32_0 = arith.constant 0 : i32
    %c0_i32_1 = arith.constant 0 : i32
    return %c0_i32, %c0_i32_0 : i32, i32
  }
  func.func @transform_7(%arg0: i32) -> (i32, i32) {
    %c0_i32 = arith.constant 0 : i32
    %c0_i32_0 = arith.constant 0 : i32
    %c0_i32_1 = arith.constant 0 : i32
    return %c0_i32, %c0_i32_0 : i32, i32
  }
  func.func @transform_8(%arg0: i32) -> (i32, i32) {
    %c0_i32 = arith.constant 0 : i32
    %c0_i32_0 = arith.constant 0 : i32
    %c0_i32_1 = arith.constant 0 : i32
    return %c0_i32, %c0_i32_0 : i32, i32
  }
  func.func @transform_9(%arg0: i32) -> (i32, i32, i32, i32) {
    %c0_i32 = arith.constant 0 : i32
    %c0_i32_0 = arith.constant 0 : i32
    %c0_i32_1 = arith.constant 0 : i32
    %c0_i32_2 = arith.constant 0 : i32
    return %arg0, %c0_i32, %c0_i32_0, %c0_i32_1 : i32, i32, i32, i32
  }
}

</mosaic_0001>

<bundles_post_ra>
// kernel: mfa2_pallas.1
= control target key start
LH: loop header
LB: loop body
LE: loop exit
PB: predicated region body
PF: predicated region fallthrough
CT: control target
= control target key end

     0   :  { %14 = vsyncpa [#allocation5], 0  ;;  %s19257_s0 = inlined_call_operand.hbm [shape: f32[2,16,16,4], index: 0, kind: input, shape index: {}]   ;;  %s19258_s1 = inlined_call_operand.hbm [shape: bf16[4,144], index: 1, kind: input, shape index: {}]   ;;  %s19259_s2 = inlined_call_operand.hbm [shape: f32[1,144], index: 2, kind: input, shape index: {}]   ;;  %s19260_s3 = inlined_call_operand.hbm [shape: bf16[4,32], index: 3, kind: input, shape index: {}]   ;;  %s19261_s4 = inlined_call_operand.hbm [shape: f32[1,32], index: 4, kind: input, shape index: {}]   ;;  %s19262_s5 = inlined_call_operand.hbm [shape: bf16[896,96], index: 5, kind: input, shape index: {}]   ;;  %s19263_s6 = inlined_call_operand.hbm [shape: f32[1,96], index: 6, kind: input, shape index: {}]   ;;  %s19264_s7 = inlined_call_operand.hbm [shape: bf16[672,80], index: 7, kind: input, shape index: {}]   ;;  %s19265_s8 = inlined_call_operand.hbm [shape: f32[1,80], index: 8, kind: input, shape index: {}]   ;;  %s19266_s9 = inlined_call_operand.hbm [shape: f32[2,16,16,128], index: 9, kind: output, shape index: {}]  }
   0x1   :  { %15 = vsyncpa [#allocation8], 0 }
   0x2   :  { %16 = vsyncpa [#allocation11], 0 }
   0x3   :  { %17 = vsyncpa [#allocation14], 0 }
   0x4   :  { %18 = vsyncpa [#allocation17], 0 }
   0x5   :  { %19 = vsyncpa [#allocation6], 0  ;;  %s13910_s30 = smov [#allocation7]   ;;  %s13911_s11 = smov [#allocation10]  }
   0x6   :  { %s38_s10 = sshll.u32 %s13910_s30, 4  ;;  %s58_s12 = sshll.u32 %s13911_s11, 4  ;;  %s39_s10 = int_to_ptr.vmem [resolvable:$true] %s38_s10  ;;  %s59_s12 = int_to_ptr.vmem [resolvable:$true] %s58_s12 }
   0x7   :  { %s13678_s15 = scalar_lea.hbm %s19258_s1, 64 }
   0x8   :  { %p13679_p0 = scmp.ne.s32.totalorder %s19258_s1, %s13678_s15  ;;  %p13682_p1 = scmp.lt.u32.totalorder %s13678_s15, %s19258_s1 }
   0xa   :  { %p13684_p2 = pnand %p13682_p1, %p13679_p0 }
   0xc   :  { %13687 = shalt.err (!%p13684_p2)
}
   0xd   :  { %s13688_s20 = scalar_lea.vmem %s39_s10, 64  ;;  %p13693_p4 = scmp.lt.s32.totalorder %s39_s10, %s39_s10 }
   0xe   :  { %p13689_p3 = scmp.ne.s32.totalorder %s39_s10, %s13688_s20  ;;  %p13694_p5 = scmp.lt.s32.totalorder %s13688_s20, %s13688_s20 }
  0x10   :  { %p13695_p6 = por %p13694_p5, %p13693_p4 }
  0x12   :  { %p13696_p7 = pnand %p13695_p6, %p13689_p3 }
  0x14   :  { %13699 = shalt.err (!%p13696_p7)
}
  0x15   :  { %41 = dma.hbm_to_vmem [thread:$0]  %s19258_s1, 64, %s39_s10, [#allocation8]  }
  0x16   :  { %s13700_s25 = scalar_lea.hbm %s19260_s3, 32 }
  0x17   :  { %p13701_p8 = scmp.ne.s32.totalorder %s19260_s3, %s13700_s25  ;;  %p13704_p9 = scmp.lt.u32.totalorder %s13700_s25, %s19260_s3 }
  0x19   :  { %p13706_p10 = pnand %p13704_p9, %p13701_p8 }
  0x1b   :  { %13709 = shalt.err (!%p13706_p10)
}
  0x1c   :  { %s13710_s30 = scalar_lea.vmem %s59_s12, 32  ;;  %p13715_p12 = scmp.lt.s32.totalorder %s59_s12, %s59_s12 }
  0x1d   :  { %p13711_p11 = scmp.ne.s32.totalorder %s59_s12, %s13710_s30  ;;  %p13716_p13 = scmp.lt.s32.totalorder %s13710_s30, %s13710_s30 }
  0x1f   :  { %p13717_p0 = por %p13716_p13, %p13715_p12 }
  0x21   :  { %p13718_p1 = pnand %p13717_p0, %p13711_p11 }
  0x23   :  { %13721 = shalt.err (!%p13718_p1)
}
  0x24   :  { %61 = dma.hbm_to_vmem [thread:$0]  %s19260_s3, 32, %s59_s12, [#allocation11]  }
  0x25   :  { %s13912_s11 = smov [#allocation13]   ;;  %s13722_s16 = scalar_lea.hbm %s19262_s5, 7168 }
  0x26   :  { %s77_s13 = sshll.u32 %s13912_s11, 4  ;;  %p13723_p2 = scmp.ne.s32.totalorder %s19262_s5, %s13722_s16  ;;  %s78_s13 = int_to_ptr.vmem [resolvable:$true] %s77_s13 }
  0x27   :  { %p13726_p3 = scmp.lt.u32.totalorder %s13722_s16, %s19262_s5 }
  0x29   :  { %p13728_p4 = pnand %p13726_p3, %p13723_p2 }
  0x2b   :  { %13731 = shalt.err (!%p13728_p4)
}
  0x2c   :  { %s13732_s21 = scalar_lea.vmem %s78_s13, 7168  ;;  %p13737_p6 = scmp.lt.s32.totalorder %s78_s13, %s78_s13 }
  0x2d   :  { %p13733_p5 = scmp.ne.s32.totalorder %s78_s13, %s13732_s21  ;;  %p13738_p7 = scmp.lt.s32.totalorder %s13732_s21, %s13732_s21 }
  0x2f   :  { %p13739_p8 = por %p13738_p7, %p13737_p6 }
  0x31   :  { %p13740_p9 = pnand %p13739_p8, %p13733_p5 }
  0x33   :  { %13743 = shalt.err (!%p13740_p9)
}
  0x34   :  { %s13913_s3 = smov 64   ;;  %s13914_s12 = smov 4  }
  0x35   :  { %83 = dma.hbm_to_vmem [thread:$0]  %s19262_s5, 7168, %s78_s13, [#allocation14], %s13913_s3, %s13913_s3, %s13914_s12  }
  0x36   :  { %s13915_s24 = smov [#allocation16]   ;;  %s13916_s26 = smov [#allocation4]  }
  0x37   :  { %s99_s25 = sshll.u32 %s13915_s24, 4  ;;  %s25_s27 = sshll.u32 %s13916_s26, 4  ;;  %s100_s25 = int_to_ptr.vmem [resolvable:$true] %s99_s25  ;;  %s26_s27 = int_to_ptr.vmem [resolvable:$true] %s25_s27 }
  0x38   :  { %s13744_s30 = scalar_lea.hbm %s19264_s7, 5376 }
  0x39   :  { %p13745_p10 = scmp.ne.s32.totalorder %s19264_s7, %s13744_s30  ;;  %p13748_p11 = scmp.lt.u32.totalorder %s13744_s30, %s19264_s7 }
  0x3b   :  { %p13750_p12 = pnand %p13748_p11, %p13745_p10 }
  0x3d   :  { %13753 = shalt.err (!%p13750_p12)
}
  0x3e   :  { %s13754_s5 = scalar_lea.vmem %s100_s25, 5376  ;;  %p13759_p0 = scmp.lt.s32.totalorder %s100_s25, %s100_s25 }
  0x3f   :  { %p13755_p13 = scmp.ne.s32.totalorder %s100_s25, %s13754_s5  ;;  %p13760_p1 = scmp.lt.s32.totalorder %s13754_s5, %s13754_s5 }
  0x41   :  { %p13761_p2 = por %p13760_p1, %p13759_p0 }
  0x43   :  { %p13762_p3 = pnand %p13761_p2, %p13755_p13 }
  0x45   :  { %13765 = shalt.err (!%p13762_p3)
}
  0x46   :  { %105 = dma.hbm_to_vmem [thread:$0]  %s19264_s7, 5376, %s100_s25, [#allocation17], %s13913_s3, %s13913_s3, %s13914_s12  }
  0x47   :  { %s13766_s18 = scalar_lea.hbm %s19257_s0, 8192 }
  0x48   :  { %p13767_p4 = scmp.ne.s32.totalorder %s19257_s0, %s13766_s18  ;;  %p13770_p5 = scmp.lt.u32.totalorder %s13766_s18, %s19257_s0 }
  0x4a   :  { %p13772_p6 = pnand %p13770_p5, %p13767_p4 }
  0x4c   :  { %13775 = shalt.err (!%p13772_p6)
}
  0x4d   :  { %s13776_s23 = scalar_lea.vmem %s26_s27, 8192  ;;  %p13781_p8 = scmp.lt.s32.totalorder %s26_s27, %s26_s27 }
  0x4e   :  { %p13777_p7 = scmp.ne.s32.totalorder %s26_s27, %s13776_s23  ;;  %p13782_p9 = scmp.lt.s32.totalorder %s13776_s23, %s13776_s23 }
  0x50   :  { %p13783_p10 = por %p13782_p9, %p13781_p8 }
  0x52   :  { %p13784_p11 = pnand %p13783_p10, %p13777_p7 }
  0x54   :  { %13787 = shalt.err (!%p13784_p11)
}
  0x55   :  { %s13917_s7 = smov 128   ;;  %s13918_s12 = smov 8  }
  0x56   :  { %31 = dma.hbm_to_vmem [thread:$0]  %s19257_s0, 8192, %s26_s27, [#allocation5], %s13917_s7, %s13917_s7, %s13918_s12  }
  0x57   :  { %s13919_s26 = smov [#allocation9]   ;;  %s13920_s29 = smov [#allocation12]  }
  0x58   :  { %s48_s28 = sshll.u32 %s13919_s26, 4  ;;  %s68_s30 = sshll.u32 %s13920_s29, 4  ;;  %s49_s28 = int_to_ptr.vmem [resolvable:$true] %s48_s28  ;;  %s69_s30 = int_to_ptr.vmem [resolvable:$true] %s68_s30 }
  0x59   :  { %s13788_s11 = scalar_lea.hbm %s19259_s2, 32 }
  0x5a   :  { %p13789_p12 = scmp.ne.s32.totalorder %s19259_s2, %s13788_s11  ;;  %p13792_p13 = scmp.lt.u32.totalorder %s13788_s11, %s19259_s2 }
  0x5c   :  { %p13794_p0 = pnand %p13792_p13, %p13789_p12 }
  0x5e   :  { %13797 = shalt.err (!%p13794_p0)
}
  0x5f   :  { %s13798_s0 = scalar_lea.vmem %s49_s28, 32  ;;  %p13803_p2 = scmp.lt.s32.totalorder %s49_s28, %s49_s28 }
  0x60   :  { %p13799_p1 = scmp.ne.s32.totalorder %s49_s28, %s13798_s0  ;;  %p13804_p3 = scmp.lt.s32.totalorder %s13798_s0, %s13798_s0 }
  0x62   :  { %p13805_p4 = por %p13804_p3, %p13803_p2 }
  0x64   :  { %p13806_p5 = pnand %p13805_p4, %p13799_p1 }
  0x66   :  { %13809 = shalt.err (!%p13806_p5)
}
  0x67   :  { %51 = dma.hbm_to_vmem [thread:$0]  %s19259_s2, 32, %s49_s28, [#allocation8]  }
  0x68   :  { %s13810_s19 = scalar_lea.hbm %s19261_s4, 16 }
  0x69   :  { %p13811_p6 = scmp.ne.s32.totalorder %s19261_s4, %s13810_s19  ;;  %p13814_p7 = scmp.lt.u32.totalorder %s13810_s19, %s19261_s4 }
  0x6b   :  { %p13816_p8 = pnand %p13814_p7, %p13811_p6 }
  0x6d   :  { %13819 = shalt.err (!%p13816_p8)
}
  0x6e   :  { %s13820_s24 = scalar_lea.vmem %s69_s30, 16  ;;  %s13824_s25 = scalar_lea.vmem %s69_s30, 32 }
  0x6f   :  { %p13821_p9 = scmp.ne.s32.totalorder %s69_s30, %s13820_s24  ;;  %p13825_p10 = scmp.lt.s32.totalorder %s69_s30, %s69_s30 }
  0x70   :  { %p13826_p11 = scmp.lt.s32.totalorder %s13824_s25, %s13820_s24 }
  0x72   :  { %p13827_p12 = por %p13826_p11, %p13825_p10 }
  0x74   :  { %p13828_p13 = pnand %p13827_p12, %p13821_p9 }
  0x76   :  { %13831 = shalt.err (!%p13828_p13)
}
  0x77   :  { %71 = dma.hbm_to_vmem [thread:$0]  %s19261_s4, 16, %s69_s30, [#allocation11]  }
  0x78   :  { %s13921_s28 = smov [#allocation15]   ;;  %s13922_s1 = smov [#allocation18]  }
  0x79   :  { %s90_s29 = sshll.u32 %s13921_s28, 4  ;;  %s112_s10 = sshll.u32 %s13922_s1, 4  ;;  %s91_s29 = int_to_ptr.vmem [resolvable:$true] %s90_s29  ;;  %s113_s10 = int_to_ptr.vmem [resolvable:$true] %s112_s10 }
  0x7a   :  { %s13832_s5 = scalar_lea.hbm %s19263_s6, 16 }
  0x7b   :  { %p13833_p0 = scmp.ne.s32.totalorder %s19263_s6, %s13832_s5  ;;  %p13836_p1 = scmp.lt.u32.totalorder %s13832_s5, %s19263_s6 }
  0x7d   :  { %p13838_p2 = pnand %p13836_p1, %p13833_p0 }
  0x7f   :  { %13841 = shalt.err (!%p13838_p2)
}
  0x80   :  { %s13842_s4 = scalar_lea.vmem %s91_s29, 16  ;;  %s13846_s30 = scalar_lea.vmem %s91_s29, 32 }
  0x81   :  { %p13843_p3 = scmp.ne.s32.totalorder %s91_s29, %s13842_s4  ;;  %p13847_p4 = scmp.lt.s32.totalorder %s91_s29, %s91_s29 }
  0x82   :  { %p13848_p5 = scmp.lt.s32.totalorder %s13846_s30, %s13842_s4 }
  0x84   :  { %p13849_p6 = por %p13848_p5, %p13847_p4 }
  0x86   :  { %p13850_p7 = pnand %p13849_p6, %p13843_p3 }
  0x88   :  { %13853 = shalt.err (!%p13850_p7)
}
  0x89   :  { %93 = dma.hbm_to_vmem [thread:$0]  %s19263_s6, 16, %s91_s29, [#allocation14]  }
  0x8a   :  { %s13854_s20 = scalar_lea.hbm %s19265_s8, 16 }
  0x8b   :  { %p13855_p8 = scmp.ne.s32.totalorder %s19265_s8, %s13854_s20  ;;  %p13858_p9 = scmp.lt.u32.totalorder %s13854_s20, %s19265_s8 }
  0x8d   :  { %p13860_p10 = pnand %p13858_p9, %p13855_p8 }
  0x8f   :  { %13863 = shalt.err (!%p13860_p10)
}
  0x90   :  { %s13864_s25 = scalar_lea.vmem %s113_s10, 16  ;;  %s13868_s2 = scalar_lea.vmem %s113_s10, 32 }
  0x91   :  { %p13865_p11 = scmp.ne.s32.totalorder %s113_s10, %s13864_s25  ;;  %p13869_p12 = scmp.lt.s32.totalorder %s113_s10, %s113_s10 }
  0x92   :  { %p13870_p13 = scmp.lt.s32.totalorder %s13868_s2, %s13864_s25 }
  0x94   :  { %p13871_p0 = por %p13870_p13, %p13869_p12 }
  0x96   :  { %p13872_p1 = pnand %p13871_p0, %p13865_p11 }
  0x98   :  { %13875 = shalt.err (!%p13872_p1)
}
  0x99   :  { %115 = dma.hbm_to_vmem [thread:$0]  %s19265_s8, 16, %s113_s10, [#allocation17]  }
  0x9a   :  { %13898 = dma.done.wait [#allocation5], 8192  }
  0x9b   :  { %13899 = vsyncadd [#allocation5], 4294959104 }
  0x9c   :  { %13900 = dma.done.wait [#allocation8], 96  }
  0x9d   :  { %13901 = vsyncadd [#allocation8], 4294967200 }
  0x9e   :  { %13902 = dma.done.wait [#allocation11], 48  }
  0x9f   :  { %13903 = vsyncadd [#allocation11], 4294967248 }
  0xa0   :  { %13904 = dma.done.wait [#allocation14], 7184  }
  0xa1   :  { %13905 = vsyncadd [#allocation14], 4294960112 }
  0xa2   :  { %13906 = dma.done.wait [#allocation17], 5392  }
  0xa3   :  { %13907 = vsyncadd [#allocation17], 4294961904  ;;  %v19271_v0 = vmov 0   ;;  %vm208_vm0 = vcmask 1041408   ;;  %vm474_vm1 = vcmask 31744   ;;  %vm1123_vm2 = vcmask 1046528  }
  0xa4   :  { %610 = vmatprep.mubr.bf16.mxu0 %v19271_v0  ;;  %770 = vmatprep.mubr.bf16.mxu1 %v19271_v0  ;;  %v11763_v1 = vld.sshfl [vmem:[#allocation7] sm:$0x33 pattern:$0x76325410]  ;;  %v145_v3 = vld [vmem:[#allocation4 + $0x8] sm:$0xff]  ;;  %v14097_v14 = vld [vmem:[#allocation4 + $0x10] sm:$0xff] }
  0xa5   :  { %v144_v2 = vld [vmem:[#allocation4] sm:$0xff]  ;;  %v473_v4 = vcombine.high %v11763_v1, %v11763_v1  ;;  %v573_v5 = vsel %vm208_vm0, %v11763_v1, 0  ;;  %v177_v8 = vld [vmem:[#allocation4 + $0x108] sm:$0xff]  ;;  %v1125_v11 = vrot.slane %v145_v3, 1  ;;  %v14099_v15 = vld [vmem:[#allocation4 + $0x18] sm:$0xff]  ;;  %v1127_v18 = vrot.slane %v14097_v14, 1 }
  0xa6   :  { %v1124_v6 = vrot.slane %v144_v2, 1  ;;  %v176_v7 = vld [vmem:[#allocation4 + $0x100] sm:$0xff]  ;;  %v420_v10 = vpack.c.bf16 %v145_v3, %v144_v2  ;;  %v1173_v13 = vrot.slane %v177_v8, 1  ;;  %v1128_v19 = vrot.slane %v14099_v15, 1  ;;  %v178_v20 = vld [vmem:[#allocation4 + $0x110] sm:$0xff]  ;;  %v179_v32 = vld [vmem:[#allocation4 + $0x118] sm:$0xff] }
  0xa7   :  { %v2137_v9 = vld [vmem:[#allocation10] sm:$0x3]  ;;  %v1172_v12 = vrot.slane %v176_v7, 1  ;;  %11764 = vmatprep.subr.msk.bf16.mxu0 %vm208_vm0, %v473_v4  ;;  %12533 = vmatprep.subr.msk.bf16.mxu1 %vm208_vm0, %v473_v4  ;;  %v436_v16 = vpack.c.bf16 %v177_v8, %v176_v7  ;;  %v14107_v22 = vmax.f32 %v145_v3, %v1125_v11  ;;  %v1175_v24 = vrot.slane %v178_v20, 1  ;;  %v14142_v40 = vld [vmem:[#allocation4 + $0x28] sm:$0xff]  ;;  %v14169_v60 = vld [vmem:[#allocation4 + $0x30] sm:$0xff] }
  0xa8   :  { %v2242_v17 = vsel %vm208_vm0, %v2137_v9, 0  ;;  %579 = vmatpush1.bf16.msra.mxu0 %v573_v5  ;;  %12534 = vmatpush1.bf16.msra.mxu1 %v573_v5  ;;  %v1126_v21 = vsel %vm1123_vm2, %v1124_v6, %v1125_v11  ;;  %v14114_v27 = vmax.f32 %v177_v8, %v1173_v13  ;;  %v1129_v28 = vsel %vm1123_vm2, %v1127_v18, %v1128_v19  ;;  %v14131_v36 = vld [vmem:[#allocation4 + $0x20] sm:$0xff]  ;;  %v181_v55 = vld [vmem:[#allocation4 + $0x128] sm:$0xff]  ;;  %v14171_v61 = vld [vmem:[#allocation4 + $0x38] sm:$0xff]  ;;  %s13924_s8 = smov 96   ;;  %s13925_s28 = smov 32  }
  0xa9   :  { %v1174_v23 = vsel %vm1123_vm2, %v1172_v12, %v1173_v13  ;;  %v14110_v25 = vmax.f32 %v144_v2, %v1126_v21  ;;  %13175 = vmatprep.subr.msk.bf16.mxu1 %vm208_vm0, %v2137_v9  ;;  %v19270_v29 = vrot.slane %v14107_v22, 1  ;;  %v14120_v30 = vmax.f32 %v14097_v14, %v1129_v28  ;;  %v180_v46 = vld [vmem:[#allocation4 + $0x120] sm:$0xff]  ;;  %v14198_v11 = vld [vmem:[#allocation4 + $0x130] sm:$0xff]  ;;  %s13926_s29 = smov 16   ;;  %s13928_s1 = smov [#allocation19]  }
  0xaa   :  { %v14112_v26 = vmax.f32 %v176_v7, %v1174_v23  ;;  %19418 = vst [vmem:[#allocation27_spill] sm:$0xff] %v14114_v27  ;;  %v14123_v31 = vmax.f32 %v14099_v15, %v1128_v19  ;;  %v1176_v33 = vrot.slane %v179_v32, 1  ;;  %v19268_v34 = vrot.slane %v14114_v27, 1  ;;  %v14294_v7 = vld [vmem:[#allocation4 + $0x58] sm:$0xff]  ;;  %v14302_v21 = vld [vmem:[#allocation4 + $0x150] sm:$0xff]  ;;  %v14380_v49 = vld [vmem:[#allocation4 + $0x160] sm:$0xff] }
  0xab   :  { %11765 = vmatmul.mubr.msk.bf16.vlgmr.msra.gmra.mrb[0].mxu0 %vm474_vm1, %v420_v10  ;;  %11781 = vmatmul.mubr.msk.bf16.vlgmr.msra.gmra.mrb[0].mxu1 %vm474_vm1, %v436_v16  ;;  %v421_v35 = vpack.c.bf16 %v14099_v15, %v14097_v14  ;;  %v14136_v37 = vmax.f32 %v14107_v22, %v19270_v29  ;;  %v1130_v41 = vrot.slane %v14131_v36, 1  ;;  %v437_v43 = vpack.c.bf16 %v179_v32, %v178_v20  ;;  %s11747_s10 = sshll.u32 %s13928_s1, 4  ;;  %s11748_s10 = int_to_ptr.vmem [resolvable:$true] %s11747_s10 }
  0xac   :  { %19417 = vst [vmem:[#allocation26_spill] sm:$0xff] %v14112_v26  ;;  %12388 = vmatpush3.bf16.msra.mxu1 %v2242_v17  ;;  %620 = vmatprep.mubr.bf16.mxu0 %v19271_v0  ;;  %v1177_v38 = vsel %vm1123_vm2, %v1175_v24, %v1176_v33  ;;  %v14140_v39 = vmax.f32 %v179_v32, %v1176_v33  ;;  %v19269_v42 = vrot.slane %v14123_v31, 1  ;;  %v1131_v45 = vrot.slane %v14142_v40, 1  ;;  %s13876_s11 = scalar_lea.vmem %s11748_s10, 8192  ;;  %p13881_p3 = scmp.lt.s32.totalorder %s11748_s10, %s11748_s10 }
  0xad   :  { %780 = vmatprep.mubr.bf16.mxu1 %v19271_v0  ;;  %7158 = vmatprep.subr.bf16.mxu1 %v19271_v0  ;;  %v14147_v44 = vmax.f32 %v178_v20, %v1177_v38  ;;  %v1178_v50 = vrot.slane %v180_v46, 1  ;;  %v14156_v51 = vmax.f32 %v14114_v27, %v19268_v34  ;;  %v422_v57 = vpack.c.bf16 %v14142_v40, %v14131_v36  ;;  %v14215_v20 = vld [vmem:[#allocation4 + $0x138] sm:$0xff]  ;;  %v14571_v27 = vld [vmem:[#allocation4 + $0xa0] sm:$0xff]  ;;  %p13877_p2 = scmp.ne.s32.totalorder %s11748_s10, %s13876_s11  ;;  %p13882_p4 = scmp.lt.s32.totalorder %s13876_s11, %s13876_s11 }
  0xae   :  { %19419 = vst [vmem:[#allocation28_spill] sm:$0xff] %v14140_v39  ;;  %v19267_v52 = vrot.slane %v14140_v39, 1  ;;  %v1132_v53 = vsel %vm1123_vm2, %v1130_v41, %v1131_v45  ;;  %v14161_v54 = vmax.f32 %v14142_v40, %v1131_v45  ;;  %v1179_v59 = vrot.slane %v181_v55, 1  ;;  %v14237_v45 = vld [vmem:[#allocation4 + $0x40] sm:$0xff]  ;;  %v14311_v34 = vld [vmem:[#allocation4 + $0x158] sm:$0xff] }
  0xaf   :  { %19420 = vst [vmem:[#allocation29_spill] sm:$0xff] %v14147_v44  ;;  %19421 = vst [vmem:[#allocation30_spill] sm:$0xff] %v14156_v51  ;;  %v14167_v58 = vmax.f32 %v14131_v36, %v1132_v53  ;;  %v14176_v62 = vmax.f32 %v14123_v31, %v19269_v42  ;;  %v1133_v1 = vrot.slane %v14169_v60, 1  ;;  %v1134_v2 = vrot.slane %v14171_v61, 1  ;;  %v14398_v42 = vld [vmem:[#allocation4 + $0x78] sm:$0xff]  ;;  %p13883_p5 = por %p13882_p4, %p13881_p3 }
  0xb0   :  { %v1419_v63 = vrot.slane %v14161_v54, 1  ;;  %v438_v4 = vpack.c.bf16 %v181_v55, %v180_v46  ;;  %v1180_v5 = vsel %vm1123_vm2, %v1178_v50, %v1179_v59  ;;  %v14185_v6 = vmax.f32 %v181_v55, %v1179_v59  ;;  %v14246_v55 = vld [vmem:[#allocation4 + $0x48] sm:$0xff] }
  0xb1   :  { %v1418_v3 = vrot.slane %v14167_v58, 1  ;;  %v14191_v8 = vmax.f32 %v14140_v39, %v19267_v52  ;;  %v14195_v9 = vmax.f32 %v180_v46, %v1180_v5  ;;  %v1135_v10 = vsel %vm1123_vm2, %v1133_v1, %v1134_v2  ;;  %v14266_v5 = vld [vmem:[#allocation4 + $0x148] sm:$0xff]  ;;  %p13884_p6 = pnand %p13883_p5, %p13877_p2 }
  0xb2   :  { %19422 = vst [vmem:[#allocation31_spill] sm:$0xff] %v14185_v6  ;;  %v1467_v13 = vrot.slane %v14185_v6, 1  ;;  %v14205_v14 = vmax.f32 %v14169_v60, %v1135_v10  ;;  %v1181_v15 = vrot.slane %v14198_v11, 1  ;;  %v14213_v19 = vmax.f32 %v14171_v61, %v1134_v2  ;;  %v14258_v2 = vld [vmem:[#allocation4 + $0x140] sm:$0xff] }
  0xb3   :  { %11766 = vmatmul.mubr.msk.bf16.gmra.mrb[4].mxu0 %vm474_vm1, %v421_v35  ;;  %11782 = vmatmul.mubr.msk.bf16.gmra.mrb[4].mxu1 %vm474_vm1, %v437_v43  ;;  %19423 = vst [vmem:[#allocation32_spill] sm:$0xff] %v14191_v8  ;;  %19424 = vst [vmem:[#allocation33_spill] sm:$0xff] %v14195_v9  ;;  %v14201_v12 = vsel %vm1123_vm2, %v1418_v3, %v1419_v63  ;;  %v1466_v18 = vrot.slane %v14195_v9, 1  ;;  %v423_v23 = vpack.c.bf16 %v14171_v61, %v14169_v60  ;;  %v14487_v8 = vld [vmem:[#allocation4 + $0x188] sm:$0xff]  ;;  %vm1700_vm3 = vcmask 1040384  }
  0xb4   :  { %630 = vmatprep.mubr.bf16.mxu0 %v19271_v0  ;;  %790 = vmatprep.mubr.bf16.mxu1 %v19271_v0  ;;  %v1421_v24 = vrot.slane %v14205_v14, 1  ;;  %v1182_v28 = vrot.slane %v14215_v20, 1  ;;  %v14223_v32 = vmax.f32 %v14161_v54, %v1419_v63  ;;  %v1422_v36 = vrot.slane %v14213_v19, 1 }
  0xb5   :  { %v14227_v35 = vsel %vm1123_vm2, %v1466_v18, %v1467_v13  ;;  %v1136_v59 = vrot.slane %v14237_v45, 1  ;;  %v14252_v60 = vmax.f32 %v14185_v6, %v1467_v13  ;;  %v1137_v1 = vrot.slane %v14246_v55, 1 }
  0xb6   :  { %19425 = vst [vmem:[#allocation34_spill] sm:$0xff] %v14227_v35  ;;  %v1183_v41 = vsel %vm1123_vm2, %v1181_v15, %v1182_v28  ;;  %v14235_v43 = vmax.f32 %v14215_v20, %v1182_v28  ;;  %v14241_v50 = vsel %vm1123_vm2, %v1421_v24, %v1422_v36  ;;  %v1184_v10 = vrot.slane %v14258_v2, 1  ;;  %v14277_v28 = vld [vmem:[#allocation4 + $0x50] sm:$0xff] }
  0xb7   :  { %v14244_v53 = vmax.f32 %v14198_v11, %v1183_v41  ;;  %19428 = vst [vmem:[#allocation37_spill] sm:$0xff] %v14252_v60  ;;  %v14270_v13 = vmax.f32 %v14213_v19, %v1422_v36  ;;  %v1138_v15 = vsel %vm1123_vm2, %v1136_v59, %v1137_v1  ;;  %v14274_v18 = vmax.f32 %v14246_v55, %v1137_v1 }
  0xb8   :  { %19426 = vst [vmem:[#allocation35_spill] sm:$0xff] %v14235_v43  ;;  %v1470_v63 = vrot.slane %v14235_v43, 1  ;;  %v1185_v24 = vrot.slane %v14266_v5, 1  ;;  %v14286_v41 = vmax.f32 %v14237_v45, %v1138_v15  ;;  %v1139_v36 = vrot.slane %v14277_v28, 1 }
  0xb9   :  { %19427 = vst [vmem:[#allocation36_spill] sm:$0xff] %v14244_v53  ;;  %v1425_v38 = vrot.slane %v14274_v18, 1  ;;  %v1140_v40 = vrot.slane %v14294_v7, 1  ;;  %v424_v46 = vpack.c.bf16 %v14246_v55, %v14237_v45  ;;  %v1187_v52 = vrot.slane %v14302_v21, 1 }
  0xba   :  { %v14299_v15 = vmax.f32 %v14266_v5, %v1185_v24  ;;  %v441_v29 = vpack.c.bf16 %v14311_v34, %v14302_v21  ;;  %v1146_v6 = vrot.slane %v14398_v42, 1  ;;  %v1197_v35 = vrot.slane %v14487_v8, 1 }
  0xbb   :  { %11767 = vmatmul.mubr.msk.bf16.gmra.mrb[8].mxu0 %vm474_vm1, %v422_v57  ;;  %11783 = vmatmul.mubr.msk.bf16.gmra.mrb[8].mxu1 %vm474_vm1, %v438_v4  ;;  %v439_v57 = vpack.c.bf16 %v14215_v20, %v14198_v11  ;;  %v1469_v4 = vrot.slane %v14244_v53, 1  ;;  %v14283_v20 = vmax.f32 %v14235_v43, %v1470_v63  ;;  %v1141_v16 = vsel %vm1123_vm2, %v1139_v36, %v1140_v40 }
  0xbc   :  { %640 = vmatprep.mubr.bf16.mxu0 %v19271_v0  ;;  %800 = vmatprep.mubr.bf16.mxu1 %v19271_v0  ;;  %19431 = vst [vmem:[#allocation40_spill] sm:$0xff] %v14299_v15  ;;  %v1473_v1 = vrot.slane %v14299_v15, 1  ;;  %v14338_v36 = vmax.f32 %v14294_v7, %v1140_v40  ;;  %v14348_v33 = vmax.f32 %v14274_v18, %v1425_v38  ;;  %vm209_vm4 = vsmask.f32 1280 }
  0xbd   :  { %v14280_v11 = vsel %vm1123_vm2, %v1469_v4, %v1470_v63  ;;  %19430 = vst [vmem:[#allocation39_spill] sm:$0xff] %v14283_v20  ;;  %v1424_v4 = vrot.slane %v14286_v41, 1  ;;  %v1186_v63 = vsel %vm1123_vm2, %v1184_v10, %v1185_v24  ;;  %v14330_v10 = vld [vmem:[#allocation4 + $0x68] sm:$0xff]  ;;  %vm15351_vm5 = vmand %vm208_vm0, %vm209_vm4  ;;  %vm308_vm6 = vsmask.f32 7942 }
  0xbe   :  { %19429 = vst [vmem:[#allocation38_spill] sm:$0xff] %v14280_v11  ;;  %v14309_v48 = vmax.f32 %v14258_v2, %v1186_v63  ;;  %v14325_v63 = vmax.f32 %v14277_v28, %v1141_v16  ;;  %19433 = vst [vmem:[#allocation42_spill] sm:$0xff] %v14338_v36  ;;  %v1188_v16 = vrot.slane %v14311_v34, 1  ;;  %v1143_v56 = vrot.slane %v14330_v10, 1 }
  0xbf   :  { %v14315_v24 = vsel %vm1123_vm2, %v1424_v4, %v1425_v38  ;;  %v14328_v4 = vld [vmem:[#allocation4 + $0x60] sm:$0xff]  ;;  %v14353_v40 = vmax.f32 %v14299_v15, %v1473_v1  ;;  %v19440_v15 = vmov 0   ;;  %vm307_vm7 = vcmask 1042433  }
  0xc0   :  { %19432 = vst [vmem:[#allocation41_spill] sm:$0xff] %v14309_v48  ;;  %v1472_v55 = vrot.slane %v14309_v48, 1  ;;  %v1427_v59 = vrot.slane %v14325_v63, 1  ;;  %v1142_v61 = vrot.slane %v14328_v4, 1  ;;  %v14362_v17 = vmax.f32 %v14330_v10, %v1143_v56  ;;  %vm15402_vm8 = vmand %vm307_vm7, %vm308_vm6 }
  0xc1   :  { %19435 = vst [vmem:[#allocation44_spill] sm:$0xff] %v14353_v40  ;;  %vm3495_vm9 = vcmask 1043457   ;;  %vm2789_vm10 = vsmask.f32 5392  ;;  %vm6574_vm13 = vcmask 1044480  }
  0xc2   :  { %v14342_v45 = vsel %vm1123_vm2, %v1472_v55, %v1473_v1  ;;  %v1189_v55 = vsel %vm1123_vm2, %v1187_v52, %v1188_v16  ;;  %v1144_v3 = vsel %vm1123_vm2, %v1142_v61, %v1143_v56  ;;  %19437 = vst [vmem:[#allocation46_spill] sm:$0xff] %v14362_v17  ;;  %v1431_v56 = vrot.slane %v14362_v17, 1  ;;  %vm15701_vm11 = vmand %vm3495_vm9, %vm308_vm6 }
  0xc3   :  { %11768 = vmatmul.mubr.msk.bf16.gmra.mrb[12].mxu0 %vm474_vm1, %v423_v23  ;;  %11784 = vmatmul.mubr.msk.bf16.gmra.mrb[12].mxu1 %vm474_vm1, %v439_v57  ;;  %v440_v57 = vpack.c.bf16 %v14266_v5, %v14258_v2  ;;  %19434 = vst [vmem:[#allocation43_spill] sm:$0xff] %v14342_v45  ;;  %v1428_v5 = vrot.slane %v14338_v36, 1  ;;  %v14358_v23 = vmax.f32 %v14311_v34, %v1188_v16  ;;  %v14468_v45 = vld [vmem:[#allocation4 + $0x88] sm:$0xff]  ;;  %vm15712_vm12 = vmor %vm209_vm4, %vm2789_vm10  ;;  %vm4265_vm14 = vsmask.f32 7424 }
  0xc4   :  { %650 = vmatprep.mubr.bf16.mxu0 %v19271_v0  ;;  %810 = vmatprep.mubr.bf16.mxu1 %v19271_v0  ;;  %v14368_v2 = vmax.f32 %v14302_v21, %v1189_v55  ;;  %v14371_v1 = vmax.f32 %v14328_v4, %v1144_v3  ;;  %v425_v52 = vpack.c.bf16 %v14294_v7, %v14277_v28  ;;  %v1190_v55 = vrot.slane %v14380_v49, 1  ;;  %v14396_v0 = vld [vmem:[#allocation4 + $0x70] sm:$0xff]  ;;  %v14412_v28 = vld [vmem:[#allocation4 + $0x178] sm:$0xff] }
  0xc5   :  { %19436 = vst [vmem:[#allocation45_spill] sm:$0xff] %v14358_v23  ;;  %v14365_v38 = vsel %vm1123_vm2, %v1427_v59, %v1428_v5  ;;  %v14376_v16 = vmax.f32 %v14338_v36, %v1428_v5  ;;  %v1476_v61 = vrot.slane %v14358_v23, 1  ;;  %v14382_v59 = vld [vmem:[#allocation4 + $0x168] sm:$0xff]  ;;  %v14410_v21 = vld [vmem:[#allocation4 + $0x170] sm:$0xff]  ;;  %v1145_v20 = vrot.slane %v14396_v0, 1 }
  0xc6   :  { %19438 = vst [vmem:[#allocation47_spill] sm:$0xff] %v14368_v2  ;;  %v1475_v3 = vrot.slane %v14368_v2, 1  ;;  %v1430_v47 = vrot.slane %v14371_v1, 1  ;;  %v1191_v34 = vrot.slane %v14382_v59, 1  ;;  %v1193_v43 = vrot.slane %v14410_v21, 1 }
  0xc7   :  { %19439 = vst [vmem:[#allocation48_spill] sm:$0xff] %v14376_v16  ;;  %v14427_v60 = vmax.f32 %v14358_v23, %v1476_v61  ;;  %v1194_v40 = vrot.slane %v14412_v28, 1  ;;  %vm5003_vm15 = vsmask.f32 6400  ;;  %vm5901_vm0 = vsmask.f32 5376 }
  0xc8   :  { %v14407_v7 = vsel %vm1123_vm2, %v1430_v47, %v1431_v56  ;;  %v14422_v47 = vmax.f32 %v14382_v59, %v1191_v34  ;;  %vm9377_vm4 = vcmask 261120   ;;  %vm11613_vm6 = vcmask 392192  }
  0xc9   :  { %19443 = vst [vmem:[#allocation51_spill] sm:$0xff] %v14427_v60  ;;  %v14448_v2 = vmax.f32 %v14412_v28, %v1194_v40 }
  0xca   :  { %19442 = vst [vmem:[#allocation50_spill] sm:$0xff] %v14422_v47 }
  0xcb   :  { %11769 = vmatmul.mubr.msk.bf16.gmra.mrb[16].mxu0 %vm474_vm1, %v424_v46  ;;  %11785 = vmatmul.mubr.msk.bf16.gmra.mrb[16].mxu1 %vm474_vm1, %v440_v57  ;;  %v14404_v57 = vsel %vm1123_vm2, %v1475_v3, %v1476_v61  ;;  %v1192_v46 = vsel %vm1123_vm2, %v1190_v55, %v1191_v34  ;;  %v14435_v3 = vmax.f32 %v14362_v17, %v1431_v56  ;;  %v1479_v55 = vrot.slane %v14422_v47, 1  ;;  %v14668_v17 = vld [vmem:[#allocation4 + $0xc0] sm:$0xff] }
  0xcc   :  { %660 = vmatprep.mubr.bf16.mxu0 %v19440_v15  ;;  %820 = vmatprep.mubr.bf16.mxu1 %v19440_v15  ;;  %19441 = vst [vmem:[#allocation49_spill] sm:$0xff] %v14404_v57  ;;  %v14430_v5 = vmax.f32 %v14380_v49, %v1192_v46  ;;  %v1147_v34 = vsel %vm1123_vm2, %v1145_v20, %v1146_v6  ;;  %19447 = vst [vmem:[#allocation55_spill] sm:$0xff] %v14448_v2 }
  0xcd   :  { %19445 = vst [vmem:[#allocation53_spill] sm:$0xff] %v14435_v3  ;;  %v14440_v57 = vmax.f32 %v14398_v42, %v1146_v6  ;;  %v14444_v23 = vmax.f32 %v14396_v0, %v1147_v34  ;;  %v1195_v46 = vsel %vm1123_vm2, %v1193_v43, %v1194_v40  ;;  %v426_v56 = vpack.c.bf16 %v14330_v10, %v14328_v4  ;;  %v14466_v4 = vld [vmem:[#allocation4 + $0x80] sm:$0xff]  ;;  %v14749_v3 = vld [vmem:[#allocation4 + $0xd0] sm:$0xff] }
  0xce   :  { %19444 = vst [vmem:[#allocation52_spill] sm:$0xff] %v14430_v5  ;;  %v1478_v61 = vrot.slane %v14430_v5, 1  ;;  %v14455_v6 = vmax.f32 %v14410_v21, %v1195_v46  ;;  %v442_v43 = vpack.c.bf16 %v14382_v59, %v14380_v49  ;;  %v1482_v10 = vrot.slane %v14448_v2, 1  ;;  %v14478_v59 = vld [vmem:[#allocation4 + $0x180] sm:$0xff]  ;;  %v14496_v5 = vld [vmem:[#allocation4 + $0x90] sm:$0xff] }
  0xcf   :  { %19446 = vst [vmem:[#allocation54_spill] sm:$0xff] %v14440_v57  ;;  %v1434_v20 = vrot.slane %v14440_v57, 1  ;;  %v1433_v34 = vrot.slane %v14444_v23, 1  ;;  %v1148_v60 = vrot.slane %v14466_v4, 1  ;;  %v14501_v46 = vmax.f32 %v14422_v47, %v1479_v55  ;;  %v14556_v47 = vld [vmem:[#allocation4 + $0x198] sm:$0xff] }
  0xd0   :  { %19448 = vst [vmem:[#allocation56_spill] sm:$0xff] %v14455_v6  ;;  %v14462_v40 = vsel %vm1123_vm2, %v1478_v61, %v1479_v55  ;;  %v1149_v61 = vrot.slane %v14468_v45, 1  ;;  %v1196_v11 = vrot.slane %v14478_v59, 1  ;;  %v1151_v51 = vrot.slane %v14496_v5, 1 }
  0xd1   :  { %19449 = vst [vmem:[#allocation57_spill] sm:$0xff] %v14462_v40  ;;  %v14482_v48 = vsel %vm1123_vm2, %v1433_v34, %v1434_v20  ;;  %v14498_v34 = vld [vmem:[#allocation4 + $0x98] sm:$0xff]  ;;  %19451 = vst [vmem:[#allocation59_spill] sm:$0xff] %v14501_v46  ;;  %v14514_v9 = vmax.f32 %v14440_v57, %v1434_v20  ;;  %v14527_v49 = vmax.f32 %v14487_v8, %v1197_v35  ;;  %v1200_v26 = vrot.slane %v14556_v47, 1  ;;  %v14591_v46 = vld [vmem:[#allocation4 + $0x1a8] sm:$0xff] }
  0xd2   :  { %v14510_v53 = vmax.f32 %v14468_v45, %v1149_v61 }
  0xd3   :  { %11770 = vmatmul.mubr.msk.bf16.gmra.mrb[20].mxu0 %vm474_vm1, %v425_v52  ;;  %11786 = vmatmul.mubr.msk.bf16.gmra.mrb[20].mxu1 %vm474_vm1, %v441_v29  ;;  %v1481_v52 = vrot.slane %v14455_v6, 1  ;;  %19453 = vst [vmem:[#allocation61_spill] sm:$0xff] %v14514_v9  ;;  %v1152_v29 = vrot.slane %v14498_v34, 1  ;;  %19456 = vst [vmem:[#allocation64_spill] sm:$0xff] %v14527_v49  ;;  %v14589_v9 = vmax.f32 %v14556_v47, %v1200_v26 }
  0xd4   :  { %670 = vmatprep.mubr.bf16.mxu0 %v19440_v15  ;;  %830 = vmatprep.mubr.bf16.mxu1 %v19440_v15  ;;  %19452 = vst [vmem:[#allocation60_spill] sm:$0xff] %v14510_v53 }
  0xd5   :  { %v14493_v40 = vsel %vm1123_vm2, %v1481_v52, %v1482_v10  ;;  %v1150_v52 = vsel %vm1123_vm2, %v1148_v60, %v1149_v61  ;;  %v1437_v60 = vrot.slane %v14510_v53, 1  ;;  %v1198_v61 = vsel %vm1123_vm2, %v1196_v11, %v1197_v35  ;;  %v14573_v35 = vld [vmem:[#allocation4 + $0xa8] sm:$0xff]  ;;  %19463 = vst [vmem:[#allocation71_spill] sm:$0xff] %v14589_v9 }
  0xd6   :  { %19450 = vst [vmem:[#allocation58_spill] sm:$0xff] %v14493_v40  ;;  %v14517_v55 = vmax.f32 %v14466_v4, %v1150_v52  ;;  %v14522_v40 = vmax.f32 %v14448_v2, %v1482_v10  ;;  %v14533_v52 = vmax.f32 %v14478_v59, %v1198_v61  ;;  %v1153_v6 = vsel %vm1123_vm2, %v1151_v51, %v1152_v29 }
  0xd7   :  { %v14537_v10 = vmax.f32 %v14498_v34, %v1152_v29  ;;  %v1485_v11 = vrot.slane %v14527_v49, 1 }
  0xd8   :  { %19454 = vst [vmem:[#allocation62_spill] sm:$0xff] %v14517_v55  ;;  %19455 = vst [vmem:[#allocation63_spill] sm:$0xff] %v14522_v40  ;;  %v1436_v20 = vrot.slane %v14517_v55, 1  ;;  %v1484_v61 = vrot.slane %v14533_v52, 1  ;;  %v1154_v40 = vrot.slane %v14571_v27, 1  ;;  %v19466_v55 = vpack.c.bf16 %v14398_v42, %v14396_v0 }
  0xd9   :  { %19457 = vst [vmem:[#allocation65_spill] sm:$0xff] %v14533_v52  ;;  %19458 = vst [vmem:[#allocation66_spill] sm:$0xff] %v14537_v10  ;;  %v1440_v2 = vrot.slane %v14537_v10, 1  ;;  %v14653_v52 = vld [vmem:[#allocation4 + $0x1b0] sm:$0xff] }
  0xda   :  { %v14552_v29 = vsel %vm1123_vm2, %v1436_v20, %v1437_v60  ;;  %v14565_v51 = vsel %vm1123_vm2, %v1484_v61, %v1485_v11  ;;  %v1203_v20 = vrot.slane %v14591_v46, 1 }
  0xdb   :  { %11771 = vmatmul.mubr.msk.bf16.gmra.mrb[24].mxu0 %vm474_vm1, %v426_v56  ;;  %11787 = vmatmul.mubr.msk.bf16.gmra.mrb[24].mxu1 %vm474_vm1, %v442_v43  ;;  %v14546_v56 = vmax.f32 %v14496_v5, %v1153_v6  ;;  %v14548_v43 = vld [vmem:[#allocation4 + $0x190] sm:$0xff]  ;;  %19460 = vst [vmem:[#allocation68_spill] sm:$0xff] %v14552_v29  ;;  %19461 = vst [vmem:[#allocation69_spill] sm:$0xff] %v14565_v51  ;;  %v14582_v29 = vld [vmem:[#allocation4 + $0x1a0] sm:$0xff]  ;;  %v14594_v6 = vmax.f32 %v14510_v53, %v1437_v60  ;;  %v1155_v51 = vrot.slane %v14573_v35, 1 }
  0xdc   :  { %680 = vmatprep.mubr.bf16.mxu0 %v19440_v15  ;;  %840 = vmatprep.mubr.bf16.mxu1 %v19440_v15  ;;  %v1199_v39 = vrot.slane %v14548_v43, 1  ;;  %v1202_v60 = vrot.slane %v14582_v29, 1  ;;  %v14618_v0 = vmax.f32 %v14537_v10, %v1440_v2  ;;  %v14651_v53 = vld [vmem:[#allocation4 + $0xb8] sm:$0xff] }
  0xdd   :  { %19459 = vst [vmem:[#allocation67_spill] sm:$0xff] %v14546_v56  ;;  %v1439_v44 = vrot.slane %v14546_v56, 1  ;;  %19464 = vst [vmem:[#allocation72_spill] sm:$0xff] %v14594_v6  ;;  %v14666_v56 = vld [vmem:[#allocation4 + $0x1b8] sm:$0xff]  ;;  %v14713_v6 = vld [vmem:[#allocation4 + $0x1c8] sm:$0xff] }
  0xde   :  { %v1201_v57 = vsel %vm1123_vm2, %v1199_v39, %v1200_v26  ;;  %v19467_v26 = vpack.c.bf16 %v14412_v28, %v14410_v21  ;;  %v14610_v39 = vmax.f32 %v14527_v49, %v1485_v11  ;;  %19469 = vst [vmem:[#allocation75_spill] sm:$0xff] %v14618_v0  ;;  %v1156_v21 = vsel %vm1123_vm2, %v1154_v40, %v1155_v51  ;;  %v14692_v0 = vld [vmem:[#allocation4 + $0xc8] sm:$0xff] }
  0xdf   :  { %v14580_v61 = vsel %vm1123_vm2, %v1439_v44, %v1440_v2  ;;  %v14597_v44 = vmax.f32 %v14548_v43, %v1201_v57  ;;  %v1488_v57 = vrot.slane %v14589_v9, 1  ;;  %v14623_v28 = vmax.f32 %v14573_v35, %v1155_v51  ;;  %v14634_v2 = vld [vmem:[#allocation4 + $0xb0] sm:$0xff] }
  0xe0   :  { %19462 = vst [vmem:[#allocation70_spill] sm:$0xff] %v14580_v61  ;;  %19468 = vst [vmem:[#allocation74_spill] sm:$0xff] %v14610_v39  ;;  %v14628_v11 = vmax.f32 %v14571_v27, %v1156_v21  ;;  %v14632_v49 = vmax.f32 %v14591_v46, %v1203_v20  ;;  %v1157_v61 = vrot.slane %v14634_v2, 1  ;;  %v1205_v21 = vrot.slane %v14653_v52, 1 }
  0xe1   :  { %19465 = vst [vmem:[#allocation73_spill] sm:$0xff] %v14597_v44  ;;  %v1487_v42 = vrot.slane %v14597_v44, 1  ;;  %19470 = vst [vmem:[#allocation76_spill] sm:$0xff] %v14623_v28  ;;  %v1443_v51 = vrot.slane %v14623_v28, 1  ;;  %v1158_v44 = vrot.slane %v14651_v53, 1 }
  0xe2   :  { %19471 = vst [vmem:[#allocation77_spill] sm:$0xff] %v14628_v11  ;;  %19472 = vst [vmem:[#allocation78_spill] sm:$0xff] %v14632_v49 }
  0xe3   :  { %11772 = vmatmul.mubr.msk.bf16.gmra.mrb[28].mxu0 %vm474_vm1, %v19466_v55  ;;  %11788 = vmatmul.mubr.msk.bf16.gmra.mrb[28].mxu1 %vm474_vm1, %v19467_v26  ;;  %v1204_v26 = vsel %vm1123_vm2, %v1202_v60, %v1203_v20  ;;  %v14638_v40 = vsel %vm1123_vm2, %v1487_v42, %v1488_v57  ;;  %v14647_v60 = vmax.f32 %v14589_v9, %v1488_v57  ;;  %v1442_v20 = vrot.slane %v14628_v11, 1  ;;  %v14711_v9 = vld [vmem:[#allocation4 + $0x1c0] sm:$0xff] }
  0xe4   :  { %690 = vmatprep.mubr.bf16.mxu0 %v19440_v15  ;;  %850 = vmatprep.mubr.bf16.mxu1 %v19440_v15  ;;  %19473 = vst [vmem:[#allocation79_spill] sm:$0xff] %v14638_v40  ;;  %v14642_v10 = vmax.f32 %v14582_v29, %v1204_v26  ;;  %v1491_v55 = vrot.slane %v14632_v49, 1  ;;  %v19479_v57 = vpack.c.bf16 %v14487_v8, %v14478_v59  ;;  %v1160_v59 = vrot.slane %v14668_v17, 1 }
  0xe5   :  { %19475 = vst [vmem:[#allocation81_spill] sm:$0xff] %v14647_v60  ;;  %v14663_v40 = vsel %vm1123_vm2, %v1442_v20, %v1443_v51  ;;  %v19478_v20 = vpack.c.bf16 %v14468_v45, %v14466_v4  ;;  %v14690_v42 = vmax.f32 %v14651_v53, %v1158_v44  ;;  %v1206_v4 = vrot.slane %v14666_v56, 1 }
  0xe6   :  { %19474 = vst [vmem:[#allocation80_spill] sm:$0xff] %v14642_v10  ;;  %v1490_v26 = vrot.slane %v14642_v10, 1  ;;  %19476 = vst [vmem:[#allocation82_spill] sm:$0xff] %v14663_v40  ;;  %v1209_v11 = vrot.slane %v14713_v6, 1 }
  0xe7   :  { %19480 = vst [vmem:[#allocation84_spill] sm:$0xff] %v14690_v42  ;;  %v1207_v60 = vsel %vm1123_vm2, %v1205_v21, %v1206_v4 }
  0xe8   :  { %v14674_v39 = vsel %vm1123_vm2, %v1490_v26, %v1491_v55  ;;  %v1159_v26 = vsel %vm1123_vm2, %v1157_v61, %v1158_v44  ;;  %v14704_v61 = vmax.f32 %v14623_v28, %v1443_v51  ;;  %v14707_v44 = vmax.f32 %v14632_v49, %v1491_v55 }
  0xe9   :  { %19477 = vst [vmem:[#allocation83_spill] sm:$0xff] %v14674_v39  ;;  %v14699_v45 = vmax.f32 %v14634_v2, %v1159_v26  ;;  %v14719_v51 = vmax.f32 %v14666_v56, %v1206_v4  ;;  %v14724_v39 = vmax.f32 %v14653_v52, %v1207_v60  ;;  %v1208_v4 = vrot.slane %v14711_v9, 1 }
  0xea   :  { %19482 = vst [vmem:[#allocation86_spill] sm:$0xff] %v14704_v61  ;;  %19483 = vst [vmem:[#allocation87_spill] sm:$0xff] %v14707_v44  ;;  %v19489_v60 = vpack.c.bf16 %v14498_v34, %v14496_v5  ;;  %v19490_v55 = vpack.c.bf16 %v14556_v47, %v14548_v43  ;;  %v14769_v5 = vld [vmem:[#allocation4 + $0x1d0] sm:$0xff]  ;;  %v14788_v61 = vld [vmem:[#allocation4 + $0x1d8] sm:$0xff] }
  0xeb   :  { %11773 = vmatmul.mubr.msk.bf16.gmra.mrb[32].mxu0 %vm474_vm1, %v19478_v20  ;;  %11789 = vmatmul.mubr.msk.bf16.gmra.mrb[32].mxu1 %vm474_vm1, %v19479_v57  ;;  %19481 = vst [vmem:[#allocation85_spill] sm:$0xff] %v14699_v45  ;;  %v1446_v57 = vrot.slane %v14690_v42, 1  ;;  %v1161_v20 = vrot.slane %v14692_v0, 1  ;;  %v1445_v8 = vrot.slane %v14699_v45, 1  ;;  %19484 = vst [vmem:[#allocation88_spill] sm:$0xff] %v14719_v51  ;;  %v1494_v49 = vrot.slane %v14719_v51, 1 }
  0xec   :  { %700 = vmatprep.mubr.bf16.mxu0 %v19440_v15  ;;  %860 = vmatprep.mubr.bf16.mxu1 %v19440_v15  ;;  %19485 = vst [vmem:[#allocation89_spill] sm:$0xff] %v14724_v39  ;;  %v1210_v43 = vsel %vm1123_vm2, %v1208_v4, %v1209_v11  ;;  %v1211_v4 = vrot.slane %v14769_v5, 1 }
  0xed   :  { %v1162_v10 = vsel %vm1123_vm2, %v1160_v59, %v1161_v20  ;;  %v14728_v28 = vmax.f32 %v14692_v0, %v1161_v20  ;;  %v14740_v40 = vmax.f32 %v14690_v42, %v1446_v57  ;;  %v1493_v59 = vrot.slane %v14724_v39, 1  ;;  %v14767_v42 = vld [vmem:[#allocation4 + $0xd8] sm:$0xff] }
  0xee   :  { %v14734_v21 = vmax.f32 %v14668_v17, %v1162_v10  ;;  %v14760_v20 = vsel %vm1123_vm2, %v1445_v8, %v1446_v57  ;;  %v1163_v8 = vrot.slane %v14749_v3, 1  ;;  %v1164_v34 = vrot.slane %v14767_v42, 1 }
  0xef   :  { %19486 = vst [vmem:[#allocation90_spill] sm:$0xff] %v14728_v28  ;;  %19488 = vst [vmem:[#allocation92_spill] sm:$0xff] %v14740_v40  ;;  %v14763_v26 = vsel %vm1123_vm2, %v1493_v59, %v1494_v49  ;;  %v1449_v44 = vrot.slane %v14728_v28, 1  ;;  %v14786_v59 = vmax.f32 %v14713_v6, %v1209_v11 }
  0xf0   :  { %19487 = vst [vmem:[#allocation91_spill] sm:$0xff] %v14734_v21  ;;  %19491 = vst [vmem:[#allocation93_spill] sm:$0xff] %v14760_v20  ;;  %v1448_v10 = vrot.slane %v14734_v21, 1  ;;  %v14804_v47 = vmax.f32 %v14767_v42, %v1164_v34 }
  0xf1   :  { %19492 = vst [vmem:[#allocation94_spill] sm:$0xff] %v14763_v26  ;;  %19495 = vst [vmem:[#allocation97_spill] sm:$0xff] %v14786_v59  ;;  %v1212_v26 = vrot.slane %v14788_v61, 1  ;;  %v1497_v11 = vrot.slane %v14786_v59, 1 }
  0xf2   :  { %v14795_v57 = vsel %vm1123_vm2, %v1448_v10, %v1449_v44  ;;  %19498 = vst [vmem:[#allocation100_spill] sm:$0xff] %v14804_v47 }
  0xf3   :  { %11774 = vmatmul.mubr.msk.bf16.gmra.mrb[36].mxu0 %vm474_vm1, %v19489_v60  ;;  %11790 = vmatmul.mubr.msk.bf16.gmra.mrb[36].mxu1 %vm474_vm1, %v19490_v55  ;;  %v14780_v55 = vmax.f32 %v14719_v51, %v1494_v49  ;;  %v14783_v60 = vmax.f32 %v14711_v9, %v1210_v43  ;;  %19496 = vst [vmem:[#allocation98_spill] sm:$0xff] %v14795_v57 }
  0xf4   :  { %710 = vmatprep.mubr.bf16.mxu0 %v19440_v15  ;;  %870 = vmatprep.mubr.bf16.mxu1 %v19440_v15  ;;  %v14798_v49 = vmax.f32 %v14728_v28, %v1449_v44  ;;  %v1165_v51 = vsel %vm1123_vm2, %v1163_v8, %v1164_v34  ;;  %v1213_v39 = vsel %vm1123_vm2, %v1211_v4, %v1212_v26 }
  0xf5   :  { %19493 = vst [vmem:[#allocation95_spill] sm:$0xff] %v14780_v55  ;;  %19494 = vst [vmem:[#allocation96_spill] sm:$0xff] %v14783_v60  ;;  %v1496_v43 = vrot.slane %v14783_v60, 1  ;;  %v14808_v40 = vmax.f32 %v14788_v61, %v1212_v26  ;;  %v14816_v28 = vmax.f32 %v14749_v3, %v1165_v51  ;;  %v14819_v36 = vmax.f32 %v14769_v5, %v1213_v39  ;;  %v14842_v26 = vld [vmem:[#allocation4 + $0xe0] sm:$0xff]  ;;  %v14865_v55 = vld [vmem:[#allocation4 + $0xf8] sm:$0xff] }
  0xf6   :  { %19497 = vst [vmem:[#allocation99_spill] sm:$0xff] %v14798_v49  ;;  %v14824_v8 = vmax.f32 %v14786_v59, %v1497_v11  ;;  %v19504_v39 = vpack.c.bf16 %v14591_v46, %v14582_v29  ;;  %v1452_v46 = vrot.slane %v14804_v47, 1  ;;  %v14863_v59 = vld [vmem:[#allocation4 + $0xf0] sm:$0xff]  ;;  %19507 = vst [vmem:[#allocation107_spill] sm:$0xff] %v14865_v55  ;;  %v1170_v49 = vrot.slane %v14865_v55, 1 }
  0xf7   :  { %19499 = vst [vmem:[#allocation101_spill] sm:$0xff] %v14808_v40  ;;  %v14813_v44 = vsel %vm1123_vm2, %v1496_v43, %v1497_v11  ;;  %19501 = vst [vmem:[#allocation103_spill] sm:$0xff] %v14819_v36  ;;  %v1500_v4 = vrot.slane %v14808_v40, 1  ;;  %v19503_v43 = vpack.c.bf16 %v14573_v35, %v14571_v27  ;;  %v1499_v10 = vrot.slane %v14819_v36, 1 }
  0xf8   :  { %19500 = vst [vmem:[#allocation102_spill] sm:$0xff] %v14813_v44  ;;  %19502 = vst [vmem:[#allocation104_spill] sm:$0xff] %v14824_v8  ;;  %v14844_v44 = vld [vmem:[#allocation4 + $0xe8] sm:$0xff]  ;;  %v1166_v35 = vrot.slane %v14842_v26, 1  ;;  %v1451_v51 = vrot.slane %v14816_v28, 1  ;;  %v14880_v16 = vmax.f32 %v14804_v47, %v1452_v46  ;;  %v1169_v57 = vrot.slane %v14863_v59, 1 }
  0xf9   :  { %v1167_v29 = vrot.slane %v14844_v44, 1  ;;  %v14860_v11 = vsel %vm1123_vm2, %v1499_v10, %v1500_v4  ;;  %19506 = vst [vmem:[#allocation106_spill] sm:$0xff] %v14863_v59  ;;  %v14901_v8 = vmax.f32 %v14865_v55, %v1170_v49  ;;  %v14903_v47 = vld [vmem:[#allocation4 + $0x1f0] sm:$0xff] }
  0xfa   :  { %19505 = vst [vmem:[#allocation105_spill] sm:$0xff] %v14860_v11  ;;  %19508 = vst [vmem:[#allocation108_spill] sm:$0xff] %v14880_v16  ;;  %v14888_v34 = vsel %vm1123_vm2, %v1451_v51, %v1452_v46  ;;  %v1171_v36 = vsel %vm1123_vm2, %v1169_v57, %v1170_v49  ;;  %v19510_v51 = vpack.c.bf16 %v14651_v53, %v14634_v2 }
  0xfb   :  { %11775 = vmatmul.mubr.msk.bf16.gmra.mrb[40].mxu0 %vm474_vm1, %v19503_v43  ;;  %11791 = vmatmul.mubr.msk.bf16.gmra.mrb[40].mxu1 %vm474_vm1, %v19504_v39  ;;  %v14852_v43 = vld [vmem:[#allocation4 + $0x1e0] sm:$0xff]  ;;  %v14854_v39 = vld [vmem:[#allocation4 + $0x1e8] sm:$0xff]  ;;  %v1168_v10 = vsel %vm1123_vm2, %v1166_v35, %v1167_v29  ;;  %v14876_v20 = vmax.f32 %v14844_v44, %v1167_v29  ;;  %v14920_v46 = vmax.f32 %v14863_v59, %v1171_v36 }
  0xfc   :  { %720 = vmatprep.mubr.bf16.mxu0 %v19440_v15  ;;  %880 = vmatprep.mubr.bf16.mxu1 %v19440_v15  ;;  %v1214_v27 = vrot.slane %v14852_v43, 1  ;;  %v1215_v45 = vrot.slane %v14854_v39, 1  ;;  %v14883_v60 = vmax.f32 %v14842_v26, %v1168_v10 }
  0xfd   :  { %v1455_v35 = vrot.slane %v14876_v20, 1 }
  0xfe   :  { %v1216_v29 = vsel %vm1123_vm2, %v1214_v27, %v1215_v45  ;;  %v14893_v21 = vmax.f32 %v14854_v39, %v1215_v45  ;;  %v1454_v11 = vrot.slane %v14883_v60, 1  ;;  %v19511_v45 = vpack.c.bf16 %v14666_v56, %v14653_v52 }
  0xff   :  { %v14897_v10 = vmax.f32 %v14852_v43, %v1216_v29  ;;  %v14914_v27 = vmax.f32 %v14808_v40, %v1500_v4  ;;  %v14922_v29 = vld [vmem:[#allocation4 + $0x1f8] sm:$0xff]  ;;  %v14932_v56 = vmax.f32 %v14876_v20, %v1455_v35  ;;  %v19517_v4 = vrot.slane %v14123_v31, 1 }
 0x100   :  { %v1503_v49 = vrot.slane %v14893_v21, 1  ;;  %v14929_v52 = vsel %vm1123_vm2, %v1454_v11, %v1455_v35  ;;  %v1217_v35 = vrot.slane %v14903_v47, 1  ;;  %v1218_v53 = vrot.slane %v14922_v29, 1 }
 0x101   :  { %19509 = vst [vmem:[#allocation109_spill] sm:$0xff] %v14897_v10  ;;  %19512 = vst [vmem:[#allocation110_spill] sm:$0xff] %v14914_v27  ;;  %v1502_v2 = vrot.slane %v14897_v10, 1  ;;  %v19514_v27 = vrot.slane %v14107_v22, 1  ;;  %v1861_v11 = vrot.slane %v14107_v22, 7  ;;  %v13207_v22 = vld [vmem:[#allocation13 + $0x180] sm:$0xff]  }
 0x102   :  { %v14959_v59 = vmax.f32 %v14893_v21, %v1503_v49  ;;  %v1219_v55 = vsel %vm1123_vm2, %v1217_v35, %v1218_v53  ;;  %v14963_v36 = vmax.f32 %v14922_v29, %v1218_v53  ;;  %12453 = vmatprep.subr.bf16.mxu0 %v13207_v22 }
 0x103   :  { %11776 = vmatmul.mubr.msk.bf16.gmra.mrb[44].mxu0 %vm474_vm1, %v19510_v51  ;;  %11792 = vmatmul.mubr.msk.bf16.gmra.mrb[44].mxu1 %vm474_vm1, %v19511_v45  ;;  %v1457_v51 = vrot.slane %v14920_v46, 1  ;;  %v1458_v45 = vrot.slane %v14901_v8, 1  ;;  %v14941_v57 = vsel %vm1123_vm2, %v1502_v2, %v1503_v49  ;;  %v19515_v2 = vrot.slane %v14110_v25, 1 }
 0x104   :  { %730 = vmatprep.mubr.bf16.mxu0 %v19440_v15  ;;  %890 = vmatprep.mubr.bf16.mxu1 %v19440_v15  ;;  %19513 = vst [vmem:[#allocation111_spill] sm:$0xff] %v14941_v57  ;;  %19516 = vst [vmem:[#allocation112_spill] sm:$0xff] %v14959_v59  ;;  %v14966_v40 = vmax.f32 %v14903_v47, %v1219_v55  ;;  %v19518_v57 = vrot.slane %v14120_v30, 1  ;;  %v19519_v49 = vmax.f32 %v14167_v58, %v14201_v12 }
 0x105   :  { %v1414_v16 = vsel %vm1123_vm2, %v19515_v2, %v19514_v27  ;;  %v14978_v35 = vsel %vm1123_vm2, %v1457_v51, %v1458_v45  ;;  %v1506_v53 = vrot.slane %v14963_v36, 1  ;;  %v19520_v59 = vpack.c.bf16 %v14692_v0, %v14668_v17  ;;  %12454 = vmatpush3.bf16.msra.mxu0 %v13207_v22 }
 0x106   :  { %v1417_v10 = vsel %vm1123_vm2, %v19518_v57, %v19517_v4  ;;  %v1572_v27 = vmax.f32 %v14110_v25, %v1414_v16  ;;  %v1707_v2 = vrot.slane %v19519_v49, 7  ;;  %v19521_v16 = vpack.c.bf16 %v14713_v6, %v14711_v9 }
 0x107   :  { %v1574_v55 = vmax.f32 %v14120_v30, %v1417_v10  ;;  %v1505_v12 = vrot.slane %v14966_v40, 1  ;;  %v19522_v4 = vrot.slane %v14223_v32, 7  ;;  %v1862_v10 = vrot.slane %v14123_v31, 7 }
 0x108   :  { %v1701_v57 = vrot.slane %v1572_v27, 7  ;;  %v14999_v17 = vmax.f32 %v14901_v8, %v1458_v45  ;;  %v1927_v6 = vsel %vm1700_vm3, %v14167_v58, %v1707_v2  ;;  %v19523_v0 = vrot.slane %v14161_v54, 7 }
 0x109   :  { %v1709_v51 = vsel %vm1700_vm3, %v1707_v2, %v19522_v4  ;;  %v1704_v9 = vrot.slane %v1574_v55, 7  ;;  %v15009_v31 = vsel %vm1123_vm2, %v1505_v12, %v1506_v53  ;;  %v19525_v49 = vmax.f32 %v14205_v14, %v14241_v50  ;;  %v13209_v4 = vld [vmem:[#allocation13 + $0x188] sm:$0xff]   ;;  %v319_v2 = vld [vmem:[#allocation2 + $0x2c] sm:$0x6] }
 0x10a   :  { %v1959_v32 = vsel %vm1123_vm2, %v1709_v51, %v19523_v0  ;;  %v1925_v45 = vsel %vm1700_vm3, %v14110_v25, %v1701_v57  ;;  %v1602_v54 = vmax.f32 %v14920_v46, %v14978_v35  ;;  %v19526_v55 = vrot.slane %v14176_v62, 7  ;;  %12455 = vmatprep.subr.bf16.mxu0 %v13209_v4  ;;  %v13196_v35 = vld [vmem:[#allocation13 + $0x8] sm:$0xff]  }
 0x10b   :  { %11777 = vmatmul.mubr.msk.bf16.gmra.mrb[48].mxu0 %vm474_vm1, %v19520_v59  ;;  %11793 = vmatmul.mubr.msk.bf16.gmra.mrb[48].mxu1 %vm474_vm1, %v19521_v16  ;;  %v19524_v59 = vrot.slane %v14136_v37, 7  ;;  %v1710_v58 = vrot.slane %v19525_v49, 7  ;;  %v1926_v16 = vsel %vm1700_vm3, %v14120_v30, %v1704_v9 }
 0x10c   :  { %740 = vmatprep.mubr.bf16.mxu0 %v19440_v15  ;;  %900 = vmatprep.mubr.bf16.mxu1 %v19440_v15  ;;  %v1706_v37 = vsel %vm1700_vm3, %v1704_v9, %v19526_v55  ;;  %v15030_v12 = vmax.f32 %v1925_v45, %v1926_v16  ;;  %v19529_v9 = vmax.f32 %v14286_v41, %v14315_v24 }
 0x10d   :  { %v1703_v27 = vsel %vm1700_vm3, %v1701_v57, %v19524_v59  ;;  %v1958_v50 = vsel %vm1123_vm2, %v1706_v37, %v1862_v10  ;;  %v1991_v57 = vmax.f32 %v1926_v16, %v1927_v6  ;;  %v19527_v59 = vrot.slane %v14270_v13, 7  ;;  %12456 = vmatpush3.bf16.msra.mxu0 %v13209_v4  ;;  %v19537_v4 = vld [vmem:[#allocation48_spill] sm:$0xff] }
 0x10e   :  { %v1957_v25 = vsel %vm1123_vm2, %v1703_v27, %v1861_v11  ;;  %v1992_v0 = vmax.f32 %v1958_v50, %v1959_v32  ;;  %v1928_v49 = vsel %vm1700_vm3, %v14205_v14, %v1710_v58  ;;  %v19528_v11 = vrot.slane %v14213_v19, 7 }
 0x10f   :  { %v15032_v51 = vmax.f32 %v1957_v25, %v1958_v50  ;;  %v1712_v62 = vsel %vm1700_vm3, %v1710_v58, %v19527_v59  ;;  %v2049_v30 = vmax.f32 %v15030_v12, %v1991_v57  ;;  %v1993_v22 = vmax.f32 %v1927_v6, %v1928_v49 }
 0x110   :  { %v1960_v10 = vsel %vm1123_vm2, %v1712_v62, %v19528_v11  ;;  %v1713_v27 = vrot.slane %v19529_v9, 7  ;;  %v19530_v14 = vmax.f32 %v14325_v63, %v14365_v38  ;;  %v19531_v19 = vpack.c.bf16 %v14767_v42, %v14749_v3 }
 0x111   :  { %v2050_v45 = vmax.f32 %v15032_v51, %v1992_v0  ;;  %v2105_v13 = vpack.c.bf16 %v15032_v51, %v15030_v12  ;;  %v1994_v55 = vmax.f32 %v1959_v32, %v1960_v10  ;;  %v19532_v24 = vpack.c.bf16 %v14788_v61, %v14769_v5  ;;  %v13213_v51 = vld [vmem:[#allocation13 + $0x1a0] sm:$0xff]  }
 0x112   :  { %v1716_v58 = vrot.slane %v19530_v14, 7  ;;  %v2051_v6 = vmax.f32 %v1991_v57, %v1993_v22  ;;  %v19533_v37 = vrot.slane %v14348_v33, 7  ;;  %v1929_v38 = vsel %vm1700_vm3, %v14286_v41, %v1713_v27 }
 0x113   :  { %11778 = vmatmul.mubr.msk.bf16.gmra.mrb[52].mxu0 %vm474_vm1, %v19531_v19  ;;  %11794 = vmatmul.mubr.msk.bf16.gmra.mrb[52].mxu1 %vm474_vm1, %v19532_v24  ;;  %v19534_v16 = vmax.f32 %v14371_v1, %v14407_v7  ;;  %v15070_v3 = vpack.c.bf16 %v2050_v45, %v2049_v30  ;;  %v2052_v42 = vmax.f32 %v1992_v0, %v1994_v55  ;;  %v19535_v61 = vrot.slane %v14274_v18, 7  ;;  %v19539_v0 = vld [vmem:[#allocation42_spill] sm:$0xff] }
 0x114   :  { %v1715_v32 = vsel %vm1700_vm3, %v1713_v27, %v19533_v37  ;;  %750 = vmatprep.mubr.bf16.mxu0 %v19440_v15  ;;  %910 = vmatprep.mubr.bf16.mxu1 %v19440_v15  ;;  %v19536_v5 = vmax.f32 %v14444_v23, %v14482_v48  ;;  %v1995_v41 = vmax.f32 %v1928_v49, %v1929_v38  ;;  %v19538_v7 = vrot.slane %v19537_v4, 7  ;;  %v19541_v27 = vld [vmem:[#allocation53_spill] sm:$0xff] }
 0x115   :  { %v1719_v25 = vrot.slane %v19534_v16, 7  ;;  %v1961_v33 = vsel %vm1123_vm2, %v1715_v32, %v19535_v61  ;;  %v1930_v62 = vsel %vm1700_vm3, %v14325_v63, %v1716_v58  ;;  %v15083_v30 = vpack.c.bf16 %v2052_v42, %v2051_v6  ;;  %v13210_v24 = vld [vmem:[#allocation13 + $0x190] sm:$0xff]  }
 0x116   :  { %v1722_v50 = vrot.slane %v19536_v5, 7  ;;  %v1996_v57 = vmax.f32 %v1960_v10, %v1961_v33  ;;  %v1718_v59 = vsel %vm1700_vm3, %v1716_v58, %v19538_v7  ;;  %v19540_v11 = vrot.slane %v19539_v0, 7  ;;  %v19543_v63 = vld [vmem:[#allocation46_spill] sm:$0xff]  ;;  %v19545_v16 = vld [vmem:[#allocation61_spill] sm:$0xff]  ;;  %12457 = vmatprep.subr.bf16.mxu0 %v13210_v24 }
 0x117   :  { %v1997_v9 = vmax.f32 %v1929_v38, %v1930_v62  ;;  %v19542_v45 = vrot.slane %v19541_v27, 7  ;;  %v2053_v49 = vmax.f32 %v1993_v22, %v1995_v41  ;;  %v1931_v19 = vsel %vm1700_vm3, %v14371_v1, %v1719_v25  ;;  %v19549_v7 = vld [vmem:[#allocation62_spill] sm:$0xff]  ;;  %12458 = vmatpush3.bf16.msra.mxu0 %v13210_v24 }
 0x118   :  { %v1962_v18 = vsel %vm1123_vm2, %v1718_v59, %v19540_v11  ;;  %v2054_v10 = vmax.f32 %v1994_v55, %v1996_v57  ;;  %v19544_v58 = vrot.slane %v19543_v63, 7  ;;  %v1999_v32 = vmax.f32 %v1930_v62, %v1931_v19  ;;  %v19550_v59 = vld [vmem:[#allocation68_spill] sm:$0xff]  ;;  %v19555_v27 = vld [vmem:[#allocation70_spill] sm:$0xff] }
 0x119   :  { %v1721_v48 = vsel %vm1700_vm3, %v1719_v25, %v19542_v45  ;;  %v1998_v14 = vmax.f32 %v1961_v33, %v1962_v18  ;;  %v2055_v37 = vmax.f32 %v1995_v41, %v1997_v9  ;;  %v19546_v42 = vrot.slane %v19545_v16, 7  ;;  %v19547_v25 = vld [vmem:[#allocation54_spill] sm:$0xff] }
 0x11a   :  { %v1963_v6 = vsel %vm1123_vm2, %v1721_v48, %v19544_v58  ;;  %v15099_v61 = vpack.c.bf16 %v2054_v10, %v2053_v49  ;;  %v1932_v55 = vsel %vm1700_vm3, %v14444_v23, %v1722_v50  ;;  %v2057_v1 = vmax.f32 %v1997_v9, %v1999_v32  ;;  %v19554_v9 = vld [vmem:[#allocation67_spill] sm:$0xff] }
 0x11b   :  { %v1724_v38 = vsel %vm1700_vm3, %v1722_v50, %v19546_v42  ;;  %v2056_v5 = vmax.f32 %v1996_v57, %v1998_v14  ;;  %v2000_v22 = vmax.f32 %v1962_v18, %v1963_v6  ;;  %v19548_v33 = vrot.slane %v19547_v25, 7  ;;  %v13212_v49 = vld [vmem:[#allocation13 + $0x198] sm:$0xff]  }
 0x11c   :  { %v2001_v4 = vmax.f32 %v1931_v19, %v1932_v55  ;;  %v19551_v62 = vmax.f32 %v19549_v7, %v19550_v59  ;;  %v19552_v11 = vpack.c.bf16 %v14844_v44, %v14842_v26  ;;  %v19553_v23 = vpack.c.bf16 %v14854_v39, %v14852_v43  ;;  %v19557_v26 = vld [vmem:[#allocation72_spill] sm:$0xff]  ;;  %v19559_v19 = vld [vmem:[#allocation77_spill] sm:$0xff]  ;;  %12459 = vmatprep.subr.bf16.mxu0 %v13212_v49  ;;  %v19566_v59 = vld [vmem:[#allocation86_spill] sm:$0xff] }
 0x11d   :  { %v1964_v41 = vsel %vm1123_vm2, %v1724_v38, %v19548_v33  ;;  %v15117_v50 = vpack.c.bf16 %v2056_v5, %v2055_v37  ;;  %v2058_v57 = vmax.f32 %v1998_v14, %v2000_v22  ;;  %v19556_v45 = vmax.f32 %v19554_v9, %v19555_v27  ;;  %v19560_v14 = vld [vmem:[#allocation82_spill] sm:$0xff]  ;;  %v19564_v5 = vld [vmem:[#allocation75_spill] sm:$0xff]  ;;  %12460 = vmatpush3.bf16.msra.mxu0 %v13212_v49 }
 0x11e   :  { %v1725_v0 = vrot.slane %v19551_v62, 7  ;;  %11779 = vmatmul.mubr.msk.bf16.gmra.mrb[56].mxu0 %vm474_vm1, %v19552_v11  ;;  %11795 = vmatmul.mubr.msk.bf16.gmra.mrb[56].mxu1 %vm474_vm1, %v19553_v23  ;;  %v2002_v18 = vmax.f32 %v1963_v6, %v1964_v41  ;;  %v2059_v44 = vmax.f32 %v1999_v32, %v2001_v4  ;;  %v19558_v10 = vrot.slane %v19557_v26, 7  ;;  %v19562_v6 = vld [vmem:[#allocation60_spill] sm:$0xff]  ;;  %v19568_v11 = vld [vmem:[#allocation66_spill] sm:$0xff] }
 0x11f   :  { %v1728_v48 = vrot.slane %v19556_v45, 7  ;;  %760 = vmatprep.mubr.bf16.mxu0 %v19440_v15  ;;  %920 = vmatprep.mubr.bf16.mxu1 %v19440_v15  ;;  %v19561_v24 = vmax.f32 %v19559_v19, %v19560_v14  ;;  %v15132_v63 = vpack.c.bf16 %v2058_v57, %v2057_v1  ;;  %v19563_v16 = vrot.slane %v19562_v6, 7  ;;  %v19570_v26 = vld [vmem:[#allocation76_spill] sm:$0xff]  ;;  %v19573_v14 = vld [vmem:[#allocation93_spill] sm:$0xff] }
 0x120   :  { %v1727_v43 = vsel %vm1700_vm3, %v1725_v0, %v19558_v10  ;;  %v1933_v39 = vsel %vm1700_vm3, %v19549_v7, %v1725_v0  ;;  %v2060_v58 = vmax.f32 %v2000_v22, %v2002_v18  ;;  %v19565_v25 = vrot.slane %v19564_v5, 7  ;;  %v19579_v5 = vld [vmem:[#allocation107_spill] sm:$0xff]  ;;  %12461 = vmatprep.subr.bf16.mxu0 %v13213_v51 }
 0x121   :  { %v1731_v37 = vrot.slane %v19561_v24, 7  ;;  %v1965_v42 = vsel %vm1123_vm2, %v1727_v43, %v19563_v16  ;;  %v2003_v38 = vmax.f32 %v1932_v55, %v1933_v39  ;;  %v1934_v7 = vsel %vm1700_vm3, %v19554_v9, %v1728_v48  ;;  %12462 = vmatpush3.bf16.msra.mxu0 %v13213_v51 }
 0x122   :  { %v2004_v32 = vmax.f32 %v1964_v41, %v1965_v42  ;;  %v1730_v33 = vsel %vm1700_vm3, %v1728_v48, %v19565_v25  ;;  %v19567_v62 = vrot.slane %v19566_v59, 7  ;;  %v15145_v22 = vpack.c.bf16 %v2060_v58, %v2059_v44  ;;  %v19572_v44 = vld [vmem:[#allocation85_spill] sm:$0xff]  ;;  %v19580_v25 = vld [vmem:[#allocation106_spill] sm:$0xff]  ;;  %v19583_v59 = vld [vmem:[#allocation92_spill] sm:$0xff] }
 0x123   :  { %v2061_v0 = vmax.f32 %v2001_v4, %v2003_v38  ;;  %v19569_v23 = vrot.slane %v19568_v11, 7  ;;  %v2005_v41 = vmax.f32 %v1933_v39, %v1934_v7  ;;  %v1935_v45 = vsel %vm1700_vm3, %v19559_v19, %v1731_v37  ;;  %v19575_v39 = vld [vmem:[#allocation91_spill] sm:$0xff] }
 0x124   :  { %v1733_v1 = vsel %vm1700_vm3, %v1731_v37, %v19567_v62  ;;  %v2062_v57 = vmax.f32 %v2002_v18, %v2004_v32  ;;  %v19571_v9 = vrot.slane %v19570_v26, 7  ;;  %v2007_v43 = vmax.f32 %v1934_v7, %v1935_v45  ;;  %v19576_v18 = vld [vmem:[#allocation98_spill] sm:$0xff] }
 0x125   :  { %v1966_v55 = vsel %vm1123_vm2, %v1730_v33, %v19569_v23  ;;  %v2063_v10 = vmax.f32 %v2003_v38, %v2005_v41  ;;  %v19574_v4 = vmax.f32 %v19572_v44, %v19573_v14  ;;  %v19577_v16 = vmax.f32 %v19575_v39, %v19576_v18 }
 0x126   :  { %v2006_v27 = vmax.f32 %v1965_v42, %v1966_v55  ;;  %v1967_v48 = vsel %vm1123_vm2, %v1733_v1, %v19571_v9  ;;  %v15158_v58 = vpack.c.bf16 %v2062_v57, %v2061_v0  ;;  %v19578_v19 = vmax.f32 %v14816_v28, %v14888_v34 }
 0x127   :  { %v2008_v49 = vmax.f32 %v1966_v55, %v1967_v48  ;;  %v1734_v24 = vrot.slane %v19574_v4, 7  ;;  %v1737_v42 = vrot.slane %v19577_v16, 7  ;;  %v19581_v38 = vpack.c.bf16 %v19579_v5, %v19580_v25  ;;  %v19592_v4 = vld [vmem:[#allocation108_spill] sm:$0xff] }
 0x128   :  { %v2064_v6 = vmax.f32 %v2004_v32, %v2006_v27  ;;  %v1740_v37 = vrot.slane %v19578_v19, 7  ;;  %v19582_v33 = vpack.c.bf16 %v14922_v29, %v14903_v47  ;;  %v2065_v7 = vmax.f32 %v2005_v41, %v2007_v43  ;;  %v19586_v29 = vld [vmem:[#allocation84_spill] sm:$0xff]  ;;  %v19588_v41 = vld [vmem:[#allocation99_spill] sm:$0xff] }
 0x129   :  { %11780 = vmatmul.mubr.msk.bf16.gmra.mrb[60].mxu0 %vm474_vm1, %v19581_v38  ;;  %v2066_v32 = vmax.f32 %v2006_v27, %v2008_v49  ;;  %v19584_v62 = vrot.slane %v19583_v59, 7  ;;  %v19585_v34 = vmax.f32 %v14883_v60, %v14929_v52  ;;  %v1936_v47 = vsel %vm1700_vm3, %v19572_v44, %v1734_v24 }
 0x12a   :  { %11796 = vmatmul.mubr.msk.bf16.gmra.mrb[60].mxu1 %vm474_vm1, %v19582_v33  ;;  %v15184_v11 = vpack.c.bf16 %v2064_v6, %v2063_v10  ;;  %v19587_v23 = vrot.slane %v19586_v29, 7  ;;  %v19589_v57 = vrot.slane %v19588_v41, 7  ;;  %v2009_v26 = vmax.f32 %v1935_v45, %v1936_v47 }
 0x12b   :  { %v1736_v1 = vsel %vm1700_vm3, %v1734_v24, %v19584_v62  ;;  %v1743_v0 = vrot.slane %v19585_v34, 7  ;;  %12389 = vmatprep.mubr.msk.bf16.mxu1 %vm474_vm1, %v2105_v13  ;;  %v15194_v52 = vpack.c.bf16 %v2066_v32, %v2065_v7  ;;  %v1937_v12 = vsel %vm1700_vm3, %v19575_v39, %v1737_v42  ;;  %v19590_v13 = vld [vmem:[#allocation90_spill] sm:$0xff]  ;;  %v13215_v62 = vld [vmem:[#allocation13 + $0x1a8] sm:$0xff]  }
 0x12c   :  { %v1968_v55 = vsel %vm1123_vm2, %v1736_v1, %v19587_v23  ;;  %v1739_v27 = vsel %vm1700_vm3, %v1737_v42, %v19589_v57  ;;  %v19591_v10 = vrot.slane %v19590_v13, 7  ;;  %v2011_v14 = vmax.f32 %v1936_v47, %v1937_v12  ;;  %v13195_v42 = vld [vmem:[#allocation13] sm:$0xff]   ;;  %v19598_v1 = vld [vmem:[#allocation110_spill] sm:$0xff]  ;;  %12463 = vmatprep.subr.bf16.mxu0 %v13215_v62 }
 0x12d   :  { %v2010_v9 = vmax.f32 %v1967_v48, %v1968_v55  ;;  %v19593_v24 = vrot.slane %v19592_v4, 7  ;;  %v1938_v18 = vsel %vm1700_vm3, %v14816_v28, %v1740_v37  ;;  %v2067_v16 = vmax.f32 %v2007_v43, %v2009_v26  ;;  %v19594_v48 = vld [vmem:[#allocation100_spill] sm:$0xff]  ;;  %12464 = vmatpush3.bf16.msra.mxu0 %v13215_v62 }
 0x12e   :  { %v1969_v44 = vsel %vm1123_vm2, %v1739_v27, %v19591_v10  ;;  %v19595_v5 = vrot.slane %v19594_v48, 7  ;;  %v2069_v25 = vmax.f32 %v2009_v26, %v2011_v14  ;;  %v15209_v38 = vmax.f32 %v1937_v12, %v1938_v18  ;;  %v19605_v26 = vld [vmem:[#allocation29_spill] sm:$0xff]  ;;  %v19607_v10 = vld [vmem:[#allocation112_spill] sm:$0xff] }
 0x12f   :  { %v1742_v6 = vsel %vm1700_vm3, %v1740_v37, %v19593_v24  ;;  %v2068_v19 = vmax.f32 %v2008_v49, %v2010_v9  ;;  %v2012_v45 = vmax.f32 %v1968_v55, %v1969_v44  ;;  %v19596_v7 = vrot.slane %v14932_v56, 7  ;;  %v19601_v55 = vld [vmem:[#allocation26_spill] sm:$0xff]  ;;  %v19608_v48 = vld [vmem:[#allocation33_spill] sm:$0xff] }
 0x130   :  { %v1970_v39 = vsel %vm1123_vm2, %v1742_v6, %v19595_v5  ;;  %v15220_v49 = vsel %vm1700_vm3, %v14883_v60, %v1743_v0  ;;  %v19597_v37 = vrot.slane %v14876_v20, 7  ;;  %v1789_v34 = vrot.slane %v19598_v1, 7  ;;  %v19599_v60 = vld [vmem:[#allocation27_spill] sm:$0xff]  ;;  %v19609_v5 = vld [vmem:[#allocation34_spill] sm:$0xff] }
 0x131   :  { %v15211_v33 = vmax.f32 %v1969_v44, %v1970_v39  ;;  %v1745_v32 = vsel %vm1700_vm3, %v1743_v0, %v19596_v7  ;;  %v15216_v28 = vpack.c.bf16 %v2068_v19, %v2067_v16  ;;  %v2070_v43 = vmax.f32 %v2010_v9, %v2012_v45 }
 0x132   :  { %v15225_v59 = vsel %vm1123_vm2, %v1745_v32, %v19597_v37  ;;  %v1747_v56 = vrot.slane %v14999_v17, 7  ;;  %v2071_v47 = vmax.f32 %v2011_v14, %v15209_v38  ;;  %12390 = vmatmul.mubr.msk.bf16.vlgmr.msra.gmra.mrb[64].mxu1 %vm474_vm1, %v15070_v3  ;;  %v1746_v20 = vrot.slane %v1602_v54, 7  ;;  %v19603_v17 = vld [vmem:[#allocation28_spill] sm:$0xff]  ;;  %v19612_v37 = vld [vmem:[#allocation38_spill] sm:$0xff] }
 0x133   :  { %v2072_v29 = vmax.f32 %v2012_v45, %v15211_v33  ;;  %v15233_v23 = vpack.c.bf16 %v2070_v43, %v2069_v25  ;;  %v19600_v0 = vrot.slane %v19599_v60, 1  ;;  %v19602_v41 = vrot.slane %v19601_v55, 1  ;;  %7159 = vmatpush1.bf16.msra.mxu1 %v13195_v42  ;;  %12393 = vmatprep.mubr.msk.bf16.mxu1 %vm474_vm1, %v15083_v30  ;;  %v13197_v25 = vld [vmem:[#allocation13 + $0x10] sm:$0xff]   ;;  %v19611_v43 = vld [vmem:[#allocation36_spill] sm:$0xff] }
 0x134   :  { %v19604_v27 = vrot.slane %v19603_v17, 1  ;;  %v19606_v9 = vrot.slane %v19605_v26, 1  ;;  %v1891_v3 = vrot.slane %v14893_v21, 7  ;;  %v1876_v51 = vrot.slane %v14901_v8, 7  ;;  %7160 = vmatprep.subr.bf16.mxu1 %v19440_v15 }
 0x135   :  { %v1462_v57 = vsel %vm1123_vm2, %v19602_v41, %v19600_v0  ;;  %v15253_v54 = vmax.f32 %v1938_v18, %v15220_v49  ;;  %v15256_v13 = vmax.f32 %v1970_v39, %v15225_v59  ;;  %v1792_v44 = vrot.slane %v19607_v10, 7  ;;  %v19616_v41 = vld [vmem:[#allocation32_spill] sm:$0xff] }
 0x136   :  { %v1465_v12 = vsel %vm1123_vm2, %v19606_v9, %v19604_v27  ;;  %v1604_v8 = vmax.f32 %v19601_v55, %v1462_v57  ;;  %v15266_v30 = vmax.f32 %v14963_v36, %v1506_v53  ;;  %v1748_v24 = vsel %vm1700_vm3, %v1746_v20, %v1747_v56  ;;  %v19618_v27 = vld [vmem:[#allocation41_spill] sm:$0xff] }
 0x137   :  { %v1606_v4 = vmax.f32 %v19605_v26, %v1465_v12  ;;  %v1877_v6 = vrot.slane %v19599_v60, 7  ;;  %v1878_v18 = vrot.slane %v19603_v17, 7  ;;  %v15271_v16 = vpack.c.bf16 %v2072_v29, %v2071_v47  ;;  %7161 = vmatpush1.bf16.msra.mxu1 %v13196_v35  ;;  %v19614_v29 = vld [vmem:[#allocation30_spill] sm:$0xff] }
 0x138   :  { %v1749_v19 = vrot.slane %v1604_v8, 7  ;;  %v19610_v39 = vmax.f32 %v19608_v48, %v19609_v5  ;;  %v2073_v53 = vmax.f32 %v15209_v38, %v15253_v54  ;;  %v2074_v7 = vmax.f32 %v15211_v33, %v15256_v13  ;;  %7162 = vmatprep.subr.bf16.mxu1 %v19440_v15 }
 0x139   :  { %v1752_v45 = vrot.slane %v1606_v4, 7  ;;  %v15282_v32 = vsel %vm1700_vm3, %v14920_v46, %v1746_v20  ;;  %v19613_v62 = vmax.f32 %v19611_v43, %v19612_v37  ;;  %v15289_v47 = vsel %vm1123_vm2, %v1748_v24, %v1876_v51  ;;  %v19619_v46 = vld [vmem:[#allocation43_spill] sm:$0xff]  ;;  %v13216_v4 = vld [vmem:[#allocation13 + $0x1b0] sm:$0xff]  }
 0x13a   :  { %v1755_v42 = vrot.slane %v19610_v39, 7  ;;  %v19615_v60 = vrot.slane %v19614_v29, 7  ;;  %v19617_v57 = vrot.slane %v19616_v41, 7  ;;  %v19620_v20 = vmax.f32 %v19618_v27, %v19619_v46  ;;  %12394 = vmatmul.mubr.msk.bf16.gmra.mrb[68].mxu1 %vm474_vm1, %v15099_v61  ;;  %v19621_v39 = vld [vmem:[#allocation37_spill] sm:$0xff]  ;;  %12465 = vmatprep.subr.bf16.mxu0 %v13216_v4 }
 0x13b   :  { %v1758_v56 = vrot.slane %v19613_v62, 7  ;;  %v1941_v12 = vsel %vm1700_vm3, %v19601_v55, %v1749_v19  ;;  %v1942_v35 = vsel %vm1700_vm3, %v19605_v26, %v1752_v45  ;;  %v19622_v37 = vrot.slane %v19621_v39, 7  ;;  %v19623_v55 = vld [vmem:[#allocation47_spill] sm:$0xff]  ;;  %12397 = vmatprep.mubr.msk.bf16.mxu1 %vm474_vm1, %v15117_v50  ;;  %7163 = vmatpush1.bf16.msra.mxu1 %v13197_v25  ;;  %v19631_v46 = vld [vmem:[#allocation57_spill] sm:$0xff]  ;;  %v19661_v50 = vld [vmem:[#allocation74_spill] sm:$0xff] }
 0x13c   :  { %v1751_v0 = vsel %vm1700_vm3, %v1749_v19, %v19615_v60  ;;  %v1754_v17 = vsel %vm1700_vm3, %v1752_v45, %v19617_v57  ;;  %v1761_v9 = vrot.slane %v19620_v20, 7  ;;  %v15308_v24 = vmax.f32 %v1941_v12, %v1942_v35  ;;  %v19624_v19 = vld [vmem:[#allocation49_spill] sm:$0xff]  ;;  %7164 = vmatprep.subr.bf16.mxu1 %v19440_v15  ;;  %12466 = vmatpush3.bf16.msra.mxu0 %v13216_v4 }
 0x13d   :  { %v1973_v51 = vsel %vm1123_vm2, %v1751_v0, %v1877_v6  ;;  %v1974_v8 = vsel %vm1123_vm2, %v1754_v17, %v1878_v18  ;;  %v1757_v62 = vsel %vm1700_vm3, %v1755_v42, %v19622_v37  ;;  %v19625_v29 = vmax.f32 %v19623_v55, %v19624_v19  ;;  %v13198_v6 = vld [vmem:[#allocation13 + $0x18] sm:$0xff]   ;;  %v19630_v17 = vld [vmem:[#allocation52_spill] sm:$0xff] }
 0x13e   :  { %v15310_v5 = vmax.f32 %v1973_v51, %v1974_v8  ;;  %v1943_v61 = vsel %vm1700_vm3, %v19608_v48, %v1755_v42  ;;  %v19626_v18 = vld [vmem:[#allocation31_spill] sm:$0xff]  ;;  %v19632_v20 = vmax.f32 %v19630_v17, %v19631_v46  ;;  %v1944_v48 = vsel %vm1700_vm3, %v19611_v43, %v1758_v56  ;;  %v19635_v19 = vld [vmem:[#allocation44_spill] sm:$0xff] }
 0x13f   :  { %v1764_v26 = vrot.slane %v19625_v29, 7  ;;  %v19627_v45 = vrot.slane %v19626_v18, 7  ;;  %v19628_v0 = vld [vmem:[#allocation39_spill] sm:$0xff]  ;;  %v2021_v25 = vmax.f32 %v1942_v35, %v1943_v61  ;;  %v19636_v29 = vrot.slane %v19635_v19, 7  ;;  %7165 = vmatpush1.bf16.msra.mxu1 %v13198_v6 }
 0x140   :  { %v19629_v41 = vrot.slane %v19628_v0, 7  ;;  %v1767_v12 = vrot.slane %v19632_v20, 7  ;;  %v19633_v42 = vld [vmem:[#allocation35_spill] sm:$0xff]  ;;  %7166 = vmatprep.subr.bf16.mxu1 %v19440_v15  ;;  %v19662_v14 = vrot.slane %v19661_v50, 7 }
 0x141   :  { %v1975_v60 = vsel %vm1123_vm2, %v1757_v62, %v19627_v45  ;;  %v19634_v39 = vrot.slane %v19633_v42, 7  ;;  %v2023_v62 = vmax.f32 %v1943_v61, %v1944_v48  ;;  %v1763_v18 = vsel %vm1700_vm3, %v1761_v9, %v19636_v29  ;;  %v19641_v20 = vld [vmem:[#allocation51_spill] sm:$0xff]  ;;  %v13352_v61 = vld [vmem:[#allocation13 + $0xe8] sm:$0xff]  }
 0x142   :  { %v1760_v57 = vsel %vm1700_vm3, %v1758_v56, %v19629_v41  ;;  %v2022_v51 = vmax.f32 %v1974_v8, %v1975_v60  ;;  %v1945_v45 = vsel %vm1700_vm3, %v19618_v27, %v1761_v9  ;;  %v2077_v0 = vmax.f32 %v15308_v24, %v2021_v25  ;;  %v19637_v41 = vld [vmem:[#allocation40_spill] sm:$0xff]  ;;  %12398 = vmatmul.mubr.msk.bf16.gmra.mrb[72].mxu1 %vm474_vm1, %v15132_v63 }
 0x143   :  { %v1976_v37 = vsel %vm1123_vm2, %v1760_v57, %v19634_v39  ;;  %v19638_v43 = vrot.slane %v19637_v41, 7  ;;  %v13199_v57 = vld [vmem:[#allocation13 + $0x20] sm:$0xff]   ;;  %v2079_v27 = vmax.f32 %v2021_v25, %v2023_v62  ;;  %v2025_v9 = vmax.f32 %v1944_v48, %v1945_v45  ;;  %v259_v39 = vld [vmem:[#allocation2 + $0xc0] sm:$0x3]  ;;  %v13220_v25 = vld [vmem:[#allocation13 + $0x1b8] sm:$0xff]   ;;  %12401 = vmatprep.mubr.msk.bf16.mxu1 %vm474_vm1, %v15145_v22 }
 0x144   :  { %v2078_v35 = vmax.f32 %v15310_v5, %v2022_v51  ;;  %v2024_v8 = vmax.f32 %v1975_v60, %v1976_v37  ;;  %v19642_v42 = vrot.slane %v19641_v20, 7  ;;  %v1946_v29 = vsel %vm1700_vm3, %v19623_v55, %v1764_v26  ;;  %12467 = vmatprep.subr.bf16.mxu0 %v13220_v25  ;;  %7167 = vmatpush1.bf16.msra.mxu1 %v13199_v57  ;;  %v358_v57 = vld [vmem:[#allocation2 + $0xc8] sm:$0x6] }
 0x145   :  { %v1977_v56 = vsel %vm1123_vm2, %v1763_v18, %v19638_v43  ;;  %v19643_v18 = vld [vmem:[#allocation45_spill] sm:$0xff]  ;;  %v2081_v48 = vmax.f32 %v2023_v62, %v2025_v9  ;;  %v2027_v43 = vmax.f32 %v1945_v45, %v1946_v29  ;;  %v1947_v55 = vsel %vm1700_vm3, %v19630_v17, %v1767_v12  ;;  %7168 = vmatprep.subr.bf16.mxu1 %v19440_v15 }
 0x146   :  { %v2026_v46 = vmax.f32 %v1976_v37, %v1977_v56  ;;  %v1766_v60 = vsel %vm1700_vm3, %v1764_v26, %v19642_v42  ;;  %v15359_v19 = vpack.c.bf16 %v2078_v35, %v2077_v0  ;;  %v2080_v4 = vmax.f32 %v2022_v51, %v2024_v8  ;;  %v19645_v0 = vld [vmem:[#allocation59_spill] sm:$0xff]  ;;  %v13200_v62 = vld [vmem:[#allocation13 + $0x28] sm:$0xff]   ;;  %12468 = vmatpush3.bf16.msra.mxu0 %v13220_v25  ;;  %v19652_v25 = vld [vmem:[#allocation58_spill] sm:$0xff] }
 0x147   :  { %v19644_v41 = vrot.slane %v19643_v18, 7  ;;  %v19646_v35 = vrot.slane %v19645_v0, 7  ;;  %v260_v26 = vsel %vm15351_vm5, 0, %v259_v39  ;;  %v2083_v63 = vmax.f32 %v2025_v9, %v2027_v43  ;;  %v211_v39 = vld [vmem:[#allocation2] sm:$0x3]  ;;  %10105 = vmatprep.subr.bf16.mxu0 %v19440_v15 }
 0x148   :  { %v2082_v37 = vmax.f32 %v2024_v8, %v2026_v46  ;;  %v15368_v42 = vpack.c.bf16 %v2080_v4, %v2079_v27  ;;  %261 = vst [vmem:[#allocation2 + $0xc0] sm:$0x3] %v260_v26  ;;  %v15384_v17 = vmax.f32 %v15220_v49, %v15282_v32  ;;  %v455_v22 = vlaneseq  ;;  %v262_v4 = vld [vmem:[#allocation2 + $0xcc] sm:$0x3]  ;;  %7169 = vmatpush1.bf16.msra.mxu1 %v13200_v62  ;;  %v15412_v26 = vld [vmem:[#allocation9] sm:$0x3] }
 0x149   :  { %v1978_v6 = vsel %vm1123_vm2, %v1766_v60, %v19644_v41  ;;  %v1769_v51 = vsel %vm1700_vm3, %v1767_v12, %v19646_v35  ;;  %v19647_v12 = vld [vmem:[#allocation50_spill] sm:$0xff]  ;;  %v15389_v60 = vmax.f32 %v1946_v29, %v1947_v55  ;;  %v15393_v9 = vmax.f32 %v15225_v59, %v15289_v47  ;;  %v19651_v41 = vld [vmem:[#allocation56_spill] sm:$0xff]  ;;  %v19654_v47 = vld [vmem:[#allocation65_spill] sm:$0xff]  ;;  %7170 = vmatprep.subr.bf16.mxu1 %v19440_v15 }
 0x14a   :  { %v2028_v20 = vmax.f32 %v1977_v56, %v1978_v6  ;;  %v15379_v45 = vpack.c.bf16 %v2082_v37, %v2081_v48  ;;  %v19648_v56 = vrot.slane %v19647_v12, 7  ;;  %v15399_v32 = vshrl.u32 %v455_v22, 7  ;;  %v19655_v37 = vld [vmem:[#allocation69_spill] sm:$0xff]  ;;  %12402 = vmatmul.mubr.msk.bf16.gmra.mrb[76].mxu1 %vm474_vm1, %v15158_v58  ;;  %v19664_v58 = vld [vmem:[#allocation64_spill] sm:$0xff] }
 0x14b   :  { %v2085_v49 = vmax.f32 %v2027_v43, %v15389_v60  ;;  %v19653_v48 = vmax.f32 %v19651_v41, %v19652_v25  ;;  %v19656_v0 = vmax.f32 %v19654_v47, %v19655_v37  ;;  %v13201_v35 = vld [vmem:[#allocation13 + $0x30] sm:$0xff]   ;;  %v359_v43 = vsel %vm15402_vm8, 0, %v358_v57  ;;  %12405 = vmatprep.mubr.msk.bf16.mxu1 %vm474_vm1, %v15184_v11 }
 0x14c   :  { %v2084_v8 = vmax.f32 %v2026_v46, %v2028_v20  ;;  %v1979_v27 = vsel %vm1123_vm2, %v1769_v51, %v19648_v56  ;;  %v461_v62 = vsub.s32 1, %v15399_v32  ;;  %360 = vst [vmem:[#allocation2 + $0xc8] sm:$0x6] %v359_v43  ;;  %7171 = vmatpush1.bf16.msra.mxu1 %v13201_v35  ;;  %v19666_v35 = vld [vmem:[#allocation73_spill] sm:$0xff] }
 0x14d   :  { %v2030_v18 = vmax.f32 %v1978_v6, %v1979_v27  ;;  %v1770_v59 = vrot.slane %v19653_v48, 7  ;;  %v1773_v6 = vrot.slane %v19656_v0, 7  ;;  %7172 = vmatprep.subr.bf16.mxu1 %v19440_v15 }
 0x14e   :  { %v15395_v46 = vpack.c.bf16 %v2084_v8, %v2083_v63  ;;  %v212_v63 = vsel %vm15351_vm5, 0, %v211_v39  ;;  %v263_v8 = vsel %vm15351_vm5, 0, %v262_v4  ;;  %v310_v39 = vld [vmem:[#allocation2 + $0x8] sm:$0x6] }
 0x14f   :  { %v2086_v51 = vmax.f32 %v2028_v20, %v2030_v18  ;;  %v19657_v20 = vld [vmem:[#allocation63_spill] sm:$0xff]  ;;  %v1948_v57 = vsel %vm1700_vm3, %v19651_v41, %v1770_v59  ;;  %213 = vst [vmem:[#allocation2] sm:$0x3] %v212_v63  ;;  %264 = vst [vmem:[#allocation2 + $0xcc] sm:$0x3] %v263_v8  ;;  %v1775_v43 = vsel %vm1700_vm3, %v1773_v6, %v19662_v14  ;;  %v19665_v8 = vrot.slane %v19664_v58, 7 }
 0x150   :  { %v19658_v56 = vrot.slane %v19657_v20, 7  ;;  %v19659_v4 = vld [vmem:[#allocation55_spill] sm:$0xff]  ;;  %v2031_v0 = vmax.f32 %v1947_v55, %v1948_v57  ;;  %v361_v20 = vld [vmem:[#allocation2 + $0xd4] sm:$0x6] }
 0x151   :  { %v15429_v25 = vpack.c.bf16 %v2086_v51, %v2085_v49  ;;  %v19660_v48 = vrot.slane %v19659_v4, 7  ;;  %v1949_v51 = vsel %vm1700_vm3, %v19654_v47, %v1773_v6  ;;  %v214_v63 = vld [vmem:[#allocation2 + $0xc] sm:$0x3]  ;;  %v313_v55 = vld [vmem:[#allocation2 + $0x14] sm:$0x6]  ;;  %v13202_v14 = vld [vmem:[#allocation13 + $0x38] sm:$0xff]  }
 0x152   :  { %v1772_v22 = vsel %vm1700_vm3, %v1770_v59, %v19658_v56  ;;  %v15442_v59 = vrot.slane %v15412_v26, %v461_v62  ;;  %v2087_v50 = vmax.f32 %v15389_v60, %v2031_v0  ;;  %v1981_v56 = vsel %vm1123_vm2, %v1775_v43, %v19665_v8  ;;  %v19667_v62 = vld [vmem:[#allocation79_spill] sm:$0xff]  ;;  %v19669_v43 = vld [vmem:[#allocation80_spill] sm:$0xff]  ;;  %7173 = vmatpush1.bf16.msra.mxu1 %v13202_v14 }
 0x153   :  { %v1980_v37 = vsel %vm1123_vm2, %v1772_v22, %v19660_v48  ;;  %v2033_v22 = vmax.f32 %v1948_v57, %v1949_v51  ;;  %v362_v11 = vsel %vm15402_vm8, 0, %v361_v20  ;;  %v19668_v4 = vmax.f32 %v19666_v35, %v19667_v62  ;;  %v19670_v58 = vld [vmem:[#allocation83_spill] sm:$0xff]  ;;  %v19672_v20 = vld [vmem:[#allocation81_spill] sm:$0xff]  ;;  %7174 = vmatprep.subr.bf16.mxu1 %v19440_v15  ;;  %12406 = vmatmul.mubr.msk.bf16.gmra.mrb[80].mxu1 %vm474_vm1, %v15194_v52 }
 0x154   :  { %19663 = vst [vmem:[#allocation48_spill] sm:$0xff] %v15442_v59  ;;  %v2032_v49 = vmax.f32 %v1979_v27, %v1980_v37  ;;  %v311_v27 = vsel %vm15402_vm8, 0, %v310_v39  ;;  %v2034_v6 = vmax.f32 %v1980_v37, %v1981_v56  ;;  %363 = vst [vmem:[#allocation2 + $0xd4] sm:$0x6] %v362_v11  ;;  %v215_v57 = vsel %vm15351_vm5, 0, %v214_v63  ;;  %12409 = vmatprep.mubr.msk.bf16.mxu1 %vm474_vm1, %v15216_v28 }
 0x155   :  { %312 = vst [vmem:[#allocation2 + $0x8] sm:$0x6] %v311_v27  ;;  %v1776_v60 = vrot.slane %v19668_v4, 7  ;;  %v2089_v48 = vmax.f32 %v2031_v0, %v2033_v22  ;;  %v19671_v39 = vmax.f32 %v19669_v43, %v19670_v58  ;;  %v19673_v41 = vrot.slane %v19672_v20, 7  ;;  %216 = vst [vmem:[#allocation2 + $0xc] sm:$0x3] %v215_v57 }
 0x156   :  { %v2088_v47 = vmax.f32 %v2030_v18, %v2032_v49  ;;  %v314_v18 = vsel %vm15402_vm8, 0, %v313_v55  ;;  %v2090_v27 = vmax.f32 %v2032_v49, %v2034_v6  ;;  %v265_v63 = vld [vmem:[#allocation2 + $0xd8] sm:$0x3]  ;;  %v364_v11 = vld [vmem:[#allocation2 + $0xe0] sm:$0x6]  ;;  %v13203_v4 = vld [vmem:[#allocation13 + $0x40] sm:$0xff]  }
 0x157   :  { %v1779_v8 = vrot.slane %v19671_v39, 7  ;;  %v1778_v62 = vsel %vm1700_vm3, %v1776_v60, %v19673_v41  ;;  %v1950_v0 = vsel %vm1700_vm3, %v19666_v35, %v1776_v60  ;;  %315 = vst [vmem:[#allocation2 + $0x14] sm:$0x6] %v314_v18  ;;  %v19674_v58 = vld [vmem:[#allocation71_spill] sm:$0xff]  ;;  %v19678_v57 = vld [vmem:[#allocation78_spill] sm:$0xff]  ;;  %7175 = vmatpush1.bf16.msra.mxu1 %v13203_v4 }
 0x158   :  { %v15467_v37 = vpack.c.bf16 %v2088_v47, %v2087_v50  ;;  %v19675_v39 = vrot.slane %v19674_v58, 7  ;;  %v2035_v50 = vmax.f32 %v1949_v51, %v1950_v0  ;;  %v19676_v47 = vld [vmem:[#allocation87_spill] sm:$0xff]  ;;  %v15483_v35 = vpack.c.bf16 %v2090_v27, %v2089_v48  ;;  %v268_v51 = vld [vmem:[#allocation2 + $0xe4] sm:$0x3]  ;;  %7176 = vmatprep.subr.bf16.mxu1 %v19440_v15 }
 0x159   :  { %v19677_v49 = vrot.slane %v19676_v47, 7  ;;  %v1951_v41 = vsel %vm1700_vm3, %v19669_v43, %v1779_v8  ;;  %v19679_v14 = vrot.slane %v19678_v57, 7  ;;  %v365_v43 = vsel %vm15402_vm8, 0, %v364_v11  ;;  %v19681_v27 = vld [vmem:[#allocation94_spill] sm:$0xff] }
 0x15a   :  { %v1982_v55 = vsel %vm1123_vm2, %v1778_v62, %v19675_v39  ;;  %v15488_v58 = vmax.f32 %v1950_v0, %v1951_v41  ;;  %v217_v62 = vld [vmem:[#allocation2 + $0x18] sm:$0x3]  ;;  %v316_v39 = vld [vmem:[#allocation2 + $0x20] sm:$0x6]  ;;  %v2091_v47 = vmax.f32 %v2033_v22, %v2035_v50  ;;  %366 = vst [vmem:[#allocation2 + $0xe0] sm:$0x6] %v365_v43 }
 0x15b   :  { %v1781_v20 = vsel %vm1700_vm3, %v1779_v8, %v19677_v49  ;;  %v2036_v60 = vmax.f32 %v1981_v56, %v1982_v55  ;;  %v266_v49 = vsel %vm15351_vm5, 0, %v265_v63  ;;  %v19680_v8 = vld [vmem:[#allocation89_spill] sm:$0xff]  ;;  %v19683_v22 = vld [vmem:[#allocation96_spill] sm:$0xff]  ;;  %v218_v52 = vsel %vm15351_vm5, 0, %v217_v62  ;;  %12410 = vmatmul.mubr.msk.bf16.gmra.mrb[84].mxu1 %vm474_vm1, %v15233_v23 }
 0x15c   :  { %v1983_v18 = vsel %vm1123_vm2, %v1781_v20, %v19679_v14  ;;  %v2093_v48 = vmax.f32 %v2035_v50, %v15488_v58  ;;  %267 = vst [vmem:[#allocation2 + $0xd8] sm:$0x3] %v266_v49  ;;  %v19682_v0 = vmax.f32 %v19680_v8, %v19681_v27  ;;  %v13204_v63 = vld [vmem:[#allocation13 + $0x48] sm:$0xff]   ;;  %v317_v50 = vsel %vm15402_vm8, 0, %v316_v39  ;;  %v367_v49 = vld [vmem:[#allocation2 + $0xec] sm:$0x6]  ;;  %12413 = vmatprep.mubr.msk.bf16.mxu1 %vm474_vm1, %v15271_v16 }
 0x15d   :  { %v2038_v12 = vmax.f32 %v1982_v55, %v1983_v18  ;;  %v2092_v56 = vmax.f32 %v2034_v6, %v2036_v60  ;;  %v19684_v55 = vld [vmem:[#allocation102_spill] sm:$0xff]  ;;  %v269_v6 = vsel %vm15351_vm5, 0, %v268_v51  ;;  %v19686_v27 = vld [vmem:[#allocation95_spill] sm:$0xff]  ;;  %219 = vst [vmem:[#allocation2 + $0x18] sm:$0x3] %v218_v52  ;;  %7177 = vmatpush1.bf16.msra.mxu1 %v13204_v63 }
 0x15e   :  { %v1782_v20 = vrot.slane %v19682_v0, 7  ;;  %v19685_v57 = vmax.f32 %v19683_v22, %v19684_v55  ;;  %v19687_v0 = vrot.slane %v19686_v27, 7  ;;  %270 = vst [vmem:[#allocation2 + $0xe4] sm:$0x3] %v269_v6  ;;  %318 = vst [vmem:[#allocation2 + $0x20] sm:$0x6] %v317_v50  ;;  %7178 = vmatprep.subr.bf16.mxu1 %v19440_v15 }
 0x15f   :  { %v2094_v11 = vmax.f32 %v2036_v60, %v2038_v12  ;;  %v15512_v43 = vpack.c.bf16 %v2092_v56, %v2091_v47  ;;  %v19688_v60 = vld [vmem:[#allocation104_spill] sm:$0xff]  ;;  %v220_v51 = vld [vmem:[#allocation2 + $0x24] sm:$0x3]  ;;  %v368_v6 = vsel %vm15402_vm8, 0, %v367_v49  ;;  %v19697_v49 = vld [vmem:[#allocation109_spill] sm:$0xff] }
 0x160   :  { %v1785_v14 = vrot.slane %v19685_v57, 7  ;;  %v1784_v28 = vsel %vm1700_vm3, %v1782_v20, %v19687_v0  ;;  %v1952_v4 = vsel %vm1700_vm3, %v19680_v8, %v1782_v20  ;;  %v19689_v62 = vrot.slane %v19688_v60, 7  ;;  %v19690_v57 = vld [vmem:[#allocation88_spill] sm:$0xff]  ;;  %v19692_v20 = vld [vmem:[#allocation97_spill] sm:$0xff]  ;;  %369 = vst [vmem:[#allocation2 + $0xec] sm:$0x6] %v368_v6 }
 0x161   :  { %v15522_v39 = vpack.c.bf16 %v2094_v11, %v2093_v48  ;;  %v19691_v47 = vrot.slane %v19690_v57, 7  ;;  %v2039_v27 = vmax.f32 %v1951_v41, %v1952_v4  ;;  %v19693_v60 = vrot.slane %v19692_v20, 7  ;;  %v271_v48 = vld [vmem:[#allocation2 + $0xf0] sm:$0x3]  ;;  %v13205_v11 = vld [vmem:[#allocation13 + $0x50] sm:$0xff]   ;;  %v19694_v41 = vld [vmem:[#allocation103_spill] sm:$0xff] }
 0x162   :  { %v1787_v55 = vsel %vm1700_vm3, %v1785_v14, %v19689_v62  ;;  %v1953_v0 = vsel %vm1700_vm3, %v19683_v22, %v1785_v14  ;;  %v19695_v57 = vld [vmem:[#allocation105_spill] sm:$0xff]  ;;  %7179 = vmatpush1.bf16.msra.mxu1 %v13205_v11 }
 0x163   :  { %v1984_v56 = vsel %vm1123_vm2, %v1784_v28, %v19691_v47  ;;  %v1985_v62 = vsel %vm1123_vm2, %v1787_v55, %v19693_v60  ;;  %v2041_v52 = vmax.f32 %v1952_v4, %v1953_v0  ;;  %v2095_v50 = vmax.f32 %v15488_v58, %v2039_v27  ;;  %v19698_v47 = vld [vmem:[#allocation111_spill] sm:$0xff]  ;;  %7180 = vmatprep.subr.bf16.mxu1 %v19440_v15 }
 0x164   :  { %v2040_v8 = vmax.f32 %v1983_v18, %v1984_v56  ;;  %v2042_v28 = vmax.f32 %v1984_v56, %v1985_v62  ;;  %v19696_v22 = vmax.f32 %v19694_v41, %v19695_v57  ;;  %v221_v18 = vsel %vm15351_vm5, 0, %v220_v51  ;;  %v19700_v57 = vld [vmem:[#allocation101_spill] sm:$0xff] }
 0x165   :  { %v2097_v55 = vmax.f32 %v2039_v27, %v2041_v52  ;;  %222 = vst [vmem:[#allocation2 + $0x24] sm:$0x3] %v221_v18  ;;  %v19699_v63 = vmax.f32 %v19697_v49, %v19698_v47  ;;  %v320_v58 = vsel %vm15402_vm8, 0, %v319_v2  ;;  %v370_v27 = vld [vmem:[#allocation2 + $0xf8] sm:$0x6]  ;;  %v19701_v2 = vrot.slane %v19700_v57, 7 }
 0x166   :  { %v1788_v14 = vrot.slane %v19696_v22, 7  ;;  %v2096_v4 = vmax.f32 %v2038_v12, %v2040_v8  ;;  %v2098_v56 = vmax.f32 %v2040_v8, %v2042_v28  ;;  %321 = vst [vmem:[#allocation2 + $0x2c] sm:$0x6] %v320_v58  ;;  %v272_v12 = vsel %vm15351_vm5, 0, %v271_v48  ;;  %v13206_v48 = vld [vmem:[#allocation13 + $0x58] sm:$0xff]  }
 0x167   :  { %v1791_v20 = vrot.slane %v19699_v63, 7  ;;  %273 = vst [vmem:[#allocation2 + $0xf0] sm:$0x3] %v272_v12  ;;  %v371_v16 = vsel %vm15402_vm8, 0, %v370_v27  ;;  %7181 = vmatpush1.bf16.msra.mxu1 %v13206_v48  ;;  %v277_v58 = vld [vmem:[#allocation2 + $0x108] sm:$0x3] }
 0x168   :  { %v1790_v60 = vsel %vm1700_vm3, %v1788_v14, %v1789_v34  ;;  %v1954_v51 = vsel %vm1700_vm3, %v19694_v41, %v1788_v14  ;;  %v15555_v6 = vpack.c.bf16 %v2096_v4, %v2095_v50  ;;  %v1795_v41 = vrot.slane %v15266_v30, 7  ;;  %v223_v14 = vld [vmem:[#allocation2 + $0x30] sm:$0x3]  ;;  %372 = vst [vmem:[#allocation2 + $0xf8] sm:$0x6] %v371_v16  ;;  %7182 = vmatprep.subr.bf16.mxu1 %v19440_v15  ;;  %v13211_v48 = vld [vmem:[#allocation13 + $0x68] sm:$0xff]  }
 0x169   :  { %v1986_v8 = vsel %vm1123_vm2, %v1790_v60, %v19701_v2  ;;  %v2043_v1 = vmax.f32 %v1953_v0, %v1954_v51  ;;  %v1793_v34 = vsel %vm1700_vm3, %v1791_v20, %v1792_v44  ;;  %v15566_v23 = vpack.c.bf16 %v2098_v56, %v2097_v55  ;;  %v274_v0 = vld [vmem:[#allocation2 + $0xfc] sm:$0x3]  ;;  %v322_v4 = vld [vmem:[#allocation2 + $0x38] sm:$0x6]  ;;  %v376_v56 = vld [vmem:[#allocation2 + $0x110] sm:$0x6] }
 0x16a   :  { %v2044_v50 = vmax.f32 %v1985_v62, %v1986_v8  ;;  %v1955_v22 = vsel %vm1700_vm3, %v19697_v49, %v1791_v20  ;;  %v1987_v44 = vsel %vm1123_vm2, %v1793_v34, %v1891_v3  ;;  %v2118_v62 = vpack.c.bf16 %v2074_v7, %v2073_v53  ;;  %v373_v3 = vld [vmem:[#allocation2 + $0x104] sm:$0x6]  ;;  %v226_v7 = vld [vmem:[#allocation2 + $0x3c] sm:$0x3]  ;;  %v280_v16 = vld [vmem:[#allocation2 + $0x114] sm:$0x3] }
 0x16b   :  { %v2099_v10 = vmax.f32 %v2041_v52, %v2043_v1  ;;  %v2045_v30 = vmax.f32 %v1954_v51, %v1955_v22  ;;  %v2046_v18 = vmax.f32 %v1986_v8, %v1987_v44  ;;  %v19702_v52 = vmax.f32 %v14966_v40, %v15009_v31  ;;  %v13208_v31 = vld [vmem:[#allocation13 + $0x60] sm:$0xff]  }
 0x16c   :  { %v2100_v11 = vmax.f32 %v2042_v28, %v2044_v50  ;;  %v19703_v55 = vmax.f32 %v15253_v54, %v15384_v17  ;;  %v19704_v49 = vmax.f32 %v15256_v13, %v15393_v9  ;;  %v224_v33 = vsel %vm15351_vm5, 0, %v223_v14  ;;  %v325_v28 = vld [vmem:[#allocation2 + $0x44] sm:$0x6]  ;;  %12414 = vmatmul.mubr.msk.bf16.gmra.mrb[88].mxu1 %vm474_vm1, %v2118_v62  ;;  %v229_v14 = vld [vmem:[#allocation2 + $0x48] sm:$0x3] }
 0x16d   :  { %v1794_v21 = vrot.slane %v19702_v52, 7  ;;  %v2101_v47 = vmax.f32 %v2043_v1, %v2045_v30  ;;  %v275_v53 = vsel %vm15351_vm5, 0, %v274_v0  ;;  %v2102_v20 = vmax.f32 %v2044_v50, %v2046_v18  ;;  %225 = vst [vmem:[#allocation2 + $0x30] sm:$0x3] %v224_v33  ;;  %7183 = vmatpush1.bf16.msra.mxu1 %v13208_v31  ;;  %v379_v52 = vld [vmem:[#allocation2 + $0x11c] sm:$0x6] }
 0x16e   :  { %v2119_v38 = vpack.c.bf16 %v19704_v49, %v19703_v55  ;;  %v15595_v63 = vpack.c.bf16 %v2100_v11, %v2099_v10  ;;  %276 = vst [vmem:[#allocation2 + $0xfc] sm:$0x3] %v275_v53  ;;  %v19705_v60 = vrot.slane %v14963_v36, 7  ;;  %v323_v27 = vsel %vm15402_vm8, 0, %v322_v4  ;;  %7184 = vmatprep.subr.bf16.mxu1 %v19440_v15  ;;  %v283_v4 = vld [vmem:[#allocation2 + $0x120] sm:$0x3] }
 0x16f   :  { %v1796_v54 = vsel %vm1700_vm3, %v1794_v21, %v1795_v41  ;;  %v1956_v13 = vsel %vm1700_vm3, %v14966_v40, %v1794_v21  ;;  %v374_v57 = vsel %vm15402_vm8, 0, %v373_v3  ;;  %v15610_v2 = vpack.c.bf16 %v2102_v20, %v2101_v47  ;;  %324 = vst [vmem:[#allocation2 + $0x38] sm:$0x6] %v323_v27  ;;  %v331_v3 = vld [vmem:[#allocation2 + $0x5c] sm:$0x6] }
 0x170   :  { %v1988_v51 = vsel %vm1123_vm2, %v1796_v54, %v19705_v60  ;;  %v15604_v12 = vmax.f32 %v1955_v22, %v1956_v13  ;;  %375 = vst [vmem:[#allocation2 + $0x104] sm:$0x6] %v374_v57  ;;  %v227_v8 = vsel %vm15351_vm5, 0, %v226_v7  ;;  %v326_v36 = vsel %vm15402_vm8, 0, %v325_v28  ;;  %12417 = vmatprep.mubr.msk.bf16.mxu1 %vm474_vm1, %v2119_v38  ;;  %v382_v49 = vld [vmem:[#allocation2 + $0x128] sm:$0x6] }
 0x171   :  { %v15612_v40 = vmax.f32 %v1987_v44, %v1988_v51  ;;  %228 = vst [vmem:[#allocation2 + $0x3c] sm:$0x3] %v227_v8  ;;  %327 = vst [vmem:[#allocation2 + $0x44] sm:$0x6] %v326_v36  ;;  %v278_v34 = vsel %vm15351_vm5, 0, %v277_v58  ;;  %v377_v41 = vsel %vm15402_vm8, 0, %v376_v56  ;;  %v2120_v44 = vpack.c.bf16 %v15393_v9, %v15384_v17  ;;  %7185 = vmatpush1.bf16.msra.mxu1 %v13211_v48 }
 0x172   :  { %v2103_v1 = vmax.f32 %v2045_v30, %v15604_v12  ;;  %279 = vst [vmem:[#allocation2 + $0x108] sm:$0x3] %v278_v34  ;;  %378 = vst [vmem:[#allocation2 + $0x110] sm:$0x6] %v377_v41  ;;  %v230_v10 = vsel %vm15351_vm5, 0, %v229_v14  ;;  %v13214_v30 = vld [vmem:[#allocation13 + $0x70] sm:$0xff]   ;;  %7186 = vmatprep.subr.bf16.mxu1 %v19440_v15  ;;  %v19706_v11 = vpack.c.bf16 %v15310_v5, %v15308_v24 }
 0x173   :  { %v2104_v50 = vmax.f32 %v2046_v18, %v15612_v40  ;;  %v2136_v22 = vpack.c.bf16 %v15612_v40, %v15604_v12  ;;  %231 = vst [vmem:[#allocation2 + $0x48] sm:$0x3] %v230_v10  ;;  %v281_v62 = vsel %vm15351_vm5, 0, %v280_v16  ;;  %v13217_v18 = vld [vmem:[#allocation13 + $0x78] sm:$0xff]   ;;  %v328_v17 = vld [vmem:[#allocation2 + $0x50] sm:$0x6] }
 0x174   :  { %282 = vst [vmem:[#allocation2 + $0x114] sm:$0x3] %v281_v62  ;;  %12418 = vmatmul.mubr.msk.bf16.gmra.mrb[92].mxu1 %vm474_vm1, %v2120_v44  ;;  %v329_v9 = vsel %vm15402_vm8, 0, %v328_v17  ;;  %v380_v21 = vsel %vm15402_vm8, 0, %v379_v52  ;;  %v232_v24 = vld [vmem:[#allocation2 + $0x54] sm:$0x3] }
 0x175   :  { %v15629_v0 = vpack.c.bf16 %v2104_v50, %v2103_v1  ;;  %12421 = vmatprep.mubr.msk.bf16.mxu1 %vm474_vm1, %v19706_v11  ;;  %7187 = vmatpush1.bf16.msra.mxu1 %v13214_v30  ;;  %330 = vst [vmem:[#allocation2 + $0x50] sm:$0x6] %v329_v9  ;;  %381 = vst [vmem:[#allocation2 + $0x11c] sm:$0x6] %v380_v21  ;;  %v233_v5 = vsel %vm15351_vm5, 0, %v232_v24  ;;  %v284_v55 = vsel %vm15351_vm5, 0, %v283_v4 }
 0x176   :  { %7188 = vmatprep.subr.bf16.mxu1 %v19440_v15  ;;  %234 = vst [vmem:[#allocation2 + $0x54] sm:$0x3] %v233_v5  ;;  %285 = vst [vmem:[#allocation2 + $0x120] sm:$0x3] %v284_v55  ;;  %v383_v38 = vsel %vm15402_vm8, 0, %v382_v49  ;;  %vm9280_vm3 = vcmask 523264  }
 0x177   :  { %384 = vst [vmem:[#allocation2 + $0x128] sm:$0x6] %v383_v38  ;;  %v235_v47 = vld [vmem:[#allocation2 + $0x60] sm:$0x3]  ;;  %v334_v1 = vld [vmem:[#allocation2 + $0x68] sm:$0x6] }
 0x178   :  { %v3609_v14 = vld [vmem:[#allocation2 + $0xc0] sm:$0xe] }
 0x179   :  { %7189 = vmatpush1.bf16.msra.mxu1 %v13217_v18  ;;  %v3497_v5 = vld [vmem:[#allocation2] sm:$0xe] }
 0x17a   :  { %7447 = vmatprep.subr.bf16.mxu1 %v19440_v15 }
 0x17c   :  { %12422 = vmatmul.mubr.msk.bf16.gmra.mrb[96].mxu1 %vm474_vm1, %v15359_v19  ;;  %v332_v19 = vsel %vm15402_vm8, 0, %v331_v3 }
 0x17d   :  { %12425 = vmatprep.mubr.msk.bf16.mxu1 %vm474_vm1, %v15368_v42  ;;  %333 = vst [vmem:[#allocation2 + $0x5c] sm:$0x6] %v332_v19  ;;  %v457_v42 = vsub.s32 0, %v15399_v32 }
 0x17e   :  { %v772_v33 = vpop.f32.mrb[0].mxu1  ;;  %v612_v32 = vpop.f32.mrb[0].mxu0 }
 0x17f   :  { %v15676_v7 = vpop.f32.mrb[1].mxu1 }
 0x180   :  { %19707 = vst [vmem:[#allocation42_spill] sm:$0xff] %v15676_v7  ;;  %v776_v31 = vpop.f32.mrb[2].mxu1 }
 0x181   :  { %v15684_v58 = vpop.f32.mrb[3].mxu1 }
 0x182   :  { %19709 = vst [vmem:[#allocation46_spill] sm:$0xff] %v15684_v58 }
 0x184   :  { %12426 = vmatmul.mubr.msk.bf16.gmra.mrb[100].mxu1 %vm474_vm1, %v15379_v45  ;;  %v15669_v45 = vrot.slane %v15412_v26, %v457_v42  ;;  %v286_v26 = vld [vmem:[#allocation2 + $0x12c] sm:$0x3] }
 0x185   :  { %12429 = vmatprep.mubr.msk.bf16.mxu1 %vm474_vm1, %v15395_v46  ;;  %v236_v46 = vsel %vm15351_vm5, 0, %v235_v47 }
 0x186   :  { %237 = vst [vmem:[#allocation2 + $0x60] sm:$0x3] %v236_v46  ;;  %v773_v53 = vadd.f32 %v772_v33, %v15669_v45  ;;  %v613_v28 = vadd.f32 %v612_v32, %v15669_v45  ;;  %v777_v13 = vadd.f32 %v776_v31, %v15669_v45  ;;  %v782_v44 = vpop.f32.mrb[4].mxu1 }
 0x187   :  { %v15695_v9 = vpop.f32.mrb[5].mxu1  ;;  %v783_v4 = vadd.f32 %v782_v44, %v15669_v45 }
 0x188   :  { %v995_v54 = vmax.f32 %v773_v53, 0.0  ;;  %v931_v56 = vmax.f32 %v613_v28, 0.0  ;;  %v997_v57 = vmax.f32 %v777_v13, 0.0  ;;  %19711 = vst [vmem:[#allocation54_spill] sm:$0xff] %v15695_v9  ;;  %v786_v3 = vpop.f32.mrb[6].mxu1 }
 0x189   :  { %v15706_v47 = vpop.f32.mrb[7].mxu1  ;;  %v999_v53 = vmax.f32 %v783_v4, 0.0 }
 0x18a   :  { %v12282_v27 = vpack.c.bf16 %v995_v54, %v995_v54  ;;  %v12250_v8 = vpack.c.bf16 %v931_v56, %v931_v56  ;;  %v12283_v48 = vpack.c.bf16 %v997_v57, %v997_v57  ;;  %19715 = vst [vmem:[#allocation68_spill] sm:$0xff] %v15706_v47  ;;  %v3613_v54 = vld [vmem:[#allocation2 + $0xc8] sm:$0x3] }
 0x18c   :  { %12430 = vmatmul.mubr.msk.bf16.gmra.mrb[104].mxu1 %vm474_vm1, %v15429_v25  ;;  %v15679_v25 = vpop.f32.mrb[1].mxu0  ;;  %v3096_v34 = vshrl.u32 %v12282_v27, 16  ;;  %v3099_v41 = vshll.u32 %v12282_v27, 16  ;;  %v2792_v50 = vshrl.u32 %v12250_v8, 16  ;;  %v2795_v10 = vshll.u32 %v12250_v8, 16 }
 0x18d   :  { %12433 = vmatprep.mubr.msk.bf16.mxu1 %vm474_vm1, %v15467_v37  ;;  %19708 = vst [vmem:[#allocation53_spill] sm:$0xff] %v15679_v25  ;;  %v616_v20 = vpop.f32.mrb[2].mxu0  ;;  %v287_v37 = vsel %vm15351_vm5, 0, %v286_v26  ;;  %v3105_v18 = vshrl.u32 %v12283_v48, 16  ;;  %v3108_v17 = vshll.u32 %v12283_v48, 16 }
 0x18e   :  { %v617_v60 = vadd.f32 %v616_v20, %v15669_v45  ;;  %v15687_v51 = vpop.f32.mrb[3].mxu0  ;;  %288 = vst [vmem:[#allocation2 + $0x12c] sm:$0x3] %v287_v37  ;;  %v3098_v62 = vrot.slane %v3096_v34, 6  ;;  %v3101_v11 = vrot.slane %v3099_v41, 7  ;;  %v2794_v21 = vrot.slane %v2792_v50, 6 }
 0x18f   :  { %19710 = vst [vmem:[#allocation61_spill] sm:$0xff] %v15687_v51  ;;  %v622_v16 = vpop.f32.mrb[4].mxu0  ;;  %v2797_v24 = vrot.slane %v2795_v10, 7  ;;  %v3107_v42 = vrot.slane %v3105_v18, 6  ;;  %v3110_v49 = vrot.slane %v3108_v17, 7  ;;  %v792_v48 = vpop.f32.mrb[8].mxu1 }
 0x190   :  { %v933_v36 = vmax.f32 %v617_v60, 0.0  ;;  %v3102_v19 = vor.u32 %v3101_v11, %v3098_v62  ;;  %v12284_v60 = vpack.c.bf16 %v999_v53, %v999_v53  ;;  %v623_v41 = vadd.f32 %v622_v16, %v15669_v45  ;;  %v15732_v44 = vpop.f32.mrb[9].mxu1 }
 0x191   :  { %v2798_v32 = vor.u32 %v2797_v24, %v2794_v21  ;;  %v3111_v20 = vor.u32 %v3110_v49, %v3107_v42  ;;  %19719 = vst [vmem:[#allocation70_spill] sm:$0xff] %v15732_v44  ;;  %v796_v16 = vpop.f32.mrb[10].mxu1  ;;  %v3616_v21 = vld [vmem:[#allocation2 + $0xcc] sm:$0xe] }
 0x192   :  { %v12251_v30 = vpack.c.bf16 %v933_v36, %v933_v36  ;;  %v3103_v26 = vrot.slane %v3102_v19, 4  ;;  %v3610_v31 = vsel %vm15701_vm11, %v3102_v19, %v3609_v14  ;;  %v787_v36 = vadd.f32 %v786_v3, %v15669_v45  ;;  %v15741_v3 = vpop.f32.mrb[11].mxu1 }
 0x193   :  { %3611 = vst [vmem:[#allocation2 + $0xc0] sm:$0xe] %v3610_v31  ;;  %v2799_v13 = vrot.slane %v2798_v32, 4  ;;  %v3498_v56 = vsel %vm15701_vm11, %v2798_v32, %v3497_v5  ;;  %v3113_v8 = vrot.slane %v3111_v20, 4  ;;  %v935_v5 = vmax.f32 %v623_v41, 0.0  ;;  %19721 = vst [vmem:[#allocation77_spill] sm:$0xff] %v15741_v3 }
 0x194   :  { %12434 = vmatmul.mubr.msk.bf16.gmra.mrb[108].mxu1 %vm474_vm1, %v15483_v35  ;;  %v335_v35 = vsel %vm15402_vm8, 0, %v334_v1  ;;  %v2801_v38 = vshrl.u32 %v12251_v30, 16  ;;  %v2804_v28 = vshll.u32 %v12251_v30, 16  ;;  %v3112_v57 = vsel %vm15712_vm12, %v3103_v26, %v3111_v20  ;;  %3499 = vst [vmem:[#allocation2] sm:$0xe] %v3498_v56 }
 0x195   :  { %12437 = vmatprep.mubr.msk.bf16.mxu1 %vm474_vm1, %v15512_v43  ;;  %v15697_v43 = vpop.f32.mrb[5].mxu0  ;;  %336 = vst [vmem:[#allocation2 + $0x68] sm:$0x6] %v335_v35  ;;  %3612 = vst [vmem:[#allocation2 + $0xc4] sm:$0xf] %v3112_v57  ;;  %v3118_v1 = vshll.u32 %v12284_v60, 16  ;;  %v3614_v14 = vsel %vm15351_vm5, %v3113_v8, %v3613_v54  ;;  %v797_v8 = vadd.f32 %v796_v16, %v15669_v45 }
 0x196   :  { %19712 = vst [vmem:[#allocation62_spill] sm:$0xff] %v15697_v43  ;;  %v626_v55 = vpop.f32.mrb[6].mxu0  ;;  %v2803_v37 = vrot.slane %v2801_v38, 6  ;;  %v2806_v27 = vrot.slane %v2804_v28, 7  ;;  %v1001_v10 = vmax.f32 %v787_v36, 0.0  ;;  %v793_v38 = vadd.f32 %v792_v48, %v15669_v45  ;;  %v802_v36 = vpop.f32.mrb[12].mxu1 }
 0x197   :  { %v15708_v46 = vpop.f32.mrb[7].mxu0  ;;  %3615 = vst [vmem:[#allocation2 + $0xc8] sm:$0x3] %v3614_v14  ;;  %v3120_v62 = vrot.slane %v3118_v1, 7  ;;  %v627_v4 = vadd.f32 %v626_v55, %v15669_v45  ;;  %v12252_v28 = vpack.c.bf16 %v935_v5, %v935_v5  ;;  %v3504_v41 = vld [vmem:[#allocation2 + $0xc] sm:$0xe] }
 0x198   :  { %19716 = vst [vmem:[#allocation67_spill] sm:$0xff] %v15708_v46  ;;  %v2807_v34 = vor.u32 %v2806_v27, %v2803_v37  ;;  %v15728_v50 = vpop.f32.mrb[8].mxu0  ;;  %v12285_v24 = vpack.c.bf16 %v1001_v10, %v1001_v10  ;;  %v1003_v20 = vmax.f32 %v793_v38, 0.0  ;;  %v15757_v48 = vpop.f32.mrb[13].mxu1  ;;  %v3672_v44 = vld [vmem:[#allocation2 + $0x12c] sm:$0xe] }
 0x199   :  { %v15734_v30 = vpop.f32.mrb[9].mxu0  ;;  %v937_v26 = vmax.f32 %v627_v4, 0.0  ;;  %v2814_v56 = vshll.u32 %v12252_v28, 16  ;;  %19723 = vst [vmem:[#allocation60_spill] sm:$0xff] %v15757_v48 }
 0x19a   :  { %19720 = vst [vmem:[#allocation72_spill] sm:$0xff] %v15734_v30  ;;  %v2808_v11 = vsel %vm15712_vm12, %v2799_v13, %v2807_v34  ;;  %v2809_v18 = vrot.slane %v2807_v34, 4  ;;  %v15738_v17 = vpop.f32.mrb[10].mxu0  ;;  %v3124_v32 = vshrl.u32 %v12285_v24, 16  ;;  %v3127_v53 = vshll.u32 %v12285_v24, 16 }
 0x19b   :  { %3500 = vst [vmem:[#allocation2 + $0x4] sm:$0xf] %v2808_v11  ;;  %v15743_v19 = vpop.f32.mrb[11].mxu0  ;;  %v2811_v13 = vshrl.u32 %v12252_v28, 16  ;;  %v12253_v27 = vpack.c.bf16 %v937_v26, %v937_v26  ;;  %v12286_v57 = vpack.c.bf16 %v1003_v20, %v1003_v20  ;;  %v2816_v34 = vrot.slane %v2814_v56, 7 }
 0x19c   :  { %12438 = vmatmul.mubr.msk.bf16.gmra.mrb[112].mxu1 %vm474_vm1, %v15522_v39  ;;  %v3115_v39 = vshrl.u32 %v12284_v60, 16  ;;  %19722 = vst [vmem:[#allocation82_spill] sm:$0xff] %v15743_v19  ;;  %v3126_v37 = vrot.slane %v3124_v32, 6  ;;  %v3129_v54 = vrot.slane %v3127_v53, 7  ;;  %v3620_v60 = vld [vmem:[#allocation2 + $0xd4] sm:$0x3] }
 0x19d   :  { %12441 = vmatprep.mubr.msk.bf16.mxu1 %vm474_vm1, %v15555_v6  ;;  %v3501_v6 = vld [vmem:[#allocation2 + $0x8] sm:$0x3]  ;;  %v2813_v1 = vrot.slane %v2811_v13, 6  ;;  %v2820_v14 = vshrl.u32 %v12253_v27, 16  ;;  %v3134_v10 = vshrl.u32 %v12286_v57, 16  ;;  %v1005_v24 = vmax.f32 %v797_v8, 0.0 }
 0x19e   :  { %v3117_v35 = vrot.slane %v3115_v39, 6  ;;  %v3502_v49 = vsel %vm15351_vm5, %v2809_v18, %v3501_v6  ;;  %v3130_v39 = vor.u32 %v3129_v54, %v3126_v37  ;;  %v2823_v6 = vshll.u32 %v12253_v27, 16  ;;  %v3508_v54 = vld [vmem:[#allocation2 + $0x14] sm:$0x3] }
 0x19f   :  { %3503 = vst [vmem:[#allocation2 + $0x8] sm:$0x3] %v3502_v49  ;;  %v3136_v38 = vrot.slane %v3134_v10, 6  ;;  %v803_v27 = vadd.f32 %v802_v36, %v15669_v45 }
 0x1a0   :  { %v3121_v42 = vor.u32 %v3120_v62, %v3117_v35  ;;  %v3137_v35 = vshll.u32 %v12286_v57, 16  ;;  %v806_v62 = vpop.f32.mrb[14].mxu1  ;;  %v3132_v16 = vrot.slane %v3130_v39, 4  ;;  %v2825_v49 = vrot.slane %v2823_v6, 7 }
 0x1a1   :  { %v15765_v5 = vpop.f32.mrb[15].mxu1 }
 0x1a2   :  { %v3122_v31 = vrot.slane %v3121_v42, 4  ;;  %v3617_v55 = vsel %vm15701_vm11, %v3121_v42, %v3616_v21  ;;  %v2817_v21 = vor.u32 %v2816_v34, %v2813_v1  ;;  %19725 = vst [vmem:[#allocation86_spill] sm:$0xff] %v15765_v5  ;;  %v2822_v42 = vrot.slane %v2820_v14, 6  ;;  %v15784_v1 = vpop.f32.mrb[16].mxu1 }
 0x1a3   :  { %3618 = vst [vmem:[#allocation2 + $0xcc] sm:$0xe] %v3617_v55  ;;  %v3139_v32 = vrot.slane %v3137_v35, 7  ;;  %v3621_v53 = vsel %vm15351_vm5, %v3132_v16, %v3620_v60  ;;  %v12287_v55 = vpack.c.bf16 %v1005_v24, %v1005_v24  ;;  %v633_v60 = vadd.f32 %v15728_v50, %v15669_v45  ;;  %v15788_v6 = vpop.f32.mrb[17].mxu1 }
 0x1a4   :  { %12442 = vmatmul.mubr.msk.bf16.gmra.mrb[116].mxu1 %vm474_vm1, %v15566_v23  ;;  %v15755_v23 = vpop.f32.mrb[12].mxu0  ;;  %v3131_v18 = vsel %vm15712_vm12, %v3122_v31, %v3130_v39  ;;  %v2818_v28 = vrot.slane %v2817_v21, 4  ;;  %v3505_v26 = vsel %vm15701_vm11, %v2817_v21, %v3504_v41  ;;  %v3623_v31 = vld [vmem:[#allocation2 + $0xd8] sm:$0xe]  ;;  %3622 = vst [vmem:[#allocation2 + $0xd4] sm:$0x3] %v3621_v53  ;;  %v2826_v20 = vor.u32 %v2825_v49, %v2822_v42 }
 0x1a5   :  { %12445 = vmatprep.mubr.msk.bf16.mxu1 %vm474_vm1, %v15595_v63  ;;  %v15759_v63 = vpop.f32.mrb[13].mxu0  ;;  %3619 = vst [vmem:[#allocation2 + $0xd0] sm:$0xf] %v3131_v18  ;;  %3506 = vst [vmem:[#allocation2 + $0xc] sm:$0xe] %v3505_v26  ;;  %v3140_v37 = vor.u32 %v3139_v32, %v3136_v38  ;;  %v3143_v13 = vshrl.u32 %v12287_v55, 16  ;;  %v637_v35 = vadd.f32 %v15738_v17, %v15669_v45 }
 0x1a6   :  { %19724 = vst [vmem:[#allocation75_spill] sm:$0xff] %v15759_v63  ;;  %v15761_v11 = vpop.f32.mrb[14].mxu0  ;;  %v3146_v56 = vshll.u32 %v12287_v55, 16  ;;  %v2827_v57 = vsel %vm15712_vm12, %v2818_v28, %v2826_v20  ;;  %v2828_v8 = vrot.slane %v2826_v20, 4  ;;  %v939_v14 = vmax.f32 %v633_v60, 0.0  ;;  %19727 = vst [vmem:[#allocation76_spill] sm:$0xff] %v15788_v6 }
 0x1a7   :  { %v15767_v4 = vpop.f32.mrb[15].mxu0  ;;  %v3624_v39 = vsel %vm15701_vm11, %v3140_v37, %v3623_v31  ;;  %3507 = vst [vmem:[#allocation2 + $0x10] sm:$0xf] %v2827_v57  ;;  %v1007_v50 = vmax.f32 %v803_v27, 0.0  ;;  %v15796_v18 = vpop.f32.mrb[18].mxu1  ;;  %v807_v49 = vadd.f32 %v806_v62, %v15669_v45  ;;  %v941_v28 = vmax.f32 %v637_v35, 0.0 }
 0x1a8   :  { %19726 = vst [vmem:[#allocation66_spill] sm:$0xff] %v15767_v4  ;;  %v15786_v34 = vpop.f32.mrb[16].mxu0  ;;  %3625 = vst [vmem:[#allocation2 + $0xd8] sm:$0xe] %v3624_v39  ;;  %v3148_v41 = vrot.slane %v3146_v56, 7  ;;  %v3509_v10 = vsel %vm15351_vm5, %v2828_v8, %v3508_v54  ;;  %v12254_v24 = vpack.c.bf16 %v939_v14, %v939_v14  ;;  %v15801_v38 = vpop.f32.mrb[19].mxu1  ;;  %v643_v14 = vadd.f32 %v15755_v23, %v15669_v45 }
 0x1a9   :  { %v15790_v36 = vpop.f32.mrb[17].mxu0  ;;  %3510 = vst [vmem:[#allocation2 + $0x14] sm:$0x3] %v3509_v10  ;;  %v12288_v42 = vpack.c.bf16 %v1007_v50, %v1007_v50  ;;  %19729 = vst [vmem:[#allocation93_spill] sm:$0xff] %v15801_v38  ;;  %v3627_v53 = vld [vmem:[#allocation2 + $0xe0] sm:$0x3] }
 0x1aa   :  { %19728 = vst [vmem:[#allocation85_spill] sm:$0xff] %v15790_v36  ;;  %v15798_v16 = vpop.f32.mrb[18].mxu0  ;;  %v2830_v31 = vshrl.u32 %v12254_v24, 16  ;;  %v2833_v55 = vshll.u32 %v12254_v24, 16  ;;  %v1009_v54 = vmax.f32 %v807_v49, 0.0 }
 0x1ab   :  { %v15803_v32 = vpop.f32.mrb[19].mxu0  ;;  %v3153_v20 = vshrl.u32 %v12288_v42, 16  ;;  %v3156_v62 = vshll.u32 %v12288_v42, 16  ;;  %v3511_v27 = vld [vmem:[#allocation2 + $0x18] sm:$0xe] }
 0x1ac   :  { %12446 = vmatmul.mubr.msk.bf16.gmra.mrb[120].mxu1 %vm474_vm1, %v15610_v2  ;;  %v3141_v2 = vrot.slane %v3140_v37, 4  ;;  %19730 = vst [vmem:[#allocation91_spill] sm:$0xff] %v15803_v32  ;;  %v12255_v37 = vpack.c.bf16 %v941_v28, %v941_v28  ;;  %v2832_v56 = vrot.slane %v2830_v31, 6  ;;  %v2835_v60 = vrot.slane %v2833_v55, 7  ;;  %v15815_v12 = vpop.f32.mrb[20].mxu0 }
 0x1ad   :  { %12449 = vmatprep.mubr.msk.bf16.mxu1 %vm474_vm1, %v15629_v0  ;;  %v3145_v0 = vrot.slane %v3143_v13, 6  ;;  %v3155_v57 = vrot.slane %v3153_v20, 6  ;;  %v3158_v8 = vrot.slane %v3156_v62, 7  ;;  %v15821_v10 = vpop.f32.mrb[21].mxu0  ;;  %v3522_v36 = vld [vmem:[#allocation2 + $0x2c] sm:$0x3] }
 0x1ae   :  { %v2842_v39 = vshll.u32 %v12255_v37, 16  ;;  %v2836_v40 = vor.u32 %v2835_v60, %v2832_v56  ;;  %19732 = vst [vmem:[#allocation107_spill] sm:$0xff] %v15821_v10  ;;  %v15825_v49 = vpop.f32.mrb[22].mxu0  ;;  %v943_v56 = vmax.f32 %v643_v14, 0.0  ;;  %v3946_v43 = vld [vmem:[#allocation2 + $0xc] sm:$0x8] }
 0x1af   :  { %v3149_v21 = vor.u32 %v3148_v41, %v3145_v0  ;;  %v15813_v0 = vpop.f32.mrb[20].mxu1  ;;  %v12289_v41 = vpack.c.bf16 %v1009_v54, %v1009_v54  ;;  %v3159_v35 = vor.u32 %v3158_v8, %v3155_v57  ;;  %v15833_v20 = vpop.f32.mrb[23].mxu0  ;;  %v647_v57 = vadd.f32 %v15761_v11, %v15669_v45 }
 0x1b0   :  { %v15819_v50 = vpop.f32.mrb[21].mxu1  ;;  %v2844_v24 = vrot.slane %v2842_v39, 7  ;;  %v3512_v28 = vsel %vm15701_vm11, %v2836_v40, %v3511_v27  ;;  %19734 = vst [vmem:[#allocation92_spill] sm:$0xff] %v15833_v20  ;;  %v813_v8 = vadd.f32 %v15784_v1, %v15669_v45  ;;  %v12256_v39 = vpack.c.bf16 %v943_v56, %v943_v56 }
 0x1b1   :  { %v3150_v26 = vsel %vm15712_vm12, %v3141_v2, %v3149_v21  ;;  %v3151_v17 = vrot.slane %v3149_v21, 4  ;;  %v2839_v2 = vshrl.u32 %v12255_v37, 16  ;;  %19731 = vst [vmem:[#allocation98_spill] sm:$0xff] %v15819_v50  ;;  %v15823_v42 = vpop.f32.mrb[22].mxu1  ;;  %3513 = vst [vmem:[#allocation2 + $0x18] sm:$0xe] %v3512_v28 }
 0x1b2   :  { %3626 = vst [vmem:[#allocation2 + $0xdc] sm:$0xf] %v3150_v26  ;;  %v3162_v26 = vshrl.u32 %v12289_v41, 16  ;;  %v15829_v31 = vpop.f32.mrb[23].mxu1  ;;  %v3160_v62 = vrot.slane %v3159_v35, 4  ;;  %v945_v14 = vmax.f32 %v647_v57, 0.0 }
 0x1b3   :  { %v3628_v13 = vsel %vm15351_vm5, %v3151_v17, %v3627_v53  ;;  %v2841_v21 = vrot.slane %v2839_v2, 6  ;;  %v2837_v53 = vrot.slane %v2836_v40, 4  ;;  %v3165_v17 = vshll.u32 %v12289_v41, 16  ;;  %19733 = vst [vmem:[#allocation106_spill] sm:$0xff] %v15829_v31  ;;  %v3515_v37 = vld [vmem:[#allocation2 + $0x20] sm:$0x3] }
 0x1b4   :  { %12450 = vmatmul.mubr.msk.bf16.gmra.mrb[124].mxu1 %vm474_vm1, %v2136_v22  ;;  %3629 = vst [vmem:[#allocation2 + $0xe0] sm:$0x3] %v3628_v13  ;;  %v3630_v22 = vld [vmem:[#allocation2 + $0xe4] sm:$0xe]  ;;  %v3164_v54 = vrot.slane %v3162_v26, 6  ;;  %v817_v40 = vadd.f32 %v15796_v18, %v15669_v45  ;;  %v2852_v28 = vshll.u32 %v12256_v39, 16 }
 0x1b5   :  { %v3631_v23 = vsel %vm15701_vm11, %v3159_v35, %v3630_v22  ;;  %v2845_v55 = vor.u32 %v2844_v24, %v2841_v21  ;;  %v3167_v13 = vrot.slane %v3165_v17, 7  ;;  %v3634_v41 = vld [vmem:[#allocation2 + $0xec] sm:$0x3]  ;;  %v1011_v35 = vmax.f32 %v813_v8, 0.0  ;;  %v15845_v21 = vpop.f32.mrb[24].mxu1  ;;  %v15847_v24 = vpop.f32.mrb[24].mxu0 }
 0x1b6   :  { %3632 = vst [vmem:[#allocation2 + $0xe4] sm:$0xe] %v3631_v23  ;;  %v15851_v26 = vpop.f32.mrb[25].mxu1  ;;  %v15853_v18 = vpop.f32.mrb[25].mxu0  ;;  %v12257_v17 = vpack.c.bf16 %v945_v14, %v945_v14  ;;  %v3722_v14 = vld [vmem:[#allocation2 + $0x4] sm:$0xf] }
 0x1b7   :  { %v2846_v60 = vsel %vm15712_vm12, %v2837_v53, %v2845_v55  ;;  %v2847_v27 = vrot.slane %v2845_v55, 4  ;;  %v3168_v2 = vor.u32 %v3167_v13, %v3164_v54  ;;  %v2849_v53 = vshrl.u32 %v12256_v39, 16  ;;  %19735 = vst [vmem:[#allocation84_spill] sm:$0xff] %v15851_v26  ;;  %19736 = vst [vmem:[#allocation99_spill] sm:$0xff] %v15853_v18  ;;  %v15855_v54 = vpop.f32.mrb[26].mxu1  ;;  %v15857_v13 = vpop.f32.mrb[26].mxu0 }
 0x1b8   :  { %3514 = vst [vmem:[#allocation2 + $0x1c] sm:$0xf] %v2846_v60  ;;  %v12290_v23 = vpack.c.bf16 %v1011_v35, %v1011_v35  ;;  %v1013_v55 = vmax.f32 %v817_v40, 0.0  ;;  %v2854_v60 = vrot.slane %v2852_v28, 7  ;;  %v15861_v57 = vpop.f32.mrb[27].mxu1  ;;  %v2858_v8 = vshrl.u32 %v12257_v17, 16 }
 0x1b9   :  { %v3516_v22 = vsel %vm15351_vm5, %v2847_v27, %v3515_v37  ;;  %v3169_v11 = vsel %vm15712_vm12, %v3160_v62, %v3168_v2  ;;  %v3170_v1 = vrot.slane %v3168_v2, 4  ;;  %v3945_v37 = vld [vmem:[#allocation2] sm:$0x8]  ;;  %v2851_v62 = vrot.slane %v2849_v53, 6  ;;  %v3518_v27 = vld [vmem:[#allocation2 + $0x24] sm:$0xe] }
 0x1ba   :  { %3517 = vst [vmem:[#allocation2 + $0x20] sm:$0x3] %v3516_v22  ;;  %3633 = vst [vmem:[#allocation2 + $0xe8] sm:$0xf] %v3169_v11  ;;  %v2861_v2 = vshll.u32 %v12257_v17, 16  ;;  %v3172_v39 = vshrl.u32 %v12290_v23, 16  ;;  %v12291_v35 = vpack.c.bf16 %v1013_v55, %v1013_v55  ;;  %v12086_v18 = vcombine.low %v3945_v37, %v3722_v14 }
 0x1bb   :  { %v3635_v56 = vsel %vm15351_vm5, %v3170_v1, %v3634_v41  ;;  %19737 = vst [vmem:[#allocation90_spill] sm:$0xff] %v15861_v57  ;;  %v3175_v22 = vshll.u32 %v12290_v23, 16  ;;  %v2855_v40 = vor.u32 %v2854_v60, %v2851_v62  ;;  %v13218_v11 = vld [vmem:[#allocation2 + $0x8] ss:$0 sps:$4 sm:$0x77]   ;;  %v15863_v20 = vpop.f32.mrb[27].mxu0 }
 0x1bc   :  { %3636 = vst [vmem:[#allocation2 + $0xec] sm:$0x3] %v3635_v56  ;;  %19738 = vst [vmem:[#allocation108_spill] sm:$0xff] %v15863_v20  ;;  %v2860_v10 = vrot.slane %v2858_v8, 6  ;;  %v2863_v32 = vrot.slane %v2861_v2, 7  ;;  %v3174_v41 = vrot.slane %v3172_v39, 6 }
 0x1bd   :  { %v3177_v1 = vrot.slane %v3175_v22, 7  ;;  %v3637_v53 = vld [vmem:[#allocation2 + $0xf0] sm:$0xe]  ;;  %v2856_v28 = vrot.slane %v2855_v40, 4  ;;  %v3519_v56 = vsel %vm15701_vm11, %v2855_v40, %v3518_v27  ;;  %v3181_v17 = vshrl.u32 %v12291_v35, 16  ;;  %v15867_v37 = vpop.f32.mrb[28].mxu1 }
 0x1be   :  { %v3184_v4 = vshll.u32 %v12291_v35, 16  ;;  %3520 = vst [vmem:[#allocation2 + $0x24] sm:$0xe] %v3519_v56  ;;  %v2864_v23 = vor.u32 %v2863_v32, %v2860_v10  ;;  %v6575_v55 = vrot.slane %v12086_v18, 3  ;;  %v15869_v60 = vpop.f32.mrb[28].mxu0  ;;  %v6576_v39 = vrot.slane %v13218_v11, 3 }
 0x1bf   :  { %v3178_v62 = vor.u32 %v3177_v1, %v3174_v41  ;;  %v3183_v8 = vrot.slane %v3181_v17, 6  ;;  %v653_v22 = vadd.f32 %v15786_v34, %v15669_v45  ;;  %v3721_v20 = vld [vmem:[#allocation2] sm:$0xf]  ;;  %v15877_v10 = vpop.f32.mrb[29].mxu1  ;;  %v15879_v18 = vpop.f32.mrb[29].mxu0  ;;  %v823_v34 = vadd.f32 %v15813_v0, %v15669_v45 }
 0x1c0   :  { %v3186_v2 = vrot.slane %v3184_v4, 7  ;;  %v2865_v27 = vsel %vm15712_vm12, %v2856_v28, %v2864_v23  ;;  %v2866_v40 = vrot.slane %v2864_v23, 4  ;;  %19739 = vst [vmem:[#allocation100_spill] sm:$0xff] %v15877_v10  ;;  %19740 = vst [vmem:[#allocation110_spill] sm:$0xff] %v15879_v18  ;;  %v6577_v11 = vsel %vm6574_vm13, %v6575_v55, %v6576_v39  ;;  %v15884_v28 = vpop.f32.mrb[30].mxu1  ;;  %v15886_v56 = vpop.f32.mrb[30].mxu0 }
 0x1c1   :  { %v3179_v35 = vrot.slane %v3178_v62, 4  ;;  %v3638_v32 = vsel %vm15701_vm11, %v3178_v62, %v3637_v53  ;;  %3521 = vst [vmem:[#allocation2 + $0x28] sm:$0xf] %v2865_v27  ;;  %v947_v41 = vmax.f32 %v653_v22, 0.0  ;;  %v3641_v17 = vld [vmem:[#allocation2 + $0xf8] sm:$0x3]  ;;  %12469 = vmatprep.mubr.bf16.mxu0 %v6577_v11  ;;  %v11894_v23 = vcombine.low %v3721_v20, %v3722_v14 }
 0x1c2   :  { %3639 = vst [vmem:[#allocation2 + $0xf0] sm:$0xe] %v3638_v32  ;;  %v3187_v4 = vor.u32 %v3186_v2, %v3183_v8  ;;  %v13222_v1 = vld [vmem:[#allocation2 + $0x8] ss:$0 sps:$4 sm:$0x11]   ;;  %v3523_v53 = vsel %vm15351_vm5, %v2866_v40, %v3522_v36  ;;  %v15890_v62 = vpop.f32.mrb[31].mxu1 }
 0x1c3   :  { %19741 = vst [vmem:[#allocation27_spill] sm:$0xff] %v15890_v62  ;;  %v15892_v8 = vpop.f32.mrb[31].mxu0  ;;  %3524 = vst [vmem:[#allocation2 + $0x2c] sm:$0x3] %v3523_v53  ;;  %v12258_v2 = vpack.c.bf16 %v947_v41, %v947_v41  ;;  %v1015_v39 = vmax.f32 %v823_v34, 0.0  ;;  %v4267_v22 = vshrl.u32 %v11894_v23, 16 }
 0x1c4   :  { %19742 = vst [vmem:[#allocation26_spill] sm:$0xff] %v15892_v8  ;;  %v3188_v55 = vsel %vm15712_vm12, %v3179_v35, %v3187_v4  ;;  %v3189_v0 = vrot.slane %v3187_v4, 4  ;;  %v4269_v27 = vshll.u32 %v11894_v23, 16  ;;  %v3525_v32 = vld [vmem:[#allocation2 + $0x30] sm:$0xe]  ;;  %v4274_v53 = vshll.u32 %v13222_v1, 16 }
 0x1c5   :  { %3640 = vst [vmem:[#allocation2 + $0xf4] sm:$0xf] %v3188_v55  ;;  %v2868_v40 = vshrl.u32 %v12258_v2, 16  ;;  %v2871_v20 = vshll.u32 %v12258_v2, 16  ;;  %v12292_v14 = vpack.c.bf16 %v1015_v39, %v1015_v39  ;;  %v657_v35 = vadd.f32 %v15798_v16, %v15669_v45  ;;  %v15902_v41 = vpop.f32.mrb[32].mxu1  ;;  %v15904_v34 = vpop.f32.mrb[32].mxu0 }
 0x1c6   :  { %v3642_v36 = vsel %vm15351_vm5, %v3189_v0, %v3641_v17  ;;  %v4271_v11 = vrot.slane %v4269_v27, 1  ;;  %v827_v4 = vadd.f32 %v15823_v42, %v15669_v45  ;;  %v13225_v2 = vld [vmem:[#allocation13 + $0x80] sm:$0xff]   ;;  %v15906_v39 = vpop.f32.mrb[33].mxu1  ;;  %v3644_v1 = vld [vmem:[#allocation2 + $0xfc] sm:$0xe]  ;;  %v4276_v18 = vrot.slane %v4274_v53, 1 }
 0x1c7   :  { %3643 = vst [vmem:[#allocation2 + $0xf8] sm:$0x3] %v3642_v36  ;;  %v2870_v55 = vrot.slane %v2868_v40, 6  ;;  %v2873_v8 = vrot.slane %v2871_v20, 7  ;;  %v3191_v17 = vshrl.u32 %v12292_v14, 16  ;;  %v3194_v0 = vshll.u32 %v12292_v14, 16 }
 0x1c8   :  { %19743 = vst [vmem:[#allocation28_spill] sm:$0xff] %v15906_v39  ;;  %v15908_v36 = vpop.f32.mrb[33].mxu0  ;;  %v4272_v27 = vor.u32 %v4271_v11, %v4267_v22  ;;  %v949_v16 = vmax.f32 %v657_v35, 0.0  ;;  %v1017_v63 = vmax.f32 %v827_v4, 0.0  ;;  %v15910_v19 = vpop.f32.mrb[34].mxu1  ;;  %vm5676_vm1 = vcmask 1045504  }
 0x1c9   :  { %19744 = vst [vmem:[#allocation29_spill] sm:$0xff] %v15908_v36  ;;  %v2874_v42 = vor.u32 %v2873_v8, %v2870_v55  ;;  %v3193_v30 = vrot.slane %v3191_v17, 6  ;;  %v3196_v46 = vrot.slane %v3194_v0, 7  ;;  %v15912_v40 = vpop.f32.mrb[35].mxu1  ;;  %v15914_v20 = vpop.f32.mrb[34].mxu0 }
 0x1ca   :  { %19745 = vst [vmem:[#allocation112_spill] sm:$0xff] %v15912_v40  ;;  %v4277_v14 = vsel %vm4265_vm14, %v4272_v27, %v4276_v18  ;;  %v12259_v51 = vpack.c.bf16 %v949_v16, %v949_v16  ;;  %v12293_v25 = vpack.c.bf16 %v1017_v63, %v1017_v63  ;;  %v3724_v36 = vld [vmem:[#allocation2 + $0x10] sm:$0xf]  ;;  %v15917_v62 = vpop.f32.mrb[35].mxu0  ;;  %v3651_v57 = vld [vmem:[#allocation2 + $0x108] sm:$0xe] }
 0x1cb   :  { %19746 = vst [vmem:[#allocation33_spill] sm:$0xff] %v15917_v62  ;;  %v3526_v22 = vsel %vm15701_vm11, %v2874_v42, %v3525_v32  ;;  %v3197_v11 = vor.u32 %v3196_v46, %v3193_v30  ;;  %7190 = vmatprep.mubr.bf16.mxu1 %v4277_v14  ;;  %v13223_v8 = vld [vmem:[#allocation2 + $0x14] ss:$0 sps:$4 sm:$0x77]   ;;  %v2875_v17 = vrot.slane %v2874_v42, 4  ;;  %v12087_v18 = vcombine.low %v3946_v43, %v3724_v36 }
 0x1cc   :  { %3527 = vst [vmem:[#allocation2 + $0x30] sm:$0xe] %v3526_v22  ;;  %v2877_v53 = vshrl.u32 %v12259_v51, 16  ;;  %v2880_v35 = vshll.u32 %v12259_v51, 16  ;;  %v3200_v4 = vshrl.u32 %v12293_v25, 16  ;;  %v3203_v55 = vshll.u32 %v12293_v25, 16  ;;  %7191 = vmatmul.mubr.bf16.vlgmr.msra.gmra.mrb[128].mxu1 %v11894_v23 }
 0x1cd   :  { %v3198_v0 = vrot.slane %v3197_v11, 4  ;;  %v3645_v63 = vsel %vm15701_vm11, %v3197_v11, %v3644_v1  ;;  %7448 = vmatpush1.bf16.msra.mxu1 %v13225_v2  ;;  %v13234_v27 = vld [vmem:[#allocation13 + $0x88] sm:$0xff]   ;;  %v15924_v51 = vpop.f32.mrb[36].mxu1  ;;  %v15926_v25 = vpop.f32.mrb[36].mxu0  ;;  %v3648_v42 = vld [vmem:[#allocation2 + $0x104] sm:$0x3]  ;;  %v663_v43 = vadd.f32 %v15815_v12, %v15669_v45 }
 0x1ce   :  { %3646 = vst [vmem:[#allocation2 + $0xfc] sm:$0xe] %v3645_v63  ;;  %v2879_v16 = vrot.slane %v2877_v53, 6  ;;  %v2882_v32 = vrot.slane %v2880_v35, 7  ;;  %v3202_v46 = vrot.slane %v3200_v4, 6  ;;  %v3205_v30 = vrot.slane %v3203_v55, 7  ;;  %7449 = vmatprep.subr.bf16.mxu1 %v19440_v15 }
 0x1cf   :  { %v13227_v14 = vld [vmem:[#allocation2 + $0x14] ss:$0 sps:$4 sm:$0x11]   ;;  %v3529_v23 = vld [vmem:[#allocation2 + $0x38] sm:$0x3]  ;;  %v6578_v22 = vrot.slane %v12087_v18, 3  ;;  %v667_v4 = vadd.f32 %v15825_v49, %v15669_v45  ;;  %v833_v55 = vadd.f32 %v15845_v21, %v15669_v45 }
 0x1d0   :  { %v6579_v62 = vrot.slane %v13223_v8, 3  ;;  %v3723_v2 = vld [vmem:[#allocation2 + $0xc] sm:$0xf]  ;;  %v15930_v1 = vpop.f32.mrb[37].mxu1  ;;  %v15932_v11 = vpop.f32.mrb[37].mxu0  ;;  %v2883_v53 = vor.u32 %v2882_v32, %v2879_v16  ;;  %v3206_v35 = vor.u32 %v3205_v30, %v3202_v46  ;;  %v951_v12 = vmax.f32 %v663_v43, 0.0 }
 0x1d1   :  { %19747 = vst [vmem:[#allocation34_spill] sm:$0xff] %v15930_v1  ;;  %19748 = vst [vmem:[#allocation36_spill] sm:$0xff] %v15932_v11  ;;  %v15938_v63 = vpop.f32.mrb[38].mxu1  ;;  %v15940_v18 = vpop.f32.mrb[38].mxu0  ;;  %7450 = vmatpush1.bf16.msra.mxu1 %v13234_v27  ;;  %v13243_v1 = vld [vmem:[#allocation13 + $0x90] sm:$0xff]   ;;  %v953_v27 = vmax.f32 %v667_v4, 0.0 }
 0x1d2   :  { %v6580_v8 = vsel %vm6574_vm13, %v6578_v22, %v6579_v62  ;;  %v15943_v40 = vpop.f32.mrb[39].mxu1  ;;  %v15945_v11 = vpop.f32.mrb[39].mxu0  ;;  %v2884_v16 = vsel %vm15712_vm12, %v2875_v17, %v2883_v53  ;;  %v2885_v49 = vrot.slane %v2883_v53, 4  ;;  %v3207_v21 = vsel %vm15712_vm12, %v3198_v0, %v3206_v35  ;;  %7451 = vmatprep.subr.bf16.mxu1 %v19440_v15 }
 0x1d3   :  { %19749 = vst [vmem:[#allocation38_spill] sm:$0xff] %v15943_v40  ;;  %19750 = vst [vmem:[#allocation30_spill] sm:$0xff] %v15945_v11  ;;  %v3208_v32 = vrot.slane %v3206_v35, 4  ;;  %12470 = vmatmul.mubr.bf16.vlgmr.msra.gmra.mrb[64].mxu0 %v6580_v8  ;;  %v12260_v62 = vpack.c.bf16 %v951_v12, %v951_v12  ;;  %v1019_v46 = vmax.f32 %v833_v55, 0.0  ;;  %v15956_v17 = vcombine.low %v3723_v2, %v3724_v36  ;;  %v3532_v12 = vld [vmem:[#allocation2 + $0x3c] sm:$0xe] }
 0x1d4   :  { %3528 = vst [vmem:[#allocation2 + $0x34] sm:$0xf] %v2884_v16  ;;  %3647 = vst [vmem:[#allocation2 + $0x100] sm:$0xf] %v3207_v21  ;;  %v3530_v30 = vsel %vm15351_vm5, %v2885_v49, %v3529_v23  ;;  %v4286_v43 = vshll.u32 %v13227_v14, 16  ;;  %v12261_v35 = vpack.c.bf16 %v953_v27, %v953_v27  ;;  %v13252_v16 = vld [vmem:[#allocation13 + $0x98] sm:$0xff]  }
 0x1d5   :  { %v3649_v22 = vsel %vm15351_vm5, %v3208_v32, %v3648_v42  ;;  %3531 = vst [vmem:[#allocation2 + $0x38] sm:$0x3] %v3530_v30  ;;  %v2887_v0 = vshrl.u32 %v12260_v62, 16  ;;  %v2890_v53 = vshll.u32 %v12260_v62, 16  ;;  %v12294_v8 = vpack.c.bf16 %v1019_v46, %v1019_v46  ;;  %7452 = vmatpush1.bf16.msra.mxu1 %v13243_v1  ;;  %v15962_v36 = vpop.f32.mrb[40].mxu1  ;;  %v15964_v14 = vpop.f32.mrb[40].mxu0 }
 0x1d6   :  { %3650 = vst [vmem:[#allocation2 + $0x104] sm:$0x3] %v3649_v22  ;;  %v4279_v4 = vshrl.u32 %v15956_v17, 16  ;;  %v4281_v55 = vshll.u32 %v15956_v17, 16  ;;  %v4288_v23 = vrot.slane %v4286_v43, 1  ;;  %v837_v42 = vadd.f32 %v15855_v54, %v15669_v45  ;;  %7453 = vmatprep.subr.bf16.mxu1 %v19440_v15  ;;  %v15967_v32 = vpop.f32.mrb[41].mxu1 }
 0x1d7   :  { %v2889_v2 = vrot.slane %v2887_v0, 6  ;;  %v2892_v49 = vrot.slane %v2890_v53, 7  ;;  %v2896_v21 = vshrl.u32 %v12261_v35, 16  ;;  %v2899_v1 = vshll.u32 %v12261_v35, 16  ;;  %19751 = vst [vmem:[#allocation32_spill] sm:$0xff] %v15967_v32  ;;  %v15969_v62 = vpop.f32.mrb[41].mxu0 }
 0x1d8   :  { %19752 = vst [vmem:[#allocation41_spill] sm:$0xff] %v15969_v62  ;;  %v3210_v27 = vshrl.u32 %v12294_v8, 16  ;;  %v3213_v46 = vshll.u32 %v12294_v8, 16  ;;  %v4283_v30 = vrot.slane %v4281_v55, 1  ;;  %v1021_v22 = vmax.f32 %v837_v42, 0.0  ;;  %v15971_v43 = vpop.f32.mrb[42].mxu1 }
 0x1d9   :  { %v15973_v54 = vpop.f32.mrb[42].mxu0  ;;  %v2893_v11 = vor.u32 %v2892_v49, %v2889_v2  ;;  %v2898_v40 = vrot.slane %v2896_v21, 6  ;;  %v2901_v39 = vrot.slane %v2899_v1, 7  ;;  %v15975_v0 = vpop.f32.mrb[43].mxu1  ;;  %7454 = vmatpush1.bf16.msra.mxu1 %v13252_v16  ;;  %v3536_v35 = vld [vmem:[#allocation2 + $0x44] sm:$0x3] }
 0x1da   :  { %19753 = vst [vmem:[#allocation43_spill] sm:$0xff] %v15975_v0  ;;  %v15977_v53 = vpop.f32.mrb[43].mxu0  ;;  %v3212_v32 = vrot.slane %v3210_v27, 6  ;;  %v3215_v62 = vrot.slane %v3213_v46, 7  ;;  %v4284_v10 = vor.u32 %v4283_v30, %v4279_v4  ;;  %v12295_v8 = vpack.c.bf16 %v1021_v22, %v1021_v22  ;;  %v3726_v55 = vld [vmem:[#allocation2 + $0x1c] sm:$0xf]  ;;  %7455 = vmatprep.subr.bf16.mxu1 %v19440_v15 }
 0x1db   :  { %19754 = vst [vmem:[#allocation37_spill] sm:$0xff] %v15977_v53  ;;  %v3947_v42 = vld [vmem:[#allocation2 + $0x18] sm:$0x8]  ;;  %v2894_v31 = vrot.slane %v2893_v11, 4  ;;  %v3533_v2 = vsel %vm15701_vm11, %v2893_v11, %v3532_v12  ;;  %v2902_v49 = vor.u32 %v2901_v39, %v2898_v40  ;;  %v13261_v1 = vld [vmem:[#allocation13 + $0xa0] sm:$0xff]  }
 0x1dc   :  { %v13228_v21 = vld [vmem:[#allocation2 + $0x20] ss:$0 sps:$4 sm:$0x77]   ;;  %3534 = vst [vmem:[#allocation2 + $0x3c] sm:$0xe] %v3533_v2  ;;  %v3216_v0 = vor.u32 %v3215_v62, %v3212_v32  ;;  %v4289_v16 = vsel %vm4265_vm14, %v4284_v10, %v4288_v23  ;;  %v3219_v53 = vshrl.u32 %v12295_v8, 16  ;;  %v12088_v30 = vcombine.low %v3947_v42, %v3726_v55 }
 0x1dd   :  { %v3222_v27 = vshll.u32 %v12295_v8, 16  ;;  %v2903_v4 = vsel %vm15712_vm12, %v2894_v31, %v2902_v49  ;;  %v2904_v46 = vrot.slane %v2902_v49, 4  ;;  %7198 = vmatprep.mubr.bf16.mxu1 %v4289_v16  ;;  %v13231_v22 = vld [vmem:[#allocation2 + $0x20] ss:$0 sps:$4 sm:$0x11]   ;;  %7456 = vmatpush1.bf16.msra.mxu1 %v13261_v1  ;;  %v6582_v23 = vrot.slane %v13228_v21, 3 }
 0x1de   :  { %3535 = vst [vmem:[#allocation2 + $0x40] sm:$0xf] %v2903_v4  ;;  %v3217_v26 = vrot.slane %v3216_v0, 4  ;;  %v3652_v39 = vsel %vm15701_vm11, %v3216_v0, %v3651_v57  ;;  %v3221_v40 = vrot.slane %v3219_v53, 6  ;;  %7199 = vmatmul.mubr.bf16.gmra.mrb[132].mxu1 %v15956_v17  ;;  %v3725_v10 = vld [vmem:[#allocation2 + $0x18] sm:$0xf]  ;;  %7457 = vmatprep.subr.bf16.mxu1 %v19440_v15  ;;  %v673_v57 = vadd.f32 %v15847_v24, %v15669_v45 }
 0x1df   :  { %v3224_v11 = vrot.slane %v3222_v27, 7  ;;  %v3537_v31 = vsel %vm15351_vm5, %v2904_v46, %v3536_v35  ;;  %3653 = vst [vmem:[#allocation2 + $0x108] sm:$0xe] %v3652_v39  ;;  %v6581_v12 = vrot.slane %v12088_v30, 3  ;;  %v15991_v32 = vpop.f32.mrb[44].mxu1  ;;  %v15993_v62 = vpop.f32.mrb[44].mxu0  ;;  %v843_v17 = vadd.f32 %v15867_v37, %v15669_v45 }
 0x1e0   :  { %3538 = vst [vmem:[#allocation2 + $0x44] sm:$0x3] %v3537_v31  ;;  %v15999_v0 = vpop.f32.mrb[45].mxu1  ;;  %v16001_v53 = vpop.f32.mrb[45].mxu0  ;;  %v3655_v35 = vld [vmem:[#allocation2 + $0x110] sm:$0x3]  ;;  %v11896_v2 = vcombine.low %v3725_v10, %v3726_v55  ;;  %v677_v31 = vadd.f32 %v15857_v13, %v15669_v45 }
 0x1e1   :  { %v3225_v8 = vor.u32 %v3224_v11, %v3221_v40  ;;  %19755 = vst [vmem:[#allocation47_spill] sm:$0xff] %v15999_v0  ;;  %19756 = vst [vmem:[#allocation49_spill] sm:$0xff] %v16001_v53  ;;  %v6583_v42 = vsel %vm6574_vm13, %v6581_v12, %v6582_v23  ;;  %v4298_v49 = vshll.u32 %v13231_v22, 16  ;;  %v16004_v21 = vpop.f32.mrb[46].mxu1  ;;  %v16006_v1 = vpop.f32.mrb[46].mxu0  ;;  %v955_v27 = vmax.f32 %v673_v57, 0.0 }
 0x1e2   :  { %12473 = vmatprep.mubr.bf16.mxu0 %v6583_v42  ;;  %v1023_v37 = vmax.f32 %v843_v17, 0.0  ;;  %v16010_v4 = vpop.f32.mrb[47].mxu1  ;;  %v16012_v46 = vpop.f32.mrb[47].mxu0  ;;  %v4291_v30 = vshrl.u32 %v11896_v2, 16  ;;  %v4293_v39 = vshll.u32 %v11896_v2, 16  ;;  %v847_v12 = vadd.f32 %v15884_v28, %v15669_v45 }
 0x1e3   :  { %v3226_v16 = vsel %vm15712_vm12, %v3217_v26, %v3225_v8  ;;  %v3227_v24 = vrot.slane %v3225_v8, 4  ;;  %19757 = vst [vmem:[#allocation31_spill] sm:$0xff] %v16010_v4  ;;  %19758 = vst [vmem:[#allocation39_spill] sm:$0xff] %v16012_v46  ;;  %v12262_v22 = vpack.c.bf16 %v955_v27, %v955_v27  ;;  %v16016_v11 = vld [vmem:[#allocation2 + $0x2c] ss:$0 sps:$4 sm:$0x77]  }
 0x1e4   :  { %3654 = vst [vmem:[#allocation2 + $0x10c] sm:$0xf] %v3226_v16  ;;  %v12296_v40 = vpack.c.bf16 %v1023_v37, %v1023_v37  ;;  %v4295_v26 = vrot.slane %v4293_v39, 1  ;;  %v4300_v10 = vrot.slane %v4298_v49, 1  ;;  %v16022_v23 = vld [vmem:[#allocation2 + $0x28] sm:$0xf] }
 0x1e5   :  { %v3656_v55 = vsel %vm15351_vm5, %v3227_v24, %v3655_v35  ;;  %v3948_v8 = vld [vmem:[#allocation2 + $0x24] sm:$0x8]  ;;  %v2906_v57 = vshrl.u32 %v12262_v22, 16  ;;  %v2909_v17 = vshll.u32 %v12262_v22, 16  ;;  %v16024_v16 = vpop.f32.mrb[48].mxu1  ;;  %v16026_v24 = vpop.f32.mrb[48].mxu0 }
 0x1e6   :  { %3657 = vst [vmem:[#allocation2 + $0x110] sm:$0x3] %v3656_v55  ;;  %v3229_v42 = vshrl.u32 %v12296_v40, 16  ;;  %v3232_v35 = vshll.u32 %v12296_v40, 16  ;;  %v4296_v27 = vor.u32 %v4295_v26, %v4291_v30  ;;  %v957_v37 = vmax.f32 %v677_v31, 0.0  ;;  %v16028_v39 = vpop.f32.mrb[49].mxu1 }
 0x1e7   :  { %v1025_v49 = vmax.f32 %v847_v12, 0.0  ;;  %19759 = vst [vmem:[#allocation52_spill] sm:$0xff] %v16028_v39  ;;  %v2908_v13 = vrot.slane %v2906_v57, 6  ;;  %v2911_v55 = vrot.slane %v2909_v17, 7  ;;  %v3539_v53 = vld [vmem:[#allocation2 + $0x48] sm:$0xe]  ;;  %v12089_v5 = vcombine.low %v3948_v8, %v16022_v23 }
 0x1e8   :  { %v3231_v46 = vrot.slane %v3229_v42, 6  ;;  %v3234_v28 = vrot.slane %v3232_v35, 7  ;;  %v3658_v4 = vld [vmem:[#allocation2 + $0x114] sm:$0xe]  ;;  %v4301_v0 = vsel %vm4265_vm14, %v4296_v27, %v4300_v10  ;;  %v12263_v22 = vpack.c.bf16 %v957_v37, %v957_v37  ;;  %v16033_v26 = vpop.f32.mrb[50].mxu1  ;;  %v16035_v31 = vpop.f32.mrb[49].mxu0 }
 0x1e9   :  { %v12297_v38 = vpack.c.bf16 %v1025_v49, %v1025_v49  ;;  %v2912_v40 = vor.u32 %v2911_v55, %v2908_v13  ;;  %7206 = vmatprep.mubr.bf16.mxu1 %v4301_v0  ;;  %v6585_v30 = vrot.slane %v16016_v11, 3  ;;  %19760 = vst [vmem:[#allocation57_spill] sm:$0xff] %v16035_v31  ;;  %v16037_v35 = vpop.f32.mrb[51].mxu1  ;;  %v16039_v10 = vpop.f32.mrb[50].mxu0  ;;  %v3543_v55 = vld [vmem:[#allocation2 + $0x50] sm:$0x3]  ;;  %v683_v31 = vadd.f32 %v15869_v60, %v15669_v45 }
 0x1ea   :  { %v3235_v50 = vor.u32 %v3234_v28, %v3231_v46  ;;  %v2915_v12 = vshrl.u32 %v12263_v22, 16  ;;  %v2918_v57 = vshll.u32 %v12263_v22, 16  ;;  %7207 = vmatmul.mubr.bf16.gmra.mrb[136].mxu1 %v11896_v2  ;;  %19761 = vst [vmem:[#allocation35_spill] sm:$0xff] %v16037_v35  ;;  %v16045_v8 = vpop.f32.mrb[51].mxu0  ;;  %v3662_v28 = vld [vmem:[#allocation2 + $0x11c] sm:$0x3] }
 0x1eb   :  { %v3238_v17 = vshrl.u32 %v12297_v38, 16  ;;  %v3241_v42 = vshll.u32 %v12297_v38, 16  ;;  %v2913_v27 = vrot.slane %v2912_v40, 4  ;;  %v3540_v0 = vsel %vm15701_vm11, %v2912_v40, %v3539_v53  ;;  %19762 = vst [vmem:[#allocation44_spill] sm:$0xff] %v16045_v8  ;;  %v16049_v53 = vpop.f32.mrb[52].mxu1  ;;  %v16051_v40 = vpop.f32.mrb[52].mxu0 }
 0x1ec   :  { %v3236_v46 = vrot.slane %v3235_v50, 4  ;;  %v3659_v11 = vsel %vm15701_vm11, %v3235_v50, %v3658_v4  ;;  %3541 = vst [vmem:[#allocation2 + $0x48] sm:$0xe] %v3540_v0  ;;  %v2917_v37 = vrot.slane %v2915_v12, 6  ;;  %v2920_v49 = vrot.slane %v2918_v57, 7 }
 0x1ed   :  { %3660 = vst [vmem:[#allocation2 + $0x114] sm:$0xe] %v3659_v11  ;;  %v3240_v38 = vrot.slane %v3238_v17, 6  ;;  %v3243_v2 = vrot.slane %v3241_v42, 7  ;;  %v6584_v22 = vrot.slane %v12089_v5, 3  ;;  %v687_v0 = vadd.f32 %v15886_v56, %v15669_v45  ;;  %v16057_v17 = vpop.f32.mrb[53].mxu1 }
 0x1ee   :  { %v13236_v13 = vld [vmem:[#allocation2 + $0x2c] ss:$0 sps:$4 sm:$0x11]   ;;  %v2921_v50 = vor.u32 %v2920_v49, %v2917_v37  ;;  %v853_v12 = vadd.f32 %v15902_v41, %v15669_v45  ;;  %v3727_v57 = vld [vmem:[#allocation2 + $0x24] sm:$0xf]  ;;  %19763 = vst [vmem:[#allocation40_spill] sm:$0xff] %v16057_v17 }
 0x1ef   :  { %v3244_v4 = vor.u32 %v3243_v2, %v3240_v38  ;;  %v16059_v42 = vpop.f32.mrb[53].mxu0  ;;  %v6586_v5 = vsel %vm6574_vm13, %v6584_v22, %v6585_v30  ;;  %v959_v60 = vmax.f32 %v683_v31, 0.0  ;;  %v16062_v11 = vpop.f32.mrb[54].mxu1  ;;  %v961_v31 = vmax.f32 %v687_v0, 0.0 }
 0x1f0   :  { %19764 = vst [vmem:[#allocation51_spill] sm:$0xff] %v16059_v42  ;;  %v16064_v8 = vpop.f32.mrb[54].mxu0  ;;  %v2922_v37 = vsel %vm15712_vm12, %v2913_v27, %v2921_v50  ;;  %v2923_v49 = vrot.slane %v2921_v50, 4  ;;  %12474 = vmatmul.mubr.bf16.gmra.mrb[68].mxu0 %v6586_v5  ;;  %v16070_v38 = vpop.f32.mrb[55].mxu1  ;;  %v1027_v22 = vmax.f32 %v853_v12, 0.0  ;;  %v11897_v50 = vcombine.low %v3727_v57, %v16022_v23 }
 0x1f1   :  { %v3245_v56 = vsel %vm15712_vm12, %v3236_v46, %v3244_v4  ;;  %v3246_v41 = vrot.slane %v3244_v4, 4  ;;  %19765 = vst [vmem:[#allocation45_spill] sm:$0xff] %v16070_v38  ;;  %v16072_v2 = vpop.f32.mrb[55].mxu0  ;;  %3542 = vst [vmem:[#allocation2 + $0x4c] sm:$0xf] %v2922_v37  ;;  %v12264_v30 = vpack.c.bf16 %v959_v60, %v959_v60  ;;  %v4310_v46 = vshll.u32 %v13236_v13, 16 }
 0x1f2   :  { %19766 = vst [vmem:[#allocation59_spill] sm:$0xff] %v16072_v2  ;;  %3661 = vst [vmem:[#allocation2 + $0x118] sm:$0xf] %v3245_v56  ;;  %v3544_v42 = vsel %vm15351_vm5, %v2923_v49, %v3543_v55  ;;  %v12265_v38 = vpack.c.bf16 %v961_v31, %v961_v31  ;;  %v12298_v2 = vpack.c.bf16 %v1027_v22, %v1027_v22  ;;  %v3546_v37 = vld [vmem:[#allocation2 + $0x54] sm:$0xe]  ;;  %v4303_v56 = vshrl.u32 %v11897_v50, 16 }
 0x1f3   :  { %v3663_v27 = vsel %vm15351_vm5, %v3246_v41, %v3662_v28  ;;  %3545 = vst [vmem:[#allocation2 + $0x50] sm:$0x3] %v3544_v42  ;;  %v2925_v4 = vshrl.u32 %v12264_v30, 16  ;;  %v2928_v5 = vshll.u32 %v12264_v30, 16  ;;  %v4305_v60 = vshll.u32 %v11897_v50, 16  ;;  %v16081_v41 = vpop.f32.mrb[56].mxu1 }
 0x1f4   :  { %3664 = vst [vmem:[#allocation2 + $0x11c] sm:$0x3] %v3663_v27  ;;  %v4312_v0 = vrot.slane %v4310_v46, 1  ;;  %v857_v12 = vadd.f32 %v15910_v19, %v15669_v45  ;;  %v2934_v35 = vshrl.u32 %v12265_v38, 16  ;;  %v2937_v28 = vshll.u32 %v12265_v38, 16  ;;  %v16083_v23 = vpop.f32.mrb[56].mxu0 }
 0x1f5   :  { %v2927_v55 = vrot.slane %v2925_v4, 6  ;;  %v2930_v49 = vrot.slane %v2928_v5, 7  ;;  %v3248_v13 = vshrl.u32 %v12298_v2, 16  ;;  %v3251_v57 = vshll.u32 %v12298_v2, 16  ;;  %v16085_v31 = vpop.f32.mrb[57].mxu1  ;;  %v16087_v22 = vpop.f32.mrb[57].mxu0 }
 0x1f6   :  { %v4307_v42 = vrot.slane %v4305_v60, 1  ;;  %v1029_v30 = vmax.f32 %v857_v12, 0.0  ;;  %19767 = vst [vmem:[#allocation50_spill] sm:$0xff] %v16085_v31  ;;  %19768 = vst [vmem:[#allocation56_spill] sm:$0xff] %v16087_v22  ;;  %v2936_v46 = vrot.slane %v2934_v35, 6  ;;  %v2939_v17 = vrot.slane %v2937_v28, 7 }
 0x1f7   :  { %v2931_v27 = vor.u32 %v2930_v49, %v2927_v55  ;;  %v3665_v19 = vld [vmem:[#allocation2 + $0x120] sm:$0xe]  ;;  %v16089_v4 = vpop.f32.mrb[58].mxu1  ;;  %v16091_v5 = vpop.f32.mrb[58].mxu0  ;;  %v3550_v38 = vld [vmem:[#allocation2 + $0x5c] sm:$0x3] }
 0x1f8   :  { %v3250_v39 = vrot.slane %v3248_v13, 6  ;;  %v3253_v6 = vrot.slane %v3251_v57, 7  ;;  %v4308_v3 = vor.u32 %v4307_v42, %v4303_v56  ;;  %v12299_v48 = vpack.c.bf16 %v1029_v30, %v1029_v30  ;;  %v3949_v2 = vld [vmem:[#allocation2 + $0x30] sm:$0x8]  ;;  %v16093_v60 = vpop.f32.mrb[59].mxu1  ;;  %v16095_v12 = vpop.f32.mrb[59].mxu0 }
 0x1f9   :  { %19769 = vst [vmem:[#allocation58_spill] sm:$0xff] %v16093_v60  ;;  %19770 = vst [vmem:[#allocation65_spill] sm:$0xff] %v16095_v12  ;;  %v2932_v31 = vrot.slane %v2931_v27, 4  ;;  %v3547_v35 = vsel %vm15701_vm11, %v2931_v27, %v3546_v37  ;;  %v2940_v55 = vor.u32 %v2939_v17, %v2936_v46  ;;  %v3730_v49 = vld [vmem:[#allocation2 + $0x34] sm:$0xf] }
 0x1fa   :  { %v13237_v28 = vld [vmem:[#allocation2 + $0x38] ss:$0 sps:$4 sm:$0x77]   ;;  %3548 = vst [vmem:[#allocation2 + $0x54] sm:$0xe] %v3547_v35  ;;  %v3254_v22 = vor.u32 %v3253_v6, %v3250_v39  ;;  %v4313_v47 = vsel %vm4265_vm14, %v4308_v3, %v4312_v0  ;;  %v3257_v13 = vshrl.u32 %v12299_v48, 16  ;;  %v12090_v30 = vcombine.low %v3949_v2, %v3730_v49 }
 0x1fb   :  { %v3260_v57 = vshll.u32 %v12299_v48, 16  ;;  %v2941_v56 = vsel %vm15712_vm12, %v2932_v31, %v2940_v55  ;;  %v2942_v42 = vrot.slane %v2940_v55, 4  ;;  %7214 = vmatprep.mubr.bf16.mxu1 %v4313_v47  ;;  %v13240_v12 = vld [vmem:[#allocation2 + $0x38] ss:$0 sps:$4 sm:$0x11]   ;;  %v6588_v0 = vrot.slane %v13237_v28, 3 }
 0x1fc   :  { %3549 = vst [vmem:[#allocation2 + $0x58] sm:$0xf] %v2941_v56  ;;  %v3255_v60 = vrot.slane %v3254_v22, 4  ;;  %v3666_v17 = vsel %vm15701_vm11, %v3254_v22, %v3665_v19  ;;  %v3259_v37 = vrot.slane %v3257_v13, 6  ;;  %7215 = vmatmul.mubr.bf16.gmra.mrb[140].mxu1 %v11897_v50  ;;  %v3729_v6 = vld [vmem:[#allocation2 + $0x30] sm:$0xf]  ;;  %v693_v22 = vadd.f32 %v15904_v34, %v15669_v45 }
 0x1fd   :  { %v3262_v27 = vrot.slane %v3260_v57, 7  ;;  %v3551_v3 = vsel %vm15351_vm5, %v2942_v42, %v3550_v38  ;;  %3667 = vst [vmem:[#allocation2 + $0x120] sm:$0xe] %v3666_v17  ;;  %v3669_v48 = vld [vmem:[#allocation2 + $0x128] sm:$0x3]  ;;  %v6587_v39 = vrot.slane %v12090_v30, 3  ;;  %v863_v50 = vadd.f32 %v15924_v51, %v15669_v45 }
 0x1fe   :  { %v16106_v31 = vpop.f32.mrb[60].mxu0  ;;  %v16108_v47 = vpop.f32.mrb[60].mxu1  ;;  %3552 = vst [vmem:[#allocation2 + $0x5c] sm:$0x3] %v3551_v3  ;;  %v385_v19 = vld [vmem:[#allocation2 + $0x134] sm:$0x6]  ;;  %v11898_v28 = vcombine.low %v3729_v6, %v3730_v49 }
 0x1ff   :  { %v3263_v46 = vor.u32 %v3262_v27, %v3259_v37  ;;  %v16114_v2 = vpop.f32.mrb[61].mxu0  ;;  %v16116_v38 = vpop.f32.mrb[61].mxu1  ;;  %v13270_v35 = vld [vmem:[#allocation13 + $0xa8] sm:$0xff]   ;;  %v6589_v55 = vsel %vm6574_vm13, %v6587_v39, %v6588_v0  ;;  %v4322_v13 = vshll.u32 %v13240_v12, 16  ;;  %v963_v51 = vmax.f32 %v693_v22, 0.0 }
 0x200   :  { %19771 = vst [vmem:[#allocation69_spill] sm:$0xff] %v16114_v2  ;;  %19772 = vst [vmem:[#allocation63_spill] sm:$0xff] %v16116_v38  ;;  %v16119_v57 = vpop.f32.mrb[62].mxu0  ;;  %v16121_v56 = vpop.f32.mrb[62].mxu1  ;;  %12477 = vmatprep.mubr.bf16.mxu0 %v6589_v55  ;;  %v1031_v30 = vmax.f32 %v863_v50, 0.0  ;;  %7458 = vmatpush1.bf16.msra.mxu1 %v13270_v35  ;;  %v4315_v27 = vshrl.u32 %v11898_v28, 16  ;;  %v697_v0 = vadd.f32 %v15914_v20, %v15669_v45 }
 0x201   :  { %v3264_v34 = vsel %vm15712_vm12, %v3255_v60, %v3263_v46  ;;  %v3265_v42 = vrot.slane %v3263_v46, 4  ;;  %v16125_v17 = vpop.f32.mrb[63].mxu1  ;;  %v16127_v37 = vpop.f32.mrb[63].mxu0  ;;  %v4317_v49 = vshll.u32 %v11898_v28, 16  ;;  %7459 = vmatprep.subr.bf16.mxu1 %v19440_v15  ;;  %v12266_v6 = vpack.c.bf16 %v963_v51, %v963_v51  ;;  %v3950_v50 = vld [vmem:[#allocation2 + $0x3c] sm:$0x8] }
 0x202   :  { %19773 = vst [vmem:[#allocation55_spill] sm:$0xff] %v16125_v17  ;;  %19774 = vst [vmem:[#allocation74_spill] sm:$0xff] %v16127_v37  ;;  %v12300_v3 = vpack.c.bf16 %v1031_v30, %v1031_v30  ;;  %v4324_v60 = vrot.slane %v4322_v13, 1  ;;  %v386_v46 = vsel %vm15402_vm8, 0, %v385_v19  ;;  %v867_v22 = vadd.f32 %v15938_v63, %v15669_v45  ;;  %v3553_v13 = vld [vmem:[#allocation2 + $0x60] sm:$0xe] }
 0x203   :  { %3668 = vst [vmem:[#allocation2 + $0x124] sm:$0xf] %v3264_v34  ;;  %v3670_v12 = vsel %vm15351_vm5, %v3265_v42, %v3669_v48  ;;  %v4319_v39 = vrot.slane %v4317_v49, 1  ;;  %v2944_v35 = vshrl.u32 %v12266_v6, 16  ;;  %v2947_v55 = vshll.u32 %v12266_v6, 16 }
 0x204   :  { %3671 = vst [vmem:[#allocation2 + $0x128] sm:$0x3] %v3670_v12  ;;  %v3267_v34 = vshrl.u32 %v12300_v3, 16  ;;  %v3270_v17 = vshll.u32 %v12300_v3, 16  ;;  %387 = vst [vmem:[#allocation2 + $0x134] sm:$0x6] %v386_v46 }
 0x205   :  { %v16138_v48 = vld [vmem:[#allocation2 + $0x40] sm:$0xf]  ;;  %v4320_v42 = vor.u32 %v4319_v39, %v4315_v27  ;;  %v965_v51 = vmax.f32 %v697_v0, 0.0  ;;  %v1033_v30 = vmax.f32 %v867_v22, 0.0  ;;  %v2946_v49 = vrot.slane %v2944_v35, 6  ;;  %v16140_v19 = vpop.f32.mrb[64].mxu1 }
 0x206   :  { %v2949_v20 = vrot.slane %v2947_v55, 7  ;;  %v3269_v12 = vrot.slane %v3267_v34, 6  ;;  %v3272_v38 = vrot.slane %v3270_v17, 7  ;;  %19775 = vst [vmem:[#allocation64_spill] sm:$0xff] %v16140_v19  ;;  %v238_v37 = vld [vmem:[#allocation2 + $0x6c] sm:$0x3]  ;;  %v12091_v39 = vcombine.low %v3950_v50, %v16138_v48 }
 0x207   :  { %v4325_v63 = vsel %vm4265_vm14, %v4320_v42, %v4324_v60  ;;  %v12267_v58 = vpack.c.bf16 %v965_v51, %v965_v51  ;;  %v12301_v6 = vpack.c.bf16 %v1033_v30, %v1033_v30  ;;  %v16143_v3 = vpop.f32.mrb[65].mxu1  ;;  %v13241_v27 = vld [vmem:[#allocation2 + $0x44] ss:$0 sps:$4 sm:$0x77]   ;;  %v13279_v22 = vld [vmem:[#allocation13 + $0xb0] sm:$0xff]  }
 0x208   :  { %19776 = vst [vmem:[#allocation73_spill] sm:$0xff] %v16143_v3  ;;  %v2950_v46 = vor.u32 %v2949_v20, %v2946_v49  ;;  %v3273_v9 = vor.u32 %v3272_v38, %v3269_v12  ;;  %7222 = vmatprep.mubr.bf16.mxu1 %v4325_v63  ;;  %v16146_v0 = vpop.f32.mrb[66].mxu1  ;;  %v337_v60 = vld [vmem:[#allocation2 + $0x74] sm:$0x6]  ;;  %7460 = vmatpush1.bf16.msra.mxu1 %v13279_v22  ;;  %v289_v63 = vld [vmem:[#allocation2 + $0x138] sm:$0x3] }
 0x209   :  { %19777 = vst [vmem:[#allocation79_spill] sm:$0xff] %v16146_v0  ;;  %v2953_v17 = vshrl.u32 %v12267_v58, 16  ;;  %v2956_v35 = vshll.u32 %v12267_v58, 16  ;;  %v3276_v55 = vshrl.u32 %v12301_v6, 16  ;;  %v3279_v34 = vshll.u32 %v12301_v6, 16  ;;  %7223 = vmatmul.mubr.bf16.gmra.mrb[144].mxu1 %v11898_v28  ;;  %v16148_v42 = vpop.f32.mrb[67].mxu1  ;;  %7461 = vmatprep.subr.bf16.mxu1 %v19440_v15 }
 0x20a   :  { %19778 = vst [vmem:[#allocation80_spill] sm:$0xff] %v16148_v42  ;;  %v2951_v51 = vrot.slane %v2950_v46, 4  ;;  %v3554_v30 = vsel %vm15701_vm11, %v2950_v46, %v3553_v13  ;;  %v3274_v38 = vrot.slane %v3273_v9, 4  ;;  %v3673_v49 = vsel %vm15701_vm11, %v3273_v9, %v3672_v44  ;;  %v3557_v28 = vld [vmem:[#allocation2 + $0x68] sm:$0x3] }
 0x20b   :  { %3555 = vst [vmem:[#allocation2 + $0x60] sm:$0xe] %v3554_v30  ;;  %3674 = vst [vmem:[#allocation2 + $0x12c] sm:$0xe] %v3673_v49  ;;  %v2955_v50 = vrot.slane %v2953_v17, 6  ;;  %v2958_v20 = vrot.slane %v2956_v35, 7  ;;  %v703_v44 = vadd.f32 %v15926_v25, %v15669_v45 }
 0x20c   :  { %v3278_v58 = vrot.slane %v3276_v55, 6  ;;  %v3281_v12 = vrot.slane %v3279_v34, 7  ;;  %v6590_v6 = vrot.slane %v12091_v39, 3  ;;  %v6591_v7 = vrot.slane %v13241_v27, 3  ;;  %v3731_v46 = vld [vmem:[#allocation2 + $0x3c] sm:$0xf] }
 0x20d   :  { %v239_v13 = vsel %vm15351_vm5, 0, %v238_v37  ;;  %v13245_v2 = vld [vmem:[#allocation2 + $0x44] ss:$0 sps:$4 sm:$0x11]   ;;  %v2959_v59 = vor.u32 %v2958_v20, %v2955_v50  ;;  %v16159_v22 = vpop.f32.mrb[68].mxu1  ;;  %v338_v39 = vsel %vm15402_vm8, 0, %v337_v60  ;;  %v707_v27 = vadd.f32 %v15940_v18, %v15669_v45 }
 0x20e   :  { %v3282_v9 = vor.u32 %v3281_v12, %v3278_v58  ;;  %240 = vst [vmem:[#allocation2 + $0x6c] sm:$0x3] %v239_v13  ;;  %19779 = vst [vmem:[#allocation83_spill] sm:$0xff] %v16159_v22  ;;  %v3676_v17 = vld [vmem:[#allocation2 + $0x134] sm:$0x3]  ;;  %v6592_v35 = vsel %vm6574_vm13, %v6590_v6, %v6591_v7  ;;  %v290_v37 = vsel %vm15351_vm5, 0, %v289_v63  ;;  %v873_v50 = vadd.f32 %v15962_v36, %v15669_v45 }
 0x20f   :  { %v16168_v55 = vpop.f32.mrb[69].mxu1  ;;  %v2960_v34 = vsel %vm15712_vm12, %v2951_v51, %v2959_v59  ;;  %v2961_v25 = vrot.slane %v2959_v59, 4  ;;  %12478 = vmatmul.mubr.bf16.gmra.mrb[72].mxu0 %v6592_v35  ;;  %339 = vst [vmem:[#allocation2 + $0x74] sm:$0x6] %v338_v39  ;;  %291 = vst [vmem:[#allocation2 + $0x138] sm:$0x3] %v290_v37 }
 0x210   :  { %19780 = vst [vmem:[#allocation81_spill] sm:$0xff] %v16168_v55  ;;  %v3283_v30 = vsel %vm15712_vm12, %v3274_v38, %v3282_v9  ;;  %v3284_v49 = vrot.slane %v3282_v9, 4  ;;  %v16174_v7 = vpop.f32.mrb[70].mxu1  ;;  %3556 = vst [vmem:[#allocation2 + $0x64] sm:$0xf] %v2960_v34  ;;  %v967_v18 = vmax.f32 %v703_v44, 0.0  ;;  %v11899_v38 = vcombine.low %v3731_v46, %v16138_v48 }
 0x211   :  { %19781 = vst [vmem:[#allocation71_spill] sm:$0xff] %v16174_v7  ;;  %3675 = vst [vmem:[#allocation2 + $0x130] sm:$0xf] %v3283_v30  ;;  %v969_v60 = vmax.f32 %v707_v27, 0.0  ;;  %v388_v20 = vld [vmem:[#allocation2 + $0x140] sm:$0x6]  ;;  %v3558_v59 = vsel %vm15351_vm5, %v2961_v25, %v3557_v28  ;;  %v877_v48 = vadd.f32 %v15971_v43, %v15669_v45 }
 0x212   :  { %v16178_v58 = vpop.f32.mrb[71].mxu1  ;;  %v3677_v51 = vsel %vm15351_vm5, %v3284_v49, %v3676_v17  ;;  %3559 = vst [vmem:[#allocation2 + $0x68] sm:$0x3] %v3558_v59  ;;  %v12268_v12 = vpack.c.bf16 %v967_v18, %v967_v18  ;;  %v1035_v6 = vmax.f32 %v873_v50, 0.0  ;;  %v4334_v13 = vshll.u32 %v13245_v2, 16  ;;  %v13290_v43 = vld [vmem:[#allocation13 + $0xb8] sm:$0xff]  }
 0x213   :  { %19782 = vst [vmem:[#allocation87_spill] sm:$0xff] %v16178_v58  ;;  %3678 = vst [vmem:[#allocation2 + $0x134] sm:$0x3] %v3677_v51  ;;  %v12269_v63 = vpack.c.bf16 %v969_v60, %v969_v60  ;;  %v4327_v9 = vshrl.u32 %v11899_v38, 16  ;;  %v4329_v44 = vshll.u32 %v11899_v38, 16  ;;  %v389_v36 = vsel %vm15402_vm8, 0, %v388_v20  ;;  %7462 = vmatpush1.bf16.msra.mxu1 %v13290_v43 }
 0x214   :  { %v2963_v35 = vshrl.u32 %v12268_v12, 16  ;;  %v2966_v39 = vshll.u32 %v12268_v12, 16  ;;  %390 = vst [vmem:[#allocation2 + $0x140] sm:$0x6] %v389_v36  ;;  %v12302_v37 = vpack.c.bf16 %v1035_v6, %v1035_v6  ;;  %v4336_v34 = vrot.slane %v4334_v13, 1  ;;  %7463 = vmatprep.subr.bf16.mxu1 %v19440_v15 }
 0x215   :  { %v2972_v27 = vshrl.u32 %v12269_v63, 16  ;;  %v2975_v28 = vshll.u32 %v12269_v63, 16  ;;  %v4331_v17 = vrot.slane %v4329_v44, 1  ;;  %v16189_v46 = vpop.f32.mrb[72].mxu1  ;;  %v3560_v60 = vld [vmem:[#allocation2 + $0x6c] sm:$0xe] }
 0x216   :  { %19783 = vst [vmem:[#allocation78_spill] sm:$0xff] %v16189_v46  ;;  %v2965_v25 = vrot.slane %v2963_v35, 6  ;;  %v2968_v2 = vrot.slane %v2966_v39, 7  ;;  %v13246_v18 = vld [vmem:[#allocation2 + $0x50] ss:$0 sps:$4 sm:$0x77]  }
 0x217   :  { %v2974_v30 = vrot.slane %v2972_v27, 6  ;;  %v2977_v49 = vrot.slane %v2975_v28, 7  ;;  %v3286_v50 = vshrl.u32 %v12302_v37, 16  ;;  %v3289_v20 = vshll.u32 %v12302_v37, 16  ;;  %v16191_v12 = vpop.f32.mrb[73].mxu1 }
 0x218   :  { %v4332_v59 = vor.u32 %v4331_v17, %v4327_v9  ;;  %v1037_v51 = vmax.f32 %v877_v48, 0.0  ;;  %19784 = vst [vmem:[#allocation89_spill] sm:$0xff] %v16191_v12  ;;  %v2969_v63 = vor.u32 %v2968_v2, %v2965_v25  ;;  %v3564_v13 = vld [vmem:[#allocation2 + $0x74] sm:$0x3]  ;;  %v3951_v44 = vld [vmem:[#allocation2 + $0x48] sm:$0x8] }
 0x219   :  { %v2978_v6 = vor.u32 %v2977_v49, %v2974_v30  ;;  %v16193_v36 = vpop.f32.mrb[74].mxu1  ;;  %v3288_v46 = vrot.slane %v3286_v50, 6  ;;  %v3291_v35 = vrot.slane %v3289_v20, 7  ;;  %v241_v28 = vld [vmem:[#allocation2 + $0x78] sm:$0x3] }
 0x21a   :  { %19785 = vst [vmem:[#allocation94_spill] sm:$0xff] %v16193_v36  ;;  %v4337_v39 = vsel %vm4265_vm14, %v4332_v59, %v4336_v34  ;;  %v12303_v27 = vpack.c.bf16 %v1037_v51, %v1037_v51  ;;  %v2970_v7 = vrot.slane %v2969_v63, 4  ;;  %v3561_v9 = vsel %vm15701_vm11, %v2969_v63, %v3560_v60  ;;  %v3679_v17 = vld [vmem:[#allocation2 + $0x138] sm:$0xe]  ;;  %v292_v48 = vld [vmem:[#allocation2 + $0x144] sm:$0x3] }
 0x21b   :  { %v2980_v37 = vrot.slane %v2978_v6, 4  ;;  %7230 = vmatprep.mubr.bf16.mxu1 %v4337_v39  ;;  %3562 = vst [vmem:[#allocation2 + $0x6c] sm:$0xe] %v3561_v9  ;;  %v3292_v25 = vor.u32 %v3291_v35, %v3288_v46  ;;  %v3734_v49 = vld [vmem:[#allocation2 + $0x4c] sm:$0xf]  ;;  %v16198_v50 = vpop.f32.mrb[75].mxu1  ;;  %v883_v9 = vadd.f32 %v15991_v32, %v15669_v45 }
 0x21c   :  { %v3295_v2 = vshrl.u32 %v12303_v27, 16  ;;  %v3298_v30 = vshll.u32 %v12303_v27, 16  ;;  %7231 = vmatmul.mubr.bf16.gmra.mrb[148].mxu1 %v11899_v38  ;;  %19786 = vst [vmem:[#allocation96_spill] sm:$0xff] %v16198_v50  ;;  %v2979_v34 = vsel %vm15712_vm12, %v2970_v7, %v2978_v6  ;;  %v12092_v20 = vcombine.low %v3951_v44, %v3734_v49  ;;  %v3733_v51 = vld [vmem:[#allocation2 + $0x48] sm:$0xf] }
 0x21d   :  { %v3565_v60 = vsel %vm15351_vm5, %v2980_v37, %v3564_v13  ;;  %v6594_v59 = vrot.slane %v13246_v18, 3  ;;  %v13249_v63 = vld [vmem:[#allocation2 + $0x50] ss:$0 sps:$4 sm:$0x11]   ;;  %3563 = vst [vmem:[#allocation2 + $0x70] sm:$0xf] %v2979_v34  ;;  %v3680_v38 = vsel %vm15701_vm11, %v3292_v25, %v3679_v17  ;;  %v713_v18 = vadd.f32 %v15964_v14, %v15669_v45 }
 0x21e   :  { %3566 = vst [vmem:[#allocation2 + $0x74] sm:$0x3] %v3565_v60  ;;  %v3293_v46 = vrot.slane %v3292_v25, 4  ;;  %v3297_v43 = vrot.slane %v3295_v2, 6  ;;  %v3300_v35 = vrot.slane %v3298_v30, 7  ;;  %v16207_v39 = vpop.f32.mrb[76].mxu1  ;;  %v11900_v30 = vcombine.low %v3733_v51, %v3734_v49 }
 0x21f   :  { %19787 = vst [vmem:[#allocation102_spill] sm:$0xff] %v16207_v39  ;;  %3681 = vst [vmem:[#allocation2 + $0x138] sm:$0xe] %v3680_v38  ;;  %v6593_v27 = vrot.slane %v12092_v20, 3  ;;  %v242_v7 = vsel %vm15351_vm5, 0, %v241_v28  ;;  %v293_v6 = vsel %vm15351_vm5, 0, %v292_v48 }
 0x220   :  { %v16215_v13 = vpop.f32.mrb[77].mxu1  ;;  %v3301_v44 = vor.u32 %v3300_v35, %v3297_v43  ;;  %243 = vst [vmem:[#allocation2 + $0x78] sm:$0x3] %v242_v7  ;;  %294 = vst [vmem:[#allocation2 + $0x144] sm:$0x3] %v293_v6  ;;  %v971_v2 = vmax.f32 %v713_v18, 0.0  ;;  %v717_v18 = vadd.f32 %v15973_v54, %v15669_v45 }
 0x221   :  { %19788 = vst [vmem:[#allocation95_spill] sm:$0xff] %v16215_v13  ;;  %v340_v37 = vld [vmem:[#allocation2 + $0x80] sm:$0x6]  ;;  %v16219_v17 = vpop.f32.mrb[78].mxu1  ;;  %v6595_v28 = vsel %vm6574_vm13, %v6593_v27, %v6594_v59  ;;  %v4346_v14 = vshll.u32 %v13249_v63, 16  ;;  %v1039_v20 = vmax.f32 %v883_v9, 0.0 }
 0x222   :  { %19789 = vst [vmem:[#allocation104_spill] sm:$0xff] %v16219_v17  ;;  %v3683_v25 = vld [vmem:[#allocation2 + $0x140] sm:$0x3]  ;;  %v16222_v34 = vpop.f32.mrb[79].mxu1  ;;  %v3302_v48 = vsel %vm15712_vm12, %v3293_v46, %v3301_v44  ;;  %v3303_v60 = vrot.slane %v3301_v44, 4  ;;  %12481 = vmatprep.mubr.bf16.mxu0 %v6595_v28  ;;  %v12270_v38 = vpack.c.bf16 %v971_v2, %v971_v2  ;;  %v4339_v32 = vshrl.u32 %v11900_v30, 16 }
 0x223   :  { %19790 = vst [vmem:[#allocation88_spill] sm:$0xff] %v16222_v34  ;;  %3682 = vst [vmem:[#allocation2 + $0x13c] sm:$0xf] %v3302_v48  ;;  %v4341_v43 = vshll.u32 %v11900_v30, 16  ;;  %v391_v35 = vld [vmem:[#allocation2 + $0x14c] sm:$0x6]  ;;  %v12304_v59 = vpack.c.bf16 %v1039_v20, %v1039_v20  ;;  %v887_v2 = vadd.f32 %v16004_v21, %v15669_v45 }
 0x224   :  { %v3684_v7 = vsel %vm15351_vm5, %v3303_v60, %v3683_v25  ;;  %v4348_v27 = vrot.slane %v4346_v14, 1  ;;  %v341_v49 = vsel %vm15402_vm8, 0, %v340_v37  ;;  %v2982_v51 = vshrl.u32 %v12270_v38, 16  ;;  %v3952_v6 = vld [vmem:[#allocation2 + $0x54] sm:$0x8] }
 0x225   :  { %3685 = vst [vmem:[#allocation2 + $0x140] sm:$0x3] %v3684_v7  ;;  %v2985_v63 = vshll.u32 %v12270_v38, 16  ;;  %v4343_v46 = vrot.slane %v4341_v43, 1  ;;  %342 = vst [vmem:[#allocation2 + $0x80] sm:$0x6] %v341_v49 }
 0x226   :  { %v13250_v44 = vld [vmem:[#allocation2 + $0x5c] ss:$0 sps:$4 sm:$0x77]   ;;  %v3305_v9 = vshrl.u32 %v12304_v59, 16  ;;  %v3308_v28 = vshll.u32 %v12304_v59, 16  ;;  %v392_v25 = vsel %vm15402_vm8, 0, %v391_v35 }
 0x227   :  { %v16236_v14 = vpop.f32.mrb[80].mxu1  ;;  %v2984_v37 = vrot.slane %v2982_v51, 6  ;;  %v2987_v48 = vrot.slane %v2985_v63, 7  ;;  %v3567_v60 = vld [vmem:[#allocation2 + $0x78] sm:$0xe]  ;;  %v4344_v20 = vor.u32 %v4343_v46, %v4339_v32  ;;  %v973_v7 = vmax.f32 %v717_v18, 0.0 }
 0x228   :  { %19791 = vst [vmem:[#allocation97_spill] sm:$0xff] %v16236_v14  ;;  %393 = vst [vmem:[#allocation2 + $0x14c] sm:$0x6] %v392_v25  ;;  %v16238_v38 = vld [vmem:[#allocation2 + $0x58] sm:$0xf]  ;;  %v3307_v54 = vrot.slane %v3305_v9, 6 }
 0x229   :  { %v3310_v43 = vrot.slane %v3308_v28, 7  ;;  %v1041_v49 = vmax.f32 %v887_v2, 0.0  ;;  %v2988_v59 = vor.u32 %v2987_v48, %v2984_v37  ;;  %v3686_v17 = vld [vmem:[#allocation2 + $0x144] sm:$0xe]  ;;  %v4349_v35 = vsel %vm4265_vm14, %v4344_v20, %v4348_v27  ;;  %v16241_v34 = vpop.f32.mrb[81].mxu1  ;;  %v13305_v20 = vld [vmem:[#allocation13 + $0xc0] sm:$0xff]  }
 0x22a   :  { %19792 = vst [vmem:[#allocation103_spill] sm:$0xff] %v16241_v34  ;;  %7238 = vmatprep.mubr.bf16.mxu1 %v4349_v35  ;;  %v12271_v14 = vpack.c.bf16 %v973_v7, %v973_v7  ;;  %v12093_v63 = vcombine.low %v3952_v6, %v16238_v38  ;;  %v244_v32 = vld [vmem:[#allocation2 + $0x84] sm:$0x3]  ;;  %v16244_v46 = vpop.f32.mrb[82].mxu1  ;;  %v6597_v18 = vrot.slane %v13250_v44, 3  ;;  %7464 = vmatpush1.bf16.msra.mxu1 %v13305_v20 }
 0x22b   :  { %v3311_v21 = vor.u32 %v3310_v43, %v3307_v54  ;;  %v12305_v51 = vpack.c.bf16 %v1041_v49, %v1041_v49  ;;  %19793 = vst [vmem:[#allocation105_spill] sm:$0xff] %v16244_v46  ;;  %v3568_v9 = vsel %vm15701_vm11, %v2988_v59, %v3567_v60  ;;  %7239 = vmatmul.mubr.bf16.gmra.mrb[152].mxu1 %v11900_v30  ;;  %v16248_v28 = vpop.f32.mrb[83].mxu1  ;;  %v2989_v25 = vrot.slane %v2988_v59, 4  ;;  %v343_v48 = vld [vmem:[#allocation2 + $0x8c] sm:$0x6] }
 0x22c   :  { %19794 = vst [vmem:[#allocation109_spill] sm:$0xff] %v16248_v28  ;;  %3569 = vst [vmem:[#allocation2 + $0x78] sm:$0xe] %v3568_v9  ;;  %v2991_v2 = vshrl.u32 %v12271_v14, 16  ;;  %v2994_v37 = vshll.u32 %v12271_v14, 16  ;;  %v6596_v43 = vrot.slane %v12093_v63, 3  ;;  %v723_v49 = vadd.f32 %v15993_v62, %v15669_v45  ;;  %7465 = vmatprep.subr.bf16.mxu1 %v19440_v15 }
 0x22d   :  { %v3687_v27 = vsel %vm15701_vm11, %v3311_v21, %v3686_v17  ;;  %v3314_v6 = vshrl.u32 %v12305_v51, 16  ;;  %v3317_v54 = vshll.u32 %v12305_v51, 16  ;;  %v245_v60 = vsel %vm15351_vm5, 0, %v244_v32  ;;  %v295_v59 = vld [vmem:[#allocation2 + $0x150] sm:$0x3] }
 0x22e   :  { %3688 = vst [vmem:[#allocation2 + $0x144] sm:$0xe] %v3687_v27  ;;  %v3312_v44 = vrot.slane %v3311_v21, 4  ;;  %v2993_v30 = vrot.slane %v2991_v2, 6  ;;  %v2996_v7 = vrot.slane %v2994_v37, 7  ;;  %v16256_v17 = vpop.f32.mrb[84].mxu1  ;;  %v6598_v9 = vsel %vm6574_vm13, %v6596_v43, %v6597_v18 }
 0x22f   :  { %246 = vst [vmem:[#allocation2 + $0x84] sm:$0x3] %v245_v60  ;;  %19795 = vst [vmem:[#allocation111_spill] sm:$0xff] %v16256_v17  ;;  %v3316_v14 = vrot.slane %v3314_v6, 6  ;;  %v3319_v35 = vrot.slane %v3317_v54, 7  ;;  %v344_v51 = vsel %vm15402_vm8, 0, %v343_v48  ;;  %12482 = vmatmul.mubr.bf16.gmra.mrb[76].mxu0 %v6598_v9  ;;  %v727_v62 = vadd.f32 %v16006_v1, %v15669_v45 }
 0x230   :  { %v2997_v21 = vor.u32 %v2996_v7, %v2993_v30  ;;  %v975_v63 = vmax.f32 %v723_v49, 0.0  ;;  %345 = vst [vmem:[#allocation2 + $0x8c] sm:$0x6] %v344_v51  ;;  %v13254_v32 = vld [vmem:[#allocation2 + $0x5c] ss:$0 sps:$4 sm:$0x11]   ;;  %v893_v48 = vadd.f32 %v16024_v16, %v15669_v45 }
 0x231   :  { %v16264_v27 = vpop.f32.mrb[85].mxu1  ;;  %v3571_v2 = vld [vmem:[#allocation2 + $0x80] sm:$0x3]  ;;  %v3320_v37 = vor.u32 %v3319_v35, %v3316_v14  ;;  %v296_v18 = vsel %vm15351_vm5, 0, %v295_v59  ;;  %v3735_v20 = vld [vmem:[#allocation2 + $0x54] sm:$0xf] }
 0x232   :  { %19796 = vst [vmem:[#allocation101_spill] sm:$0xff] %v16264_v27  ;;  %v16270_v6 = vpop.f32.mrb[86].mxu1  ;;  %v2998_v54 = vsel %vm15712_vm12, %v2989_v25, %v2997_v21  ;;  %v2999_v43 = vrot.slane %v2997_v21, 4  ;;  %v3690_v60 = vld [vmem:[#allocation2 + $0x14c] sm:$0x3]  ;;  %v12272_v1 = vpack.c.bf16 %v975_v63, %v975_v63  ;;  %v977_v30 = vmax.f32 %v727_v62, 0.0 }
 0x233   :  { %19797 = vst [vmem:[#allocation113_spill] sm:$0xff] %v16270_v6  ;;  %297 = vst [vmem:[#allocation2 + $0x150] sm:$0x3] %v296_v18  ;;  %v16274_v7 = vpop.f32.mrb[87].mxu1  ;;  %v3321_v49 = vsel %vm15712_vm12, %v3312_v44, %v3320_v37  ;;  %v3322_v59 = vrot.slane %v3320_v37, 4  ;;  %v1043_v14 = vmax.f32 %v893_v48, 0.0  ;;  %v11901_v63 = vcombine.low %v3735_v20, %v16238_v38 }
 0x234   :  { %19798 = vst [vmem:[#allocation114_spill] sm:$0xff] %v16274_v7  ;;  %3570 = vst [vmem:[#allocation2 + $0x7c] sm:$0xf] %v2998_v54  ;;  %v3572_v16 = vsel %vm15351_vm5, %v2999_v43, %v3571_v2  ;;  %v3001_v35 = vshrl.u32 %v12272_v1, 16  ;;  %v3004_v9 = vshll.u32 %v12272_v1, 16  ;;  %v12273_v25 = vpack.c.bf16 %v977_v30, %v977_v30 }
 0x235   :  { %3689 = vst [vmem:[#allocation2 + $0x148] sm:$0xf] %v3321_v49  ;;  %3573 = vst [vmem:[#allocation2 + $0x80] sm:$0x3] %v3572_v16  ;;  %v3691_v51 = vsel %vm15351_vm5, %v3322_v59, %v3690_v60  ;;  %v12306_v21 = vpack.c.bf16 %v1043_v14, %v1043_v14  ;;  %v4358_v62 = vshll.u32 %v13254_v32, 16  ;;  %v4351_v30 = vshrl.u32 %v11901_v63, 16 }
 0x236   :  { %v394_v18 = vld [vmem:[#allocation2 + $0x158] sm:$0x6]  ;;  %3692 = vst [vmem:[#allocation2 + $0x14c] sm:$0x3] %v3691_v51  ;;  %v3003_v44 = vrot.slane %v3001_v35, 6  ;;  %v3006_v37 = vrot.slane %v3004_v9, 7 }
 0x237   :  { %v3010_v48 = vshrl.u32 %v12273_v25, 16  ;;  %v3013_v54 = vshll.u32 %v12273_v25, 16  ;;  %v3574_v2 = vld [vmem:[#allocation2 + $0x84] sm:$0xe]  ;;  %v3324_v43 = vshrl.u32 %v12306_v21, 16  ;;  %v3327_v1 = vshll.u32 %v12306_v21, 16 }
 0x238   :  { %v4353_v49 = vshll.u32 %v11901_v63, 16  ;;  %v3007_v16 = vor.u32 %v3006_v37, %v3003_v44  ;;  %v4360_v59 = vrot.slane %v4358_v62, 1  ;;  %v395_v35 = vsel %vm15402_vm8, 0, %v394_v18  ;;  %v3953_v9 = vld [vmem:[#allocation2 + $0x60] sm:$0x8] }
 0x239   :  { %v3012_v7 = vrot.slane %v3010_v48, 6  ;;  %v3015_v60 = vrot.slane %v3013_v54, 7  ;;  %v3326_v38 = vrot.slane %v3324_v43, 6  ;;  %v3329_v32 = vrot.slane %v3327_v1, 7  ;;  %396 = vst [vmem:[#allocation2 + $0x158] sm:$0x6] %v395_v35 }
 0x23a   :  { %v4355_v20 = vrot.slane %v4353_v49, 1  ;;  %v3008_v25 = vrot.slane %v3007_v16, 4  ;;  %v3575_v51 = vsel %vm15701_vm11, %v3007_v16, %v3574_v2  ;;  %v897_v44 = vadd.f32 %v16033_v26, %v15669_v45  ;;  %v3738_v62 = vld [vmem:[#allocation2 + $0x64] sm:$0xf]  ;;  %v247_v37 = vld [vmem:[#allocation2 + $0x90] sm:$0x3] }
 0x23b   :  { %v3016_v21 = vor.u32 %v3015_v60, %v3012_v7  ;;  %v298_v48 = vld [vmem:[#allocation2 + $0x15c] sm:$0x3]  ;;  %3576 = vst [vmem:[#allocation2 + $0x84] sm:$0xe] %v3575_v51  ;;  %v3578_v54 = vld [vmem:[#allocation2 + $0x8c] sm:$0x3]  ;;  %v3330_v43 = vor.u32 %v3329_v32, %v3326_v38  ;;  %v12094_v16 = vcombine.low %v3953_v9, %v3738_v62 }
 0x23c   :  { %v4356_v1 = vor.u32 %v4355_v20, %v4351_v30  ;;  %v13255_v49 = vld [vmem:[#allocation2 + $0x68] ss:$0 sps:$4 sm:$0x77]   ;;  %v1045_v7 = vmax.f32 %v897_v44, 0.0  ;;  %v3737_v20 = vld [vmem:[#allocation2 + $0x60] sm:$0xf] }
 0x23d   :  { %v3018_v2 = vrot.slane %v3016_v21, 4  ;;  %v6599_v32 = vrot.slane %v12094_v16, 3  ;;  %v299_v9 = vsel %vm15351_vm5, 0, %v298_v48  ;;  %v3331_v48 = vrot.slane %v3330_v43, 4  ;;  %v13531_v28 = vld [vmem:[#allocation2 + $0x7c] sm:$0xf] }
 0x23e   :  { %v4361_v60 = vsel %vm4265_vm14, %v4356_v1, %v4360_v59  ;;  %v12307_v38 = vpack.c.bf16 %v1045_v7, %v1045_v7  ;;  %v733_v59 = vadd.f32 %v16026_v24, %v15669_v45  ;;  %300 = vst [vmem:[#allocation2 + $0x15c] sm:$0x3] %v299_v9  ;;  %v346_v24 = vld [vmem:[#allocation2 + $0x98] sm:$0x6] }
 0x23f   :  { %v16283_v6 = vpop.f32.mrb[88].mxu1  ;;  %v3579_v30 = vsel %vm15351_vm5, %v3018_v2, %v3578_v54  ;;  %7246 = vmatprep.mubr.bf16.mxu1 %v4361_v60  ;;  %v903_v54 = vadd.f32 %v16049_v53, %v15669_v45  ;;  %v16319_v2 = vcombine.low %v3737_v20, %v3738_v62  ;;  %v347_v62 = vsel %vm15402_vm8, 0, %v346_v24  ;;  %v397_v20 = vld [vmem:[#allocation2 + $0x164] sm:$0x6] }
 0x240   :  { %19799 = vst [vmem:[#allocation115_spill] sm:$0xff] %v16283_v6  ;;  %v16285_v14 = vpop.f32.mrb[89].mxu1  ;;  %v3693_v6 = vld [vmem:[#allocation2 + $0x150] sm:$0xe]  ;;  %3580 = vst [vmem:[#allocation2 + $0x8c] sm:$0x3] %v3579_v30  ;;  %7247 = vmatmul.mubr.bf16.gmra.mrb[156].mxu1 %v11901_v63 }
 0x241   :  { %19800 = vst [vmem:[#allocation116_spill] sm:$0xff] %v16285_v14  ;;  %v16293_v18 = vpop.f32.mrb[90].mxu1  ;;  %v3017_v14 = vsel %vm15712_vm12, %v3008_v25, %v3016_v21  ;;  %v3694_v26 = vsel %vm15701_vm11, %v3330_v43, %v3693_v6  ;;  %v248_v6 = vsel %vm15351_vm5, 0, %v247_v37  ;;  %v3333_v21 = vshrl.u32 %v12307_v38, 16  ;;  %348 = vst [vmem:[#allocation2 + $0x98] sm:$0x6] %v347_v62 }
 0x242   :  { %19801 = vst [vmem:[#allocation117_spill] sm:$0xff] %v16293_v18  ;;  %3577 = vst [vmem:[#allocation2 + $0x88] sm:$0xf] %v3017_v14  ;;  %v16300_v35 = vpop.f32.mrb[91].mxu1  ;;  %v6600_v14 = vrot.slane %v13255_v49, 3  ;;  %v3336_v44 = vshll.u32 %v12307_v38, 16 }
 0x243   :  { %19802 = vst [vmem:[#allocation118_spill] sm:$0xff] %v16300_v35  ;;  %3695 = vst [vmem:[#allocation2 + $0x150] sm:$0xe] %v3694_v26  ;;  %v13258_v63 = vld [vmem:[#allocation2 + $0x68] ss:$0 sps:$4 sm:$0x11]  }
 0x244   :  { %249 = vst [vmem:[#allocation2 + $0x90] sm:$0x3] %v248_v6  ;;  %v6601_v37 = vsel %vm6574_vm13, %v6599_v32, %v6600_v14  ;;  %v979_v49 = vmax.f32 %v733_v59, 0.0  ;;  %v3335_v16 = vrot.slane %v3333_v21, 6  ;;  %v3338_v26 = vrot.slane %v3336_v44, 7  ;;  %v13318_v6 = vld [vmem:[#allocation13 + $0xc8] sm:$0xff]  }
 0x245   :  { %12485 = vmatprep.mubr.bf16.mxu0 %v6601_v37  ;;  %v1047_v60 = vmax.f32 %v903_v54, 0.0  ;;  %v4363_v38 = vshrl.u32 %v16319_v2, 16  ;;  %v4365_v53 = vshll.u32 %v16319_v2, 16  ;;  %v4370_v32 = vshll.u32 %v13258_v63, 16  ;;  %v3697_v14 = vld [vmem:[#allocation2 + $0x158] sm:$0x3]  ;;  %7466 = vmatpush1.bf16.msra.mxu1 %v13318_v6 }
 0x246   :  { %v12274_v30 = vpack.c.bf16 %v979_v49, %v979_v49  ;;  %v3339_v9 = vor.u32 %v3338_v26, %v3335_v16  ;;  %v737_v44 = vadd.f32 %v16039_v10, %v15669_v45  ;;  %7467 = vmatprep.subr.bf16.mxu1 %v19440_v15  ;;  %v13520_v18 = vld [vmem:[#allocation2 + $0x20] ss:$0 sps:$4 sm:$0x11]   ;;  %v13528_v17 = vld [vmem:[#allocation2 + $0x50] ss:$0 sps:$4 sm:$0x11]  }
 0x247   :  { %v16304_v25 = vpop.f32.mrb[92].mxu1  ;;  %v4367_v21 = vrot.slane %v4365_v53, 1  ;;  %v907_v53 = vadd.f32 %v16062_v11, %v15669_v45  ;;  %v4372_v62 = vrot.slane %v4370_v32, 1  ;;  %v13259_v11 = vld [vmem:[#allocation2 + $0x74] ss:$0 sps:$4 sm:$0x77]  }
 0x248   :  { %19803 = vst [vmem:[#allocation119_spill] sm:$0xff] %v16304_v25  ;;  %v16312_v51 = vpop.f32.mrb[93].mxu1  ;;  %v3020_v59 = vshrl.u32 %v12274_v30, 16  ;;  %v3023_v43 = vshll.u32 %v12274_v30, 16  ;;  %v3340_v54 = vsel %vm15712_vm12, %v3331_v48, %v3339_v9  ;;  %v3341_v37 = vrot.slane %v3339_v9, 4 }
 0x249   :  { %19804 = vst [vmem:[#allocation120_spill] sm:$0xff] %v16312_v51  ;;  %v16316_v1 = vpop.f32.mrb[94].mxu1  ;;  %3696 = vst [vmem:[#allocation2 + $0x154] sm:$0xf] %v3340_v54  ;;  %v4368_v30 = vor.u32 %v4367_v21, %v4363_v38  ;;  %v3700_v9 = vld [vmem:[#allocation2 + $0x15c] sm:$0xe] }
 0x24a   :  { %19805 = vst [vmem:[#allocation121_spill] sm:$0xff] %v16316_v1  ;;  %v16321_v7 = vpop.f32.mrb[95].mxu1  ;;  %v12308_v1 = vpack.c.bf16 %v1047_v60, %v1047_v60  ;;  %v3022_v24 = vrot.slane %v3020_v59, 6  ;;  %v3025_v26 = vrot.slane %v3023_v43, 7  ;;  %v3698_v10 = vsel %vm15351_vm5, %v3341_v37, %v3697_v14  ;;  %v13533_v58 = vld [vmem:[#allocation2 + $0x88] sm:$0xf] }
 0x24b   :  { %19806 = vst [vmem:[#allocation122_spill] sm:$0xff] %v16321_v7  ;;  %v3581_v60 = vld [vmem:[#allocation2 + $0x90] sm:$0xe]  ;;  %3699 = vst [vmem:[#allocation2 + $0x158] sm:$0x3] %v3698_v10  ;;  %v398_v54 = vsel %vm15402_vm8, 0, %v397_v20  ;;  %v4373_v21 = vsel %vm4265_vm14, %v4368_v30, %v4372_v62 }
 0x24c   :  { %v3343_v49 = vshrl.u32 %v12308_v1, 16  ;;  %v3346_v16 = vshll.u32 %v12308_v1, 16  ;;  %v3026_v1 = vor.u32 %v3025_v26, %v3022_v24  ;;  %v1049_v59 = vmax.f32 %v907_v53, 0.0  ;;  %399 = vst [vmem:[#allocation2 + $0x164] sm:$0x6] %v398_v54  ;;  %7254 = vmatprep.mubr.bf16.mxu1 %v4373_v21 }
 0x24d   :  { %7255 = vmatmul.mubr.bf16.gmra.mrb[160].mxu1 %v16319_v2  ;;  %v6603_v62 = vrot.slane %v13259_v11, 3  ;;  %v743_v54 = vadd.f32 %v16051_v40, %v15669_v45  ;;  %v747_v40 = vadd.f32 %v16064_v8, %v15669_v45  ;;  %v4798_v46 = vrot.slane %v13528_v17, 1  ;;  %v13391_v13 = vld [vmem:[#allocation2 + $0x8c] ss:$0 sps:$4 sm:$0x33]  }
 0x24e   :  { %v3345_v6 = vrot.slane %v3343_v49, 6  ;;  %v3348_v48 = vrot.slane %v3346_v16, 7  ;;  %v3582_v14 = vsel %vm15701_vm11, %v3026_v1, %v3581_v60  ;;  %v12309_v37 = vpack.c.bf16 %v1049_v59, %v1049_v59  ;;  %v3954_v49 = vld [vmem:[#allocation2 + $0x6c] sm:$0x8]  ;;  %v250_v16 = vld [vmem:[#allocation2 + $0x9c] sm:$0x3] }
 0x24f   :  { %v16331_v63 = vpop.f32.mrb[96].mxu1  ;;  %v3027_v20 = vrot.slane %v3026_v1, 4  ;;  %3583 = vst [vmem:[#allocation2 + $0x90] sm:$0xe] %v3582_v14  ;;  %v251_v1 = vsel %vm15351_vm5, 0, %v250_v16 }
 0x250   :  { %19807 = vst [vmem:[#allocation123_spill] sm:$0xff] %v16331_v63  ;;  %v981_v63 = vmax.f32 %v737_v44, 0.0  ;;  %v16340_v43 = vpop.f32.mrb[97].mxu1  ;;  %v3349_v38 = vor.u32 %v3348_v48, %v3345_v6  ;;  %v3740_v44 = vld [vmem:[#allocation2 + $0x70] sm:$0xf]  ;;  %v3352_v60 = vshrl.u32 %v12309_v37, 16 }
 0x251   :  { %19808 = vst [vmem:[#allocation124_spill] sm:$0xff] %v16340_v43  ;;  %v16343_v7 = vpop.f32.mrb[98].mxu1  ;;  %v3355_v6 = vshll.u32 %v12309_v37, 16  ;;  %v12095_v48 = vcombine.low %v3954_v49, %v3740_v44  ;;  %v301_v59 = vld [vmem:[#allocation2 + $0x168] sm:$0x3] }
 0x252   :  { %19809 = vst [vmem:[#allocation125_spill] sm:$0xff] %v16343_v7  ;;  %v12275_v32 = vpack.c.bf16 %v981_v63, %v981_v63  ;;  %v3350_v24 = vrot.slane %v3349_v38, 4  ;;  %v3701_v26 = vsel %vm15701_vm11, %v3349_v38, %v3700_v9  ;;  %v16350_v30 = vpop.f32.mrb[99].mxu1  ;;  %v349_v63 = vld [vmem:[#allocation2 + $0xa4] sm:$0x6]  ;;  %v3354_v21 = vrot.slane %v3352_v60, 6 }
 0x253   :  { %19810 = vst [vmem:[#allocation126_spill] sm:$0xff] %v16350_v30  ;;  %3702 = vst [vmem:[#allocation2 + $0x15c] sm:$0xe] %v3701_v26  ;;  %v3357_v14 = vrot.slane %v3355_v6, 7  ;;  %v983_v26 = vmax.f32 %v743_v54, 0.0  ;;  %v350_v37 = vsel %vm15402_vm8, 0, %v349_v63  ;;  %v913_v63 = vadd.f32 %v16081_v41, %v15669_v45 }
 0x254   :  { %v3029_v53 = vshrl.u32 %v12275_v32, 16  ;;  %v3032_v10 = vshll.u32 %v12275_v32, 16  ;;  %252 = vst [vmem:[#allocation2 + $0x9c] sm:$0x3] %v251_v1  ;;  %v6602_v32 = vrot.slane %v12095_v48, 3  ;;  %v13331_v7 = vld [vmem:[#allocation13 + $0xd0] sm:$0xff]  }
 0x255   :  { %v3358_v16 = vor.u32 %v3357_v14, %v3354_v21  ;;  %351 = vst [vmem:[#allocation2 + $0xa4] sm:$0x6] %v350_v37  ;;  %v3585_v60 = vld [vmem:[#allocation2 + $0x98] sm:$0x3]  ;;  %v3704_v6 = vld [vmem:[#allocation2 + $0x164] sm:$0x3]  ;;  %v12276_v1 = vpack.c.bf16 %v983_v26, %v983_v26  ;;  %7468 = vmatpush1.bf16.msra.mxu1 %v13331_v7 }
 0x256   :  { %v3031_v2 = vrot.slane %v3029_v53, 6  ;;  %v3034_v38 = vrot.slane %v3032_v10, 7  ;;  %v302_v53 = vsel %vm15351_vm5, 0, %v301_v59  ;;  %v6604_v48 = vsel %vm6574_vm13, %v6602_v32, %v6603_v62  ;;  %v3739_v54 = vld [vmem:[#allocation2 + $0x6c] sm:$0xf]  ;;  %7469 = vmatprep.subr.bf16.mxu1 %v19440_v15 }
 0x257   :  { %v16356_v9 = vpop.f32.mrb[100].mxu1  ;;  %303 = vst [vmem:[#allocation2 + $0x168] sm:$0x3] %v302_v53  ;;  %v3359_v8 = vsel %vm15712_vm12, %v3350_v24, %v3358_v16  ;;  %v3360_v59 = vrot.slane %v3358_v16, 4  ;;  %12486 = vmatmul.mubr.bf16.gmra.mrb[80].mxu0 %v6604_v48  ;;  %v3039_v14 = vshrl.u32 %v12276_v1, 16  ;;  %v3042_v62 = vshll.u32 %v12276_v1, 16 }
 0x258   :  { %19811 = vst [vmem:[#allocation127_spill] sm:$0xff] %v16356_v9  ;;  %v16360_v11 = vpop.f32.mrb[101].mxu1  ;;  %v3035_v49 = vor.u32 %v3034_v38, %v3031_v2  ;;  %v13263_v21 = vld [vmem:[#allocation2 + $0x74] ss:$0 sps:$4 sm:$0x11]   ;;  %v985_v32 = vmax.f32 %v747_v40, 0.0 }
 0x259   :  { %19812 = vst [vmem:[#allocation128_spill] sm:$0xff] %v16360_v11  ;;  %v16366_v10 = vpop.f32.mrb[102].mxu1  ;;  %3703 = vst [vmem:[#allocation2 + $0x160] sm:$0xf] %v3359_v8  ;;  %v1051_v26 = vmax.f32 %v913_v63, 0.0  ;;  %v3705_v37 = vsel %vm15351_vm5, %v3360_v59, %v3704_v6  ;;  %v3041_v24 = vrot.slane %v3039_v14, 6 }
 0x25a   :  { %19813 = vst [vmem:[#allocation129_spill] sm:$0xff] %v16366_v10  ;;  %v3036_v2 = vsel %vm15712_vm12, %v3027_v20, %v3035_v49  ;;  %v3037_v38 = vrot.slane %v3035_v49, 4  ;;  %v11903_v20 = vcombine.low %v3739_v54, %v3740_v44  ;;  %v16379_v49 = vpop.f32.mrb[103].mxu1  ;;  %3706 = vst [vmem:[#allocation2 + $0x164] sm:$0x3] %v3705_v37  ;;  %v3044_v16 = vrot.slane %v3042_v62, 7 }
 0x25b   :  { %3584 = vst [vmem:[#allocation2 + $0x94] sm:$0xf] %v3036_v2  ;;  %19814 = vst [vmem:[#allocation130_spill] sm:$0xff] %v16379_v49  ;;  %v12277_v53 = vpack.c.bf16 %v985_v32, %v985_v32  ;;  %v12310_v48 = vpack.c.bf16 %v1051_v26, %v1051_v26  ;;  %v400_v2 = vld [vmem:[#allocation2 + $0x170] sm:$0x6]  ;;  %v4382_v63 = vshll.u32 %v13263_v21, 16 }
 0x25c   :  { %v3586_v41 = vsel %vm15351_vm5, %v3037_v38, %v3585_v60  ;;  %v3588_v8 = vld [vmem:[#allocation2 + $0x9c] sm:$0xe]  ;;  %v4375_v1 = vshrl.u32 %v11903_v20, 16  ;;  %v4377_v40 = vshll.u32 %v11903_v20, 16  ;;  %v3045_v10 = vor.u32 %v3044_v16, %v3041_v24  ;;  %v253_v14 = vld [vmem:[#allocation2 + $0xa8] sm:$0x3] }
 0x25d   :  { %3587 = vst [vmem:[#allocation2 + $0x98] sm:$0x3] %v3586_v41  ;;  %v3048_v9 = vshrl.u32 %v12277_v53, 16  ;;  %v3051_v60 = vshll.u32 %v12277_v53, 16  ;;  %v3362_v38 = vshrl.u32 %v12310_v48, 16  ;;  %v3365_v6 = vshll.u32 %v12310_v48, 16 }
 0x25e   :  { %v4379_v44 = vrot.slane %v4377_v40, 1  ;;  %v4384_v54 = vrot.slane %v4382_v63, 1  ;;  %v401_v59 = vsel %vm15402_vm8, 0, %v400_v2  ;;  %v3046_v62 = vrot.slane %v3045_v10, 4  ;;  %v352_v53 = vld [vmem:[#allocation2 + $0xb0] sm:$0x6] }
 0x25f   :  { %v3589_v32 = vsel %vm15701_vm11, %v3045_v10, %v3588_v8  ;;  %v3050_v26 = vrot.slane %v3048_v9, 6  ;;  %v3053_v41 = vrot.slane %v3051_v60, 7  ;;  %402 = vst [vmem:[#allocation2 + $0x170] sm:$0x6] %v401_v59  ;;  %v3364_v21 = vrot.slane %v3362_v38, 6  ;;  %v16395_v38 = vpop.f32.mrb[104].mxu1 }
 0x260   :  { %3590 = vst [vmem:[#allocation2 + $0x9c] sm:$0xe] %v3589_v32  ;;  %v3367_v37 = vrot.slane %v3365_v6, 7  ;;  %v4380_v24 = vor.u32 %v4379_v44, %v4375_v1  ;;  %v917_v16 = vadd.f32 %v16089_v4, %v15669_v45  ;;  %v3707_v2 = vld [vmem:[#allocation2 + $0x168] sm:$0xe]  ;;  %v254_v40 = vsel %vm15351_vm5, 0, %v253_v14 }
 0x261   :  { %v3054_v48 = vor.u32 %v3053_v41, %v3050_v26  ;;  %v13264_v10 = vld [vmem:[#allocation2 + $0x80] ss:$0 sps:$4 sm:$0x77]   ;;  %v3592_v9 = vld [vmem:[#allocation2 + $0xa4] sm:$0x3]  ;;  %v753_v1 = vadd.f32 %v16083_v23, %v15669_v45  ;;  %19815 = vst [vmem:[#allocation131_spill] sm:$0xff] %v16395_v38  ;;  %v757_v32 = vadd.f32 %v16091_v5, %v15669_v45 }
 0x262   :  { %v3368_v8 = vor.u32 %v3367_v37, %v3364_v21  ;;  %v4385_v7 = vsel %vm4265_vm14, %v4380_v24, %v4384_v54  ;;  %v1053_v63 = vmax.f32 %v917_v16, 0.0  ;;  %255 = vst [vmem:[#allocation2 + $0xa8] sm:$0x3] %v254_v40  ;;  %v3955_v54 = vld [vmem:[#allocation2 + $0x78] sm:$0x8]  ;;  %v16399_v14 = vpop.f32.mrb[105].mxu1 }
 0x263   :  { %v3055_v4 = vsel %vm15712_vm12, %v3046_v62, %v3054_v48  ;;  %v3056_v60 = vrot.slane %v3054_v48, 4  ;;  %7262 = vmatprep.mubr.bf16.mxu1 %v4385_v7  ;;  %v987_v59 = vmax.f32 %v753_v1, 0.0  ;;  %19816 = vst [vmem:[#allocation132_spill] sm:$0xff] %v16399_v14  ;;  %v353_v62 = vsel %vm15402_vm8, 0, %v352_v53  ;;  %v3742_v37 = vld [vmem:[#allocation2 + $0x7c] sm:$0xf] }
 0x264   :  { %3591 = vst [vmem:[#allocation2 + $0xa0] sm:$0xf] %v3055_v4  ;;  %v3708_v6 = vsel %vm15701_vm11, %v3368_v8, %v3707_v2  ;;  %v12311_v44 = vpack.c.bf16 %v1053_v63, %v1053_v63  ;;  %7263 = vmatmul.mubr.bf16.gmra.mrb[164].mxu1 %v11903_v20  ;;  %354 = vst [vmem:[#allocation2 + $0xb0] sm:$0x6] %v353_v62  ;;  %v256_v20 = vld [vmem:[#allocation2 + $0xb4] sm:$0x3]  ;;  %v12096_v48 = vcombine.low %v3955_v54, %v3742_v37 }
 0x265   :  { %v3593_v23 = vsel %vm15351_vm5, %v3056_v60, %v3592_v9  ;;  %3709 = vst [vmem:[#allocation2 + $0x168] sm:$0xe] %v3708_v6  ;;  %v12278_v21 = vpack.c.bf16 %v987_v59, %v987_v59  ;;  %v3369_v24 = vrot.slane %v3368_v8, 4  ;;  %v989_v16 = vmax.f32 %v757_v32, 0.0  ;;  %v16407_v40 = vpop.f32.mrb[106].mxu1 }
 0x266   :  { %3594 = vst [vmem:[#allocation2 + $0xa4] sm:$0x3] %v3593_v23  ;;  %v3371_v26 = vshrl.u32 %v12311_v44, 16  ;;  %v3374_v41 = vshll.u32 %v12311_v44, 16  ;;  %v6606_v2 = vrot.slane %v13264_v10, 3  ;;  %19817 = vst [vmem:[#allocation133_spill] sm:$0xff] %v16407_v40  ;;  %v763_v10 = vadd.f32 %v16106_v31, %v15669_v45 }
 0x267   :  { %v3058_v63 = vshrl.u32 %v12278_v21, 16  ;;  %v3061_v53 = vshll.u32 %v12278_v21, 16  ;;  %v304_v1 = vld [vmem:[#allocation2 + $0x174] sm:$0x3]  ;;  %v12279_v4 = vpack.c.bf16 %v989_v16, %v989_v16  ;;  %v6605_v5 = vrot.slane %v12096_v48, 3  ;;  %v16411_v6 = vpop.f32.mrb[107].mxu1 }
 0x268   :  { %v3373_v9 = vrot.slane %v3371_v26, 6  ;;  %v3376_v7 = vrot.slane %v3374_v41, 7  ;;  %v257_v60 = vsel %vm15351_vm5, 0, %v256_v20  ;;  %19818 = vst [vmem:[#allocation134_spill] sm:$0xff] %v16411_v6  ;;  %v3711_v59 = vld [vmem:[#allocation2 + $0x170] sm:$0x3] }
 0x269   :  { %v3060_v8 = vrot.slane %v3058_v63, 6  ;;  %v3063_v23 = vrot.slane %v3061_v53, 7  ;;  %258 = vst [vmem:[#allocation2 + $0xb4] sm:$0x3] %v257_v60  ;;  %v3595_v54 = vld [vmem:[#allocation2 + $0xa8] sm:$0xe]  ;;  %v6607_v26 = vsel %vm6574_vm13, %v6605_v5, %v6606_v2  ;;  %v923_v2 = vadd.f32 %v16108_v47, %v15669_v45 }
 0x26a   :  { %v3377_v44 = vor.u32 %v3376_v7, %v3373_v9  ;;  %v3067_v62 = vshrl.u32 %v12279_v4, 16  ;;  %v3070_v32 = vshll.u32 %v12279_v4, 16  ;;  %v305_v41 = vsel %vm15351_vm5, 0, %v304_v1  ;;  %v16418_v21 = vpop.f32.mrb[108].mxu1  ;;  %12489 = vmatprep.mubr.bf16.mxu0 %v6607_v26  ;;  %v3741_v1 = vld [vmem:[#allocation2 + $0x78] sm:$0xf] }
 0x26b   :  { %19819 = vst [vmem:[#allocation135_spill] sm:$0xff] %v16418_v21  ;;  %v3064_v48 = vor.u32 %v3063_v23, %v3060_v8  ;;  %v991_v9 = vmax.f32 %v763_v10, 0.0  ;;  %306 = vst [vmem:[#allocation2 + $0x174] sm:$0x3] %v305_v41  ;;  %v16422_v31 = vpop.f32.mrb[109].mxu1  ;;  %v1055_v8 = vmax.f32 %v923_v2, 0.0  ;;  %v11904_v26 = vcombine.low %v3741_v1, %v3742_v37 }
 0x26c   :  { %v3378_v20 = vsel %vm15712_vm12, %v3369_v24, %v3377_v44  ;;  %v3379_v16 = vrot.slane %v3377_v44, 4  ;;  %v13267_v7 = vld [vmem:[#allocation2 + $0x80] ss:$0 sps:$4 sm:$0x11]   ;;  %19820 = vst [vmem:[#allocation136_spill] sm:$0xff] %v16422_v31  ;;  %v3069_v63 = vrot.slane %v3067_v62, 6 }
 0x26d   :  { %3710 = vst [vmem:[#allocation2 + $0x16c] sm:$0xf] %v3378_v20  ;;  %v3072_v53 = vrot.slane %v3070_v32, 7  ;;  %v3065_v5 = vrot.slane %v3064_v48, 4  ;;  %v3596_v24 = vsel %vm15701_vm11, %v3064_v48, %v3595_v54  ;;  %v12280_v60 = vpack.c.bf16 %v991_v9, %v991_v9  ;;  %v16430_v23 = vpop.f32.mrb[110].mxu1 }
 0x26e   :  { %v3712_v4 = vsel %vm15351_vm5, %v3379_v16, %v3711_v59  ;;  %3597 = vst [vmem:[#allocation2 + $0xa8] sm:$0xe] %v3596_v24  ;;  %19821 = vst [vmem:[#allocation137_spill] sm:$0xff] %v16430_v23  ;;  %v3599_v10 = vld [vmem:[#allocation2 + $0xb0] sm:$0x3]  ;;  %v4394_v47 = vshll.u32 %v13267_v7, 16  ;;  %v12312_v16 = vpack.c.bf16 %v1055_v8, %v1055_v8 }
 0x26f   :  { %3713 = vst [vmem:[#allocation2 + $0x170] sm:$0x3] %v3712_v4  ;;  %v3073_v44 = vor.u32 %v3072_v53, %v3069_v63  ;;  %v3077_v62 = vshrl.u32 %v12280_v60, 16  ;;  %v3080_v32 = vshll.u32 %v12280_v60, 16  ;;  %v16432_v41 = vpop.f32.mrb[111].mxu1  ;;  %v4387_v53 = vshrl.u32 %v11904_v26, 16 }
 0x270   :  { %19822 = vst [vmem:[#allocation138_spill] sm:$0xff] %v16432_v41  ;;  %v355_v54 = vld [vmem:[#allocation2 + $0xbc] sm:$0x6]  ;;  %v4389_v2 = vshll.u32 %v11904_v26, 16  ;;  %v3744_v4 = vld [vmem:[#allocation2 + $0x88] sm:$0xf] }
 0x271   :  { %v3074_v59 = vsel %vm15712_vm12, %v3065_v5, %v3073_v44  ;;  %v3075_v20 = vrot.slane %v3073_v44, 4  ;;  %v403_v48 = vld [vmem:[#allocation2 + $0x17c] sm:$0x6]  ;;  %v3079_v9 = vrot.slane %v3077_v62, 6  ;;  %v3082_v63 = vrot.slane %v3080_v32, 7  ;;  %v13342_v41 = vld [vmem:[#allocation13 + $0xd8] sm:$0xff]  }
 0x272   :  { %3598 = vst [vmem:[#allocation2 + $0xac] sm:$0xf] %v3074_v59  ;;  %v3956_v24 = vld [vmem:[#allocation2 + $0x84] sm:$0x8]  ;;  %v3602_v7 = vld [vmem:[#allocation2 + $0xb4] sm:$0xe]  ;;  %v767_v62 = vadd.f32 %v16119_v57, %v15669_v45  ;;  %7470 = vmatpush1.bf16.msra.mxu1 %v13342_v41 }
 0x273   :  { %v3600_v37 = vsel %vm15351_vm5, %v3075_v20, %v3599_v10  ;;  %v3381_v1 = vshrl.u32 %v12312_v16, 16  ;;  %v3384_v60 = vshll.u32 %v12312_v16, 16  ;;  %v4396_v23 = vrot.slane %v4394_v47, 1  ;;  %v13268_v32 = vld [vmem:[#allocation2 + $0x8c] ss:$0 sps:$4 sm:$0x77]   ;;  %7471 = vmatprep.subr.bf16.mxu1 %v19440_v15 }
 0x274   :  { %3601 = vst [vmem:[#allocation2 + $0xb0] sm:$0x3] %v3600_v37  ;;  %v16438_v5 = vor.u32 %v3082_v63, %v3079_v9  ;;  %v4391_v44 = vrot.slane %v4389_v2, 1  ;;  %v356_v8 = vsel %vm15402_vm8, 0, %v355_v54  ;;  %v16444_v59 = vpop.f32.mrb[112].mxu1  ;;  %v404_v47 = vsel %vm15402_vm8, 0, %v403_v48 }
 0x275   :  { %19823 = vst [vmem:[#allocation139_spill] sm:$0xff] %v16444_v59  ;;  %v3383_v21 = vrot.slane %v3381_v1, 6  ;;  %v3386_v10 = vrot.slane %v3384_v60, 7  ;;  %357 = vst [vmem:[#allocation2 + $0xbc] sm:$0x6] %v356_v8  ;;  %v927_v20 = vadd.f32 %v16121_v56, %v15669_v45  ;;  %v13347_v16 = vld [vmem:[#allocation13 + $0xe0] sm:$0xff]   ;;  %v12097_v29 = vcombine.low %v3956_v24, %v3744_v4 }
 0x276   :  { %v3603_v54 = vsel %vm15701_vm11, %v16438_v5, %v3602_v7  ;;  %v3714_v9 = vld [vmem:[#allocation2 + $0x174] sm:$0xe]  ;;  %v4392_v57 = vor.u32 %v4391_v44, %v4387_v53  ;;  %v993_v63 = vmax.f32 %v767_v62, 0.0  ;;  %405 = vst [vmem:[#allocation2 + $0x17c] sm:$0x6] %v404_v47  ;;  %v6609_v56 = vrot.slane %v13268_v32, 3  ;;  %7472 = vmatpush1.bf16.msra.mxu1 %v13347_v16 }
 0x277   :  { %3604 = vst [vmem:[#allocation2 + $0xb4] sm:$0xe] %v3603_v54  ;;  %v3387_v2 = vor.u32 %v3386_v10, %v3383_v21  ;;  %v1057_v37 = vmax.f32 %v927_v20, 0.0  ;;  %v3743_v48 = vld [vmem:[#allocation2 + $0x84] sm:$0xf]  ;;  %v16455_v60 = vpop.f32.mrb[113].mxu1  ;;  %7473 = vmatprep.subr.bf16.mxu1 %v19440_v15 }
 0x278   :  { %v4397_v1 = vsel %vm4265_vm14, %v4392_v57, %v4396_v23  ;;  %v12281_v45 = vpack.c.bf16 %v993_v63, %v993_v63  ;;  %v13272_v41 = vld [vmem:[#allocation2 + $0x8c] ss:$0 sps:$4 sm:$0x11]   ;;  %19824 = vst [vmem:[#allocation140_spill] sm:$0xff] %v16455_v60  ;;  %v16459_v44 = vpop.f32.mrb[114].mxu1  ;;  %v3084_v21 = vrot.slane %v16438_v5, 4  ;;  %v11905_v52 = vcombine.low %v3743_v48, %v3744_v4 }
 0x279   :  { %v3715_v7 = vsel %vm15701_vm11, %v3387_v2, %v3714_v9  ;;  %7270 = vmatprep.mubr.bf16.mxu1 %v4397_v1  ;;  %v12313_v53 = vpack.c.bf16 %v1057_v37, %v1057_v37  ;;  %19825 = vst [vmem:[#allocation141_spill] sm:$0xff] %v16459_v44  ;;  %v6608_v62 = vrot.slane %v12097_v29, 3  ;;  %v16462_v23 = vpop.f32.mrb[115].mxu1  ;;  %v4406_v9 = vshll.u32 %v13272_v41, 16  ;;  %v3957_v16 = vld [vmem:[#allocation2 + $0x90] sm:$0x8] }
 0x27a   :  { %3716 = vst [vmem:[#allocation2 + $0x174] sm:$0xe] %v3715_v7  ;;  %v3086_v24 = vshrl.u32 %v12281_v45, 16  ;;  %v3089_v8 = vshll.u32 %v12281_v45, 16  ;;  %7271 = vmatmul.mubr.bf16.gmra.mrb[168].mxu1 %v11904_v26  ;;  %19826 = vst [vmem:[#allocation142_spill] sm:$0xff] %v16462_v23  ;;  %v16466_v57 = vpop.f32.mrb[116].mxu1 }
 0x27b   :  { %v3390_v32 = vshrl.u32 %v12313_v53, 16  ;;  %v3393_v10 = vshll.u32 %v12313_v53, 16  ;;  %v6610_v54 = vsel %vm6574_vm13, %v6608_v62, %v6609_v56  ;;  %19827 = vst [vmem:[#allocation143_spill] sm:$0xff] %v16466_v57  ;;  %v3388_v5 = vrot.slane %v3387_v2, 4  ;;  %v3746_v26 = vld [vmem:[#allocation2 + $0x94] sm:$0xf]  ;;  %7474 = vmatpush1.bf16.msra.mxu1 %v13352_v61 }
 0x27c   :  { %v3088_v47 = vrot.slane %v3086_v24, 6  ;;  %v3091_v20 = vrot.slane %v3089_v8, 7  ;;  %12490 = vmatmul.mubr.bf16.gmra.mrb[84].mxu0 %v6610_v54  ;;  %v4399_v1 = vshrl.u32 %v11905_v52, 16  ;;  %v4401_v45 = vshll.u32 %v11905_v52, 16  ;;  %v3745_v44 = vld [vmem:[#allocation2 + $0x90] sm:$0xf]  ;;  %7475 = vmatprep.subr.bf16.mxu1 %v19440_v15 }
 0x27d   :  { %v3392_v63 = vrot.slane %v3390_v32, 6  ;;  %v3395_v37 = vrot.slane %v3393_v10, 7  ;;  %v13273_v7 = vld [vmem:[#allocation2 + $0x98] ss:$0 sps:$4 sm:$0x77]   ;;  %v16468_v53 = vpop.f32.mrb[117].mxu1  ;;  %v12098_v24 = vcombine.low %v3957_v16, %v3746_v26 }
 0x27e   :  { %v3092_v29 = vor.u32 %v3091_v20, %v3088_v47  ;;  %19828 = vst [vmem:[#allocation144_spill] sm:$0xff] %v16468_v53  ;;  %v3606_v4 = vld [vmem:[#allocation2 + $0xbc] sm:$0x3]  ;;  %v13276_v56 = vld [vmem:[#allocation2 + $0x98] ss:$0 sps:$4 sm:$0x11]  }
 0x27f   :  { %v3396_v48 = vor.u32 %v3395_v37, %v3392_v63  ;;  %v16470_v41 = vpop.f32.mrb[118].mxu1  ;;  %v3718_v62 = vld [vmem:[#allocation2 + $0x17c] sm:$0x3]  ;;  %v4403_v32 = vrot.slane %v4401_v45, 1  ;;  %v4408_v10 = vrot.slane %v4406_v9, 1  ;;  %v6611_v37 = vrot.slane %v12098_v24, 3 }
 0x280   :  { %19829 = vst [vmem:[#allocation145_spill] sm:$0xff] %v16470_v41  ;;  %v3093_v2 = vsel %vm15712_vm12, %v3084_v21, %v3092_v29  ;;  %v3094_v8 = vrot.slane %v3092_v29, 4  ;;  %v16474_v47 = vpop.f32.mrb[119].mxu1  ;;  %v6612_v21 = vrot.slane %v13273_v7, 3  ;;  %v3748_v29 = vld [vmem:[#allocation2 + $0xa0] sm:$0xf]  ;;  %v11906_v45 = vcombine.low %v3745_v44, %v3746_v26 }
 0x281   :  { %19830 = vst [vmem:[#allocation146_spill] sm:$0xff] %v16474_v47  ;;  %3605 = vst [vmem:[#allocation2 + $0xb8] sm:$0xf] %v3093_v2  ;;  %v3397_v20 = vsel %vm15712_vm12, %v3388_v5, %v3396_v48  ;;  %v3398_v54 = vrot.slane %v3396_v48, 4  ;;  %v16478_v57 = vpop.f32.mrb[120].mxu1  ;;  %v4404_v63 = vor.u32 %v4403_v32, %v4399_v1 }
 0x282   :  { %19831 = vst [vmem:[#allocation147_spill] sm:$0xff] %v16478_v57  ;;  %v3607_v16 = vsel %vm15351_vm5, %v3094_v8, %v3606_v4  ;;  %3717 = vst [vmem:[#allocation2 + $0x178] sm:$0xf] %v3397_v20  ;;  %v3958_v41 = vld [vmem:[#allocation2 + $0x9c] sm:$0x8]  ;;  %v6613_v48 = vsel %vm6574_vm13, %v6611_v37, %v6612_v21  ;;  %v4418_v57 = vshll.u32 %v13276_v56, 16 }
 0x283   :  { %3608 = vst [vmem:[#allocation2 + $0xbc] sm:$0x3] %v3607_v16  ;;  %v3719_v9 = vsel %vm15351_vm5, %v3398_v54, %v3718_v62  ;;  %v13277_v2 = vld [vmem:[#allocation2 + $0xa4] ss:$0 sps:$4 sm:$0x77]   ;;  %v4409_v5 = vsel %vm4265_vm14, %v4404_v63, %v4408_v10  ;;  %v16486_v4 = vpop.f32.mrb[121].mxu1  ;;  %12493 = vmatprep.mubr.bf16.mxu0 %v6613_v48  ;;  %v12099_v44 = vcombine.low %v3958_v41, %v3748_v29 }
 0x284   :  { %v13281_v33 = vld [vmem:[#allocation2 + $0xa4] ss:$0 sps:$4 sm:$0x11]   ;;  %3720 = vst [vmem:[#allocation2 + $0x17c] sm:$0x3] %v3719_v9  ;;  %19832 = vst [vmem:[#allocation148_spill] sm:$0xff] %v16486_v4  ;;  %7278 = vmatprep.mubr.bf16.mxu1 %v4409_v5 }
 0x285   :  { %v4411_v1 = vshrl.u32 %v11906_v45, 16  ;;  %v4413_v7 = vshll.u32 %v11906_v45, 16  ;;  %v3747_v24 = vld [vmem:[#allocation2 + $0x9c] sm:$0xf]  ;;  %v16488_v8 = vpop.f32.mrb[122].mxu1  ;;  %7279 = vmatmul.mubr.bf16.gmra.mrb[172].mxu1 %v11905_v52  ;;  %v4420_v10 = vrot.slane %v4418_v57, 1 }
 0x286   :  { %19833 = vst [vmem:[#allocation149_spill] sm:$0xff] %v16488_v8  ;;  %v3959_v26 = vld [vmem:[#allocation2 + $0xa8] sm:$0x8]  ;;  %v16490_v62 = vpop.f32.mrb[123].mxu1  ;;  %v6615_v20 = vrot.slane %v13277_v2, 3  ;;  %v6614_v16 = vrot.slane %v12099_v44, 3  ;;  %v16494_v63 = vcombine.low %v3747_v24, %v3748_v29 }
 0x287   :  { %19834 = vst [vmem:[#allocation150_spill] sm:$0xff] %v16490_v62  ;;  %v4415_v32 = vrot.slane %v4413_v7, 1  ;;  %v3750_v54 = vld [vmem:[#allocation2 + $0xac] sm:$0xf]  ;;  %v16492_v56 = vpop.f32.mrb[124].mxu1  ;;  %v4430_v37 = vshll.u32 %v13281_v33, 16 }
 0x288   :  { %19835 = vst [vmem:[#allocation151_spill] sm:$0xff] %v16492_v56  ;;  %v13282_v21 = vld [vmem:[#allocation2 + $0xb0] ss:$0 sps:$4 sm:$0x77]   ;;  %v16496_v9 = vld [vmem:[#allocation2 + $0xc4] sm:$0xf]  ;;  %v6616_v7 = vsel %vm6574_vm13, %v6614_v16, %v6615_v20  ;;  %v12100_v8 = vcombine.low %v3959_v26, %v3750_v54 }
 0x289   :  { %v16498_v5 = vpop.f32.mrb[125].mxu1  ;;  %v4416_v52 = vor.u32 %v4415_v32, %v4411_v1  ;;  %v3752_v41 = vld [vmem:[#allocation2 + $0xb8] sm:$0xf]  ;;  %v3960_v48 = vld [vmem:[#allocation2 + $0xb4] sm:$0x8]  ;;  %v4423_v61 = vshrl.u32 %v16494_v63, 16  ;;  %12494 = vmatmul.mubr.bf16.gmra.mrb[88].mxu0 %v6616_v7 }
 0x28a   :  { %19836 = vst [vmem:[#allocation152_spill] sm:$0xff] %v16498_v5  ;;  %v13286_v57 = vld [vmem:[#allocation2 + $0xc8] ss:$0 sps:$4 sm:$0x77]   ;;  %v16501_v2 = vpop.f32.mrb[126].mxu1  ;;  %v4425_v29 = vshll.u32 %v16494_v63, 16 }
 0x28b   :  { %19837 = vst [vmem:[#allocation153_spill] sm:$0xff] %v16501_v2  ;;  %v3961_v33 = vld [vmem:[#allocation2 + $0xc0] sm:$0x8]  ;;  %v3749_v24 = vld [vmem:[#allocation2 + $0xa8] sm:$0xf]  ;;  %v16506_v44 = vpop.f32.mrb[127].mxu1  ;;  %v4421_v56 = vsel %vm4265_vm14, %v4416_v52, %v4420_v10  ;;  %v12101_v2 = vcombine.low %v3960_v48, %v3752_v41 }
 0x28c   :  { %19838 = vst [vmem:[#allocation154_spill] sm:$0xff] %v16506_v44  ;;  %v13284_v1 = vld [vmem:[#allocation2 + $0xbc] ss:$0 sps:$4 sm:$0x77]   ;;  %7286 = vmatprep.mubr.bf16.mxu1 %v4421_v56  ;;  %v4427_v32 = vrot.slane %v4425_v29, 1  ;;  %v4432_v5 = vrot.slane %v4430_v37, 1  ;;  %v12102_v47 = vcombine.low %v3961_v33, %v16496_v9  ;;  %v11908_v52 = vcombine.low %v3749_v24, %v3750_v54 }
 0x28d   :  { %v6618_v62 = vrot.slane %v13282_v21, 3  ;;  %v13289_v4 = vld [vmem:[#allocation2 + $0xb0] ss:$0 sps:$4 sm:$0x11]   ;;  %v6617_v20 = vrot.slane %v12100_v8, 3  ;;  %v6621_v16 = vrot.slane %v13284_v1, 3  ;;  %7287 = vmatmul.mubr.bf16.gmra.mrb[176].mxu1 %v11906_v45 }
 0x28e   :  { %v4428_v53 = vor.u32 %v4427_v32, %v4423_v61  ;;  %v6620_v23 = vrot.slane %v12101_v2, 3  ;;  %v6623_v59 = vrot.slane %v12102_v47, 3  ;;  %v6624_v10 = vrot.slane %v13286_v57, 3  ;;  %v16511_v26 = vld [vmem:[#allocation2 + $0xd0] sm:$0xf]  ;;  %v13357_v61 = vld [vmem:[#allocation13 + $0xf0] sm:$0xff]  }
 0x28f   :  { %v6619_v44 = vsel %vm6574_vm13, %v6617_v20, %v6618_v62  ;;  %v3962_v56 = vld [vmem:[#allocation2 + $0xcc] sm:$0x8]  ;;  %v4442_v8 = vshll.u32 %v13289_v4, 16  ;;  %v13291_v48 = vld [vmem:[#allocation2 + $0xd4] ss:$0 sps:$4 sm:$0x77]   ;;  %7476 = vmatpush1.bf16.msra.mxu1 %v13357_v61 }
 0x290   :  { %v4433_v37 = vsel %vm4265_vm14, %v4428_v53, %v4432_v5  ;;  %12497 = vmatprep.mubr.bf16.mxu0 %v6619_v44  ;;  %v6622_v21 = vsel %vm6574_vm13, %v6620_v23, %v6621_v16  ;;  %v16515_v7 = vld [vmem:[#allocation2 + $0xdc] sm:$0xf]  ;;  %v13293_v45 = vld [vmem:[#allocation2 + $0xe0] ss:$0 sps:$4 sm:$0x77]   ;;  %v4435_v2 = vshrl.u32 %v11908_v52, 16  ;;  %v12103_v54 = vcombine.low %v3962_v56, %v16511_v26  ;;  %7477 = vmatprep.subr.bf16.mxu1 %v19440_v15 }
 0x291   :  { %7294 = vmatprep.mubr.bf16.mxu1 %v4433_v37  ;;  %v4437_v62 = vshll.u32 %v11908_v52, 16  ;;  %v3963_v47 = vld [vmem:[#allocation2 + $0xd8] sm:$0x8]  ;;  %v3751_v57 = vld [vmem:[#allocation2 + $0xb4] sm:$0xf]  ;;  %12498 = vmatmul.mubr.bf16.gmra.mrb[92].mxu0 %v6622_v21  ;;  %v6625_v53 = vsel %vm6574_vm13, %v6623_v59, %v6624_v10  ;;  %v4444_v23 = vrot.slane %v4442_v8, 1 }
 0x292   :  { %v13296_v29 = vld [vmem:[#allocation2 + $0xbc] ss:$0 sps:$4 sm:$0x11]   ;;  %v12104_v4 = vcombine.low %v3963_v47, %v16515_v7  ;;  %12501 = vmatprep.mubr.bf16.mxu0 %v6625_v53  ;;  %v16521_v24 = vcombine.low %v3751_v57, %v3752_v41  ;;  %v3753_v44 = vld [vmem:[#allocation2 + $0xc0] sm:$0xf]  ;;  %v6626_v1 = vrot.slane %v12103_v54, 3 }
 0x293   :  { %v4439_v5 = vrot.slane %v4437_v62, 1  ;;  %v6627_v32 = vrot.slane %v13291_v48, 3  ;;  %v6630_v20 = vrot.slane %v13293_v45, 3  ;;  %v4454_v16 = vshll.u32 %v13296_v29, 16  ;;  %v16524_v56 = vld [vmem:[#allocation2 + $0xe8] sm:$0xf] }
 0x294   :  { %v6629_v10 = vrot.slane %v12104_v4, 3  ;;  %v4447_v37 = vshrl.u32 %v16521_v24, 16  ;;  %v4449_v21 = vshll.u32 %v16521_v24, 16  ;;  %v16530_v41 = vcombine.low %v3753_v44, %v16496_v9  ;;  %v13298_v8 = vld [vmem:[#allocation2 + $0xc8] ss:$0 sps:$4 sm:$0x11]  }
 0x295   :  { %v4440_v33 = vor.u32 %v4439_v5, %v4435_v2  ;;  %7295 = vmatmul.mubr.bf16.gmra.mrb[180].mxu1 %v16494_v63  ;;  %v16532_v61 = vld [vmem:[#allocation2 + $0xf4] sm:$0xf]  ;;  %v4456_v48 = vrot.slane %v4454_v16, 1  ;;  %v3964_v45 = vld [vmem:[#allocation2 + $0xe4] sm:$0x8]  ;;  %v6628_v2 = vsel %vm6574_vm13, %v6626_v1, %v6627_v32  ;;  %v4466_v4 = vshll.u32 %v13298_v8, 16 }
 0x296   :  { %v4451_v63 = vrot.slane %v4449_v21, 1  ;;  %v4461_v62 = vshll.u32 %v16530_v41, 16  ;;  %v13299_v47 = vld [vmem:[#allocation2 + $0xec] ss:$0 sps:$4 sm:$0x77]   ;;  %v12105_v57 = vcombine.low %v3964_v45, %v16524_v56  ;;  %v6631_v29 = vsel %vm6574_vm13, %v6629_v10, %v6630_v20  ;;  %v13362_v10 = vld [vmem:[#allocation13 + $0xf8] sm:$0xff]  }
 0x297   :  { %v4445_v59 = vsel %vm4265_vm14, %v4440_v33, %v4444_v23  ;;  %v3965_v54 = vld [vmem:[#allocation2 + $0xf0] sm:$0x8]  ;;  %v13301_v9 = vld [vmem:[#allocation2 + $0xf8] ss:$0 sps:$4 sm:$0x77]   ;;  %v6633_v32 = vrot.slane %v13299_v47, 3  ;;  %7478 = vmatpush1.bf16.msra.mxu1 %v13362_v10 }
 0x298   :  { %7302 = vmatprep.mubr.bf16.mxu1 %v4445_v59  ;;  %v4452_v53 = vor.u32 %v4451_v63, %v4447_v37  ;;  %v12106_v5 = vcombine.low %v3965_v54, %v16532_v61  ;;  %v3755_v33 = vld [vmem:[#allocation2 + $0xcc] sm:$0xf]  ;;  %v4463_v44 = vrot.slane %v4461_v62, 1  ;;  %v6632_v1 = vrot.slane %v12105_v57, 3  ;;  %v16543_v20 = vld [vmem:[#allocation2 + $0x100] sm:$0xf]  ;;  %7736 = vmatprep.subr.bf16.mxu1 %v19440_v15 }
 0x299   :  { %12502 = vmatmul.mubr.bf16.gmra.mrb[96].mxu0 %v6628_v2  ;;  %v16541_v16 = vcombine.low %v3755_v33, %v16511_v26  ;;  %v6636_v21 = vrot.slane %v13301_v9, 3  ;;  %v4459_v37 = vshrl.u32 %v16530_v41, 16  ;;  %v16546_v63 = vld [vmem:[#allocation2 + $0x10c] sm:$0xf]  ;;  %v3966_v45 = vld [vmem:[#allocation2 + $0xfc] sm:$0x8] }
 0x29a   :  { %12505 = vmatprep.mubr.bf16.mxu0 %v6631_v29  ;;  %v4457_v23 = vsel %vm4265_vm14, %v4452_v53, %v4456_v48  ;;  %v6635_v59 = vrot.slane %v12106_v5, 3  ;;  %v4468_v48 = vrot.slane %v4466_v4, 1  ;;  %v13304_v8 = vld [vmem:[#allocation2 + $0xd4] ss:$0 sps:$4 sm:$0x11]   ;;  %v6634_v2 = vsel %vm6574_vm13, %v6632_v1, %v6633_v32 }
 0x29b   :  { %v4473_v26 = vshll.u32 %v16541_v16, 16  ;;  %v13306_v62 = vld [vmem:[#allocation2 + $0x104] ss:$0 sps:$4 sm:$0x77]   ;;  %v12107_v47 = vcombine.low %v3966_v45, %v16543_v20  ;;  %v3967_v57 = vld [vmem:[#allocation2 + $0x108] sm:$0x8] }
 0x29c   :  { %v6637_v54 = vsel %vm6574_vm13, %v6635_v59, %v6636_v21  ;;  %v13308_v29 = vld [vmem:[#allocation2 + $0x110] ss:$0 sps:$4 sm:$0x77]   ;;  %v12108_v53 = vcombine.low %v3967_v57, %v16546_v63  ;;  %v3757_v9 = vld [vmem:[#allocation2 + $0xd8] sm:$0xf]  ;;  %v4478_v5 = vshll.u32 %v13304_v8, 16 }
 0x29d   :  { %7303 = vmatmul.mubr.bf16.gmra.mrb[184].mxu1 %v11908_v52  ;;  %v4464_v52 = vor.u32 %v4463_v44, %v4459_v37  ;;  %v4475_v33 = vrot.slane %v4473_v26, 1  ;;  %v6638_v44 = vrot.slane %v12107_v47, 3  ;;  %v6639_v1 = vrot.slane %v13306_v62, 3  ;;  %v16559_v32 = vld [vmem:[#allocation2 + $0x118] sm:$0xf] }
 0x29e   :  { %7310 = vmatprep.mubr.bf16.mxu1 %v4457_v23  ;;  %v16555_v23 = vcombine.low %v3757_v9, %v16515_v7  ;;  %v6641_v59 = vrot.slane %v12108_v53, 3  ;;  %v6642_v21 = vrot.slane %v13308_v29, 3  ;;  %v13311_v10 = vld [vmem:[#allocation2 + $0xe0] ss:$0 sps:$4 sm:$0x11]   ;;  %v4471_v8 = vshrl.u32 %v16541_v16, 16 }
 0x29f   :  { %v4469_v4 = vsel %vm4265_vm14, %v4464_v52, %v4468_v48  ;;  %v3968_v37 = vld [vmem:[#allocation2 + $0x114] sm:$0x8]  ;;  %v16561_v45 = vld [vmem:[#allocation2 + $0x124] sm:$0xf]  ;;  %v4480_v57 = vrot.slane %v4478_v5, 1  ;;  %v6640_v48 = vsel %vm6574_vm13, %v6638_v44, %v6639_v1  ;;  %vm11548_vm5 = vcmask 130048  }
 0x2a0   :  { %v4485_v7 = vshll.u32 %v16555_v23, 16  ;;  %v12109_v52 = vcombine.low %v3968_v37, %v16559_v32  ;;  %v3969_v26 = vld [vmem:[#allocation2 + $0x120] sm:$0x8]  ;;  %v6643_v47 = vsel %vm6574_vm13, %v6641_v59, %v6642_v21  ;;  %v3759_v9 = vld [vmem:[#allocation2 + $0xe4] sm:$0xf]  ;;  %v4483_v21 = vshrl.u32 %v16555_v23, 16 }
 0x2a1   :  { %12506 = vmatmul.mubr.bf16.gmra.mrb[100].mxu0 %v6634_v2  ;;  %v13312_v2 = vld [vmem:[#allocation2 + $0x11c] ss:$0 sps:$4 sm:$0x77]   ;;  %v12110_v29 = vcombine.low %v3969_v26, %v16561_v45  ;;  %v16580_v59 = vcombine.low %v3759_v9, %v16524_v56  ;;  %v13317_v40 = vld [vmem:[#allocation2 + $0xec] ss:$0 sps:$4 sm:$0x11]  }
 0x2a2   :  { %12509 = vmatprep.mubr.bf16.mxu0 %v6637_v54  ;;  %v13314_v54 = vld [vmem:[#allocation2 + $0x128] ss:$0 sps:$4 sm:$0x77]   ;;  %v4487_v5 = vrot.slane %v4485_v7, 1  ;;  %v6644_v37 = vrot.slane %v12109_v52, 3 }
 0x2a3   :  { %v6648_v26 = vrot.slane %v13314_v54, 3  ;;  %v16585_v7 = vld [vmem:[#allocation2 + $0x13c] sm:$0xf]  ;;  %v3971_v52 = vld [vmem:[#allocation2 + $0x138] sm:$0x8] }
 0x2a4   :  { %v13321_v54 = vld [vmem:[#allocation2 + $0x140] ss:$0 sps:$4 sm:$0x77]   ;;  %v12112_v9 = vcombine.low %v3971_v52, %v16585_v7  ;;  %v3972_v52 = vld [vmem:[#allocation2 + $0x144] sm:$0x8] }
 0x2a5   :  { %7311 = vmatmul.mubr.bf16.gmra.mrb[188].mxu1 %v16521_v24  ;;  %v4476_v24 = vor.u32 %v4475_v33, %v4471_v8  ;;  %v4490_v33 = vshll.u32 %v13311_v10, 16  ;;  %v6645_v8 = vrot.slane %v13312_v2, 3  ;;  %v4488_v10 = vor.u32 %v4487_v5, %v4483_v21  ;;  %v3765_v14 = vld [vmem:[#allocation2 + $0x108] sm:$0xf]  ;;  %v3769_v11 = vld [vmem:[#allocation2 + $0x120] sm:$0xf] }
 0x2a6   :  { %7318 = vmatprep.mubr.bf16.mxu1 %v4469_v4  ;;  %v16567_v62 = vpop.f32.mrb[64].mxu0  ;;  %v4497_v2 = vshll.u32 %v16580_v59, 16  ;;  %v13366_v30 = vld [vmem:[#allocation2 + $0x14] ss:$0 sps:$4 sm:$0x33]  }
 0x2a7   :  { %v16571_v53 = vpop.f32.mrb[65].mxu0  ;;  %v4481_v1 = vsel %vm4265_vm14, %v4476_v24, %v4480_v57  ;;  %v4492_v60 = vrot.slane %v4490_v33, 1  ;;  %v6646_v24 = vsel %vm6574_vm13, %v6644_v37, %v6645_v8  ;;  %v13319_v57 = vld [vmem:[#allocation2 + $0x134] ss:$0 sps:$4 sm:$0x77]   ;;  %v4502_v33 = vshll.u32 %v13317_v40, 16 }
 0x2a8   :  { %v16573_v4 = vpop.f32.mrb[66].mxu0  ;;  %v4499_v37 = vrot.slane %v4497_v2, 1  ;;  %v6651_v21 = vrot.slane %v13319_v57, 3  ;;  %v4495_v40 = vshrl.u32 %v16580_v59, 16  ;;  %v3820_v43 = vld [vmem:[#allocation2 + $0x24] sm:$0xe] }
 0x2a9   :  { %12510 = vmatmul.mubr.bf16.gmra.mrb[104].mxu0 %v6640_v48  ;;  %v16575_v44 = vpop.f32.mrb[67].mxu0  ;;  %v6647_v48 = vrot.slane %v12110_v29, 3  ;;  %v4493_v5 = vsel %vm4265_vm14, %v4488_v10, %v4492_v60  ;;  %v4504_v60 = vrot.slane %v4502_v33, 1  ;;  %v13325_v10 = vld [vmem:[#allocation2 + $0x14c] ss:$0 sps:$4 sm:$0x77]  }
 0x2aa   :  { %12513 = vmatprep.mubr.bf16.mxu0 %v6643_v47  ;;  %v16583_v47 = vld [vmem:[#allocation2 + $0x130] sm:$0xf]  ;;  %v4500_v2 = vor.u32 %v4499_v37, %v4495_v40  ;;  %v6657_v40 = vrot.slane %v13325_v10, 3  ;;  %v13396_v19 = vld [vmem:[#allocation2 + $0xa4] ss:$0 sps:$4 sm:$0x33]  }
 0x2ab   :  { %v6649_v29 = vsel %vm6574_vm13, %v6647_v48, %v6648_v26  ;;  %v6653_v48 = vrot.slane %v12112_v9, 3  ;;  %v6654_v26 = vrot.slane %v13321_v54, 3  ;;  %v13327_v54 = vld [vmem:[#allocation2 + $0x158] ss:$0 sps:$4 sm:$0x77]  }
 0x2ac   :  { %v4505_v37 = vsel %vm4265_vm14, %v4500_v2, %v4504_v60  ;;  %v13332_v2 = vld [vmem:[#allocation2 + $0x164] ss:$0 sps:$4 sm:$0x77]  }
 0x2ad   :  { %7319 = vmatmul.mubr.bf16.gmra.mrb[192].mxu1 %v16530_v41  ;;  %v3970_v41 = vld [vmem:[#allocation2 + $0x12c] sm:$0x8]  ;;  %v6655_v9 = vsel %vm6574_vm13, %v6653_v48, %v6654_v26  ;;  %v16612_v48 = vld [vmem:[#allocation2 + $0x160] sm:$0xf] }
 0x2ae   :  { %7326 = vmatprep.mubr.bf16.mxu1 %v4481_v1  ;;  %v12111_v56 = vcombine.low %v3970_v41, %v16583_v47  ;;  %v3761_v1 = vld [vmem:[#allocation2 + $0xf0] sm:$0xf]  ;;  %v16597_v41 = vld [vmem:[#allocation2 + $0x148] sm:$0xf] }
 0x2af   :  { %v16595_v31 = vcombine.low %v3761_v1, %v16532_v61  ;;  %v3763_v1 = vld [vmem:[#allocation2 + $0xfc] sm:$0xf] }
 0x2b0   :  { %v6650_v8 = vrot.slane %v12111_v56, 3  ;;  %v12113_v56 = vcombine.low %v3972_v52, %v16597_v41  ;;  %v16608_v33 = vcombine.low %v3763_v1, %v16543_v20 }
 0x2b1   :  { %12514 = vmatmul.mubr.bf16.gmra.mrb[108].mxu0 %v6646_v24  ;;  %v13324_v24 = vld [vmem:[#allocation2 + $0xf8] ss:$0 sps:$4 sm:$0x11]   ;;  %v4509_v61 = vshll.u32 %v16595_v31, 16  ;;  %v4507_v26 = vshrl.u32 %v16595_v31, 16 }
 0x2b2   :  { %12517 = vmatprep.mubr.bf16.mxu0 %v6649_v29  ;;  %v16599_v29 = vld [vmem:[#allocation2 + $0x154] sm:$0xf]  ;;  %v6652_v57 = vsel %vm6574_vm13, %v6650_v8, %v6651_v21  ;;  %v4514_v6 = vshll.u32 %v13324_v24, 16  ;;  %v6656_v21 = vrot.slane %v12113_v56, 3  ;;  %v4521_v20 = vshll.u32 %v16608_v33, 16 }
 0x2b3   :  { %v4511_v8 = vrot.slane %v4509_v61, 1  ;;  %v13330_v24 = vld [vmem:[#allocation2 + $0x104] ss:$0 sps:$4 sm:$0x11]   ;;  %v3975_v61 = vld [vmem:[#allocation2 + $0x168] sm:$0x8] }
 0x2b4   :  { %v6658_v60 = vsel %vm6574_vm13, %v6656_v21, %v6657_v40  ;;  %v4526_v38 = vshll.u32 %v13330_v24, 16  ;;  %v6663_v21 = vrot.slane %v13332_v2, 3  ;;  %v11916_v40 = vcombine.low %v3765_v14, %v16546_v63  ;;  %v3976_v24 = vld [vmem:[#allocation2 + $0x174] sm:$0x8] }
 0x2b5   :  { %7327 = vmatmul.mubr.bf16.gmra.mrb[196].mxu1 %v16541_v16  ;;  %v3973_v16 = vld [vmem:[#allocation2 + $0x150] sm:$0x8]  ;;  %v4512_v1 = vor.u32 %v4511_v8, %v4507_v26  ;;  %v4519_v26 = vshrl.u32 %v16608_v33, 16 }
 0x2b6   :  { %7334 = vmatprep.mubr.bf16.mxu1 %v4493_v5  ;;  %v12114_v5 = vcombine.low %v3973_v16, %v16599_v29  ;;  %v16615_v16 = vld [vmem:[#allocation2 + $0x16c] sm:$0xf] }
 0x2b8   :  { %v6659_v52 = vrot.slane %v12114_v5, 3  ;;  %v12116_v5 = vcombine.low %v3975_v61, %v16615_v16 }
 0x2b9   :  { %12518 = vmatmul.mubr.bf16.gmra.mrb[112].mxu0 %v6652_v57  ;;  %v6660_v57 = vrot.slane %v13327_v54, 3  ;;  %v13334_v54 = vld [vmem:[#allocation2 + $0x170] ss:$0 sps:$4 sm:$0x77]  }
 0x2ba   :  { %12521 = vmatprep.mubr.bf16.mxu0 %v6655_v9  ;;  %v3974_v9 = vld [vmem:[#allocation2 + $0x15c] sm:$0x8] }
 0x2bb   :  { %v12115_v10 = vcombine.low %v3974_v9, %v16612_v48  ;;  %v6661_v56 = vsel %vm6574_vm13, %v6659_v52, %v6660_v57  ;;  %v6665_v9 = vrot.slane %v12116_v5, 3  ;;  %v6666_v52 = vrot.slane %v13334_v54, 3  ;;  %v16626_v57 = vld [vmem:[#allocation2 + $0x178] sm:$0xf] }
 0x2bc   :  { %v12117_v2 = vcombine.low %v3976_v24, %v16626_v57  ;;  %v4531_v24 = vshrl.u32 %v11916_v40, 16 }
 0x2bd   :  { %7335 = vmatmul.mubr.bf16.gmra.mrb[200].mxu1 %v16555_v23  ;;  %v4516_v23 = vrot.slane %v4514_v6, 1  ;;  %v6662_v8 = vrot.slane %v12115_v10, 3  ;;  %v6667_v63 = vsel %vm6574_vm13, %v6665_v9, %v6666_v52 }
 0x2be   :  { %7342 = vmatprep.mubr.bf16.mxu1 %v4505_v37  ;;  %v4523_v37 = vrot.slane %v4521_v20, 1  ;;  %v4528_v20 = vrot.slane %v4526_v38, 1 }
 0x2bf   :  { %v4517_v6 = vsel %vm4265_vm14, %v4512_v1, %v4516_v23  ;;  %v4533_v1 = vshll.u32 %v11916_v40, 16  ;;  %v13338_v23 = vld [vmem:[#allocation2 + $0x17c] ss:$0 sps:$4 sm:$0x77]  }
 0x2c0   :  { %v4524_v61 = vor.u32 %v4523_v37, %v4519_v26  ;;  %v3767_v37 = vld [vmem:[#allocation2 + $0x114] sm:$0xf] }
 0x2c1   :  { %12522 = vmatmul.mubr.bf16.gmra.mrb[116].mxu0 %v6658_v60  ;;  %v13337_v60 = vld [vmem:[#allocation2 + $0x110] ss:$0 sps:$4 sm:$0x11]   ;;  %v11917_v26 = vcombine.low %v3767_v37, %v16559_v32 }
 0x2c2   :  { %12525 = vmatprep.mubr.bf16.mxu0 %v6661_v56  ;;  %v4529_v38 = vsel %vm4265_vm14, %v4524_v61, %v4528_v20  ;;  %v4538_v5 = vshll.u32 %v13337_v60, 16  ;;  %v11918_v20 = vcombine.low %v3769_v11, %v16561_v45  ;;  %v3773_v45 = vld [vmem:[#allocation2 + $0x138] sm:$0xf] }
 0x2c3   :  { %v16628_v56 = vpop.f32.mrb[68].mxu0  ;;  %v4545_v49 = vshll.u32 %v11917_v26, 16  ;;  %v4543_v32 = vshrl.u32 %v11917_v26, 16 }
 0x2c4   :  { %v16632_v14 = vpop.f32.mrb[69].mxu0  ;;  %v4540_v9 = vrot.slane %v4538_v5, 1  ;;  %v3771_v5 = vld [vmem:[#allocation2 + $0x12c] sm:$0xf] }
 0x2c5   :  { %7343 = vmatmul.mubr.bf16.gmra.mrb[204].mxu1 %v16580_v59  ;;  %v6664_v59 = vsel %vm6574_vm13, %v6662_v8, %v6663_v21  ;;  %v16635_v10 = vpop.f32.mrb[70].mxu0  ;;  %v6668_v8 = vrot.slane %v12117_v2, 3  ;;  %v6669_v21 = vrot.slane %v13338_v23, 3  ;;  %v13344_v2 = vld [vmem:[#allocation2 + $0x128] ss:$0 sps:$4 sm:$0x11]  }
 0x2c6   :  { %7350 = vmatprep.mubr.bf16.mxu1 %v4517_v6  ;;  %v16637_v54 = vpop.f32.mrb[71].mxu0  ;;  %v4535_v6 = vrot.slane %v4533_v1, 1 }
 0x2c7   :  { %v6670_v52 = vsel %vm6574_vm13, %v6668_v8, %v6669_v21  ;;  %v4562_v8 = vshll.u32 %v13344_v2, 16  ;;  %v4555_v21 = vshrl.u32 %v11918_v20, 16 }
 0x2c9   :  { %12526 = vmatmul.mubr.bf16.gmra.mrb[120].mxu0 %v6664_v59  ;;  %v4536_v59 = vor.u32 %v4535_v6, %v4531_v24  ;;  %v4564_v24 = vrot.slane %v4562_v8, 1 }
 0x2ca   :  { %12529 = vmatprep.mubr.bf16.mxu0 %v6667_v63  ;;  %v13341_v63 = vld [vmem:[#allocation2 + $0x11c] ss:$0 sps:$4 sm:$0x11]  }
 0x2cb   :  { %v4541_v60 = vsel %vm4265_vm14, %v4536_v59, %v4540_v9  ;;  %v4550_v61 = vshll.u32 %v13341_v63, 16  ;;  %v13346_v59 = vld [vmem:[#allocation2 + $0x134] ss:$0 sps:$4 sm:$0x11]  }
 0x2cc   :  { %v4574_v63 = vshll.u32 %v13346_v59, 16 }
 0x2cd   :  { %7351 = vmatmul.mubr.bf16.gmra.mrb[208].mxu1 %v16595_v31  ;;  %v4547_v31 = vrot.slane %v4545_v49, 1  ;;  %v4552_v23 = vrot.slane %v4550_v61, 1 }
 0x2ce   :  { %7358 = vmatprep.mubr.bf16.mxu1 %v4529_v38  ;;  %v4557_v38 = vshll.u32 %v11918_v20, 16 }
 0x2cf   :  { %v4548_v1 = vor.u32 %v4547_v31, %v4543_v32  ;;  %v4576_v32 = vrot.slane %v4574_v63, 1 }
 0x2d0   :  { %v4559_v6 = vrot.slane %v4557_v38, 1 }
 0x2d1   :  { %12530 = vmatmul.mubr.bf16.gmra.mrb[124].mxu0 %v6670_v52  ;;  %v4553_v37 = vsel %vm4265_vm14, %v4548_v1, %v4552_v23  ;;  %v13349_v1 = vld [vmem:[#allocation2 + $0x140] ss:$0 sps:$4 sm:$0x11]  }
 0x2d2   :  { %v4560_v49 = vor.u32 %v4559_v6, %v4555_v21 }
 0x2d4   :  { %v4565_v9 = vsel %vm4265_vm14, %v4560_v49, %v4564_v24  ;;  %v13351_v24 = vld [vmem:[#allocation2 + $0x14c] ss:$0 sps:$4 sm:$0x11]  }
 0x2d5   :  { %7359 = vmatmul.mubr.bf16.gmra.mrb[212].mxu1 %v16608_v33  ;;  %v11919_v33 = vcombine.low %v3771_v5, %v16583_v47 }
 0x2d6   :  { %7366 = vmatprep.mubr.bf16.mxu1 %v4541_v60 }
 0x2d7   :  { %v4569_v11 = vshll.u32 %v11919_v33, 16  ;;  %v4567_v60 = vshrl.u32 %v11919_v33, 16 }
 0x2d9   :  { %v4571_v52 = vrot.slane %v4569_v11, 1  ;;  %v3777_v11 = vld [vmem:[#allocation2 + $0x150] sm:$0xf] }
 0x2db   :  { %v4572_v47 = vor.u32 %v4571_v52, %v4567_v60  ;;  %v4598_v52 = vshll.u32 %v13351_v24, 16 }
 0x2dd   :  { %7367 = vmatmul.mubr.bf16.gmra.mrb[216].mxu1 %v11916_v40  ;;  %v11920_v40 = vcombine.low %v3773_v45, %v16585_v7  ;;  %v4577_v5 = vsel %vm4265_vm14, %v4572_v47, %v4576_v32  ;;  %v4586_v7 = vshll.u32 %v13349_v1, 16  ;;  %v4600_v47 = vrot.slane %v4598_v52, 1  ;;  %v13354_v32 = vld [vmem:[#allocation2 + $0x158] ss:$0 sps:$4 sm:$0x11]  }
 0x2de   :  { %7374 = vmatprep.mubr.bf16.mxu1 %v4553_v37  ;;  %v3779_v1 = vld [vmem:[#allocation2 + $0x15c] sm:$0xf] }
 0x2df   :  { %v4581_v23 = vshll.u32 %v11920_v40, 16  ;;  %v4579_v8 = vshrl.u32 %v11920_v40, 16  ;;  %v4588_v49 = vrot.slane %v4586_v7, 1 }
 0x2e1   :  { %v4583_v37 = vrot.slane %v4581_v23, 1 }
 0x2e2   :  { %v16650_v31 = vpop.f32.mrb[72].mxu0 }
 0x2e3   :  { %v16652_v61 = vpop.f32.mrb[73].mxu0  ;;  %v4584_v21 = vor.u32 %v4583_v37, %v4579_v8 }
 0x2e4   :  { %v16654_v2 = vpop.f32.mrb[74].mxu0 }
 0x2e5   :  { %7375 = vmatmul.mubr.bf16.gmra.mrb[220].mxu1 %v11917_v26  ;;  %v16656_v38 = vpop.f32.mrb[75].mxu0  ;;  %v3775_v26 = vld [vmem:[#allocation2 + $0x144] sm:$0xf]  ;;  %v4589_v45 = vsel %vm4265_vm14, %v4584_v21, %v4588_v49  ;;  %v3781_v49 = vld [vmem:[#allocation2 + $0x168] sm:$0xf] }
 0x2e6   :  { %7382 = vmatprep.mubr.bf16.mxu1 %v4565_v9  ;;  %v11921_v6 = vcombine.low %v3775_v26, %v16597_v41  ;;  %v13356_v21 = vld [vmem:[#allocation2 + $0x164] ss:$0 sps:$4 sm:$0x11]  }
 0x2e8   :  { %v4593_v59 = vshll.u32 %v11921_v6, 16  ;;  %v4591_v63 = vshrl.u32 %v11921_v6, 16 }
 0x2ea   :  { %v4595_v9 = vrot.slane %v4593_v59, 1 }
 0x2ec   :  { %v4596_v60 = vor.u32 %v4595_v9, %v4591_v63 }
 0x2ed   :  { %7383 = vmatmul.mubr.bf16.gmra.mrb[224].mxu1 %v11918_v20  ;;  %v11922_v20 = vcombine.low %v3777_v11, %v16599_v29  ;;  %v4622_v11 = vshll.u32 %v13356_v21, 16  ;;  %v13361_v21 = vld [vmem:[#allocation2 + $0x17c] ss:$0 sps:$4 sm:$0x11]  }
 0x2ee   :  { %7390 = vmatprep.mubr.bf16.mxu1 %v4577_v5  ;;  %v4601_v23 = vsel %vm4265_vm14, %v4596_v60, %v4600_v47  ;;  %v4610_v5 = vshll.u32 %v13354_v32, 16  ;;  %v13359_v60 = vld [vmem:[#allocation2 + $0x170] ss:$0 sps:$4 sm:$0x11]  }
 0x2ef   :  { %v4605_v41 = vshll.u32 %v11922_v20, 16  ;;  %v4603_v37 = vshrl.u32 %v11922_v20, 16  ;;  %v4624_v63 = vrot.slane %v4622_v11, 1 }
 0x2f0   :  { %v4612_v8 = vrot.slane %v4610_v5, 1 }
 0x2f1   :  { %v4607_v26 = vrot.slane %v4605_v41, 1 }
 0x2f3   :  { %v4608_v7 = vor.u32 %v4607_v26, %v4603_v37  ;;  %v3817_v37 = vld [vmem:[#allocation2] sm:$0xe] }
 0x2f5   :  { %7391 = vmatmul.mubr.bf16.gmra.mrb[228].mxu1 %v11919_v33  ;;  %v11923_v33 = vcombine.low %v3779_v1, %v16612_v48  ;;  %v4613_v24 = vsel %vm4265_vm14, %v4608_v7, %v4612_v8 }
 0x2f6   :  { %7398 = vmatprep.mubr.bf16.mxu1 %v4589_v45 }
 0x2f7   :  { %v4617_v29 = vshll.u32 %v11923_v33, 16  ;;  %v4615_v45 = vshrl.u32 %v11923_v33, 16 }
 0x2f9   :  { %v4619_v59 = vrot.slane %v4617_v29, 1 }
 0x2fb   :  { %v4620_v48 = vor.u32 %v4619_v59, %v4615_v45  ;;  %v13364_v45 = vld [vmem:[#allocation2 + $0x8] ss:$0 sps:$4 sm:$0x33]  }
 0x2fd   :  { %7399 = vmatmul.mubr.bf16.gmra.mrb[232].mxu1 %v11920_v40  ;;  %v11924_v40 = vcombine.low %v3781_v49, %v16615_v16  ;;  %v4625_v1 = vsel %vm4265_vm14, %v4620_v48, %v4624_v63  ;;  %v4634_v16 = vshll.u32 %v13359_v60, 16  ;;  %v13513_v49 = vld [vmem:[#allocation2 + $0x4] sm:$0xf] }
 0x2fe   :  { %7406 = vmatprep.mubr.bf16.mxu1 %v4601_v23 }
 0x2ff   :  { %v4629_v47 = vshll.u32 %v11924_v40, 16  ;;  %v4627_v5 = vshrl.u32 %v11924_v40, 16  ;;  %v4636_v8 = vrot.slane %v4634_v16, 1 }
 0x301   :  { %v4631_v23 = vrot.slane %v4629_v47, 1 }
 0x302   :  { %v16666_v9 = vpop.f32.mrb[76].mxu0 }
 0x303   :  { %v16668_v52 = vpop.f32.mrb[77].mxu0  ;;  %v4632_v7 = vor.u32 %v4631_v23, %v4627_v5  ;;  %v3818_v23 = vld [vmem:[#allocation2 + $0xc] sm:$0xe] }
 0x304   :  { %v16670_v32 = vpop.f32.mrb[78].mxu0 }
 0x305   :  { %7407 = vmatmul.mubr.bf16.gmra.mrb[236].mxu1 %v11921_v6  ;;  %v16672_v41 = vpop.f32.mrb[79].mxu0  ;;  %v3783_v6 = vld [vmem:[#allocation2 + $0x174] sm:$0xf]  ;;  %v4637_v59 = vsel %vm4265_vm14, %v4632_v7, %v4636_v8  ;;  %v13514_v8 = vld [vmem:[#allocation2 + $0x10] sm:$0xf] }
 0x306   :  { %7414 = vmatprep.mubr.bf16.mxu1 %v4613_v24  ;;  %v11925_v26 = vcombine.low %v3783_v6, %v16626_v57  ;;  %v11958_v24 = vcombine.low %v3817_v37, %v13513_v49  ;;  %v5013_v6 = vshrl.u32 %v13364_v45, 16  ;;  %v5030_v49 = vshrl.u32 %v13366_v30, 16 }
 0x308   :  { %v4641_v29 = vshll.u32 %v11925_v26, 16  ;;  %v4639_v48 = vshrl.u32 %v11925_v26, 16  ;;  %v5005_v63 = vshrl.u32 %v11958_v24, 16  ;;  %v5008_v60 = vshll.u32 %v11958_v24, 16 }
 0x309   :  { %v5015_v37 = vrot.slane %v5013_v6, 1 }
 0x30a   :  { %v4643_v11 = vrot.slane %v4641_v29, 1  ;;  %v5007_v16 = vrot.slane %v5005_v63, 1  ;;  %v5010_v5 = vrot.slane %v5008_v60, 2  ;;  %v5032_v63 = vrot.slane %v5030_v49, 1 }
 0x30c   :  { %v4644_v57 = vor.u32 %v4643_v11, %v4639_v48  ;;  %v5011_v29 = vor.u32 %v5010_v5, %v5007_v16  ;;  %v3819_v48 = vld [vmem:[#allocation2 + $0x18] sm:$0xe]  ;;  %v4779_v16 = vrot.slane %v11958_v24, 1  ;;  %v13516_v5 = vld [vmem:[#allocation2 + $0x8] ss:$0 sps:$4 sm:$0x11]  }
 0x30d   :  { %7415 = vmatmul.mubr.bf16.gmra.mrb[240].mxu1 %v11922_v20  ;;  %v4646_v20 = vshll.u32 %v13361_v21, 16  ;;  %v16678_v21 = vcombine.low %v3818_v23, %v13514_v8 }
 0x30e   :  { %7422 = vmatprep.mubr.bf16.mxu1 %v4625_v1  ;;  %v5016_v1 = vshll.u32 %v13364_v45, 16  ;;  %v5033_v45 = vshll.u32 %v13366_v30, 16 }
 0x30f   :  { %v4648_v47 = vrot.slane %v4646_v20, 1  ;;  %v5022_v11 = vshrl.u32 %v16678_v21, 16  ;;  %v5025_v20 = vshll.u32 %v16678_v21, 16 }
 0x310   :  { %v5018_v7 = vrot.slane %v5016_v1, 2  ;;  %v5035_v23 = vrot.slane %v5033_v45, 2 }
 0x311   :  { %v5024_v6 = vrot.slane %v5022_v11, 1  ;;  %v5027_v1 = vrot.slane %v5025_v20, 2  ;;  %v13371_v20 = vld [vmem:[#allocation2 + $0x2c] ss:$0 sps:$4 sm:$0x33]  }
 0x312   :  { %v5036_v8 = vor.u32 %v5035_v23, %v5032_v63 }
 0x315   :  { %7423 = vmatmul.mubr.bf16.gmra.mrb[244].mxu1 %v11923_v33  ;;  %v4649_v33 = vsel %vm4265_vm14, %v4644_v57, %v4648_v47  ;;  %v13369_v57 = vld [vmem:[#allocation2 + $0x20] ss:$0 sps:$4 sm:$0x33]  }
 0x316   :  { %7430 = vmatprep.mubr.bf16.mxu1 %v4637_v59  ;;  %v5019_v59 = vor.u32 %v5018_v7, %v5015_v37  ;;  %v5047_v30 = vshrl.u32 %v13369_v57, 16  ;;  %v5028_v7 = vor.u32 %v5027_v1, %v5024_v6  ;;  %v13517_v1 = vld [vmem:[#allocation2 + $0x28] sm:$0xf] }
 0x318   :  { %v5020_v47 = vsel %vm5003_vm15, %v5011_v29, %v5019_v59  ;;  %v5049_v24 = vrot.slane %v5047_v30, 1  ;;  %v5064_v30 = vshrl.u32 %v13371_v20, 16 }
 0x31d   :  { %7431 = vmatmul.mubr.bf16.gmra.mrb[248].mxu1 %v11924_v40  ;;  %v13515_v40 = vld [vmem:[#allocation2 + $0x1c] sm:$0xf] }
 0x31e   :  { %7438 = vmatprep.mubr.bf16.mxu1 %v4649_v33  ;;  %v16682_v60 = vcombine.low %v3819_v48, %v13515_v40  ;;  %v4780_v33 = vrot.slane %v13516_v5, 1  ;;  %v5050_v48 = vshll.u32 %v13369_v57, 16  ;;  %v13367_v40 = vld [vmem:[#allocation13 + $0x100] sm:$0xff]   ;;  %v16695_v57 = vcombine.low %v3820_v43, %v13517_v1  ;;  %v13372_v5 = vld [vmem:[#allocation13 + $0x108] sm:$0xff]  }
 0x320   :  { %v5039_v37 = vshrl.u32 %v16682_v60, 16  ;;  %v5042_v49 = vshll.u32 %v16682_v60, 16  ;;  %v4781_v59 = vsel %vm1123_vm2, %v4779_v16, %v4780_v33  ;;  %v5052_v6 = vrot.slane %v5050_v48, 2  ;;  %v13518_v33 = vld [vmem:[#allocation2 + $0x14] ss:$0 sps:$4 sm:$0x11]  }
 0x321   :  { %v4782_v16 = vrot.slane %v16678_v21, 1  ;;  %v5059_v43 = vshll.u32 %v16695_v57, 16  ;;  %v13377_v48 = vld [vmem:[#allocation13 + $0x110] sm:$0xff]   ;;  %v13374_v21 = vld [vmem:[#allocation2 + $0x38] ss:$0 sps:$4 sm:$0x33]  }
 0x322   :  { %v5041_v11 = vrot.slane %v5039_v37, 1  ;;  %v5044_v63 = vrot.slane %v5042_v49, 2  ;;  %v4783_v37 = vrot.slane %v13518_v33, 1  ;;  %v3821_v49 = vld [vmem:[#allocation2 + $0x30] sm:$0xe] }
 0x324   :  { %v5045_v25 = vor.u32 %v5044_v63, %v5041_v11  ;;  %v5061_v11 = vrot.slane %v5059_v43, 2  ;;  %v13387_v43 = vld [vmem:[#allocation13 + $0x120] sm:$0xff]  }
 0x325   :  { %7439 = vmatmul.mubr.bf16.gmra.mrb[252].mxu1 %v11925_v26 }
 0x326   :  { %7479 = vmatprep.mubr.bf16.mxu1 %v5020_v47  ;;  %v5037_v47 = vsel %vm5003_vm15, %v5028_v7, %v5036_v8  ;;  %v5053_v7 = vor.u32 %v5052_v6, %v5049_v24  ;;  %v5056_v8 = vshrl.u32 %v16695_v57, 16  ;;  %v13519_v24 = vld [vmem:[#allocation2 + $0x34] sm:$0xf]  ;;  %v13382_v6 = vld [vmem:[#allocation13 + $0x118] sm:$0xff]  }
 0x327   :  { %v16706_v63 = vcombine.low %v3821_v49, %v13519_v24  ;;  %v4788_v24 = vrot.slane %v16695_v57, 1 }
 0x328   :  { %v5054_v33 = vsel %vm5003_vm15, %v5045_v25, %v5053_v7 }
 0x329   :  { %v5073_v25 = vshrl.u32 %v16706_v63, 16  ;;  %v5076_v7 = vshll.u32 %v16706_v63, 16 }
 0x32a   :  { %v16687_v26 = vpop.f32.mrb[80].mxu0 }
 0x32b   :  { %v16689_v29 = vpop.f32.mrb[81].mxu0 }
 0x32c   :  { %v16692_v45 = vpop.f32.mrb[82].mxu0 }
 0x32d   :  { %7480 = vmatmul.mubr.bf16.vlgmr.msra.gmra.mrb[128].mxu1 %v4781_v59  ;;  %v16697_v23 = vpop.f32.mrb[83].mxu0  ;;  %v5067_v59 = vshll.u32 %v13371_v20, 16  ;;  %v5058_v20 = vrot.slane %v5056_v8, 1  ;;  %v3822_v8 = vld [vmem:[#allocation2 + $0x3c] sm:$0xe] }
 0x32e   :  { %7487 = vmatprep.mubr.bf16.mxu1 %v5037_v47  ;;  %7737 = vmatpush1.bf16.msra.mxu1 %v13367_v40  ;;  %v4784_v40 = vsel %vm1123_vm2, %v4782_v16, %v4783_v37  ;;  %v5066_v47 = vrot.slane %v5064_v30, 1  ;;  %v4786_v16 = vrot.slane %v13520_v18, 1  ;;  %v5081_v37 = vshrl.u32 %v13374_v21, 16 }
 0x32f   :  { %7738 = vmatprep.subr.bf16.mxu1 %v19440_v15  ;;  %v5069_v1 = vrot.slane %v5067_v59, 2  ;;  %v5084_v30 = vshll.u32 %v13374_v21, 16  ;;  %v5062_v59 = vor.u32 %v5061_v11, %v5058_v20  ;;  %v5075_v21 = vrot.slane %v5073_v25, 1  ;;  %v13392_v11 = vld [vmem:[#allocation13 + $0x128] sm:$0xff]   ;;  %v3823_v25 = vld [vmem:[#allocation2 + $0x48] sm:$0xe] }
 0x330   :  { %v5078_v20 = vrot.slane %v5076_v7, 2  ;;  %v13397_v7 = vld [vmem:[#allocation13 + $0x130] sm:$0xff]  }
 0x332   :  { %7739 = vmatpush1.bf16.msra.mxu1 %v13372_v5  ;;  %v4785_v5 = vrot.slane %v16682_v60, 1  ;;  %v13376_v60 = vld [vmem:[#allocation2 + $0x44] ss:$0 sps:$4 sm:$0x33]  }
 0x333   :  { %7740 = vmatprep.subr.bf16.mxu1 %v19440_v15 }
 0x334   :  { %v4787_v49 = vsel %vm1123_vm2, %v4785_v5, %v4786_v16 }
 0x335   :  { %7488 = vmatmul.mubr.bf16.gmra.mrb[132].mxu1 %v4784_v40  ;;  %v5070_v40 = vor.u32 %v5069_v1, %v5066_v47  ;;  %v13521_v47 = vld [vmem:[#allocation2 + $0x40] sm:$0xf] }
 0x336   :  { %7495 = vmatprep.mubr.bf16.mxu1 %v5054_v33  ;;  %7741 = vmatpush1.bf16.msra.mxu1 %v13377_v48  ;;  %v5083_v48 = vrot.slane %v5081_v37, 1  ;;  %v5086_v33 = vrot.slane %v5084_v30, 2  ;;  %v16715_v1 = vcombine.low %v3822_v8, %v13521_v47  ;;  %v5098_v37 = vshrl.u32 %v13376_v60, 16  ;;  %v13379_v47 = vld [vmem:[#allocation2 + $0x50] ss:$0 sps:$4 sm:$0x33]  }
 0x337   :  { %7742 = vmatprep.subr.bf16.mxu1 %v19440_v15  ;;  %v5071_v18 = vsel %vm5003_vm15, %v5062_v59, %v5070_v40  ;;  %v5079_v30 = vor.u32 %v5078_v20, %v5075_v21  ;;  %v5101_v40 = vshll.u32 %v13376_v60, 16  ;;  %v13402_v60 = vld [vmem:[#allocation13 + $0x138] sm:$0xff]  }
 0x338   :  { %v5087_v16 = vor.u32 %v5086_v33, %v5083_v48  ;;  %v5093_v59 = vshll.u32 %v16715_v1, 16 }
 0x339   :  { %v5103_v20 = vrot.slane %v5101_v40, 2 }
 0x33a   :  { %7743 = vmatpush1.bf16.msra.mxu1 %v13382_v6  ;;  %v13522_v6 = vld [vmem:[#allocation2 + $0x2c] ss:$0 sps:$4 sm:$0x11]   ;;  %v5088_v48 = vsel %vm5003_vm15, %v5079_v30, %v5087_v16  ;;  %v5095_v21 = vrot.slane %v5093_v59, 2  ;;  %v5118_v16 = vshll.u32 %v13379_v47, 16 }
 0x33b   :  { %7744 = vmatprep.subr.bf16.mxu1 %v19440_v15  ;;  %v4789_v5 = vrot.slane %v13522_v6, 1  ;;  %v13524_v6 = vld [vmem:[#allocation2 + $0x38] ss:$0 sps:$4 sm:$0x11]   ;;  %v3824_v30 = vld [vmem:[#allocation2 + $0x54] sm:$0xe] }
 0x33c   :  { %v5120_v51 = vrot.slane %v5118_v16, 2 }
 0x33d   :  { %7496 = vmatmul.mubr.bf16.gmra.mrb[136].mxu1 %v4787_v49  ;;  %v5090_v49 = vshrl.u32 %v16715_v1, 16  ;;  %v4790_v8 = vsel %vm1123_vm2, %v4788_v24, %v4789_v5  ;;  %v4792_v24 = vrot.slane %v13524_v6, 1 }
 0x33e   :  { %7503 = vmatprep.mubr.bf16.mxu1 %v5071_v18  ;;  %7745 = vmatpush1.bf16.msra.mxu1 %v13387_v43  ;;  %v5100_v43 = vrot.slane %v5098_v37, 1  ;;  %v13523_v18 = vld [vmem:[#allocation2 + $0x4c] sm:$0xf]  ;;  %v5115_v37 = vshrl.u32 %v13379_v47, 16  ;;  %v13412_v47 = vld [vmem:[#allocation13 + $0x148] sm:$0xff]  }
 0x33f   :  { %7746 = vmatprep.subr.bf16.mxu1 %v19440_v15  ;;  %v16723_v57 = vcombine.low %v3823_v25, %v13523_v18  ;;  %v5092_v33 = vrot.slane %v5090_v49, 1  ;;  %v13407_v49 = vld [vmem:[#allocation13 + $0x140] sm:$0xff]  }
 0x340   :  { %v5104_v18 = vor.u32 %v5103_v20, %v5100_v43 }
 0x341   :  { %v5107_v5 = vshrl.u32 %v16723_v57, 16  ;;  %v5096_v25 = vor.u32 %v5095_v21, %v5092_v33  ;;  %v13525_v33 = vld [vmem:[#allocation2 + $0x58] sm:$0xf] }
 0x342   :  { %7747 = vmatpush1.bf16.msra.mxu1 %v13392_v11  ;;  %v4791_v11 = vrot.slane %v16706_v63, 1  ;;  %v13381_v63 = vld [vmem:[#allocation2 + $0x5c] ss:$0 sps:$4 sm:$0x33]   ;;  %v16733_v43 = vcombine.low %v3824_v30, %v13525_v33 }
 0x343   :  { %7748 = vmatprep.subr.bf16.mxu1 %v19440_v15  ;;  %v5109_v40 = vrot.slane %v5107_v5, 1  ;;  %v5132_v5 = vshrl.u32 %v13381_v63, 16 }
 0x344   :  { %v4793_v59 = vsel %vm1123_vm2, %v4791_v11, %v4792_v24  ;;  %v13526_v11 = vld [vmem:[#allocation2 + $0x44] ss:$0 sps:$4 sm:$0x11]   ;;  %v5124_v16 = vshrl.u32 %v16733_v43, 16  ;;  %v5127_v30 = vshll.u32 %v16733_v43, 16 }
 0x345   :  { %7504 = vmatmul.mubr.bf16.gmra.mrb[140].mxu1 %v4790_v8  ;;  %v5110_v8 = vshll.u32 %v16723_v57, 16  ;;  %v4795_v24 = vrot.slane %v13526_v11, 1  ;;  %v5134_v33 = vrot.slane %v5132_v5, 1 }
 0x346   :  { %7511 = vmatprep.mubr.bf16.mxu1 %v5088_v48  ;;  %7749 = vmatpush1.bf16.msra.mxu1 %v13397_v7  ;;  %v5117_v7 = vrot.slane %v5115_v37, 1  ;;  %v5105_v48 = vsel %vm5003_vm15, %v5096_v25, %v5104_v18  ;;  %v5135_v37 = vshll.u32 %v13381_v63, 16  ;;  %v13384_v63 = vld [vmem:[#allocation2 + $0x68] ss:$0 sps:$4 sm:$0x33]  }
 0x347   :  { %7750 = vmatprep.subr.bf16.mxu1 %v19440_v15  ;;  %v5112_v6 = vrot.slane %v5110_v8, 2 }
 0x348   :  { %v5121_v8 = vor.u32 %v5120_v51, %v5117_v7  ;;  %v5137_v11 = vrot.slane %v5135_v37, 2  ;;  %v5126_v51 = vrot.slane %v5124_v16, 1  ;;  %v5129_v7 = vrot.slane %v5127_v30, 2 }
 0x349   :  { %v5113_v18 = vor.u32 %v5112_v6, %v5109_v40  ;;  %v13527_v6 = vld [vmem:[#allocation2 + $0x64] sm:$0xf] }
 0x34a   :  { %7751 = vmatpush1.bf16.msra.mxu1 %v13402_v60  ;;  %v4794_v60 = vrot.slane %v16715_v1, 1  ;;  %v5130_v5 = vor.u32 %v5129_v7, %v5126_v51  ;;  %v5138_v37 = vor.u32 %v5137_v11, %v5134_v33  ;;  %v13422_v11 = vld [vmem:[#allocation13 + $0x158] sm:$0xff]  }
 0x34b   :  { %7752 = vmatprep.subr.bf16.mxu1 %v19440_v15  ;;  %v5122_v40 = vsel %vm5003_vm15, %v5113_v18, %v5121_v8  ;;  %v3826_v8 = vld [vmem:[#allocation2 + $0x6c] sm:$0xe] }
 0x34c   :  { %v4796_v1 = vsel %vm1123_vm2, %v4794_v60, %v4795_v24  ;;  %v5149_v60 = vshrl.u32 %v13384_v63, 16  ;;  %v5152_v24 = vshll.u32 %v13384_v63, 16  ;;  %v13529_v63 = vld [vmem:[#allocation2 + $0x70] sm:$0xf] }
 0x34d   :  { %7512 = vmatmul.mubr.bf16.gmra.mrb[144].mxu1 %v4793_v59  ;;  %v3825_v59 = vld [vmem:[#allocation2 + $0x60] sm:$0xe]  ;;  %v16760_v51 = vcombine.low %v3826_v8, %v13529_v63 }
 0x34e   :  { %7519 = vmatprep.mubr.bf16.mxu1 %v5105_v48  ;;  %7753 = vmatpush1.bf16.msra.mxu1 %v13407_v49  ;;  %v13417_v48 = vld [vmem:[#allocation13 + $0x150] sm:$0xff]   ;;  %v16750_v35 = vcombine.low %v3825_v59, %v13527_v6  ;;  %v5151_v30 = vrot.slane %v5149_v60, 1  ;;  %v5154_v59 = vrot.slane %v5152_v24, 2 }
 0x34f   :  { %v16735_v21 = vpop.f32.mrb[84].mxu0  ;;  %7754 = vmatprep.subr.bf16.mxu1 %v19440_v15  ;;  %v13530_v60 = vld [vmem:[#allocation2 + $0x5c] ss:$0 sps:$4 sm:$0x11]   ;;  %v5161_v8 = vshll.u32 %v16760_v51, 16 }
 0x350   :  { %v16738_v20 = vpop.f32.mrb[85].mxu0  ;;  %v5144_v18 = vshll.u32 %v16750_v35, 16  ;;  %v4801_v24 = vrot.slane %v13530_v60, 1 }
 0x351   :  { %v16741_v25 = vpop.f32.mrb[86].mxu0 }
 0x352   :  { %v16745_v49 = vpop.f32.mrb[87].mxu0  ;;  %7755 = vmatpush1.bf16.msra.mxu1 %v13412_v47  ;;  %v4797_v47 = vrot.slane %v16723_v57, 1  ;;  %v5146_v6 = vrot.slane %v5144_v18, 2  ;;  %v5158_v18 = vshrl.u32 %v16760_v51, 16 }
 0x353   :  { %7756 = vmatprep.subr.bf16.mxu1 %v19440_v15 }
 0x354   :  { %v4799_v16 = vsel %vm1123_vm2, %v4797_v47, %v4798_v46  ;;  %v4800_v47 = vrot.slane %v16733_v43, 1  ;;  %v13389_v43 = vld [vmem:[#allocation2 + $0x80] ss:$0 sps:$4 sm:$0x33]  }
 0x355   :  { %7520 = vmatmul.mubr.bf16.gmra.mrb[148].mxu1 %v4796_v1  ;;  %v5141_v1 = vshrl.u32 %v16750_v35, 16 }
 0x356   :  { %7527 = vmatprep.mubr.bf16.mxu1 %v5122_v40  ;;  %7757 = vmatpush1.bf16.msra.mxu1 %v13417_v48  ;;  %v13386_v48 = vld [vmem:[#allocation2 + $0x74] ss:$0 sps:$4 sm:$0x33]   ;;  %v5139_v40 = vsel %vm5003_vm15, %v5130_v5, %v5138_v37  ;;  %v5155_v5 = vor.u32 %v5154_v59, %v5151_v30  ;;  %v4802_v63 = vsel %vm1123_vm2, %v4800_v47, %v4801_v24  ;;  %v5160_v59 = vrot.slane %v5158_v18, 1 }
 0x357   :  { %7758 = vmatprep.subr.bf16.mxu1 %v19440_v15  ;;  %v5143_v17 = vrot.slane %v5141_v1, 1  ;;  %v5166_v37 = vshrl.u32 %v13386_v48, 16  ;;  %v4803_v47 = vrot.slane %v16750_v35, 1  ;;  %v13532_v24 = vld [vmem:[#allocation2 + $0x68] ss:$0 sps:$4 sm:$0x11]  }
 0x359   :  { %v5147_v1 = vor.u32 %v5146_v6, %v5143_v17  ;;  %v5168_v27 = vrot.slane %v5166_v37, 1  ;;  %v5163_v17 = vrot.slane %v5161_v8, 2  ;;  %v4804_v37 = vrot.slane %v13532_v24, 1 }
 0x35a   :  { %7759 = vmatpush1.bf16.msra.mxu1 %v13422_v11  ;;  %v5186_v8 = vshll.u32 %v13389_v43, 16 }
 0x35b   :  { %7760 = vmatprep.subr.bf16.mxu1 %v19440_v15  ;;  %v5156_v30 = vsel %vm5003_vm15, %v5147_v1, %v5155_v5  ;;  %v5164_v5 = vor.u32 %v5163_v17, %v5160_v59  ;;  %v4806_v17 = vrot.slane %v16760_v51, 1 }
 0x35c   :  { %v16758_v57 = vpop.f32.mrb[88].mxu0  ;;  %v5188_v12 = vrot.slane %v5186_v8, 2  ;;  %v3829_v8 = vld [vmem:[#allocation2 + $0x90] sm:$0xe] }
 0x35d   :  { %7528 = vmatmul.mubr.bf16.gmra.mrb[152].mxu1 %v4799_v16  ;;  %v16762_v33 = vpop.f32.mrb[89].mxu0  ;;  %v5169_v16 = vshll.u32 %v13386_v48, 16 }
 0x35e   :  { %7535 = vmatprep.mubr.bf16.mxu1 %v5139_v40  ;;  %v16764_v7 = vpop.f32.mrb[90].mxu0  ;;  %v3827_v40 = vld [vmem:[#allocation2 + $0x78] sm:$0xe] }
 0x35f   :  { %v16766_v46 = vpop.f32.mrb[91].mxu0  ;;  %v16773_v34 = vcombine.low %v3827_v40, %v13531_v28  ;;  %v5171_v6 = vrot.slane %v5169_v16, 2  ;;  %v3828_v16 = vld [vmem:[#allocation2 + $0x84] sm:$0xe] }
 0x360   :  { %v16791_v22 = vcombine.low %v3828_v16, %v13533_v58 }
 0x361   :  { %v5175_v40 = vshrl.u32 %v16773_v34, 16  ;;  %v5172_v1 = vor.u32 %v5171_v6, %v5168_v27  ;;  %v5178_v18 = vshll.u32 %v16773_v34, 16  ;;  %v13534_v6 = vld [vmem:[#allocation2 + $0x74] ss:$0 sps:$4 sm:$0x11]  }
 0x362   :  { %v5192_v58 = vshrl.u32 %v16791_v22, 16 }
 0x363   :  { %v5177_v39 = vrot.slane %v5175_v40, 1  ;;  %v5173_v35 = vsel %vm5003_vm15, %v5164_v5, %v5172_v1  ;;  %v5180_v50 = vrot.slane %v5178_v18, 2  ;;  %v5200_v40 = vshrl.u32 %v13391_v13, 16 }
 0x364   :  { %v16776_v11 = vpop.f32.mrb[92].mxu0  ;;  %v5195_v18 = vshll.u32 %v16791_v22, 16 }
 0x365   :  { %7536 = vmatmul.mubr.bf16.gmra.mrb[156].mxu1 %v4802_v63  ;;  %v16778_v48 = vpop.f32.mrb[93].mxu0  ;;  %v5183_v63 = vshrl.u32 %v13389_v43, 16  ;;  %v13427_v43 = vld [vmem:[#allocation13 + $0x160] sm:$0xff]   ;;  %v5181_v5 = vor.u32 %v5180_v50, %v5177_v39 }
 0x366   :  { %7543 = vmatprep.mubr.bf16.mxu1 %v5156_v30  ;;  %v16780_v60 = vpop.f32.mrb[94].mxu0  ;;  %v4805_v30 = vsel %vm1123_vm2, %v4803_v47, %v4804_v37  ;;  %v4807_v47 = vrot.slane %v13534_v6, 1  ;;  %7761 = vmatpush1.bf16.msra.mxu1 %v13427_v43  ;;  %v5197_v50 = vrot.slane %v5195_v18, 2 }
 0x367   :  { %v16783_v28 = vpop.f32.mrb[95].mxu0  ;;  %v5185_v36 = vrot.slane %v5183_v63, 1  ;;  %v5203_v63 = vshll.u32 %v13391_v13, 16  ;;  %7762 = vmatprep.subr.bf16.mxu1 %v19440_v15  ;;  %v5194_v13 = vrot.slane %v5192_v58, 1 }
 0x368   :  { %v4808_v16 = vsel %vm1123_vm2, %v4806_v17, %v4807_v47  ;;  %v4809_v17 = vrot.slane %v16773_v34, 1  ;;  %v13536_v47 = vld [vmem:[#allocation2 + $0x80] ss:$0 sps:$4 sm:$0x11]  }
 0x369   :  { %v5189_v1 = vor.u32 %v5188_v12, %v5185_v36  ;;  %v5205_v51 = vrot.slane %v5203_v63, 2  ;;  %v13535_v12 = vld [vmem:[#allocation2 + $0x94] sm:$0xf] }
 0x36a   :  { %v16807_v36 = vcombine.low %v3829_v8, %v13535_v12  ;;  %v3830_v8 = vld [vmem:[#allocation2 + $0x9c] sm:$0xe] }
 0x36b   :  { %v5190_v6 = vsel %vm5003_vm15, %v5181_v5, %v5189_v1  ;;  %v5198_v1 = vor.u32 %v5197_v50, %v5194_v13 }
 0x36c   :  { %v16789_v24 = vpop.f32.mrb[96].mxu0  ;;  %v5209_v58 = vshrl.u32 %v16807_v36, 16  ;;  %v5212_v18 = vshll.u32 %v16807_v36, 16 }
 0x36d   :  { %7544 = vmatmul.mubr.bf16.gmra.mrb[160].mxu1 %v4805_v30  ;;  %19839 = vst [vmem:[#allocation155_spill] sm:$0xff] %v16789_v24  ;;  %v16793_v27 = vpop.f32.mrb[97].mxu0  ;;  %v5202_v30 = vrot.slane %v5200_v40, 1  ;;  %v4810_v40 = vrot.slane %v13536_v47, 1 }
 0x36e   :  { %7551 = vmatprep.mubr.bf16.mxu1 %v5173_v35  ;;  %v16795_v59 = vpop.f32.mrb[98].mxu0  ;;  %v13394_v35 = vld [vmem:[#allocation2 + $0x98] ss:$0 sps:$4 sm:$0x33]   ;;  %v5211_v3 = vrot.slane %v5209_v58, 1 }
 0x36f   :  { %19840 = vst [vmem:[#allocation156_spill] sm:$0xff] %v16795_v59  ;;  %v16798_v37 = vpop.f32.mrb[99].mxu0  ;;  %v5220_v5 = vshll.u32 %v13394_v35, 16  ;;  %v5206_v55 = vor.u32 %v5205_v51, %v5202_v30  ;;  %v13432_v51 = vld [vmem:[#allocation13 + $0x168] sm:$0xff]  }
 0x370   :  { %7763 = vmatpush1.bf16.msra.mxu1 %v13432_v51 }
 0x371   :  { %v5222_v42 = vrot.slane %v5220_v5, 2  ;;  %v5207_v34 = vsel %vm5003_vm15, %v5198_v1, %v5206_v55  ;;  %v5234_v1 = vshrl.u32 %v13396_v19, 16  ;;  %7764 = vmatprep.subr.bf16.mxu1 %v19440_v15 }
 0x374   :  { %v16805_v0 = vpop.f32.mrb[100].mxu0 }
 0x375   :  { %7552 = vmatmul.mubr.bf16.gmra.mrb[164].mxu1 %v4808_v16  ;;  %19841 = vst [vmem:[#allocation157_spill] sm:$0xff] %v16805_v0  ;;  %v16809_v39 = vpop.f32.mrb[101].mxu0  ;;  %v5217_v16 = vshrl.u32 %v13394_v35, 16  ;;  %v13537_v35 = vld [vmem:[#allocation2 + $0xa0] sm:$0xf] }
 0x376   :  { %7559 = vmatprep.mubr.bf16.mxu1 %v5190_v6  ;;  %19842 = vst [vmem:[#allocation158_spill] sm:$0xff] %v16809_v39  ;;  %v16811_v43 = vpop.f32.mrb[102].mxu0  ;;  %v4811_v6 = vsel %vm1123_vm2, %v4809_v17, %v4810_v40  ;;  %v16822_v13 = vcombine.low %v3830_v8, %v13537_v35  ;;  %v4812_v17 = vrot.slane %v16791_v22, 1  ;;  %v13538_v40 = vld [vmem:[#allocation2 + $0x8c] ss:$0 sps:$4 sm:$0x11]  }
 0x377   :  { %19843 = vst [vmem:[#allocation159_spill] sm:$0xff] %v16811_v43  ;;  %v16814_v63 = vpop.f32.mrb[103].mxu0  ;;  %v5219_v12 = vrot.slane %v5217_v16, 1  ;;  %v5214_v43 = vrot.slane %v5212_v18, 2  ;;  %v4813_v16 = vrot.slane %v13538_v40, 1 }
 0x378   :  { %19844 = vst [vmem:[#allocation160_spill] sm:$0xff] %v16814_v63  ;;  %v5226_v18 = vshrl.u32 %v16822_v13, 16  ;;  %v5229_v8 = vshll.u32 %v16822_v13, 16  ;;  %v13539_v22 = vld [vmem:[#allocation2 + $0xac] sm:$0xf] }
 0x379   :  { %v5223_v55 = vor.u32 %v5222_v42, %v5219_v12  ;;  %v5215_v58 = vor.u32 %v5214_v43, %v5211_v3  ;;  %v4814_v35 = vsel %vm1123_vm2, %v4812_v17, %v4813_v16  ;;  %v13399_v40 = vld [vmem:[#allocation2 + $0xb0] ss:$0 sps:$4 sm:$0x33]   ;;  %v4815_v17 = vrot.slane %v16807_v36, 1  ;;  %v13541_v0 = vld [vmem:[#allocation2 + $0xb8] sm:$0xf] }
 0x37a   :  { %v5228_v3 = vrot.slane %v5226_v18, 1  ;;  %v5231_v43 = vrot.slane %v5229_v8, 2  ;;  %v13540_v16 = vld [vmem:[#allocation2 + $0x98] ss:$0 sps:$4 sm:$0x11]   ;;  %v5254_v8 = vshll.u32 %v13399_v40, 16 }
 0x37b   :  { %v5224_v42 = vsel %vm5003_vm15, %v5215_v58, %v5223_v55 }
 0x37c   :  { %v16820_v47 = vpop.f32.mrb[104].mxu0  ;;  %v5232_v55 = vor.u32 %v5231_v43, %v5228_v3  ;;  %v4818_v43 = vrot.slane %v16822_v13, 1 }
 0x37d   :  { %7560 = vmatmul.mubr.bf16.gmra.mrb[168].mxu1 %v4811_v6  ;;  %19845 = vst [vmem:[#allocation161_spill] sm:$0xff] %v16820_v47  ;;  %v16824_v30 = vpop.f32.mrb[105].mxu0  ;;  %v5237_v6 = vshll.u32 %v13396_v19, 16 }
 0x37e   :  { %7567 = vmatprep.mubr.bf16.mxu1 %v5207_v34  ;;  %19846 = vst [vmem:[#allocation162_spill] sm:$0xff] %v16824_v30  ;;  %v16826_v50 = vpop.f32.mrb[106].mxu0  ;;  %v3831_v34 = vld [vmem:[#allocation2 + $0xa8] sm:$0xe]  ;;  %v5256_v30 = vrot.slane %v5254_v8, 2 }
 0x37f   :  { %19847 = vst [vmem:[#allocation163_spill] sm:$0xff] %v16826_v50  ;;  %v16829_v5 = vpop.f32.mrb[107].mxu0  ;;  %v5236_v50 = vrot.slane %v5234_v1, 1  ;;  %v16835_v47 = vcombine.low %v3831_v34, %v13539_v22  ;;  %v5239_v51 = vrot.slane %v5237_v6, 2  ;;  %v4816_v1 = vrot.slane %v13540_v16, 1 }
 0x380   :  { %19848 = vst [vmem:[#allocation164_spill] sm:$0xff] %v16829_v5  ;;  %v5251_v22 = vshrl.u32 %v13399_v40, 16  ;;  %v3832_v6 = vld [vmem:[#allocation2 + $0xb4] sm:$0xe]  ;;  %v13437_v40 = vld [vmem:[#allocation13 + $0x170] sm:$0xff]  }
 0x381   :  { %v5240_v58 = vor.u32 %v5239_v51, %v5236_v50  ;;  %v5246_v18 = vshll.u32 %v16835_v47, 16  ;;  %v16853_v63 = vcombine.low %v3832_v6, %v13541_v0  ;;  %v13542_v51 = vld [vmem:[#allocation2 + $0xa4] ss:$0 sps:$4 sm:$0x11]   ;;  %7765 = vmatpush1.bf16.msra.mxu1 %v13437_v40  ;;  %v3833_v8 = vld [vmem:[#allocation2 + $0xc0] sm:$0xe] }
 0x382   :  { %7766 = vmatprep.subr.bf16.mxu1 %v19440_v15 }
 0x383   :  { %v5241_v36 = vsel %vm5003_vm15, %v5232_v55, %v5240_v58  ;;  %v5260_v0 = vshrl.u32 %v16853_v63, 16 }
 0x384   :  { %v16838_v12 = vpop.f32.mrb[108].mxu0 }
 0x385   :  { %7568 = vmatmul.mubr.bf16.gmra.mrb[172].mxu1 %v4814_v35  ;;  %19849 = vst [vmem:[#allocation165_spill] sm:$0xff] %v16838_v12  ;;  %v16840_v19 = vpop.f32.mrb[109].mxu0  ;;  %v5243_v35 = vshrl.u32 %v16835_v47, 16 }
 0x386   :  { %7575 = vmatprep.mubr.bf16.mxu1 %v5224_v42  ;;  %19850 = vst [vmem:[#allocation166_spill] sm:$0xff] %v16840_v19  ;;  %v16842_v5 = vpop.f32.mrb[110].mxu0  ;;  %v4817_v42 = vsel %vm1123_vm2, %v4815_v17, %v4816_v1  ;;  %v5253_v19 = vrot.slane %v5251_v22, 1  ;;  %v4819_v17 = vrot.slane %v13542_v51, 1 }
 0x387   :  { %19851 = vst [vmem:[#allocation167_spill] sm:$0xff] %v16842_v5  ;;  %v16845_v34 = vpop.f32.mrb[111].mxu0  ;;  %v5245_v12 = vrot.slane %v5243_v35, 1  ;;  %v13401_v5 = vld [vmem:[#allocation2 + $0xbc] ss:$0 sps:$4 sm:$0x33]  }
 0x388   :  { %19852 = vst [vmem:[#allocation168_spill] sm:$0xff] %v16845_v34  ;;  %v5248_v34 = vrot.slane %v5246_v18, 2  ;;  %v5268_v35 = vshrl.u32 %v13401_v5, 16  ;;  %v5271_v22 = vshll.u32 %v13401_v5, 16  ;;  %v5257_v58 = vor.u32 %v5256_v30, %v5253_v19  ;;  %v13543_v30 = vld [vmem:[#allocation2 + $0xc4] sm:$0xf] }
 0x389   :  { %v5263_v18 = vshll.u32 %v16853_v63, 16  ;;  %v4820_v6 = vsel %vm1123_vm2, %v4818_v43, %v4819_v17  ;;  %v5262_v5 = vrot.slane %v5260_v0, 1  ;;  %v16869_v19 = vcombine.low %v3833_v8, %v13543_v30  ;;  %v13544_v17 = vld [vmem:[#allocation2 + $0xb0] ss:$0 sps:$4 sm:$0x11]  }
 0x38a   :  { %v5249_v55 = vor.u32 %v5248_v34, %v5245_v12  ;;  %v5273_v13 = vrot.slane %v5271_v22, 2  ;;  %v4821_v43 = vrot.slane %v16835_v47, 1  ;;  %v3834_v8 = vld [vmem:[#allocation2 + $0xcc] sm:$0xe] }
 0x38b   :  { %v5265_v12 = vrot.slane %v5263_v18, 2  ;;  %v5277_v0 = vshrl.u32 %v16869_v19, 16  ;;  %v5280_v18 = vshll.u32 %v16869_v19, 16 }
 0x38c   :  { %v16851_v16 = vpop.f32.mrb[112].mxu0  ;;  %v5258_v51 = vsel %vm5003_vm15, %v5249_v55, %v5257_v58 }
 0x38d   :  { %7576 = vmatmul.mubr.bf16.gmra.mrb[176].mxu1 %v4817_v42  ;;  %19853 = vst [vmem:[#allocation169_spill] sm:$0xff] %v16851_v16  ;;  %v16855_v50 = vpop.f32.mrb[113].mxu0  ;;  %v5270_v42 = vrot.slane %v5268_v35, 1  ;;  %v4822_v35 = vrot.slane %v13544_v17, 1  ;;  %v5266_v58 = vor.u32 %v5265_v12, %v5262_v5  ;;  %v5282_v16 = vrot.slane %v5280_v18, 2 }
 0x38e   :  { %7583 = vmatprep.mubr.bf16.mxu1 %v5241_v36  ;;  %19854 = vst [vmem:[#allocation170_spill] sm:$0xff] %v16855_v50  ;;  %v16857_v3 = vpop.f32.mrb[114].mxu0  ;;  %v13404_v36 = vld [vmem:[#allocation2 + $0xc8] ss:$0 sps:$4 sm:$0x33]  }
 0x38f   :  { %19855 = vst [vmem:[#allocation171_spill] sm:$0xff] %v16857_v3  ;;  %v16860_v1 = vpop.f32.mrb[115].mxu0  ;;  %v5288_v55 = vshll.u32 %v13404_v36, 16 }
 0x390   :  { %19856 = vst [vmem:[#allocation172_spill] sm:$0xff] %v16860_v1 }
 0x394   :  { %v16867_v3 = vpop.f32.mrb[116].mxu0 }
 0x395   :  { %7584 = vmatmul.mubr.bf16.gmra.mrb[180].mxu1 %v4820_v6  ;;  %19857 = vst [vmem:[#allocation173_spill] sm:$0xff] %v16867_v3  ;;  %v16871_v34 = vpop.f32.mrb[117].mxu0  ;;  %v5285_v6 = vshrl.u32 %v13404_v36, 16  ;;  %v5274_v3 = vor.u32 %v5273_v13, %v5270_v42  ;;  %v13545_v36 = vld [vmem:[#allocation2 + $0xd0] sm:$0xf]  ;;  %v13442_v13 = vld [vmem:[#allocation13 + $0x178] sm:$0xff]  }
 0x396   :  { %7591 = vmatprep.mubr.bf16.mxu1 %v5258_v51  ;;  %19858 = vst [vmem:[#allocation174_spill] sm:$0xff] %v16871_v34  ;;  %v16873_v40 = vpop.f32.mrb[118].mxu0  ;;  %v4823_v51 = vsel %vm1123_vm2, %v4821_v43, %v4822_v35  ;;  %v5290_v34 = vrot.slane %v5288_v55, 2  ;;  %v16884_v5 = vcombine.low %v3834_v8, %v13545_v36  ;;  %v4824_v43 = vrot.slane %v16853_v63, 1  ;;  %7767 = vmatpush1.bf16.msra.mxu1 %v13442_v13 }
 0x397   :  { %19859 = vst [vmem:[#allocation175_spill] sm:$0xff] %v16873_v40  ;;  %v16876_v22 = vpop.f32.mrb[119].mxu0  ;;  %v5287_v30 = vrot.slane %v5285_v6, 1  ;;  %v13406_v40 = vld [vmem:[#allocation2 + $0xd4] ss:$0 sps:$4 sm:$0x33]   ;;  %v5275_v47 = vsel %vm5003_vm15, %v5266_v58, %v5274_v3 }
 0x398   :  { %19860 = vst [vmem:[#allocation176_spill] sm:$0xff] %v16876_v22  ;;  %v5279_v22 = vrot.slane %v5277_v0, 1  ;;  %v13546_v35 = vld [vmem:[#allocation2 + $0xbc] ss:$0 sps:$4 sm:$0x11]   ;;  %v5302_v58 = vshrl.u32 %v13406_v40, 16 }
 0x399   :  { %v4825_v6 = vrot.slane %v13546_v35, 1  ;;  %v5291_v3 = vor.u32 %v5290_v34, %v5287_v30  ;;  %v5294_v18 = vshrl.u32 %v16884_v5, 16  ;;  %v5297_v8 = vshll.u32 %v16884_v5, 16  ;;  %v13409_v63 = vld [vmem:[#allocation2 + $0xe0] ss:$0 sps:$4 sm:$0x33]  }
 0x39a   :  { %v5283_v0 = vor.u32 %v5282_v16, %v5279_v22 }
 0x39b   :  { %v4826_v36 = vsel %vm1123_vm2, %v4824_v43, %v4825_v6  ;;  %v5296_v30 = vrot.slane %v5294_v18, 1  ;;  %v5299_v16 = vrot.slane %v5297_v8, 2  ;;  %v4827_v43 = vrot.slane %v16869_v19, 1  ;;  %v13548_v6 = vld [vmem:[#allocation2 + $0xc8] ss:$0 sps:$4 sm:$0x11]  }
 0x39c   :  { %v16882_v17 = vpop.f32.mrb[120].mxu0  ;;  %v5292_v35 = vsel %vm5003_vm15, %v5283_v0, %v5291_v3  ;;  %v5322_v8 = vshll.u32 %v13409_v63, 16 }
 0x39d   :  { %7592 = vmatmul.mubr.bf16.gmra.mrb[184].mxu1 %v4823_v51  ;;  %19861 = vst [vmem:[#allocation177_spill] sm:$0xff] %v16882_v17  ;;  %v16886_v42 = vpop.f32.mrb[121].mxu0  ;;  %v5305_v51 = vshll.u32 %v13406_v40, 16  ;;  %v5304_v17 = vrot.slane %v5302_v58, 1  ;;  %v4828_v58 = vrot.slane %v13548_v6, 1  ;;  %v5300_v3 = vor.u32 %v5299_v16, %v5296_v30 }
 0x39e   :  { %7599 = vmatprep.mubr.bf16.mxu1 %v5275_v47  ;;  %19862 = vst [vmem:[#allocation178_spill] sm:$0xff] %v16886_v42  ;;  %v16888_v12 = vpop.f32.mrb[122].mxu0  ;;  %v3835_v47 = vld [vmem:[#allocation2 + $0xd8] sm:$0xe]  ;;  %v4830_v30 = vrot.slane %v16884_v5, 1 }
 0x39f   :  { %19863 = vst [vmem:[#allocation179_spill] sm:$0xff] %v16888_v12  ;;  %v16891_v55 = vpop.f32.mrb[123].mxu0  ;;  %v13547_v12 = vld [vmem:[#allocation2 + $0xdc] sm:$0xf]  ;;  %v5307_v22 = vrot.slane %v5305_v51, 2 }
 0x3a0   :  { %19864 = vst [vmem:[#allocation180_spill] sm:$0xff] %v16891_v55  ;;  %v16896_v42 = vcombine.low %v3835_v47, %v13547_v12  ;;  %v3836_v51 = vld [vmem:[#allocation2 + $0xe4] sm:$0xe]  ;;  %v5324_v55 = vrot.slane %v5322_v8, 2  ;;  %v13551_v5 = vld [vmem:[#allocation2 + $0xf4] sm:$0xf] }
 0x3a1   :  { %v5308_v0 = vor.u32 %v5307_v22, %v5304_v17  ;;  %v13550_v17 = vld [vmem:[#allocation2 + $0xd4] ss:$0 sps:$4 sm:$0x11]  }
 0x3a2   :  { %v5311_v47 = vshrl.u32 %v16896_v42, 16  ;;  %v5314_v18 = vshll.u32 %v16896_v42, 16  ;;  %v4831_v16 = vrot.slane %v13550_v17, 1 }
 0x3a3   :  { %v5309_v19 = vsel %vm5003_vm15, %v5300_v3, %v5308_v0  ;;  %v13414_v0 = vld [vmem:[#allocation2 + $0xf8] ss:$0 sps:$4 sm:$0x33]  }
 0x3a4   :  { %v16899_v34 = vpop.f32.mrb[124].mxu0  ;;  %v5316_v6 = vrot.slane %v5314_v18, 2 }
 0x3a5   :  { %7600 = vmatmul.mubr.bf16.gmra.mrb[188].mxu1 %v4826_v36  ;;  %19865 = vst [vmem:[#allocation181_spill] sm:$0xff] %v16899_v34  ;;  %v16901_v13 = vpop.f32.mrb[125].mxu0  ;;  %v5319_v36 = vshrl.u32 %v13409_v63, 16  ;;  %v5313_v34 = vrot.slane %v5311_v47, 1  ;;  %v3837_v47 = vld [vmem:[#allocation2 + $0xf0] sm:$0xe] }
 0x3a6   :  { %7607 = vmatprep.mubr.bf16.mxu1 %v5292_v35  ;;  %19866 = vst [vmem:[#allocation182_spill] sm:$0xff] %v16901_v13  ;;  %v16903_v40 = vpop.f32.mrb[126].mxu0  ;;  %v4829_v35 = vsel %vm1123_vm2, %v4827_v43, %v4828_v58 }
 0x3a7   :  { %19867 = vst [vmem:[#allocation183_spill] sm:$0xff] %v16903_v40  ;;  %v16906_v12 = vpop.f32.mrb[127].mxu0  ;;  %v5321_v13 = vrot.slane %v5319_v36, 1  ;;  %v13411_v40 = vld [vmem:[#allocation2 + $0xec] ss:$0 sps:$4 sm:$0x33]   ;;  %v5317_v50 = vor.u32 %v5316_v6, %v5313_v34  ;;  %v4832_v36 = vsel %vm1123_vm2, %v4830_v30, %v4831_v16 }
 0x3a8   :  { %19868 = vst [vmem:[#allocation184_spill] sm:$0xff] %v16906_v12  ;;  %v13549_v12 = vld [vmem:[#allocation2 + $0xe8] sm:$0xf]  ;;  %v5336_v22 = vshrl.u32 %v13411_v40, 16  ;;  %v5339_v63 = vshll.u32 %v13411_v40, 16  ;;  %v4833_v40 = vrot.slane %v16896_v42, 1 }
 0x3a9   :  { %v11977_v1 = vcombine.low %v3836_v51, %v13549_v12  ;;  %v5325_v39 = vor.u32 %v5324_v55, %v5321_v13  ;;  %v11978_v51 = vcombine.low %v3837_v47, %v13551_v5  ;;  %v13552_v34 = vld [vmem:[#allocation2 + $0xe0] ss:$0 sps:$4 sm:$0x11]   ;;  %v5353_v13 = vshrl.u32 %v13414_v0, 16 }
 0x3aa   :  { %v5341_v3 = vrot.slane %v5339_v63, 2  ;;  %v4834_v55 = vrot.slane %v13552_v34, 1  ;;  %v13553_v42 = vld [vmem:[#allocation2 + $0x100] sm:$0xf] }
 0x3ab   :  { %v5328_v43 = vshrl.u32 %v11977_v1, 16  ;;  %v5331_v58 = vshll.u32 %v11977_v1, 16  ;;  %v5326_v12 = vsel %vm5003_vm15, %v5317_v50, %v5325_v39  ;;  %v5345_v30 = vshrl.u32 %v11978_v51, 16  ;;  %v13416_v50 = vld [vmem:[#allocation2 + $0x104] ss:$0 sps:$4 sm:$0x33]  }
 0x3ac   :  { %v5348_v16 = vshll.u32 %v11978_v51, 16  ;;  %v4835_v63 = vsel %vm1123_vm2, %v4833_v40, %v4834_v55  ;;  %v4836_v5 = vrot.slane %v11977_v1, 1  ;;  %v5373_v40 = vshll.u32 %v13416_v50, 16  ;;  %v3839_v55 = vld [vmem:[#allocation2 + $0x108] sm:$0xe] }
 0x3ad   :  { %7608 = vmatmul.mubr.bf16.gmra.mrb[192].mxu1 %v4829_v35  ;;  %v5338_v35 = vrot.slane %v5336_v22, 1  ;;  %v5330_v18 = vrot.slane %v5328_v43, 1  ;;  %v5333_v8 = vrot.slane %v5331_v58, 2  ;;  %v3838_v22 = vld [vmem:[#allocation2 + $0xfc] sm:$0xe]  ;;  %v5347_v58 = vrot.slane %v5345_v30, 1 }
 0x3ae   :  { %7615 = vmatprep.mubr.bf16.mxu1 %v5309_v19  ;;  %v5356_v19 = vshll.u32 %v13414_v0, 16  ;;  %v5350_v47 = vrot.slane %v5348_v16, 2  ;;  %v13554_v0 = vld [vmem:[#allocation2 + $0xec] ss:$0 sps:$4 sm:$0x11]  }
 0x3af   :  { %v5334_v6 = vor.u32 %v5333_v8, %v5330_v18  ;;  %v5342_v17 = vor.u32 %v5341_v3, %v5338_v35  ;;  %v4837_v18 = vrot.slane %v13554_v0, 1  ;;  %v5370_v3 = vshrl.u32 %v13416_v50, 16 }
 0x3b0   :  { %v5358_v39 = vrot.slane %v5356_v19, 2  ;;  %v5351_v8 = vor.u32 %v5350_v47, %v5347_v58 }
 0x3b1   :  { %v5343_v43 = vsel %vm5003_vm15, %v5334_v6, %v5342_v17  ;;  %v5372_v19 = vrot.slane %v5370_v3, 1  ;;  %v13419_v17 = vld [vmem:[#allocation2 + $0x110] ss:$0 sps:$4 sm:$0x33]  }
 0x3b2   :  { %v5387_v47 = vshrl.u32 %v13419_v17, 16 }
 0x3b5   :  { %7616 = vmatmul.mubr.bf16.gmra.mrb[196].mxu1 %v4832_v36  ;;  %v5355_v36 = vrot.slane %v5353_v13, 1  ;;  %v4838_v13 = vsel %vm1123_vm2, %v4836_v5, %v4837_v18  ;;  %v5390_v5 = vshll.u32 %v13419_v17, 16  ;;  %v3840_v18 = vld [vmem:[#allocation2 + $0x114] sm:$0xe] }
 0x3b6   :  { %7623 = vmatprep.mubr.bf16.mxu1 %v5326_v12  ;;  %v11979_v12 = vcombine.low %v3838_v22, %v13553_v42  ;;  %v5375_v22 = vrot.slane %v5373_v40, 2 }
 0x3b7   :  { %v5359_v35 = vor.u32 %v5358_v39, %v5355_v36  ;;  %v4839_v36 = vrot.slane %v11978_v51, 1  ;;  %v13556_v39 = vld [vmem:[#allocation2 + $0xf8] ss:$0 sps:$4 sm:$0x11]  }
 0x3b8   :  { %v5362_v34 = vshrl.u32 %v11979_v12, 16  ;;  %v5365_v59 = vshll.u32 %v11979_v12, 16  ;;  %v5376_v42 = vor.u32 %v5375_v22, %v5372_v19  ;;  %v13557_v51 = vld [vmem:[#allocation2 + $0x118] sm:$0xf]  ;;  %v4842_v40 = vrot.slane %v11979_v12, 1 }
 0x3b9   :  { %v5360_v30 = vsel %vm5003_vm15, %v5351_v8, %v5359_v35  ;;  %v5392_v8 = vrot.slane %v5390_v5, 2  ;;  %v13559_v12 = vld [vmem:[#allocation2 + $0x124] sm:$0xf] }
 0x3ba   :  { %v5364_v16 = vrot.slane %v5362_v34, 1  ;;  %v5367_v1 = vrot.slane %v5365_v59, 2  ;;  %v11981_v34 = vcombine.low %v3840_v18, %v13557_v51 }
 0x3bc   :  { %v5368_v50 = vor.u32 %v5367_v1, %v5364_v16 }
 0x3bd   :  { %7624 = vmatmul.mubr.bf16.gmra.mrb[200].mxu1 %v4835_v63  ;;  %v13555_v63 = vld [vmem:[#allocation2 + $0x10c] sm:$0xf] }
 0x3be   :  { %7631 = vmatprep.mubr.bf16.mxu1 %v5343_v43  ;;  %v11980_v6 = vcombine.low %v3839_v55, %v13555_v63  ;;  %v4840_v43 = vrot.slane %v13556_v39, 1  ;;  %v13421_v63 = vld [vmem:[#allocation2 + $0x11c] ss:$0 sps:$4 sm:$0x33]   ;;  %v5377_v59 = vsel %vm5003_vm15, %v5368_v50, %v5376_v42  ;;  %v5396_v39 = vshrl.u32 %v11981_v34, 16 }
 0x3bf   :  { %v5404_v19 = vshrl.u32 %v13421_v63, 16  ;;  %v5407_v1 = vshll.u32 %v13421_v63, 16  ;;  %v13424_v50 = vld [vmem:[#allocation2 + $0x128] ss:$0 sps:$4 sm:$0x33]  }
 0x3c0   :  { %v5379_v58 = vshrl.u32 %v11980_v6, 16  ;;  %v5382_v0 = vshll.u32 %v11980_v6, 16  ;;  %v4841_v3 = vsel %vm1123_vm2, %v4839_v36, %v4840_v43  ;;  %v5399_v36 = vshll.u32 %v11981_v34, 16  ;;  %v3841_v43 = vld [vmem:[#allocation2 + $0x120] sm:$0xe] }
 0x3c1   :  { %v11982_v18 = vcombine.low %v3841_v43, %v13559_v12  ;;  %v13560_v63 = vld [vmem:[#allocation2 + $0x110] ss:$0 sps:$4 sm:$0x11]  }
 0x3c2   :  { %v5381_v55 = vrot.slane %v5379_v58, 1  ;;  %v5384_v35 = vrot.slane %v5382_v0, 2  ;;  %v5398_v0 = vrot.slane %v5396_v39, 1  ;;  %v5401_v5 = vrot.slane %v5399_v36, 2 }
 0x3c4   :  { %v5385_v17 = vor.u32 %v5384_v35, %v5381_v55  ;;  %v4846_v55 = vrot.slane %v13560_v63, 1  ;;  %v5424_v35 = vshll.u32 %v13424_v50, 16 }
 0x3c5   :  { %7632 = vmatmul.mubr.bf16.gmra.mrb[204].mxu1 %v4838_v13  ;;  %v5389_v13 = vrot.slane %v5387_v47, 1  ;;  %v5406_v47 = vrot.slane %v5404_v19, 1 }
 0x3c6   :  { %7639 = vmatprep.mubr.bf16.mxu1 %v5360_v30  ;;  %v13558_v30 = vld [vmem:[#allocation2 + $0x104] ss:$0 sps:$4 sm:$0x11]  }
 0x3c7   :  { %v4843_v16 = vrot.slane %v13558_v30, 1  ;;  %v5393_v22 = vor.u32 %v5392_v8, %v5389_v13  ;;  %v5421_v13 = vshrl.u32 %v13424_v50, 16  ;;  %v5402_v8 = vor.u32 %v5401_v5, %v5398_v0  ;;  %v13562_v50 = vld [vmem:[#allocation2 + $0x11c] ss:$0 sps:$4 sm:$0x11]  }
 0x3c8   :  { %v5413_v30 = vshrl.u32 %v11982_v18, 16  ;;  %v4849_v0 = vrot.slane %v13562_v50, 1 }
 0x3c9   :  { %v4844_v58 = vsel %vm1123_vm2, %v4842_v40, %v4843_v16  ;;  %v5394_v42 = vsel %vm5003_vm15, %v5385_v17, %v5393_v22  ;;  %v5416_v40 = vshll.u32 %v11982_v18, 16  ;;  %v3842_v16 = vld [vmem:[#allocation2 + $0x12c] sm:$0xe]  ;;  %v13426_v17 = vld [vmem:[#allocation2 + $0x134] ss:$0 sps:$4 sm:$0x33]  }
 0x3ca   :  { %v5415_v39 = vrot.slane %v5413_v30, 1 }
 0x3cb   :  { %v5418_v36 = vrot.slane %v5416_v40, 2 }
 0x3cd   :  { %7640 = vmatmul.mubr.bf16.gmra.mrb[208].mxu1 %v4841_v3  ;;  %v5409_v3 = vrot.slane %v5407_v1, 2  ;;  %v5423_v1 = vrot.slane %v5421_v13, 1  ;;  %v5419_v5 = vor.u32 %v5418_v36, %v5415_v39 }
 0x3ce   :  { %7647 = vmatprep.mubr.bf16.mxu1 %v5377_v59  ;;  %v4845_v59 = vrot.slane %v11980_v6, 1  ;;  %v13561_v6 = vld [vmem:[#allocation2 + $0x130] sm:$0xf] }
 0x3cf   :  { %v5410_v51 = vor.u32 %v5409_v3, %v5406_v47  ;;  %v11983_v43 = vcombine.low %v3842_v16, %v13561_v6  ;;  %v5438_v3 = vshrl.u32 %v13426_v17, 16 }
 0x3d0   :  { %v4847_v19 = vsel %vm1123_vm2, %v4845_v59, %v4846_v55  ;;  %v5441_v59 = vshll.u32 %v13426_v17, 16  ;;  %v3843_v55 = vld [vmem:[#allocation2 + $0x138] sm:$0xe] }
 0x3d1   :  { %v5411_v22 = vsel %vm5003_vm15, %v5402_v8, %v5410_v51  ;;  %v5430_v12 = vshrl.u32 %v11983_v43, 16  ;;  %v5433_v63 = vshll.u32 %v11983_v43, 16  ;;  %v13429_v51 = vld [vmem:[#allocation2 + $0x140] ss:$0 sps:$4 sm:$0x33]  }
 0x3d2   :  { %v5443_v16 = vrot.slane %v5441_v59, 2  ;;  %v5455_v36 = vshrl.u32 %v13429_v51, 16  ;;  %v4854_v59 = vrot.slane %v11983_v43, 1  ;;  %v13567_v43 = vld [vmem:[#allocation2 + $0x154] sm:$0xf] }
 0x3d3   :  { %v5432_v40 = vrot.slane %v5430_v12, 1 }
 0x3d5   :  { %7648 = vmatmul.mubr.bf16.gmra.mrb[212].mxu1 %v4844_v58  ;;  %v5426_v58 = vrot.slane %v5424_v35, 2  ;;  %v5440_v35 = vrot.slane %v5438_v3, 1 }
 0x3d6   :  { %7655 = vmatprep.mubr.bf16.mxu1 %v5394_v42  ;;  %v4848_v42 = vrot.slane %v11981_v34, 1  ;;  %v5435_v34 = vrot.slane %v5433_v63, 2 }
 0x3d7   :  { %v5427_v47 = vor.u32 %v5426_v58, %v5423_v1  ;;  %v4851_v1 = vrot.slane %v11982_v18, 1  ;;  %v13564_v58 = vld [vmem:[#allocation2 + $0x128] ss:$0 sps:$4 sm:$0x11]   ;;  %v5444_v6 = vor.u32 %v5443_v16, %v5440_v35 }
 0x3d8   :  { %v4850_v13 = vsel %vm1123_vm2, %v4848_v42, %v4849_v0  ;;  %v5436_v17 = vor.u32 %v5435_v34, %v5432_v40  ;;  %v5458_v42 = vshll.u32 %v13429_v51, 16  ;;  %v3844_v0 = vld [vmem:[#allocation2 + $0x144] sm:$0xe]  ;;  %v13565_v18 = vld [vmem:[#allocation2 + $0x148] sm:$0xf] }
 0x3d9   :  { %v5428_v30 = vsel %vm5003_vm15, %v5419_v5, %v5427_v47  ;;  %v11985_v63 = vcombine.low %v3844_v0, %v13565_v18 }
 0x3da   :  { %v5445_v47 = vsel %vm5003_vm15, %v5436_v17, %v5444_v6  ;;  %v5460_v12 = vrot.slane %v5458_v42, 2  ;;  %v13434_v17 = vld [vmem:[#allocation2 + $0x158] ss:$0 sps:$4 sm:$0x33]  }
 0x3dd   :  { %7656 = vmatmul.mubr.bf16.gmra.mrb[216].mxu1 %v4847_v19  ;;  %v13563_v19 = vld [vmem:[#allocation2 + $0x13c] sm:$0xf] }
 0x3de   :  { %7663 = vmatprep.mubr.bf16.mxu1 %v5411_v22  ;;  %v11984_v8 = vcombine.low %v3843_v55, %v13563_v19  ;;  %v4852_v22 = vrot.slane %v13564_v58, 1  ;;  %v13431_v19 = vld [vmem:[#allocation2 + $0x14c] ss:$0 sps:$4 sm:$0x33]   ;;  %v5464_v58 = vshrl.u32 %v11985_v63, 16 }
 0x3df   :  { %v5472_v35 = vshrl.u32 %v13431_v19, 16  ;;  %v5475_v34 = vshll.u32 %v13431_v19, 16  ;;  %v13568_v19 = vld [vmem:[#allocation2 + $0x140] ss:$0 sps:$4 sm:$0x11]  }
 0x3e0   :  { %v5447_v39 = vshrl.u32 %v11984_v8, 16  ;;  %v5450_v50 = vshll.u32 %v11984_v8, 16  ;;  %v4853_v3 = vsel %vm1123_vm2, %v4851_v1, %v4852_v22  ;;  %v5467_v1 = vshll.u32 %v11985_v63, 16  ;;  %v3845_v22 = vld [vmem:[#allocation2 + $0x150] sm:$0xe] }
 0x3e1   :  { %v11986_v0 = vcombine.low %v3845_v22, %v13567_v43 }
 0x3e2   :  { %v5449_v55 = vrot.slane %v5447_v39, 1  ;;  %v5452_v5 = vrot.slane %v5450_v50, 2  ;;  %v5466_v50 = vrot.slane %v5464_v58, 1  ;;  %v5469_v42 = vrot.slane %v5467_v1, 2 }
 0x3e4   :  { %v5453_v51 = vor.u32 %v5452_v5, %v5449_v55  ;;  %v4858_v55 = vrot.slane %v13568_v19, 1  ;;  %v5492_v5 = vshll.u32 %v13434_v17, 16 }
 0x3e5   :  { %7664 = vmatmul.mubr.bf16.gmra.mrb[220].mxu1 %v4850_v13  ;;  %v5457_v13 = vrot.slane %v5455_v36, 1  ;;  %v5474_v36 = vrot.slane %v5472_v35, 1 }
 0x3e6   :  { %7671 = vmatprep.mubr.bf16.mxu1 %v5428_v30  ;;  %v13566_v30 = vld [vmem:[#allocation2 + $0x134] ss:$0 sps:$4 sm:$0x11]  }
 0x3e7   :  { %v4855_v40 = vrot.slane %v13566_v30, 1  ;;  %v5461_v16 = vor.u32 %v5460_v12, %v5457_v13  ;;  %v5489_v13 = vshrl.u32 %v13434_v17, 16  ;;  %v5470_v12 = vor.u32 %v5469_v42, %v5466_v50  ;;  %v13570_v17 = vld [vmem:[#allocation2 + $0x14c] ss:$0 sps:$4 sm:$0x11]  }
 0x3e8   :  { %v5481_v30 = vshrl.u32 %v11986_v0, 16  ;;  %v4861_v50 = vrot.slane %v13570_v17, 1 }
 0x3e9   :  { %v4856_v39 = vsel %vm1123_vm2, %v4854_v59, %v4855_v40  ;;  %v5462_v6 = vsel %vm5003_vm15, %v5453_v51, %v5461_v16  ;;  %v5484_v59 = vshll.u32 %v11986_v0, 16  ;;  %v3846_v40 = vld [vmem:[#allocation2 + $0x15c] sm:$0xe]  ;;  %v13436_v51 = vld [vmem:[#allocation2 + $0x164] ss:$0 sps:$4 sm:$0x33]  }
 0x3ea   :  { %v5483_v58 = vrot.slane %v5481_v30, 1 }
 0x3eb   :  { %v5486_v1 = vrot.slane %v5484_v59, 2 }
 0x3ed   :  { %7672 = vmatmul.mubr.bf16.gmra.mrb[224].mxu1 %v4853_v3  ;;  %v5477_v3 = vrot.slane %v5475_v34, 2  ;;  %v5491_v34 = vrot.slane %v5489_v13, 1  ;;  %v5487_v42 = vor.u32 %v5486_v1, %v5483_v58 }
 0x3ee   :  { %7679 = vmatprep.mubr.bf16.mxu1 %v5445_v47  ;;  %v4857_v47 = vrot.slane %v11984_v8, 1  ;;  %v13569_v8 = vld [vmem:[#allocation2 + $0x160] sm:$0xf] }
 0x3ef   :  { %v5478_v18 = vor.u32 %v5477_v3, %v5474_v36  ;;  %v11987_v22 = vcombine.low %v3846_v40, %v13569_v8  ;;  %v5506_v36 = vshrl.u32 %v13436_v51, 16  ;;  %v5509_v3 = vshll.u32 %v13436_v51, 16  ;;  %v13572_v51 = vld [vmem:[#allocation2 + $0x158] ss:$0 sps:$4 sm:$0x11]  }
 0x3f0   :  { %v4859_v35 = vsel %vm1123_vm2, %v4857_v47, %v4858_v55  ;;  %v3847_v55 = vld [vmem:[#allocation2 + $0x168] sm:$0xe]  ;;  %v4864_v58 = vrot.slane %v13572_v51, 1 }
 0x3f1   :  { %v5479_v16 = vsel %vm5003_vm15, %v5470_v12, %v5478_v18  ;;  %v5498_v19 = vshrl.u32 %v11987_v22, 16  ;;  %v5501_v47 = vshll.u32 %v11987_v22, 16  ;;  %v13439_v12 = vld [vmem:[#allocation2 + $0x170] ss:$0 sps:$4 sm:$0x33]  }
 0x3f3   :  { %v5500_v30 = vrot.slane %v5498_v19, 1  ;;  %v5503_v59 = vrot.slane %v5501_v47, 2 }
 0x3f5   :  { %7680 = vmatmul.mubr.bf16.gmra.mrb[228].mxu1 %v4856_v39  ;;  %v5494_v39 = vrot.slane %v5492_v5, 2  ;;  %v5508_v5 = vrot.slane %v5506_v36, 1  ;;  %v5504_v1 = vor.u32 %v5503_v59, %v5500_v30 }
 0x3f6   :  { %7687 = vmatprep.mubr.bf16.mxu1 %v5462_v6  ;;  %v4860_v6 = vrot.slane %v11985_v63, 1  ;;  %v13571_v63 = vld [vmem:[#allocation2 + $0x16c] sm:$0xf] }
 0x3f7   :  { %v5495_v43 = vor.u32 %v5494_v39, %v5491_v34  ;;  %v11988_v40 = vcombine.low %v3847_v55, %v13571_v63  ;;  %v5523_v39 = vshrl.u32 %v13439_v12, 16 }
 0x3f8   :  { %v4862_v13 = vsel %vm1123_vm2, %v4860_v6, %v4861_v50  ;;  %v5526_v6 = vshll.u32 %v13439_v12, 16  ;;  %v3848_v50 = vld [vmem:[#allocation2 + $0x174] sm:$0xe] }
 0x3f9   :  { %v5496_v18 = vsel %vm5003_vm15, %v5487_v42, %v5495_v43  ;;  %v5515_v8 = vshrl.u32 %v11988_v40, 16  ;;  %v5518_v17 = vshll.u32 %v11988_v40, 16  ;;  %v13441_v43 = vld [vmem:[#allocation2 + $0x17c] ss:$0 sps:$4 sm:$0x33]  }
 0x3fa   :  { %v5528_v55 = vrot.slane %v5526_v6, 2  ;;  %v5540_v12 = vshrl.u32 %v13441_v43, 16  ;;  %v5543_v63 = vshll.u32 %v13441_v43, 16  ;;  %v13576_v6 = vld [vmem:[#allocation2 + $0x170] ss:$0 sps:$4 sm:$0x11]  }
 0x3fb   :  { %v5517_v47 = vrot.slane %v5515_v8, 1  ;;  %v13575_v8 = vld [vmem:[#allocation2 + $0x4] sm:$0xf] }
 0x3fd   :  { %7688 = vmatmul.mubr.bf16.gmra.mrb[232].mxu1 %v4859_v35  ;;  %v5511_v35 = vrot.slane %v5509_v3, 2  ;;  %v5525_v3 = vrot.slane %v5523_v39, 1 }
 0x3fe   :  { %7695 = vmatprep.mubr.bf16.mxu1 %v5479_v16  ;;  %v4863_v16 = vrot.slane %v11986_v0, 1  ;;  %v5520_v0 = vrot.slane %v5518_v17, 2  ;;  %v4869_v17 = vrot.slane %v11988_v40, 1  ;;  %v13578_v40 = vld [vmem:[#allocation2 + $0x10] sm:$0xf] }
 0x3ff   :  { %v5512_v34 = vor.u32 %v5511_v35, %v5508_v5  ;;  %v4866_v5 = vrot.slane %v11987_v22, 1  ;;  %v13574_v35 = vld [vmem:[#allocation2 + $0x164] ss:$0 sps:$4 sm:$0x11]  }
 0x400   :  { %v4865_v36 = vsel %vm1123_vm2, %v4863_v16, %v4864_v58  ;;  %v5521_v51 = vor.u32 %v5520_v0, %v5517_v47  ;;  %v5529_v16 = vor.u32 %v5528_v55, %v5525_v3  ;;  %v3881_v58 = vld [vmem:[#allocation2] sm:$0xc]  ;;  %v13577_v47 = vld [vmem:[#allocation2 + $0x8] ss:$0 sps:$4 sm:$0x77]  }
 0x401   :  { %v5513_v19 = vsel %vm5003_vm15, %v5504_v1, %v5512_v34  ;;  %v5545_v34 = vrot.slane %v5543_v63, 2  ;;  %v12022_v22 = vcombine.low %v3881_v58, %v13575_v8  ;;  %v5911_v3 = vshrl.u32 %v13577_v47, 16 }
 0x402   :  { %v5530_v1 = vsel %vm5003_vm15, %v5521_v51, %v5529_v16 }
 0x403   :  { %v5903_v0 = vshrl.u32 %v12022_v22, 16  ;;  %v5906_v55 = vshll.u32 %v12022_v22, 16 }
 0x405   :  { %7696 = vmatmul.mubr.bf16.gmra.mrb[236].mxu1 %v4862_v13  ;;  %v13573_v13 = vld [vmem:[#allocation2 + $0x178] sm:$0xf]  ;;  %v5905_v63 = vrot.slane %v5903_v0, 2  ;;  %v5908_v51 = vrot.slane %v5906_v55, 3 }
 0x406   :  { %7703 = vmatprep.mubr.bf16.mxu1 %v5496_v18  ;;  %v11989_v42 = vcombine.low %v3848_v50, %v13573_v13  ;;  %v4867_v18 = vrot.slane %v13574_v35, 1  ;;  %v5542_v13 = vrot.slane %v5540_v12, 1  ;;  %v5913_v12 = vrot.slane %v5911_v3, 2  ;;  %v13581_v3 = vld [vmem:[#allocation2 + $0x1c] sm:$0xf] }
 0x407   :  { %v5909_v8 = vor.u32 %v5908_v51, %v5905_v63 }
 0x408   :  { %v5532_v30 = vshrl.u32 %v11989_v42, 16  ;;  %v5535_v59 = vshll.u32 %v11989_v42, 16  ;;  %v4868_v39 = vsel %vm1123_vm2, %v4866_v5, %v4867_v18  ;;  %v5546_v43 = vor.u32 %v5545_v34, %v5542_v13  ;;  %v3882_v18 = vld [vmem:[#allocation2 + $0xc] sm:$0xc] }
 0x409   :  { %v5914_v5 = vshll.u32 %v13577_v47, 16  ;;  %v12023_v58 = vcombine.low %v3882_v18, %v13578_v40  ;;  %v13580_v13 = vld [vmem:[#allocation2 + $0x14] ss:$0 sps:$4 sm:$0x77]  }
 0x40a   :  { %v5534_v50 = vrot.slane %v5532_v30, 1  ;;  %v5928_v34 = vshrl.u32 %v13580_v13, 16 }
 0x40b   :  { %v5916_v16 = vrot.slane %v5914_v5, 3  ;;  %v5920_v47 = vshrl.u32 %v12023_v58, 16 }
 0x40d   :  { %7704 = vmatmul.mubr.bf16.gmra.mrb[240].mxu1 %v4865_v36  ;;  %v5537_v36 = vrot.slane %v5535_v59, 2  ;;  %v5922_v55 = vrot.slane %v5920_v47, 2 }
 0x40e   :  { %7711 = vmatprep.mubr.bf16.mxu1 %v5513_v19  ;;  %v4870_v19 = vrot.slane %v13576_v6, 1  ;;  %v5917_v6 = vor.u32 %v5916_v16, %v5913_v12 }
 0x40f   :  { %v5538_v35 = vor.u32 %v5537_v36, %v5534_v50  ;;  %v13579_v50 = vld [vmem:[#allocation2 + $0x17c] ss:$0 sps:$4 sm:$0x11]  }
 0x410   :  { %v4871_v30 = vsel %vm1123_vm2, %v4869_v17, %v4870_v19  ;;  %v4873_v36 = vrot.slane %v13579_v50, 1  ;;  %v5923_v17 = vshll.u32 %v12023_v58, 16  ;;  %v3883_v19 = vld [vmem:[#allocation2 + $0x18] sm:$0xc] }
 0x411   :  { %v5547_v59 = vsel %vm5003_vm15, %v5538_v35, %v5546_v43  ;;  %v5930_v43 = vrot.slane %v5928_v34, 2  ;;  %v16943_v0 = vcombine.low %v3883_v19, %v13581_v3  ;;  %v13585_v3 = vld [vmem:[#allocation2 + $0x14] ss:$0 sps:$4 sm:$0x33]  }
 0x412   :  { %v5925_v5 = vrot.slane %v5923_v17, 3  ;;  %v13584_v17 = vld [vmem:[#allocation2 + $0x28] sm:$0xf] }
 0x413   :  { %v5937_v63 = vshrl.u32 %v16943_v0, 16  ;;  %v5940_v51 = vshll.u32 %v16943_v0, 16 }
 0x414   :  { %v5926_v16 = vor.u32 %v5925_v5, %v5922_v55 }
 0x415   :  { %7712 = vmatmul.mubr.bf16.gmra.mrb[244].mxu1 %v4868_v39  ;;  %v4872_v39 = vrot.slane %v11989_v42, 1  ;;  %v5918_v42 = vsel %vm5901_vm0, %v5909_v8, %v5917_v6  ;;  %v5939_v8 = vrot.slane %v5937_v63, 2  ;;  %v5942_v6 = vrot.slane %v5940_v51, 3 }
 0x416   :  { %7719 = vmatprep.mubr.bf16.mxu1 %v5530_v1  ;;  %v5931_v1 = vshll.u32 %v13580_v13, 16  ;;  %v3884_v13 = vld [vmem:[#allocation2 + $0x24] sm:$0xc] }
 0x417   :  { %v4874_v35 = vsel %vm1123_vm2, %v4872_v39, %v4873_v36  ;;  %v13583_v39 = vld [vmem:[#allocation2 + $0x20] ss:$0 sps:$4 sm:$0x77]   ;;  %v12025_v19 = vcombine.low %v3884_v13, %v13584_v17  ;;  %vm406_vm2 = vcmask 785408  }
 0x418   :  { %v5933_v18 = vrot.slane %v5931_v1, 3  ;;  %v5945_v50 = vshrl.u32 %v13583_v39, 16  ;;  %v5948_v36 = vshll.u32 %v13583_v39, 16  ;;  %407 = vst.msk [vmem:[#allocation3] sm:$0xff] %vm406_vm2, %v19440_v15  ;;  %408 = vst.msk [vmem:[#allocation3 + $0x8] sm:$0xff] %vm406_vm2, %v19440_v15 }
 0x419   :  { %v5954_v39 = vshrl.u32 %v12025_v19, 16  ;;  %409 = vst.msk [vmem:[#allocation3 + $0x10] sm:$0xff] %vm406_vm2, %v19440_v15  ;;  %410 = vst.msk [vmem:[#allocation3 + $0xb0] sm:$0xff] %vm406_vm2, %v19440_v15 }
 0x41a   :  { %v5934_v40 = vor.u32 %v5933_v18, %v5930_v43  ;;  %v5947_v1 = vrot.slane %v5945_v50, 2  ;;  %v5950_v47 = vrot.slane %v5948_v36, 3  ;;  %v5681_v43 = vrot.slane %v13585_v3, 2  ;;  %411 = vst.msk [vmem:[#allocation3 + $0xb8] sm:$0xff] %vm406_vm2, %v19440_v15  ;;  %412 = vst.msk [vmem:[#allocation3 + $0xc0] sm:$0xff] %vm406_vm2, %v19440_v15 }
 0x41b   :  { %v5943_v18 = vor.u32 %v5942_v6, %v5939_v8  ;;  %v5956_v50 = vrot.slane %v5954_v39, 2  ;;  %v13589_v6 = vld [vmem:[#allocation2 + $0x38] ss:$0 sps:$4 sm:$0x77]   ;;  %414 = vst.msk [vmem:[#allocation3 + $0x98] sm:$0xff] %vm406_vm2, %v19440_v15  ;;  %415 = vst.msk [vmem:[#allocation3 + $0xa0] sm:$0xff] %vm406_vm2, %v19440_v15 }
 0x41c   :  { %416 = vst.msk [vmem:[#allocation3 + $0xa8] sm:$0xff] %vm406_vm2, %v19440_v15  ;;  %417 = vst.msk [vmem:[#allocation3 + $0x148] sm:$0xff] %vm406_vm2, %v19440_v15 }
 0x41d   :  { %7720 = vmatmul.mubr.bf16.gmra.mrb[248].mxu1 %v4871_v30  ;;  %v5677_v30 = vrot.slane %v12022_v22, 2  ;;  %v5935_v22 = vsel %vm5901_vm0, %v5926_v16, %v5934_v40  ;;  %418 = vst.msk [vmem:[#allocation3 + $0x150] sm:$0xff] %vm406_vm2, %v19440_v15  ;;  %419 = vst.msk [vmem:[#allocation3 + $0x158] sm:$0xff] %vm406_vm2, %v19440_v15 }
 0x41e   :  { %7727 = vmatprep.mubr.bf16.mxu1 %v5547_v59  ;;  %v13582_v59 = vld [vmem:[#allocation2 + $0x8] ss:$0 sps:$4 sm:$0x33]  }
 0x41f   :  { %v5678_v12 = vrot.slane %v13582_v59, 2  ;;  %v5951_v59 = vor.u32 %v5950_v47, %v5947_v1  ;;  %v5979_v1 = vshrl.u32 %v13589_v6, 16  ;;  %v5982_v47 = vshll.u32 %v13589_v6, 16 }
 0x421   :  { %v5679_v34 = vsel %vm5676_vm1, %v5677_v30, %v5678_v12  ;;  %v5957_v30 = vshll.u32 %v12025_v19, 16  ;;  %v3885_v12 = vld [vmem:[#allocation2 + $0x30] sm:$0xc]  ;;  %v5952_v40 = vsel %vm5901_vm0, %v5943_v18, %v5951_v59  ;;  %v13590_v18 = vld [vmem:[#allocation2 + $0x40] sm:$0xf] }
 0x423   :  { %v5959_v36 = vrot.slane %v5957_v30, 3 }
 0x425   :  { %7728 = vmatmul.mubr.bf16.gmra.mrb[252].mxu1 %v4874_v35  ;;  %v5680_v35 = vrot.slane %v12023_v58, 2  ;;  %v13587_v58 = vld [vmem:[#allocation2 + $0x34] sm:$0xf]  ;;  %v5960_v17 = vor.u32 %v5959_v36, %v5956_v50 }
 0x426   :  { %7768 = vmatprep.mubr.bf16.mxu1 %v5918_v42  ;;  %v13586_v42 = vld [vmem:[#allocation2 + $0x2c] ss:$0 sps:$4 sm:$0x77]   ;;  %v12026_v13 = vcombine.low %v3885_v12, %v13587_v58  ;;  %v5984_v12 = vrot.slane %v5982_v47, 3 }
 0x427   :  { %v5962_v55 = vshrl.u32 %v13586_v42, 16  ;;  %v5965_v5 = vshll.u32 %v13586_v42, 16  ;;  %v5682_v63 = vsel %vm5676_vm1, %v5680_v35, %v5681_v43  ;;  %v3886_v42 = vld [vmem:[#allocation2 + $0x3c] sm:$0xc] }
 0x428   :  { %v5971_v35 = vshrl.u32 %v12026_v13, 16  ;;  %v5974_v43 = vshll.u32 %v12026_v13, 16  ;;  %v12027_v59 = vcombine.low %v3886_v42, %v13590_v18  ;;  %v13594_v18 = vld [vmem:[#allocation2 + $0x38] ss:$0 sps:$4 sm:$0x33]  }
 0x429   :  { %v5964_v51 = vrot.slane %v5962_v55, 2  ;;  %v5967_v16 = vrot.slane %v5965_v5, 3  ;;  %v5981_v5 = vrot.slane %v5979_v1, 2 }
 0x42a   :  { %v5973_v30 = vrot.slane %v5971_v35, 2  ;;  %v5988_v50 = vshrl.u32 %v12027_v59, 16  ;;  %v5991_v6 = vshll.u32 %v12027_v59, 16 }
 0x42b   :  { %v5968_v3 = vor.u32 %v5967_v16, %v5964_v51  ;;  %v13592_v51 = vld [vmem:[#allocation2 + $0x44] ss:$0 sps:$4 sm:$0x77]  }
 0x42c   :  { %v5996_v16 = vshrl.u32 %v13592_v51, 16  ;;  %v5990_v42 = vrot.slane %v5988_v50, 2  ;;  %v5993_v47 = vrot.slane %v5991_v6, 3 }
 0x42d   :  { %7769 = vmatmul.mubr.bf16.vlgmr.msra.gmra.mrb[128].mxu1 %v5679_v34  ;;  %v5683_v34 = vrot.slane %v16943_v0, 2  ;;  %v5969_v39 = vsel %vm5901_vm0, %v5960_v17, %v5968_v3  ;;  %v5976_v0 = vrot.slane %v5974_v43, 3  ;;  %v5689_v43 = vrot.slane %v12026_v13, 2  ;;  %v13596_v13 = vld [vmem:[#allocation2 + $0x58] sm:$0xf] }
 0x42e   :  { %7776 = vmatprep.mubr.bf16.mxu1 %v5935_v22  ;;  %v13588_v22 = vld [vmem:[#allocation2 + $0x20] ss:$0 sps:$4 sm:$0x33]  }
 0x42f   :  { %v5684_v8 = vrot.slane %v13588_v22, 2  ;;  %v5977_v36 = vor.u32 %v5976_v0, %v5973_v30  ;;  %v5985_v22 = vor.u32 %v5984_v12, %v5981_v5  ;;  %v13595_v30 = vld [vmem:[#allocation2 + $0x50] ss:$0 sps:$4 sm:$0x77]   ;;  %v5994_v12 = vor.u32 %v5993_v47, %v5990_v42 }
 0x430   :  { %v6013_v5 = vshrl.u32 %v13595_v30, 16  ;;  %v6016_v0 = vshll.u32 %v13595_v30, 16 }
 0x431   :  { %v5685_v55 = vsel %vm5676_vm1, %v5683_v34, %v5684_v8  ;;  %v5999_v34 = vshll.u32 %v13592_v51, 16  ;;  %v3887_v8 = vld [vmem:[#allocation2 + $0x48] sm:$0xc]  ;;  %v5986_v17 = vsel %vm5901_vm0, %v5977_v36, %v5985_v22 }
 0x432   :  { %v6018_v36 = vrot.slane %v6016_v0, 3 }
 0x433   :  { %v6001_v3 = vrot.slane %v5999_v34, 3 }
 0x435   :  { %7777 = vmatmul.mubr.bf16.gmra.mrb[132].mxu1 %v5682_v63  ;;  %v5686_v63 = vrot.slane %v12025_v19, 2  ;;  %v13593_v19 = vld [vmem:[#allocation2 + $0x4c] sm:$0xf] }
 0x436   :  { %7784 = vmatprep.mubr.bf16.mxu1 %v5952_v40  ;;  %v13591_v40 = vld [vmem:[#allocation2 + $0x2c] ss:$0 sps:$4 sm:$0x33]   ;;  %v12028_v35 = vcombine.low %v3887_v8, %v13593_v19 }
 0x437   :  { %v5687_v58 = vrot.slane %v13591_v40, 2 }
 0x438   :  { %v6005_v51 = vshrl.u32 %v12028_v35, 16 }
 0x439   :  { %v5688_v1 = vsel %vm5676_vm1, %v5686_v63, %v5687_v58  ;;  %v6008_v63 = vshll.u32 %v12028_v35, 16  ;;  %v3888_v58 = vld [vmem:[#allocation2 + $0x54] sm:$0xc] }
 0x43a   :  { %v6007_v6 = vrot.slane %v6005_v51, 2  ;;  %v12029_v8 = vcombine.low %v3888_v58, %v13596_v13 }
 0x43b   :  { %v6010_v34 = vrot.slane %v6008_v63, 3 }
 0x43c   :  { %v6025_v30 = vshll.u32 %v12029_v8, 16 }
 0x43d   :  { %7785 = vmatmul.mubr.bf16.gmra.mrb[136].mxu1 %v5685_v55  ;;  %v5998_v55 = vrot.slane %v5996_v16, 2  ;;  %v6015_v16 = vrot.slane %v6013_v5, 2 }
 0x43e   :  { %7792 = vmatprep.mubr.bf16.mxu1 %v5969_v39  ;;  %v5690_v39 = vrot.slane %v13594_v18, 2  ;;  %v6022_v18 = vshrl.u32 %v12029_v8, 16 }
 0x43f   :  { %v6002_v40 = vor.u32 %v6001_v3, %v5998_v55  ;;  %v6019_v42 = vor.u32 %v6018_v36, %v6015_v16  ;;  %v13598_v55 = vld [vmem:[#allocation2 + $0x5c] ss:$0 sps:$4 sm:$0x77]   ;;  %v6011_v3 = vor.u32 %v6010_v34, %v6007_v6  ;;  %v13600_v16 = vld [vmem:[#allocation2 + $0x50] ss:$0 sps:$4 sm:$0x33]  }
 0x440   :  { %v5691_v50 = vsel %vm5676_vm1, %v5689_v43, %v5690_v39  ;;  %v6030_v47 = vshrl.u32 %v13598_v55, 16  ;;  %v6033_v43 = vshll.u32 %v13598_v55, 16  ;;  %v3889_v39 = vld [vmem:[#allocation2 + $0x60] sm:$0xc]  ;;  %v6024_v63 = vrot.slane %v6022_v18, 2 }
 0x441   :  { %v6003_v22 = vsel %vm5901_vm0, %v5994_v12, %v6002_v40  ;;  %v13599_v12 = vld [vmem:[#allocation2 + $0x64] sm:$0xf]  ;;  %v6020_v51 = vsel %vm5901_vm0, %v6011_v3, %v6019_v42  ;;  %v5696_v36 = vrot.slane %v13600_v16, 2  ;;  %v13601_v6 = vld [vmem:[#allocation2 + $0x68] ss:$0 sps:$4 sm:$0x77]  }
 0x442   :  { %v6032_v0 = vrot.slane %v6030_v47, 2  ;;  %v12030_v40 = vcombine.low %v3889_v39, %v13599_v12  ;;  %v6035_v58 = vrot.slane %v6033_v43, 3  ;;  %v6047_v34 = vshrl.u32 %v13601_v6, 16  ;;  %v13603_v12 = vld [vmem:[#allocation2 + $0x5c] ss:$0 sps:$4 sm:$0x33]  }
 0x443   :  { %v5698_v43 = vrot.slane %v12029_v8, 2  ;;  %v13605_v8 = vld [vmem:[#allocation2 + $0x7c] sm:$0xf] }
 0x444   :  { %v6042_v55 = vshll.u32 %v12030_v40, 16 }
 0x445   :  { %7793 = vmatmul.mubr.bf16.gmra.mrb[140].mxu1 %v5688_v1  ;;  %v5692_v1 = vrot.slane %v12027_v59, 2  ;;  %v6027_v59 = vrot.slane %v6025_v30, 3 }
 0x446   :  { %7800 = vmatprep.mubr.bf16.mxu1 %v5986_v17  ;;  %v13597_v17 = vld [vmem:[#allocation2 + $0x44] ss:$0 sps:$4 sm:$0x33]   ;;  %v6044_v3 = vrot.slane %v6042_v55, 3 }
 0x447   :  { %v5693_v19 = vrot.slane %v13597_v17, 2  ;;  %v6028_v13 = vor.u32 %v6027_v59, %v6024_v63  ;;  %v6036_v17 = vor.u32 %v6035_v58, %v6032_v0  ;;  %v13604_v63 = vld [vmem:[#allocation2 + $0x74] ss:$0 sps:$4 sm:$0x77]  }
 0x448   :  { %v6064_v0 = vshrl.u32 %v13604_v63, 16  ;;  %v6067_v59 = vshll.u32 %v13604_v63, 16 }
 0x449   :  { %v5694_v5 = vsel %vm5676_vm1, %v5692_v1, %v5693_v19  ;;  %v6050_v1 = vshll.u32 %v13601_v6, 16  ;;  %v3890_v19 = vld [vmem:[#allocation2 + $0x6c] sm:$0xc]  ;;  %v6037_v42 = vsel %vm5901_vm0, %v6028_v13, %v6036_v17 }
 0x44a   :  { %v6069_v13 = vrot.slane %v6067_v59, 3 }
 0x44b   :  { %v6052_v18 = vrot.slane %v6050_v1, 3 }
 0x44d   :  { %7801 = vmatmul.mubr.bf16.gmra.mrb[144].mxu1 %v5691_v50  ;;  %v5695_v50 = vrot.slane %v12028_v35, 2  ;;  %v13602_v35 = vld [vmem:[#allocation2 + $0x70] sm:$0xf] }
 0x44e   :  { %7808 = vmatprep.mubr.bf16.mxu1 %v6003_v22  ;;  %v6039_v22 = vshrl.u32 %v12030_v40, 16  ;;  %v12031_v30 = vcombine.low %v3890_v19, %v13602_v35 }
 0x44f   :  { %v5697_v47 = vsel %vm5676_vm1, %v5695_v50, %v5696_v36  ;;  %v3891_v36 = vld [vmem:[#allocation2 + $0x78] sm:$0xc] }
 0x450   :  { %v6041_v39 = vrot.slane %v6039_v22, 2  ;;  %v6056_v6 = vshrl.u32 %v12031_v30, 16  ;;  %v6059_v50 = vshll.u32 %v12031_v30, 16  ;;  %v12032_v19 = vcombine.low %v3891_v36, %v13605_v8 }
 0x452   :  { %v6045_v58 = vor.u32 %v6044_v3, %v6041_v39  ;;  %v6058_v55 = vrot.slane %v6056_v6, 2  ;;  %v6061_v1 = vrot.slane %v6059_v50, 3  ;;  %v13607_v39 = vld [vmem:[#allocation2 + $0x80] ss:$0 sps:$4 sm:$0x77]   ;;  %v6073_v63 = vshrl.u32 %v12032_v19, 16 }
 0x453   :  { %v6084_v3 = vshll.u32 %v13607_v39, 16 }
 0x454   :  { %v6075_v6 = vrot.slane %v6073_v63, 2 }
 0x455   :  { %7809 = vmatmul.mubr.bf16.gmra.mrb[148].mxu1 %v5694_v5  ;;  %v6049_v5 = vrot.slane %v6047_v34, 2  ;;  %v6066_v34 = vrot.slane %v6064_v0, 2 }
 0x456   :  { %7816 = vmatprep.mubr.bf16.mxu1 %v6020_v51  ;;  %v5699_v51 = vrot.slane %v13603_v12, 2 }
 0x457   :  { %v6053_v16 = vor.u32 %v6052_v18, %v6049_v5  ;;  %v6081_v5 = vshrl.u32 %v13607_v39, 16  ;;  %v6062_v18 = vor.u32 %v6061_v1, %v6058_v55  ;;  %v6070_v12 = vor.u32 %v6069_v13, %v6066_v34  ;;  %v13610_v55 = vld [vmem:[#allocation2 + $0x8c] ss:$0 sps:$4 sm:$0x77]  }
 0x458   :  { %v5700_v22 = vsel %vm5676_vm1, %v5698_v43, %v5699_v51  ;;  %v6076_v43 = vshll.u32 %v12032_v19, 16  ;;  %v3892_v51 = vld [vmem:[#allocation2 + $0x84] sm:$0xc]  ;;  %v6098_v34 = vshrl.u32 %v13610_v55, 16  ;;  %v6101_v13 = vshll.u32 %v13610_v55, 16 }
 0x459   :  { %v6054_v17 = vsel %vm5901_vm0, %v6045_v58, %v6053_v16  ;;  %v6083_v59 = vrot.slane %v6081_v5, 2  ;;  %v6086_v58 = vrot.slane %v6084_v3, 3  ;;  %v6071_v16 = vsel %vm5901_vm0, %v6062_v18, %v6070_v12  ;;  %v3894_v55 = vld [vmem:[#allocation2 + $0x9c] sm:$0xc] }
 0x45a   :  { %v6078_v50 = vrot.slane %v6076_v43, 3  ;;  %v6100_v3 = vrot.slane %v6098_v34, 2  ;;  %v6103_v18 = vrot.slane %v6101_v13, 3 }
 0x45c   :  { %v6079_v1 = vor.u32 %v6078_v50, %v6075_v6 }
 0x45d   :  { %7817 = vmatmul.mubr.bf16.gmra.mrb[152].mxu1 %v5697_v47  ;;  %v5701_v47 = vrot.slane %v12030_v40, 2  ;;  %v13608_v40 = vld [vmem:[#allocation2 + $0x88] sm:$0xf] }
 0x45e   :  { %7824 = vmatprep.mubr.bf16.mxu1 %v6037_v42  ;;  %v13606_v42 = vld [vmem:[#allocation2 + $0x68] ss:$0 sps:$4 sm:$0x33]   ;;  %v12033_v36 = vcombine.low %v3892_v51, %v13608_v40 }
 0x45f   :  { %v5702_v35 = vrot.slane %v13606_v42, 2  ;;  %v6087_v42 = vor.u32 %v6086_v58, %v6083_v59  ;;  %v6104_v59 = vor.u32 %v6103_v18, %v6100_v3  ;;  %v13613_v58 = vld [vmem:[#allocation2 + $0x98] ss:$0 sps:$4 sm:$0x77]  }
 0x460   :  { %v6090_v39 = vshrl.u32 %v12033_v36, 16  ;;  %v6115_v50 = vshrl.u32 %v13613_v58, 16  ;;  %v13615_v3 = vld [vmem:[#allocation2 + $0x8c] ss:$0 sps:$4 sm:$0x33]  }
 0x461   :  { %v5703_v0 = vsel %vm5676_vm1, %v5701_v47, %v5702_v35  ;;  %v6093_v47 = vshll.u32 %v12033_v36, 16  ;;  %v3893_v35 = vld [vmem:[#allocation2 + $0x90] sm:$0xc]  ;;  %v6088_v12 = vsel %vm5901_vm0, %v6079_v1, %v6087_v42  ;;  %v13614_v1 = vld [vmem:[#allocation2 + $0xa0] sm:$0xf]  ;;  %v5711_v18 = vrot.slane %v13615_v3, 2 }
 0x462   :  { %v6092_v63 = vrot.slane %v6090_v39, 2  ;;  %v6117_v13 = vrot.slane %v6115_v50, 2  ;;  %v16974_v42 = vcombine.low %v3894_v55, %v13614_v1  ;;  %v13618_v1 = vld [vmem:[#allocation2 + $0x98] ss:$0 sps:$4 sm:$0x33]  }
 0x463   :  { %v6095_v43 = vrot.slane %v6093_v47, 3 }
 0x465   :  { %7825 = vmatmul.mubr.bf16.gmra.mrb[156].mxu1 %v5700_v22  ;;  %v5704_v22 = vrot.slane %v12031_v30, 2  ;;  %v13611_v30 = vld [vmem:[#allocation2 + $0x94] sm:$0xf]  ;;  %v6096_v40 = vor.u32 %v6095_v43, %v6092_v63  ;;  %v13616_v63 = vld [vmem:[#allocation2 + $0xa4] ss:$0 sps:$4 sm:$0x77]  }
 0x466   :  { %7832 = vmatprep.mubr.bf16.mxu1 %v6054_v17  ;;  %v13609_v17 = vld [vmem:[#allocation2 + $0x74] ss:$0 sps:$4 sm:$0x33]   ;;  %v16969_v51 = vcombine.low %v3893_v35, %v13611_v30  ;;  %v6132_v43 = vshrl.u32 %v13616_v63, 16  ;;  %v6135_v30 = vshll.u32 %v13616_v63, 16 }
 0x467   :  { %v5705_v8 = vrot.slane %v13609_v17, 2  ;;  %v3896_v63 = vld [vmem:[#allocation2 + $0xb4] sm:$0xc] }
 0x468   :  { %v6110_v17 = vshll.u32 %v16969_v51, 16 }
 0x469   :  { %v5706_v5 = vsel %vm5676_vm1, %v5704_v22, %v5705_v8  ;;  %v6107_v22 = vshrl.u32 %v16969_v51, 16  ;;  %v6118_v8 = vshll.u32 %v13613_v58, 16  ;;  %v3895_v58 = vld [vmem:[#allocation2 + $0xa8] sm:$0xc] }
 0x46a   :  { %v6112_v47 = vrot.slane %v6110_v17, 3 }
 0x46b   :  { %v6109_v39 = vrot.slane %v6107_v22, 2  ;;  %v6120_v35 = vrot.slane %v6118_v8, 3  ;;  %v6137_v22 = vrot.slane %v6135_v30, 3  ;;  %v13617_v8 = vld [vmem:[#allocation2 + $0xac] sm:$0xf] }
 0x46c   :  { %v16981_v55 = vcombine.low %v3895_v58, %v13617_v8  ;;  %v13620_v58 = vld [vmem:[#allocation2 + $0xb8] sm:$0xf] }
 0x46d   :  { %7833 = vmatmul.mubr.bf16.gmra.mrb[160].mxu1 %v5703_v0  ;;  %v5707_v0 = vrot.slane %v12032_v19, 2  ;;  %v6105_v19 = vsel %vm5901_vm0, %v6096_v40, %v6104_v59  ;;  %v6134_v40 = vrot.slane %v6132_v43, 2 }
 0x46e   :  { %7840 = vmatprep.mubr.bf16.mxu1 %v6071_v16  ;;  %v13612_v16 = vld [vmem:[#allocation2 + $0x80] ss:$0 sps:$4 sm:$0x33]  }
 0x46f   :  { %v5708_v6 = vrot.slane %v13612_v16, 2  ;;  %v6121_v16 = vor.u32 %v6120_v35, %v6117_v13  ;;  %v5713_v13 = vrot.slane %v16969_v51, 2  ;;  %v6138_v3 = vor.u32 %v6137_v22, %v6134_v40  ;;  %v8509_v40 = vld [vmem:[#allocation3 + $0x10] sm:$0xff] }
 0x470   :  { %8706 = vrot.lane.b32.xlu1 %v8509_v40, %s13924_s8  ;;  %v5716_v22 = vrot.slane %v16974_v42, 2 }
 0x471   :  { %v5709_v34 = vsel %vm5676_vm1, %v5707_v0, %v5708_v6  ;;  %v6113_v0 = vor.u32 %v6112_v47, %v6109_v39  ;;  %v6127_v6 = vshll.u32 %v16974_v42, 16  ;;  %v13619_v39 = vld [vmem:[#allocation2 + $0xb0] ss:$0 sps:$4 sm:$0x77]  }
 0x472   :  { %v6149_v47 = vshrl.u32 %v13619_v39, 16  ;;  %v6152_v35 = vshll.u32 %v13619_v39, 16 }
 0x473   :  { %v6129_v17 = vrot.slane %v6127_v6, 3 }
 0x474   :  { %v6151_v30 = vrot.slane %v6149_v47, 2 }
 0x475   :  { %7841 = vmatmul.mubr.bf16.gmra.mrb[164].mxu1 %v5706_v5  ;;  %v5710_v5 = vrot.slane %v12033_v36, 2  ;;  %v6122_v36 = vsel %vm5901_vm0, %v6113_v0, %v6121_v16  ;;  %v6154_v0 = vrot.slane %v6152_v35, 3 }
 0x476   :  { %7848 = vmatprep.mubr.bf16.mxu1 %v6088_v12  ;;  %v6124_v12 = vshrl.u32 %v16974_v42, 16  ;;  %v13623_v42 = vld [vmem:[#allocation2 + $0xc4] sm:$0xf] }
 0x477   :  { %v5712_v50 = vsel %vm5676_vm1, %v5710_v5, %v5711_v18  ;;  %v6141_v18 = vshrl.u32 %v16981_v55, 16 }
 0x478   :  { %v6126_v59 = vrot.slane %v6124_v12, 2  ;;  %v6144_v12 = vshll.u32 %v16981_v55, 16 }
 0x479   :  { %v6143_v16 = vrot.slane %v6141_v18, 2 }
 0x47a   :  { %v6130_v5 = vor.u32 %v6129_v17, %v6126_v59  ;;  %v6146_v6 = vrot.slane %v6144_v12, 3  ;;  %v13472_v59 = vld [vmem:[#allocation16 + $0x8] sm:$0xff]   ;;  %v13621_v17 = vld [vmem:[#allocation2 + $0xa4] ss:$0 sps:$4 sm:$0x33]  }
 0x47b   :  { %v5717_v8 = vrot.slane %v13621_v17, 2 }
 0x47c   :  { %v6139_v51 = vsel %vm5901_vm0, %v6130_v5, %v6138_v3  ;;  %v3897_v5 = vld [vmem:[#allocation2 + $0xc0] sm:$0xc] }
 0x47d   :  { %7849 = vmatmul.mubr.bf16.gmra.mrb[168].mxu1 %v5709_v34  ;;  %v13471_v34 = vld [vmem:[#allocation16] sm:$0xff]   ;;  %v5718_v3 = vsel %vm5676_vm1, %v5716_v22, %v5717_v8  ;;  %v17023_v12 = vcombine.low %v3897_v5, %v13623_v42  ;;  %v13474_v42 = vld [vmem:[#allocation16 + $0x18] sm:$0xff]  }
 0x47e   :  { %7856 = vmatprep.mubr.bf16.mxu1 %v6105_v19  ;;  %10106 = vmatpush1.bf16.msra.mxu0 %v13471_v34  ;;  %v5714_v19 = vrot.slane %v13618_v1, 2  ;;  %v6155_v34 = vor.u32 %v6154_v0, %v6151_v30  ;;  %v13626_v5 = vld [vmem:[#allocation2 + $0xd0] sm:$0xf] }
 0x47f   :  { %10107 = vmatprep.subr.bf16.mxu0 %v19440_v15  ;;  %v6178_v8 = vshll.u32 %v17023_v12, 16 }
 0x480   :  { %v5715_v43 = vsel %vm5676_vm1, %v5713_v13, %v5714_v19  ;;  %v13622_v13 = vld [vmem:[#allocation2 + $0xbc] ss:$0 sps:$4 sm:$0x77]   ;;  %v6147_v19 = vor.u32 %v6146_v6, %v6143_v16  ;;  %v5719_v16 = vrot.slane %v16981_v55, 2 }
 0x481   :  { %v6166_v1 = vshrl.u32 %v13622_v13, 16  ;;  %v6169_v35 = vshll.u32 %v13622_v13, 16  ;;  %v13624_v6 = vld [vmem:[#allocation2 + $0xb0] ss:$0 sps:$4 sm:$0x33]  }
 0x482   :  { %10108 = vmatpush1.bf16.msra.mxu0 %v13472_v59  ;;  %v13625_v59 = vld [vmem:[#allocation2 + $0xc8] ss:$0 sps:$4 sm:$0x77]  }
 0x483   :  { %10109 = vmatprep.subr.bf16.mxu0 %v19440_v15  ;;  %v6168_v18 = vrot.slane %v6166_v1, 2  ;;  %v6171_v0 = vrot.slane %v6169_v35, 3 }
 0x485   :  { %7857 = vmatmul.mubr.bf16.gmra.mrb[172].mxu1 %v5712_v50  ;;  %v17013_v50 = vcombine.low %v3896_v63, %v13620_v58  ;;  %v6156_v63 = vsel %vm5901_vm0, %v6147_v19, %v6155_v34  ;;  %v5720_v58 = vrot.slane %v13624_v6, 2  ;;  %v6172_v17 = vor.u32 %v6171_v0, %v6168_v18 }
 0x486   :  { %7864 = vmatprep.mubr.bf16.mxu1 %v6122_v36  ;;  %v8476_v36 = vld [vmem:[#allocation3 + $0x8] sm:$0xff]  ;;  %v6186_v34 = vshll.u32 %v13625_v59, 16 }
 0x487   :  { %8704 = vrot.lane.b32.xlu0 %v8476_v36, %s13924_s8  ;;  %v6158_v39 = vshrl.u32 %v17013_v50, 16  ;;  %v6161_v47 = vshll.u32 %v17013_v50, 16  ;;  %v6175_v36 = vshrl.u32 %v17023_v12, 16  ;;  %v5721_v13 = vsel %vm5676_vm1, %v5719_v16, %v5720_v58 }
 0x488   :  { %v6188_v35 = vrot.slane %v6186_v34, 3  ;;  %v5722_v18 = vrot.slane %v17013_v50, 2 }
 0x489   :  { %v6163_v30 = vrot.slane %v6161_v47, 3  ;;  %v6177_v1 = vrot.slane %v6175_v36, 2  ;;  %v6180_v47 = vrot.slane %v6178_v8, 3 }
 0x48b   :  { %8800 = vrot.lane.b32.xlu0 %v8509_v40, %s13913_s3  ;;  %v6183_v40 = vshrl.u32 %v13625_v59, 16  ;;  %v6181_v16 = vor.u32 %v6180_v47, %v6177_v1  ;;  %v5725_v1 = vrot.slane %v17023_v12, 2 }
 0x48d   :  { %7865 = vmatmul.mubr.bf16.gmra.mrb[176].mxu1 %v5715_v43  ;;  %v6160_v43 = vrot.slane %v6158_v39, 2  ;;  %v6185_v19 = vrot.slane %v6183_v40, 2  ;;  %v3898_v39 = vld [vmem:[#allocation2 + $0xcc] sm:$0xc] }
 0x48e   :  { %7872 = vmatprep.mubr.bf16.mxu1 %v6139_v51  ;;  %v13473_v51 = vld [vmem:[#allocation16 + $0x10] sm:$0xff]  }
 0x48f   :  { %10110 = vmatpush1.bf16.msra.mxu0 %v13473_v51  ;;  %v6164_v22 = vor.u32 %v6163_v30, %v6160_v43  ;;  %v13628_v30 = vld [vmem:[#allocation2 + $0xd4] ss:$0 sps:$4 sm:$0x77]   ;;  %v6189_v6 = vor.u32 %v6188_v35, %v6185_v19  ;;  %v13630_v19 = vld [vmem:[#allocation2 + $0xc8] ss:$0 sps:$4 sm:$0x33]  }
 0x490   :  { %10111 = vmatprep.subr.bf16.mxu0 %v19440_v15  ;;  %v6200_v0 = vshrl.u32 %v13628_v30, 16  ;;  %v6203_v51 = vshll.u32 %v13628_v30, 16  ;;  %v5726_v47 = vrot.slane %v13630_v19, 2  ;;  %v13631_v35 = vld [vmem:[#allocation2 + $0xe0] ss:$0 sps:$4 sm:$0x77]  }
 0x491   :  { %v6173_v55 = vsel %vm5901_vm0, %v6164_v22, %v6172_v17  ;;  %v3899_v17 = vld [vmem:[#allocation2 + $0xd8] sm:$0xc]  ;;  %v6190_v50 = vsel %vm5901_vm0, %v6181_v16, %v6189_v6  ;;  %v3900_v6 = vld [vmem:[#allocation2 + $0xe4] sm:$0xc] }
 0x492   :  { %v6202_v40 = vrot.slane %v6200_v0, 2  ;;  %v6205_v22 = vrot.slane %v6203_v51, 3  ;;  %v5727_v0 = vsel %vm5676_vm1, %v5725_v1, %v5726_v47 }
 0x493   :  { %10112 = vmatpush1.bf16.msra.mxu0 %v13474_v42  ;;  %v6220_v42 = vshll.u32 %v13631_v35, 16 }
 0x494   :  { %10113 = vmatprep.subr.bf16.mxu0 %v19440_v15 }
 0x495   :  { %7873 = vmatmul.mubr.bf16.gmra.mrb[180].mxu1 %v5718_v3  ;;  %v17032_v3 = vcombine.low %v3898_v39, %v13626_v5  ;;  %v6217_v5 = vshrl.u32 %v13631_v35, 16  ;;  %v6222_v16 = vrot.slane %v6220_v42, 3 }
 0x496   :  { %7880 = vmatprep.mubr.bf16.mxu1 %v6156_v63  ;;  %v13627_v63 = vld [vmem:[#allocation2 + $0xbc] ss:$0 sps:$4 sm:$0x33]  }
 0x497   :  { %v5723_v43 = vrot.slane %v13627_v63, 2  ;;  %v6192_v58 = vshrl.u32 %v17032_v3, 16  ;;  %v6195_v36 = vshll.u32 %v17032_v3, 16  ;;  %v6206_v63 = vor.u32 %v6205_v22, %v6202_v40  ;;  %v13633_v22 = vld [vmem:[#allocation2 + $0xd4] ss:$0 sps:$4 sm:$0x33]  }
 0x498   :  { %v6219_v51 = vrot.slane %v6217_v5, 2  ;;  %v5728_v40 = vrot.slane %v17032_v3, 2  ;;  %v3901_v5 = vld [vmem:[#allocation2 + $0xf0] sm:$0xc] }
 0x499   :  { %v5724_v59 = vsel %vm5676_vm1, %v5722_v18, %v5723_v43  ;;  %v6194_v8 = vrot.slane %v6192_v58, 2  ;;  %v6197_v34 = vrot.slane %v6195_v36, 3 }
 0x49b   :  { %v6198_v18 = vor.u32 %v6197_v34, %v6194_v8  ;;  %v5729_v8 = vrot.slane %v13633_v22, 2  ;;  %v6223_v34 = vor.u32 %v6222_v16, %v6219_v51  ;;  %v13477_v16 = vld [vmem:[#allocation16 + $0x30] sm:$0xff]  }
 0x49d   :  { %7881 = vmatmul.mubr.bf16.gmra.mrb[184].mxu1 %v5721_v13  ;;  %v13629_v13 = vld [vmem:[#allocation2 + $0xdc] sm:$0xf]  ;;  %v6207_v12 = vsel %vm5901_vm0, %v6198_v18, %v6206_v63  ;;  %v5730_v42 = vsel %vm5676_vm1, %v5728_v40, %v5729_v8  ;;  %v13635_v63 = vld [vmem:[#allocation2 + $0xf4] sm:$0xf] }
 0x49e   :  { %7888 = vmatprep.mubr.bf16.mxu1 %v6173_v55  ;;  %v17040_v39 = vcombine.low %v3899_v17, %v13629_v13  ;;  %v13475_v55 = vld [vmem:[#allocation16 + $0x20] sm:$0xff]  }
 0x49f   :  { %10114 = vmatpush1.bf16.msra.mxu0 %v13475_v55  ;;  %v13634_v13 = vld [vmem:[#allocation2 + $0xec] ss:$0 sps:$4 sm:$0x77]  }
 0x4a0   :  { %10115 = vmatprep.subr.bf16.mxu0 %v19440_v15  ;;  %v6209_v43 = vshrl.u32 %v17040_v39, 16  ;;  %v6212_v30 = vshll.u32 %v17040_v39, 16  ;;  %v6234_v55 = vshrl.u32 %v13634_v13, 16  ;;  %v6237_v35 = vshll.u32 %v13634_v13, 16 }
 0x4a2   :  { %v6211_v58 = vrot.slane %v6209_v43, 2  ;;  %v6214_v36 = vrot.slane %v6212_v30, 3  ;;  %v6236_v18 = vrot.slane %v6234_v55, 2  ;;  %v17055_v43 = vcombine.low %v3901_v5, %v13635_v63  ;;  %v13638_v5 = vld [vmem:[#allocation2 + $0x100] sm:$0xf]  ;;  %v13478_v63 = vld [vmem:[#allocation16 + $0x38] sm:$0xff]  }
 0x4a3   :  { %v6239_v51 = vrot.slane %v6237_v35, 3 }
 0x4a4   :  { %v6215_v1 = vor.u32 %v6214_v36, %v6211_v58  ;;  %v6243_v36 = vshrl.u32 %v17055_v43, 16  ;;  %v6246_v8 = vshll.u32 %v17055_v43, 16 }
 0x4a5   :  { %7889 = vmatmul.mubr.bf16.gmra.mrb[188].mxu1 %v5724_v59  ;;  %v13632_v59 = vld [vmem:[#allocation2 + $0xe8] sm:$0xf]  ;;  %v6240_v22 = vor.u32 %v6239_v51, %v6236_v18 }
 0x4a6   :  { %7896 = vmatprep.mubr.bf16.mxu1 %v6190_v50  ;;  %v17048_v17 = vcombine.low %v3900_v6, %v13632_v59  ;;  %v13476_v50 = vld [vmem:[#allocation16 + $0x28] sm:$0xff]   ;;  %v6224_v3 = vsel %vm5901_vm0, %v6215_v1, %v6223_v34  ;;  %v5731_v6 = vrot.slane %v17040_v39, 2  ;;  %v6245_v55 = vrot.slane %v6243_v36, 2 }
 0x4a7   :  { %10116 = vmatpush1.bf16.msra.mxu0 %v13476_v50  ;;  %v13637_v59 = vld [vmem:[#allocation2 + $0xf8] ss:$0 sps:$4 sm:$0x77]  }
 0x4a8   :  { %10117 = vmatprep.subr.bf16.mxu0 %v19440_v15  ;;  %v6226_v19 = vshrl.u32 %v17048_v17, 16  ;;  %v6229_v47 = vshll.u32 %v17048_v17, 16  ;;  %v6251_v50 = vshrl.u32 %v13637_v59, 16  ;;  %v6254_v34 = vshll.u32 %v13637_v59, 16 }
 0x4a9   :  { %v5734_v18 = vrot.slane %v17048_v17, 2 }
 0x4aa   :  { %v6228_v30 = vrot.slane %v6226_v19, 2  ;;  %v6253_v1 = vrot.slane %v6251_v50, 2  ;;  %v3902_v19 = vld [vmem:[#allocation2 + $0xfc] sm:$0xc]  ;;  %v6256_v35 = vrot.slane %v6254_v34, 3 }
 0x4ab   :  { %10118 = vmatpush1.bf16.msra.mxu0 %v13477_v16 }
 0x4ac   :  { %10119 = vmatprep.subr.bf16.mxu0 %v19440_v15 }
 0x4ad   :  { %7897 = vmatmul.mubr.bf16.gmra.mrb[192].mxu1 %v5727_v0  ;;  %v6231_v0 = vrot.slane %v6229_v47, 3  ;;  %v6248_v47 = vrot.slane %v6246_v8, 3 }
 0x4ae   :  { %7904 = vmatprep.mubr.bf16.mxu1 %v6207_v12  ;;  %v13636_v12 = vld [vmem:[#allocation2 + $0xe0] ss:$0 sps:$4 sm:$0x33]  }
 0x4af   :  { %v5732_v58 = vrot.slane %v13636_v12, 2  ;;  %v6232_v40 = vor.u32 %v6231_v0, %v6228_v30  ;;  %10120 = vmatpush1.bf16.msra.mxu0 %v13478_v63  ;;  %v13640_v0 = vld [vmem:[#allocation2 + $0x104] ss:$0 sps:$4 sm:$0x77]   ;;  %v6257_v12 = vor.u32 %v6256_v35, %v6253_v1 }
 0x4b0   :  { %v6268_v51 = vshrl.u32 %v13640_v0, 16  ;;  %v6271_v16 = vshll.u32 %v13640_v0, 16  ;;  %10121 = vmatprep.subr.bf16.mxu0 %v19440_v15  ;;  %v13642_v1 = vld [vmem:[#allocation2 + $0xf8] ss:$0 sps:$4 sm:$0x33]  }
 0x4b1   :  { %v5733_v13 = vsel %vm5676_vm1, %v5731_v6, %v5732_v58  ;;  %v6241_v39 = vsel %vm5901_vm0, %v6232_v40, %v6240_v22  ;;  %v6249_v6 = vor.u32 %v6248_v47, %v6245_v55  ;;  %v3903_v22 = vld [vmem:[#allocation2 + $0x108] sm:$0xc]  ;;  %v5737_v55 = vrot.slane %v17055_v43, 2  ;;  %v13643_v35 = vld [vmem:[#allocation2 + $0x110] ss:$0 sps:$4 sm:$0x77]  }
 0x4b2   :  { %v6270_v50 = vrot.slane %v6268_v51, 2  ;;  %v6273_v40 = vrot.slane %v6271_v16, 3  ;;  %v5738_v47 = vrot.slane %v13642_v1, 2  ;;  %v6288_v63 = vshll.u32 %v13643_v35, 16 }
 0x4b3   :  { %v6258_v17 = vsel %vm5901_vm0, %v6249_v6, %v6257_v12  ;;  %v3904_v12 = vld [vmem:[#allocation2 + $0x114] sm:$0xc] }
 0x4b4   :  { %v5739_v51 = vsel %vm5676_vm1, %v5737_v55, %v5738_v47  ;;  %v6290_v6 = vrot.slane %v6288_v63, 3 }
 0x4b5   :  { %7905 = vmatmul.mubr.bf16.gmra.mrb[196].mxu1 %v5730_v42  ;;  %v17064_v42 = vcombine.low %v3902_v19, %v13638_v5  ;;  %v6285_v5 = vshrl.u32 %v13643_v35, 16 }
 0x4b6   :  { %7912 = vmatprep.mubr.bf16.mxu1 %v6224_v3  ;;  %v13639_v3 = vld [vmem:[#allocation2 + $0xec] ss:$0 sps:$4 sm:$0x33]  }
 0x4b7   :  { %v5735_v30 = vrot.slane %v13639_v3, 2  ;;  %v6260_v58 = vshrl.u32 %v17064_v42, 16  ;;  %v6263_v36 = vshll.u32 %v17064_v42, 16  ;;  %v6274_v3 = vor.u32 %v6273_v40, %v6270_v50  ;;  %v13645_v40 = vld [vmem:[#allocation2 + $0x104] ss:$0 sps:$4 sm:$0x33]  }
 0x4b8   :  { %v6287_v16 = vrot.slane %v6285_v5, 2  ;;  %v5740_v50 = vrot.slane %v17064_v42, 2  ;;  %v3905_v5 = vld [vmem:[#allocation2 + $0x120] sm:$0xc] }
 0x4b9   :  { %v5736_v59 = vsel %vm5676_vm1, %v5734_v18, %v5735_v30  ;;  %v6262_v8 = vrot.slane %v6260_v58, 2  ;;  %v6265_v34 = vrot.slane %v6263_v36, 3 }
 0x4bb   :  { %v6266_v18 = vor.u32 %v6265_v34, %v6262_v8  ;;  %v5741_v8 = vrot.slane %v13645_v40, 2  ;;  %v6291_v34 = vor.u32 %v6290_v6, %v6287_v16  ;;  %v13481_v6 = vld [vmem:[#allocation16 + $0x50] sm:$0xff]  }
 0x4bd   :  { %7913 = vmatmul.mubr.bf16.gmra.mrb[200].mxu1 %v5733_v13  ;;  %v13641_v13 = vld [vmem:[#allocation2 + $0x10c] sm:$0xf]  ;;  %v6275_v43 = vsel %vm5901_vm0, %v6266_v18, %v6274_v3  ;;  %v5742_v63 = vsel %vm5676_vm1, %v5740_v50, %v5741_v8  ;;  %v13647_v3 = vld [vmem:[#allocation2 + $0x124] sm:$0xf] }
 0x4be   :  { %7920 = vmatprep.mubr.bf16.mxu1 %v6241_v39  ;;  %v17072_v19 = vcombine.low %v3903_v22, %v13641_v13  ;;  %v13479_v39 = vld [vmem:[#allocation16 + $0x40] sm:$0xff]   ;;  %v13646_v13 = vld [vmem:[#allocation2 + $0x11c] ss:$0 sps:$4 sm:$0x77]  }
 0x4bf   :  { %10122 = vmatpush1.bf16.msra.mxu0 %v13479_v39  ;;  %v6302_v39 = vshrl.u32 %v13646_v13, 16  ;;  %v6305_v35 = vshll.u32 %v13646_v13, 16 }
 0x4c0   :  { %10123 = vmatprep.subr.bf16.mxu0 %v19440_v15  ;;  %v6277_v30 = vshrl.u32 %v17072_v19, 16  ;;  %v6280_v0 = vshll.u32 %v17072_v19, 16 }
 0x4c1   :  { %v6304_v18 = vrot.slane %v6302_v39, 2  ;;  %v6307_v16 = vrot.slane %v6305_v35, 3 }
 0x4c2   :  { %v6279_v58 = vrot.slane %v6277_v30, 2  ;;  %v6282_v36 = vrot.slane %v6280_v0, 3  ;;  %v17087_v30 = vcombine.low %v3905_v5, %v13647_v3  ;;  %v13650_v5 = vld [vmem:[#allocation2 + $0x130] sm:$0xf]  ;;  %v13482_v3 = vld [vmem:[#allocation16 + $0x58] sm:$0xff]  }
 0x4c3   :  { %v6308_v40 = vor.u32 %v6307_v16, %v6304_v18 }
 0x4c4   :  { %v6283_v55 = vor.u32 %v6282_v36, %v6279_v58  ;;  %v6311_v36 = vshrl.u32 %v17087_v30, 16  ;;  %v6314_v8 = vshll.u32 %v17087_v30, 16 }
 0x4c5   :  { %7921 = vmatmul.mubr.bf16.gmra.mrb[204].mxu1 %v5736_v59  ;;  %v13644_v59 = vld [vmem:[#allocation2 + $0x118] sm:$0xf] }
 0x4c6   :  { %7928 = vmatprep.mubr.bf16.mxu1 %v6258_v17  ;;  %v17080_v22 = vcombine.low %v3904_v12, %v13644_v59  ;;  %v13480_v17 = vld [vmem:[#allocation16 + $0x48] sm:$0xff]   ;;  %v6292_v42 = vsel %vm5901_vm0, %v6283_v55, %v6291_v34  ;;  %v5743_v12 = vrot.slane %v17072_v19, 2  ;;  %v13649_v59 = vld [vmem:[#allocation2 + $0x128] ss:$0 sps:$4 sm:$0x77]   ;;  %v6313_v39 = vrot.slane %v6311_v36, 2 }
 0x4c7   :  { %10124 = vmatpush1.bf16.msra.mxu0 %v13480_v17  ;;  %v6319_v17 = vshrl.u32 %v13649_v59, 16  ;;  %v6322_v34 = vshll.u32 %v13649_v59, 16 }
 0x4c8   :  { %10125 = vmatprep.subr.bf16.mxu0 %v19440_v15  ;;  %v6294_v1 = vshrl.u32 %v17080_v22, 16  ;;  %v6297_v47 = vshll.u32 %v17080_v22, 16  ;;  %v5746_v18 = vrot.slane %v17080_v22, 2 }
 0x4c9   :  { %v6321_v55 = vrot.slane %v6319_v17, 2  ;;  %v6324_v35 = vrot.slane %v6322_v34, 3 }
 0x4ca   :  { %v6296_v0 = vrot.slane %v6294_v1, 2  ;;  %v3906_v1 = vld [vmem:[#allocation2 + $0x12c] sm:$0xc] }
 0x4cb   :  { %10126 = vmatpush1.bf16.msra.mxu0 %v13481_v6 }
 0x4cc   :  { %10127 = vmatprep.subr.bf16.mxu0 %v19440_v15 }
 0x4cd   :  { %7929 = vmatmul.mubr.bf16.gmra.mrb[208].mxu1 %v5739_v51  ;;  %v6299_v51 = vrot.slane %v6297_v47, 3  ;;  %v6316_v47 = vrot.slane %v6314_v8, 3 }
 0x4ce   :  { %7936 = vmatprep.mubr.bf16.mxu1 %v6275_v43  ;;  %v13648_v43 = vld [vmem:[#allocation2 + $0x110] ss:$0 sps:$4 sm:$0x33]  }
 0x4cf   :  { %v5744_v58 = vrot.slane %v13648_v43, 2  ;;  %v6300_v50 = vor.u32 %v6299_v51, %v6296_v0  ;;  %10128 = vmatpush1.bf16.msra.mxu0 %v13482_v3  ;;  %v13652_v51 = vld [vmem:[#allocation2 + $0x134] ss:$0 sps:$4 sm:$0x77]   ;;  %v6325_v43 = vor.u32 %v6324_v35, %v6321_v55 }
 0x4d0   :  { %v6336_v16 = vshrl.u32 %v13652_v51, 16  ;;  %v6339_v6 = vshll.u32 %v13652_v51, 16  ;;  %10129 = vmatprep.subr.bf16.mxu0 %v19440_v15  ;;  %v13654_v55 = vld [vmem:[#allocation2 + $0x128] ss:$0 sps:$4 sm:$0x33]  }
 0x4d1   :  { %v5745_v13 = vsel %vm5676_vm1, %v5743_v12, %v5744_v58  ;;  %v6309_v19 = vsel %vm5901_vm0, %v6300_v50, %v6308_v40  ;;  %v6317_v12 = vor.u32 %v6316_v47, %v6313_v39  ;;  %v3907_v40 = vld [vmem:[#allocation2 + $0x138] sm:$0xc]  ;;  %v5749_v39 = vrot.slane %v17087_v30, 2  ;;  %v13655_v35 = vld [vmem:[#allocation2 + $0x140] ss:$0 sps:$4 sm:$0x77]  }
 0x4d2   :  { %v6338_v17 = vrot.slane %v6336_v16, 2  ;;  %v6341_v50 = vrot.slane %v6339_v6, 3  ;;  %v5750_v47 = vrot.slane %v13654_v55, 2  ;;  %v6356_v3 = vshll.u32 %v13655_v35, 16 }
 0x4d3   :  { %v6326_v22 = vsel %vm5901_vm0, %v6317_v12, %v6325_v43  ;;  %v3908_v43 = vld [vmem:[#allocation2 + $0x144] sm:$0xc] }
 0x4d4   :  { %v5751_v16 = vsel %vm5676_vm1, %v5749_v39, %v5750_v47  ;;  %v6358_v12 = vrot.slane %v6356_v3, 3 }
 0x4d5   :  { %7937 = vmatmul.mubr.bf16.gmra.mrb[212].mxu1 %v5742_v63  ;;  %v17096_v63 = vcombine.low %v3906_v1, %v13650_v5  ;;  %v6353_v5 = vshrl.u32 %v13655_v35, 16 }
 0x4d6   :  { %7944 = vmatprep.mubr.bf16.mxu1 %v6292_v42  ;;  %v13651_v42 = vld [vmem:[#allocation2 + $0x11c] ss:$0 sps:$4 sm:$0x33]  }
 0x4d7   :  { %v5747_v0 = vrot.slane %v13651_v42, 2  ;;  %v6328_v58 = vshrl.u32 %v17096_v63, 16  ;;  %v6331_v36 = vshll.u32 %v17096_v63, 16  ;;  %v6342_v42 = vor.u32 %v6341_v50, %v6338_v17  ;;  %v13657_v50 = vld [vmem:[#allocation2 + $0x134] ss:$0 sps:$4 sm:$0x33]  }
 0x4d8   :  { %v6355_v6 = vrot.slane %v6353_v5, 2  ;;  %v5752_v17 = vrot.slane %v17096_v63, 2 }
 0x4d9   :  { %v5748_v59 = vsel %vm5676_vm1, %v5746_v18, %v5747_v0  ;;  %v6330_v8 = vrot.slane %v6328_v58, 2  ;;  %v6333_v34 = vrot.slane %v6331_v36, 3 }
 0x4da   :  { %v6359_v55 = vor.u32 %v6358_v12, %v6355_v6  ;;  %v13660_v12 = vld [vmem:[#allocation2 + $0x140] ss:$0 sps:$4 sm:$0x33]  }
 0x4db   :  { %v6334_v18 = vor.u32 %v6333_v34, %v6330_v8  ;;  %v5753_v8 = vrot.slane %v13657_v50, 2  ;;  %v13658_v34 = vld [vmem:[#allocation2 + $0x14c] ss:$0 sps:$4 sm:$0x77]  }
 0x4dd   :  { %7945 = vmatmul.mubr.bf16.gmra.mrb[216].mxu1 %v5745_v13  ;;  %v13653_v13 = vld [vmem:[#allocation2 + $0x13c] sm:$0xf]  ;;  %v6343_v30 = vsel %vm5901_vm0, %v6334_v18, %v6342_v42  ;;  %v5754_v5 = vsel %vm5676_vm1, %v5752_v17, %v5753_v8  ;;  %v3909_v42 = vld [vmem:[#allocation2 + $0x150] sm:$0xc] }
 0x4de   :  { %7952 = vmatprep.mubr.bf16.mxu1 %v6309_v19  ;;  %v17104_v1 = vcombine.low %v3907_v40, %v13653_v13  ;;  %v13483_v19 = vld [vmem:[#allocation16 + $0x60] sm:$0xff]   ;;  %v6370_v13 = vshrl.u32 %v13658_v34, 16 }
 0x4df   :  { %10130 = vmatpush1.bf16.msra.mxu0 %v13483_v19  ;;  %v6373_v19 = vshll.u32 %v13658_v34, 16 }
 0x4e0   :  { %10131 = vmatprep.subr.bf16.mxu0 %v19440_v15  ;;  %v6345_v0 = vshrl.u32 %v17104_v1, 16  ;;  %v6348_v51 = vshll.u32 %v17104_v1, 16  ;;  %v6372_v3 = vrot.slane %v6370_v13, 2  ;;  %v5755_v6 = vrot.slane %v17104_v1, 2  ;;  %v3910_v13 = vld [vmem:[#allocation2 + $0x15c] sm:$0xc] }
 0x4e1   :  { %v6375_v18 = vrot.slane %v6373_v19, 3 }
 0x4e2   :  { %v6347_v58 = vrot.slane %v6345_v0, 2  ;;  %v6350_v36 = vrot.slane %v6348_v51, 3 }
 0x4e4   :  { %v6351_v39 = vor.u32 %v6350_v36, %v6347_v58  ;;  %v5756_v58 = vrot.slane %v13660_v12, 2  ;;  %v6376_v36 = vor.u32 %v6375_v18, %v6372_v3  ;;  %v13486_v18 = vld [vmem:[#allocation16 + $0x78] sm:$0xff]  }
 0x4e5   :  { %7953 = vmatmul.mubr.bf16.gmra.mrb[220].mxu1 %v5748_v59  ;;  %v13656_v59 = vld [vmem:[#allocation2 + $0x148] sm:$0xf] }
 0x4e6   :  { %7960 = vmatprep.mubr.bf16.mxu1 %v6326_v22  ;;  %v17112_v40 = vcombine.low %v3908_v43, %v13656_v59  ;;  %v13484_v22 = vld [vmem:[#allocation16 + $0x68] sm:$0xff]   ;;  %v6360_v63 = vsel %vm5901_vm0, %v6351_v39, %v6359_v55  ;;  %v5757_v19 = vsel %vm5676_vm1, %v5755_v6, %v5756_v58  ;;  %v13662_v55 = vld [vmem:[#allocation2 + $0x160] sm:$0xf] }
 0x4e7   :  { %10132 = vmatpush1.bf16.msra.mxu0 %v13484_v22  ;;  %v13661_v59 = vld [vmem:[#allocation2 + $0x158] ss:$0 sps:$4 sm:$0x77]  }
 0x4e8   :  { %10133 = vmatprep.subr.bf16.mxu0 %v19440_v15  ;;  %v6362_v47 = vshrl.u32 %v17112_v40, 16  ;;  %v6365_v35 = vshll.u32 %v17112_v40, 16  ;;  %v6387_v22 = vshrl.u32 %v13661_v59, 16  ;;  %v6390_v34 = vshll.u32 %v13661_v59, 16 }
 0x4ea   :  { %v6364_v0 = vrot.slane %v6362_v47, 2  ;;  %v6367_v51 = vrot.slane %v6365_v35, 3  ;;  %v6389_v39 = vrot.slane %v6387_v22, 2  ;;  %v17127_v47 = vcombine.low %v3910_v13, %v13662_v55 }
 0x4eb   :  { %v6392_v3 = vrot.slane %v6390_v34, 3 }
 0x4ec   :  { %v6368_v17 = vor.u32 %v6367_v51, %v6364_v0  ;;  %v13663_v0 = vld [vmem:[#allocation2 + $0x14c] ss:$0 sps:$4 sm:$0x33]   ;;  %v6396_v12 = vshrl.u32 %v17127_v47, 16 }
 0x4ed   :  { %7961 = vmatmul.mubr.bf16.gmra.mrb[224].mxu1 %v5751_v16  ;;  %v13659_v16 = vld [vmem:[#allocation2 + $0x154] sm:$0xf]  ;;  %v5759_v51 = vrot.slane %v13663_v0, 2  ;;  %v3911_v0 = vld [vmem:[#allocation2 + $0x168] sm:$0xc] }
 0x4ee   :  { %7968 = vmatprep.mubr.bf16.mxu1 %v6343_v30  ;;  %v17120_v43 = vcombine.low %v3909_v42, %v13659_v16  ;;  %v13485_v30 = vld [vmem:[#allocation16 + $0x70] sm:$0xff]   ;;  %v6377_v1 = vsel %vm5901_vm0, %v6368_v17, %v6376_v36  ;;  %v17130_v42 = vld [vmem:[#allocation15] ss:$0 sm:$0xff]  ;;  %v13664_v16 = vld [vmem:[#allocation2 + $0x164] ss:$0 sps:$4 sm:$0x77]  }
 0x4ef   :  { %10134 = vmatpush1.bf16.msra.mxu0 %v13485_v30  ;;  %v6404_v30 = vshrl.u32 %v13664_v16, 16  ;;  %v6407_v58 = vshll.u32 %v13664_v16, 16  ;;  %v6398_v16 = vrot.slane %v6396_v12, 2 }
 0x4f0   :  { %10135 = vmatprep.subr.bf16.mxu0 %v19440_v15  ;;  %v6379_v50 = vshrl.u32 %v17120_v43, 16  ;;  %v6382_v8 = vshll.u32 %v17120_v43, 16 }
 0x4f1   :  { %v6409_v24 = vrot.slane %v6407_v58, 3  ;;  %v5761_v58 = vrot.slane %v17120_v43, 2 }
 0x4f2   :  { %v6381_v35 = vrot.slane %v6379_v50, 2  ;;  %v6393_v50 = vor.u32 %v6392_v3, %v6389_v39 }
 0x4f3   :  { %10136 = vmatpush1.bf16.msra.mxu0 %v13486_v18  ;;  %v6406_v18 = vrot.slane %v6404_v30, 2 }
 0x4f4   :  { %10394 = vmatprep.subr.bf16.mxu0 %v19440_v15 }
 0x4f5   :  { %7969 = vmatmul.mubr.bf16.gmra.mrb[228].mxu1 %v5754_v5  ;;  %v6384_v5 = vrot.slane %v6382_v8, 3  ;;  %v6399_v8 = vshll.u32 %v17127_v47, 16 }
 0x4f6   :  { %7976 = vmatprep.mubr.bf16.mxu1 %v6360_v63  ;;  %v5758_v63 = vrot.slane %v17112_v40, 2  ;;  %v8443_v40 = vld [vmem:[#allocation3] sm:$0xff] }
 0x4f7   :  { %v6385_v17 = vor.u32 %v6384_v5, %v6381_v35  ;;  %v6401_v3 = vrot.slane %v6399_v8, 3 }
 0x4f8   :  { %v5760_v13 = vsel %vm5676_vm1, %v5758_v63, %v5759_v51  ;;  %v13487_v51 = vld [vmem:[#allocation16 + $0x80] sm:$0xff]  }
 0x4f9   :  { %v8705_v59 = vpop.permute.xlu0 %8704 }
 0x4fa   :  { %v9154_v39 = vsel %vm406_vm2, %v8443_v40, %v8705_v59 }
 0x4fd   :  { %7977 = vmatmul.mubr.bf16.gmra.mrb[232].mxu1 %v5757_v19  ;;  %v17143_v35 = vpop.permute.xlu0 %8800 }
 0x4fe   :  { %7984 = vmatprep.mubr.bf16.mxu1 %v6377_v1  ;;  %v9282_v63 = vsel %vm9280_vm3, %v8705_v59, %v17143_v35 }
 0x4ff   :  { %10137 = vmatprep.mubr.bf16.mxu0 %v9282_v63 }
 0x500   :  { %v7770_v6 = vpop.f32.mrb[128].mxu1  ;;  %10138 = vmatmul.mubr.bf16.vlgmr.msra.gmra.mrb[128].mxu0 %v9154_v39 }
 0x501   :  { %v12535_v36 = vadd.f32 %v17130_v42, %v7770_v6  ;;  %v7772_v22 = vpop.f32.mrb[129].mxu1  ;;  %v13665_v6 = vld [vmem:[#allocation2 + $0x16c] sm:$0xf]  ;;  %10395 = vmatpush1.bf16.msra.mxu0 %v13487_v51 }
 0x502   :  { %v7773_v34 = vpop.f32.mrb[130].mxu1  ;;  %v17140_v22 = vcombine.low %v3911_v0, %v13665_v6  ;;  %v6410_v0 = vor.u32 %v6409_v24, %v6406_v18  ;;  %10396 = vmatprep.subr.bf16.mxu0 %v19440_v15  ;;  %v13668_v18 = vld [vmem:[#allocation2 + $0x178] sm:$0xf] }
 0x503   :  { %v8060_v19 = vadd.f32 %v12535_v36, %v16571_v53  ;;  %v12536_v55 = vadd.f32 %v17130_v42, %v7773_v34  ;;  %v7775_v1 = vpop.f32.mrb[131].mxu1  ;;  %v6394_v53 = vsel %vm5901_vm0, %v6385_v17, %v6393_v50  ;;  %v13666_v36 = vld [vmem:[#allocation2 + $0x158] ss:$0 sps:$4 sm:$0x33]  }
 0x504   :  { %v5762_v40 = vrot.slane %v13666_v36, 2  ;;  %v13667_v17 = vld [vmem:[#allocation2 + $0x170] ss:$0 sps:$4 sm:$0x77]   ;;  %v3912_v36 = vld [vmem:[#allocation2 + $0x174] sm:$0xc] }
 0x505   :  { %v8063_v5 = vadd.f32 %v12536_v55, %v16575_v44  ;;  %7985 = vmatmul.mubr.bf16.gmra.mrb[236].mxu1 %v5760_v13  ;;  %v8314_v30 = vmax.f32 %v8060_v19, 0.0  ;;  %v6413_v44 = vshrl.u32 %v17140_v22, 16  ;;  %v6416_v13 = vshll.u32 %v17140_v22, 16 }
 0x506   :  { %7992 = vmatprep.mubr.bf16.mxu1 %v6394_v53  ;;  %v6421_v50 = vshrl.u32 %v13667_v17, 16  ;;  %v6424_v8 = vshll.u32 %v13667_v17, 16  ;;  %v6402_v19 = vor.u32 %v6401_v3, %v6398_v16  ;;  %v5763_v53 = vsel %vm5676_vm1, %v5761_v58, %v5762_v40 }
 0x507   :  { %v8315_v12 = vmax.f32 %v8063_v5, 0.0  ;;  %v6415_v63 = vrot.slane %v6413_v44, 2  ;;  %v6418_v51 = vrot.slane %v6416_v13, 3  ;;  %v17160_v3 = vcombine.low %v3912_v36, %v13668_v18 }
 0x508   :  { %v7778_v34 = vpop.f32.mrb[132].mxu1  ;;  %v6411_v24 = vsel %vm5901_vm0, %v6402_v19, %v6410_v0  ;;  %v5764_v17 = vrot.slane %v17127_v47, 2 }
 0x509   :  { %v8378_v59 = vpack.c.bf16 %v8315_v12, %v8314_v30  ;;  %v12537_v55 = vadd.f32 %v17130_v42, %v7778_v34  ;;  %v7780_v1 = vpop.f32.mrb[133].mxu1  ;;  %v6423_v30 = vrot.slane %v6421_v50, 2  ;;  %v6426_v12 = vrot.slane %v6424_v8, 3  ;;  %v13670_v50 = vld [vmem:[#allocation2 + $0x17c] ss:$0 sps:$4 sm:$0x77]  }
 0x50a   :  { %v7781_v43 = vpop.f32.mrb[134].mxu1  ;;  %v6419_v44 = vor.u32 %v6418_v51, %v6415_v63  ;;  %v6438_v8 = vshrl.u32 %v13670_v50, 16  ;;  %v6430_v0 = vshrl.u32 %v17160_v3, 16 }
 0x50b   :  { %8411 = vst.msk [vmem:[#allocation3 + $0x18] sm:$0xff] %vm406_vm2, %v8378_v59  ;;  %v8068_v6 = vadd.f32 %v12537_v55, %v16567_v62  ;;  %v12538_v39 = vadd.f32 %v17130_v42, %v7781_v43  ;;  %v7783_v5 = vpop.f32.mrb[135].mxu1  ;;  %v13669_v59 = vld [vmem:[#allocation2 + $0x164] ss:$0 sps:$4 sm:$0x33]   ;;  %v6427_v13 = vor.u32 %v6426_v12, %v6423_v30  ;;  %v6441_v55 = vshll.u32 %v13670_v50, 16 }
 0x50c   :  { %v5765_v58 = vrot.slane %v13669_v59, 2  ;;  %v6433_v43 = vshll.u32 %v17160_v3, 16  ;;  %v6440_v51 = vrot.slane %v6438_v8, 2  ;;  %v5767_v59 = vrot.slane %v17140_v22, 2 }
 0x50d   :  { %v8071_v16 = vadd.f32 %v12538_v39, %v16573_v4  ;;  %7993 = vmatmul.mubr.bf16.gmra.mrb[240].mxu1 %v5763_v53  ;;  %v8316_v62 = vmax.f32 %v8068_v6, 0.0  ;;  %v6443_v30 = vrot.slane %v6441_v55, 3  ;;  %v6428_v36 = vsel %vm5901_vm0, %v6419_v44, %v6427_v13 }
 0x50e   :  { %8000 = vmatprep.mubr.bf16.mxu1 %v6411_v24  ;;  %v5766_v63 = vsel %vm5676_vm1, %v5764_v17, %v5765_v58  ;;  %v13488_v24 = vld [vmem:[#allocation16 + $0x88] sm:$0xff]  }
 0x50f   :  { %v8317_v34 = vmax.f32 %v8071_v16, 0.0  ;;  %v6432_v16 = vrot.slane %v6430_v0, 2  ;;  %10397 = vmatpush1.bf16.msra.mxu0 %v13488_v24  ;;  %v6444_v44 = vor.u32 %v6443_v30, %v6440_v51 }
 0x510   :  { %v7786_v40 = vpop.f32.mrb[136].mxu1  ;;  %10398 = vmatprep.subr.bf16.mxu0 %v19440_v15 }
 0x511   :  { %v8379_v4 = vpack.c.bf16 %v8317_v34, %v8316_v62  ;;  %v12539_v1 = vadd.f32 %v17130_v42, %v7786_v40  ;;  %v7788_v19 = vpop.f32.mrb[137].mxu1  ;;  %v13671_v40 = vld [vmem:[#allocation2 + $0x170] ss:$0 sps:$4 sm:$0x33]  }
 0x512   :  { %v7789_v6 = vpop.f32.mrb[138].mxu1  ;;  %v17166_v39 = vld [vmem:[#allocation3 + $0x18] sm:$0xff]  ;;  %v5768_v50 = vrot.slane %v13671_v40, 2 }
 0x513   :  { %8412 = vst.msk [vmem:[#allocation3 + $0x20] sm:$0xff] %vm406_vm2, %v8379_v4  ;;  %v8076_v47 = vadd.f32 %v12539_v1, %v16632_v14  ;;  %v12540_v5 = vadd.f32 %v17130_v42, %v7789_v6  ;;  %v7791_v53 = vpop.f32.mrb[139].mxu1  ;;  %8802 = vrot.lane.b32.xlu1 %v17166_v39, %s13913_s3  ;;  %8708 = vrot.lane.b32.xlu0 %v17166_v39, %s13924_s8  ;;  %v6435_v14 = vrot.slane %v6433_v43, 3 }
 0x514   :  { %v5769_v19 = vsel %vm5676_vm1, %v5767_v59, %v5768_v50  ;;  %v13672_v53 = vld [vmem:[#allocation2 + $0x17c] ss:$0 sps:$4 sm:$0x33]  }
 0x515   :  { %v8079_v12 = vadd.f32 %v12540_v5, %v16637_v54  ;;  %8001 = vmatmul.mubr.bf16.gmra.mrb[244].mxu1 %v5766_v63  ;;  %v8318_v18 = vmax.f32 %v8076_v47, 0.0  ;;  %v6436_v8 = vor.u32 %v6435_v14, %v6432_v16  ;;  %v5770_v5 = vrot.slane %v17160_v3, 2 }
 0x516   :  { %8008 = vmatprep.mubr.bf16.mxu1 %v6428_v36  ;;  %v5771_v63 = vrot.slane %v13672_v53, 2  ;;  %v13490_v53 = vld [vmem:[#allocation16 + $0x98] sm:$0xff]  }
 0x517   :  { %v8319_v62 = vmax.f32 %v8079_v12, 0.0  ;;  %v6445_v43 = vsel %vm5901_vm0, %v6436_v8, %v6444_v44 }
 0x518   :  { %v7794_v34 = vpop.f32.mrb[140].mxu1  ;;  %v5772_v3 = vsel %vm5676_vm1, %v5770_v5, %v5771_v63 }
 0x519   :  { %v8380_v17 = vpack.c.bf16 %v8319_v62, %v8318_v18  ;;  %v12541_v54 = vadd.f32 %v17130_v42, %v7794_v34  ;;  %v7796_v58 = vpop.f32.mrb[141].mxu1  ;;  %v13489_v62 = vld [vmem:[#allocation16 + $0x90] sm:$0xff]  }
 0x51a   :  { %v7797_v13 = vpop.f32.mrb[142].mxu1  ;;  %v17181_v55 = vld [vmem:[#allocation3 + $0x20] sm:$0xff]  ;;  %10399 = vmatpush1.bf16.msra.mxu0 %v13489_v62 }
 0x51b   :  { %8413 = vst.msk [vmem:[#allocation3 + $0x28] sm:$0xff] %vm406_vm2, %v8380_v17  ;;  %v8084_v4 = vadd.f32 %v12541_v54, %v16628_v56  ;;  %v12542_v1 = vadd.f32 %v17130_v42, %v7797_v13  ;;  %v7799_v22 = vpop.f32.mrb[143].mxu1  ;;  %8804 = vrot.lane.b32.xlu1 %v17181_v55, %s13913_s3  ;;  %8710 = vrot.lane.b32.xlu0 %v17181_v55, %s13924_s8 }
 0x51c   :  { %10400 = vmatprep.subr.bf16.mxu0 %v19440_v15 }
 0x51d   :  { %v8087_v0 = vadd.f32 %v12542_v1, %v16635_v10  ;;  %8009 = vmatmul.mubr.bf16.gmra.mrb[248].mxu1 %v5769_v19  ;;  %v8320_v6 = vmax.f32 %v8084_v4, 0.0 }
 0x51e   :  { %8016 = vmatprep.mubr.bf16.mxu1 %v6445_v43  ;;  %10401 = vmatpush1.bf16.msra.mxu0 %v13490_v53 }
 0x51f   :  { %v8321_v47 = vmax.f32 %v8087_v0, 0.0  ;;  %10402 = vmatprep.subr.bf16.mxu0 %v19440_v15 }
 0x520   :  { %v7802_v56 = vpop.f32.mrb[144].mxu1 }
 0x521   :  { %v8381_v51 = vpack.c.bf16 %v8321_v47, %v8320_v6  ;;  %v12543_v30 = vadd.f32 %v17130_v42, %v7802_v56  ;;  %v7804_v12 = vpop.f32.mrb[145].mxu1 }
 0x522   :  { %v7805_v36 = vpop.f32.mrb[146].mxu1  ;;  %v17195_v16 = vld [vmem:[#allocation3 + $0x28] sm:$0xff] }
 0x523   :  { %8414 = vst.msk [vmem:[#allocation3 + $0x30] sm:$0xff] %vm406_vm2, %v8381_v51  ;;  %v8092_v10 = vadd.f32 %v12543_v30, %v16652_v61  ;;  %v12544_v14 = vadd.f32 %v17130_v42, %v7805_v36  ;;  %v7807_v24 = vpop.f32.mrb[147].mxu1  ;;  %8806 = vrot.lane.b32.xlu1 %v17195_v16, %s13913_s3  ;;  %8712 = vrot.lane.b32.xlu0 %v17195_v16, %s13924_s8 }
 0x525   :  { %v8095_v18 = vadd.f32 %v12544_v14, %v16656_v38  ;;  %8017 = vmatmul.mubr.bf16.gmra.mrb[252].mxu1 %v5772_v3  ;;  %v8322_v34 = vmax.f32 %v8092_v10, 0.0 }
 0x527   :  { %v8323_v59 = vmax.f32 %v8095_v18, 0.0 }
 0x528   :  { %v7810_v40 = vpop.f32.mrb[148].mxu1 }
 0x529   :  { %v8382_v61 = vpack.c.bf16 %v8323_v59, %v8322_v34  ;;  %v12545_v50 = vadd.f32 %v17130_v42, %v7810_v40  ;;  %v7812_v17 = vpop.f32.mrb[149].mxu1 }
 0x52a   :  { %v7813_v54 = vpop.f32.mrb[150].mxu1  ;;  %v17208_v58 = vld [vmem:[#allocation3 + $0x30] sm:$0xff] }
 0x52b   :  { %8415 = vst.msk [vmem:[#allocation3 + $0x38] sm:$0xff] %vm406_vm2, %v8382_v61  ;;  %v8100_v8 = vadd.f32 %v12545_v50, %v16650_v31  ;;  %v12546_v38 = vadd.f32 %v17130_v42, %v7813_v54  ;;  %v7815_v44 = vpop.f32.mrb[151].mxu1  ;;  %8808 = vrot.lane.b32.xlu1 %v17208_v58, %s13913_s3  ;;  %8714 = vrot.lane.b32.xlu0 %v17208_v58, %s13924_s8 }
 0x52c   :  { %v13491_v44 = vld [vmem:[#allocation16 + $0xa0] sm:$0xff]  }
 0x52d   :  { %v8103_v13 = vadd.f32 %v12546_v38, %v16654_v2  ;;  %v8324_v4 = vmax.f32 %v8100_v8, 0.0  ;;  %10403 = vmatpush1.bf16.msra.mxu0 %v13491_v44 }
 0x52e   :  { %10404 = vmatprep.subr.bf16.mxu0 %v19440_v15 }
 0x52f   :  { %v8325_v1 = vmax.f32 %v8103_v13, 0.0 }
 0x530   :  { %v7818_v22 = vpop.f32.mrb[152].mxu1 }
 0x531   :  { %v8383_v19 = vpack.c.bf16 %v8325_v1, %v8324_v4  ;;  %v12547_v0 = vadd.f32 %v17130_v42, %v7818_v22  ;;  %v7820_v43 = vpop.f32.mrb[153].mxu1 }
 0x532   :  { %v7821_v6 = vpop.f32.mrb[154].mxu1  ;;  %v17219_v31 = vld [vmem:[#allocation3 + $0x38] sm:$0xff] }
 0x533   :  { %8416 = vst.msk [vmem:[#allocation3 + $0x40] sm:$0xff] %vm406_vm2, %v8383_v19  ;;  %v8108_v47 = vadd.f32 %v12547_v0, %v16668_v52  ;;  %v12548_v56 = vadd.f32 %v17130_v42, %v7821_v6  ;;  %v7823_v5 = vpop.f32.mrb[155].mxu1  ;;  %8810 = vrot.lane.b32.xlu1 %v17219_v31, %s13913_s3  ;;  %8716 = vrot.lane.b32.xlu0 %v17219_v31, %s13924_s8 }
 0x535   :  { %v8111_v2 = vadd.f32 %v12548_v56, %v16672_v41  ;;  %v8326_v63 = vmax.f32 %v8108_v47, 0.0 }
 0x537   :  { %v8327_v51 = vmax.f32 %v8111_v2, 0.0 }
 0x538   :  { %v7826_v30 = vpop.f32.mrb[156].mxu1 }
 0x539   :  { %v8384_v12 = vpack.c.bf16 %v8327_v51, %v8326_v63  ;;  %v12549_v52 = vadd.f32 %v17130_v42, %v7826_v30  ;;  %v7828_v36 = vpop.f32.mrb[157].mxu1 }
 0x53a   :  { %v7829_v10 = vpop.f32.mrb[158].mxu1  ;;  %v17231_v14 = vld [vmem:[#allocation3 + $0x40] sm:$0xff] }
 0x53b   :  { %8417 = vst.msk [vmem:[#allocation3 + $0x48] sm:$0xff] %vm406_vm2, %v8384_v12  ;;  %v8116_v24 = vadd.f32 %v12549_v52, %v16666_v9  ;;  %v12550_v41 = vadd.f32 %v17130_v42, %v7829_v10  ;;  %v7831_v3 = vpop.f32.mrb[159].mxu1  ;;  %8812 = vrot.lane.b32.xlu1 %v17231_v14, %s13913_s3  ;;  %8718 = vrot.lane.b32.xlu0 %v17231_v14, %s13924_s8 }
 0x53d   :  { %v8119_v18 = vadd.f32 %v12550_v41, %v16670_v32  ;;  %v8328_v62 = vmax.f32 %v8116_v24, 0.0  ;;  %v13492_v24 = vld [vmem:[#allocation16 + $0xa8] sm:$0xff]  }
 0x53e   :  { %10405 = vmatpush1.bf16.msra.mxu0 %v13492_v24 }
 0x53f   :  { %v8329_v34 = vmax.f32 %v8119_v18, 0.0  ;;  %10406 = vmatprep.subr.bf16.mxu0 %v19440_v15 }
 0x540   :  { %v7834_v59 = vpop.f32.mrb[160].mxu1 }
 0x541   :  { %v8385_v40 = vpack.c.bf16 %v8329_v34, %v8328_v62  ;;  %v12551_v61 = vadd.f32 %v17130_v42, %v7834_v59  ;;  %v7836_v50 = vpop.f32.mrb[161].mxu1 }
 0x542   :  { %v7837_v17 = vpop.f32.mrb[162].mxu1  ;;  %v17242_v9 = vld [vmem:[#allocation3 + $0x48] sm:$0xff] }
 0x543   :  { %8418 = vst.msk [vmem:[#allocation3 + $0x50] sm:$0xff] %vm406_vm2, %v8385_v40  ;;  %v8124_v54 = vadd.f32 %v12551_v61, %v16689_v29  ;;  %v12552_v8 = vadd.f32 %v17130_v42, %v7837_v17  ;;  %v7839_v38 = vpop.f32.mrb[163].mxu1  ;;  %8814 = vrot.lane.b32.xlu1 %v17242_v9, %s13913_s3  ;;  %8720 = vrot.lane.b32.xlu0 %v17242_v9, %s13924_s8 }
 0x545   :  { %v8127_v32 = vadd.f32 %v12552_v8, %v16697_v23  ;;  %v8330_v13 = vmax.f32 %v8124_v54, 0.0 }
 0x547   :  { %v8331_v4 = vmax.f32 %v8127_v32, 0.0 }
 0x548   :  { %v7842_v1 = vpop.f32.mrb[164].mxu1 }
 0x549   :  { %v8386_v22 = vpack.c.bf16 %v8331_v4, %v8330_v13  ;;  %v12553_v29 = vadd.f32 %v17130_v42, %v7842_v1  ;;  %v7844_v19 = vpop.f32.mrb[165].mxu1 }
 0x54a   :  { %v7845_v0 = vpop.f32.mrb[166].mxu1  ;;  %v17254_v43 = vld [vmem:[#allocation3 + $0x50] sm:$0xff]  ;;  %v13493_v19 = vld [vmem:[#allocation16 + $0xb0] sm:$0xff]  }
 0x54b   :  { %8419 = vst.msk [vmem:[#allocation3 + $0x58] sm:$0xff] %vm406_vm2, %v8386_v22  ;;  %v8132_v6 = vadd.f32 %v12553_v29, %v16687_v26  ;;  %v12554_v23 = vadd.f32 %v17130_v42, %v7845_v0  ;;  %v7847_v47 = vpop.f32.mrb[167].mxu1  ;;  %8816 = vrot.lane.b32.xlu1 %v17254_v43, %s13913_s3  ;;  %8722 = vrot.lane.b32.xlu0 %v17254_v43, %s13924_s8 }
 0x54c   :  { %10407 = vmatpush1.bf16.msra.mxu0 %v13493_v19 }
 0x54d   :  { %v8135_v56 = vadd.f32 %v12554_v23, %v16692_v45  ;;  %v8332_v5 = vmax.f32 %v8132_v6, 0.0  ;;  %10408 = vmatprep.subr.bf16.mxu0 %v19440_v15 }
 0x54f   :  { %v8333_v2 = vmax.f32 %v8135_v56, 0.0 }
 0x550   :  { %v7850_v53 = vpop.f32.mrb[168].mxu1 }
 0x551   :  { %v8387_v63 = vpack.c.bf16 %v8333_v2, %v8332_v5  ;;  %v12555_v51 = vadd.f32 %v17130_v42, %v7850_v53  ;;  %v7852_v30 = vpop.f32.mrb[169].mxu1 }
 0x552   :  { %v7853_v12 = vpop.f32.mrb[170].mxu1  ;;  %v17265_v26 = vld [vmem:[#allocation3 + $0x58] sm:$0xff] }
 0x553   :  { %8420 = vst.msk [vmem:[#allocation3 + $0x60] sm:$0xff] %vm406_vm2, %v8387_v63  ;;  %v8140_v52 = vadd.f32 %v12555_v51, %v16738_v20  ;;  %v12556_v36 = vadd.f32 %v17130_v42, %v7853_v12  ;;  %v7855_v10 = vpop.f32.mrb[171].mxu1  ;;  %8818 = vrot.lane.b32.xlu1 %v17265_v26, %s13913_s3  ;;  %8724 = vrot.lane.b32.xlu0 %v17265_v26, %s13924_s8 }
 0x555   :  { %v8143_v45 = vadd.f32 %v12556_v36, %v16745_v49  ;;  %v8334_v41 = vmax.f32 %v8140_v52, 0.0 }
 0x557   :  { %v8335_v3 = vmax.f32 %v8143_v45, 0.0 }
 0x558   :  { %v7858_v18 = vpop.f32.mrb[172].mxu1 }
 0x559   :  { %v8388_v62 = vpack.c.bf16 %v8335_v3, %v8334_v41  ;;  %v12557_v20 = vadd.f32 %v17130_v42, %v7858_v18  ;;  %v7860_v34 = vpop.f32.mrb[173].mxu1 }
 0x55a   :  { %v7861_v59 = vpop.f32.mrb[174].mxu1  ;;  %v17277_v40 = vld [vmem:[#allocation3 + $0x60] sm:$0xff] }
 0x55b   :  { %8421 = vst.msk [vmem:[#allocation3 + $0x68] sm:$0xff] %vm406_vm2, %v8388_v62  ;;  %v8148_v61 = vadd.f32 %v12557_v20, %v16735_v21  ;;  %v12558_v49 = vadd.f32 %v17130_v42, %v7861_v59  ;;  %v7863_v50 = vpop.f32.mrb[175].mxu1  ;;  %8820 = vrot.lane.b32.xlu1 %v17277_v40, %s13913_s3  ;;  %8726 = vrot.lane.b32.xlu0 %v17277_v40, %s13924_s8  ;;  %v13494_v62 = vld [vmem:[#allocation16 + $0xb8] sm:$0xff]  }
 0x55c   :  { %10409 = vmatpush1.bf16.msra.mxu0 %v13494_v62 }
 0x55d   :  { %v8151_v17 = vadd.f32 %v12558_v49, %v16741_v25  ;;  %v8336_v54 = vmax.f32 %v8148_v61, 0.0  ;;  %10410 = vmatprep.subr.bf16.mxu0 %v19440_v15 }
 0x55f   :  { %v8337_v8 = vmax.f32 %v8151_v17, 0.0 }
 0x560   :  { %v7866_v38 = vpop.f32.mrb[176].mxu1 }
 0x561   :  { %v8389_v32 = vpack.c.bf16 %v8337_v8, %v8336_v54  ;;  %v12559_v44 = vadd.f32 %v17130_v42, %v7866_v38  ;;  %v7868_v13 = vpop.f32.mrb[177].mxu1  ;;  %v17332_v38 = vld [vmem:[#allocation3 + $0xb8] sm:$0xff] }
 0x562   :  { %v7869_v4 = vpop.f32.mrb[178].mxu1  ;;  %v17288_v21 = vld [vmem:[#allocation3 + $0x68] sm:$0xff] }
 0x563   :  { %8422 = vst.msk [vmem:[#allocation3 + $0x70] sm:$0xff] %vm406_vm2, %v8389_v32  ;;  %v8156_v1 = vadd.f32 %v12559_v44, %v16762_v33  ;;  %v12560_v22 = vadd.f32 %v17130_v42, %v7869_v4  ;;  %v7871_v29 = vpop.f32.mrb[179].mxu1  ;;  %8822 = vrot.lane.b32.xlu1 %v17288_v21, %s13913_s3  ;;  %8728 = vrot.lane.b32.xlu0 %v17288_v21, %s13924_s8  ;;  %v8707_v4 = vpop.permute.xlu1 %8706 }
 0x565   :  { %v8159_v25 = vadd.f32 %v12560_v22, %v16766_v46  ;;  %v8338_v0 = vmax.f32 %v8156_v1, 0.0 }
 0x567   :  { %v8339_v6 = vmax.f32 %v8159_v25, 0.0 }
 0x568   :  { %v7874_v23 = vpop.f32.mrb[180].mxu1 }
 0x569   :  { %v8390_v47 = vpack.c.bf16 %v8339_v6, %v8338_v0  ;;  %v12561_v33 = vadd.f32 %v17130_v42, %v7874_v23  ;;  %v7876_v56 = vpop.f32.mrb[181].mxu1  ;;  %v17340_v0 = vld [vmem:[#allocation3 + $0xc0] sm:$0xff] }
 0x56a   :  { %v7877_v5 = vpop.f32.mrb[182].mxu1  ;;  %v17300_v2 = vld [vmem:[#allocation3 + $0x70] sm:$0xff] }
 0x56b   :  { %8423 = vst.msk [vmem:[#allocation3 + $0x78] sm:$0xff] %vm406_vm2, %v8390_v47  ;;  %v8164_v53 = vadd.f32 %v12561_v33, %v16758_v57  ;;  %v12562_v46 = vadd.f32 %v17130_v42, %v7877_v5  ;;  %v7879_v63 = vpop.f32.mrb[183].mxu1  ;;  %8824 = vrot.lane.b32.xlu1 %v17300_v2, %s13913_s3  ;;  %8730 = vrot.lane.b32.xlu0 %v17300_v2, %s13924_s8  ;;  %v13495_v47 = vld [vmem:[#allocation16 + $0xc0] sm:$0xff]  }
 0x56c   :  { %10411 = vmatpush1.bf16.msra.mxu0 %v13495_v47 }
 0x56d   :  { %v8167_v51 = vadd.f32 %v12562_v46, %v16764_v7  ;;  %v8340_v30 = vmax.f32 %v8164_v53, 0.0  ;;  %10412 = vmatprep.subr.bf16.mxu0 %v19440_v15  ;;  %v13673_v46 = vld [vmem:[#allocation3 + $0x8] sm:$0xff] }
 0x56e   :  { %v9158_v63 = vsel %vm406_vm2, %v13673_v46, %v8707_v4 }
 0x56f   :  { %v8341_v12 = vmax.f32 %v8167_v51, 0.0 }
 0x570   :  { %v7882_v52 = vpop.f32.mrb[184].mxu1 }
 0x571   :  { %v8391_v36 = vpack.c.bf16 %v8341_v12, %v8340_v30  ;;  %v12563_v10 = vadd.f32 %v17130_v42, %v7882_v52  ;;  %v7884_v45 = vpop.f32.mrb[185].mxu1 }
 0x572   :  { %v7885_v24 = vpop.f32.mrb[186].mxu1  ;;  %v17311_v57 = vld [vmem:[#allocation3 + $0x78] sm:$0xff] }
 0x573   :  { %8424 = vst.msk [vmem:[#allocation3 + $0x80] sm:$0xff] %vm406_vm2, %v8391_v36  ;;  %v8172_v41 = vadd.f32 %v12563_v10, %v16778_v48  ;;  %v12564_v3 = vadd.f32 %v17130_v42, %v7885_v24  ;;  %v7887_v18 = vpop.f32.mrb[187].mxu1  ;;  %8826 = vrot.lane.b32.xlu1 %v17311_v57, %s13913_s3  ;;  %8732 = vrot.lane.b32.xlu0 %v17311_v57, %s13924_s8  ;;  %v19869_v36 = vld [vmem:[#allocation155_spill] sm:$0xff] }
 0x575   :  { %v8175_v7 = vadd.f32 %v12564_v3, %v16783_v28  ;;  %v8342_v20 = vmax.f32 %v8172_v41, 0.0  ;;  %v19870_v3 = vld [vmem:[#allocation156_spill] sm:$0xff] }
 0x577   :  { %v8343_v34 = vmax.f32 %v8175_v7, 0.0 }
 0x578   :  { %v7890_v59 = vpop.f32.mrb[188].mxu1 }
 0x579   :  { %v8392_v61 = vpack.c.bf16 %v8343_v34, %v8342_v20  ;;  %v12565_v48 = vadd.f32 %v17130_v42, %v7890_v59  ;;  %v7892_v49 = vpop.f32.mrb[189].mxu1  ;;  %v13674_v59 = vld [vmem:[#allocation3 + $0x10] sm:$0xff] }
 0x57a   :  { %v7893_v50 = vpop.f32.mrb[190].mxu1  ;;  %v17323_v17 = vld [vmem:[#allocation3 + $0x80] sm:$0xff] }
 0x57b   :  { %8425 = vst.msk [vmem:[#allocation3 + $0x88] sm:$0xff] %vm406_vm2, %v8392_v61  ;;  %v8180_v54 = vadd.f32 %v12565_v48, %v16776_v11  ;;  %v12566_v28 = vadd.f32 %v17130_v42, %v7893_v50  ;;  %v7895_v8 = vpop.f32.mrb[191].mxu1  ;;  %8828 = vrot.lane.b32.xlu1 %v17323_v17, %s13913_s3  ;;  %8734 = vrot.lane.b32.xlu0 %v17323_v17, %s13924_s8 }
 0x57d   :  { %v8183_v32 = vadd.f32 %v12566_v28, %v16780_v60  ;;  %v8344_v44 = vmax.f32 %v8180_v54, 0.0  ;;  %v13496_v28 = vld [vmem:[#allocation16 + $0xc8] sm:$0xff]  }
 0x57e   :  { %10413 = vmatpush1.bf16.msra.mxu0 %v13496_v28 }
 0x57f   :  { %v8345_v13 = vmax.f32 %v8183_v32, 0.0  ;;  %8736 = vrot.lane.b32.xlu0 %v17332_v38, %s13924_s8  ;;  %10414 = vmatprep.subr.bf16.mxu0 %v19440_v15 }
 0x580   :  { %v7898_v11 = vpop.f32.mrb[192].mxu1 }
 0x581   :  { %v8393_v1 = vpack.c.bf16 %v8345_v13, %v8344_v44  ;;  %v12567_v22 = vadd.f32 %v17130_v42, %v7898_v11  ;;  %v7900_v29 = vpop.f32.mrb[193].mxu1  ;;  %v19871_v44 = vld [vmem:[#allocation158_spill] sm:$0xff] }
 0x582   :  { %v7901_v25 = vpop.f32.mrb[194].mxu1  ;;  %v17338_v19 = vld [vmem:[#allocation3 + $0x88] sm:$0xff] }
 0x583   :  { %8426 = vst.msk [vmem:[#allocation3 + $0x90] sm:$0xff] %vm406_vm2, %v8393_v1  ;;  %v8188_v60 = vadd.f32 %v12567_v22, %v16793_v27  ;;  %v12568_v6 = vadd.f32 %v17130_v42, %v7901_v25  ;;  %v7903_v23 = vpop.f32.mrb[195].mxu1  ;;  %8830 = vrot.lane.b32.xlu1 %v17338_v19, %s13913_s3  ;;  %8738 = vrot.lane.b32.xlu0 %v17340_v0, %s13924_s8  ;;  %v19872_v22 = vld [vmem:[#allocation160_spill] sm:$0xff] }
 0x585   :  { %v8191_v33 = vadd.f32 %v12568_v6, %v16798_v37  ;;  %v17350_v56 = vpop.permute.xlu1 %8802  ;;  %v8346_v27 = vmax.f32 %v8188_v60, 0.0  ;;  %v8709_v41 = vpop.permute.xlu0 %8708 }
 0x586   :  { %v9285_v5 = vsel %vm9280_vm3, %v8707_v4, %v17350_v56  ;;  %v9162_v61 = vsel %vm406_vm2, %v13674_v59, %v8709_v41  ;;  %v13497_v59 = vld [vmem:[#allocation16 + $0xd0] sm:$0xff]  }
 0x587   :  { %v8347_v53 = vmax.f32 %v8191_v33, 0.0  ;;  %10145 = vmatprep.mubr.bf16.mxu0 %v9285_v5  ;;  %8832 = vrot.lane.b32.xlu1 %v17340_v0, %s13913_s3 }
 0x588   :  { %v7906_v51 = vpop.f32.mrb[196].mxu1  ;;  %10146 = vmatmul.mubr.bf16.gmra.mrb[132].mxu0 %v9158_v63 }
 0x589   :  { %v8394_v37 = vpack.c.bf16 %v8347_v53, %v8346_v27  ;;  %v12569_v30 = vadd.f32 %v17130_v42, %v7906_v51  ;;  %v7908_v12 = vpop.f32.mrb[197].mxu1  ;;  %v19873_v51 = vld [vmem:[#allocation157_spill] sm:$0xff]  ;;  %10415 = vmatpush1.bf16.msra.mxu0 %v13497_v59 }
 0x58a   :  { %v7909_v52 = vpop.f32.mrb[198].mxu1  ;;  %10416 = vmatprep.subr.bf16.mxu0 %v19440_v15 }
 0x58b   :  { %8427 = vst.msk [vmem:[#allocation3 + $0xc8] sm:$0xff] %vm406_vm2, %v8394_v37  ;;  %v8196_v10 = vadd.f32 %v12569_v30, %v19869_v36  ;;  %v12570_v45 = vadd.f32 %v17130_v42, %v7909_v52  ;;  %v7911_v24 = vpop.f32.mrb[199].mxu1  ;;  %v19874_v52 = vld [vmem:[#allocation159_spill] sm:$0xff] }
 0x58d   :  { %v8199_v18 = vadd.f32 %v12570_v45, %v19870_v3  ;;  %v17363_v7 = vpop.permute.xlu1 %8804  ;;  %v8348_v20 = vmax.f32 %v8196_v10, 0.0  ;;  %v8711_v1 = vpop.permute.xlu0 %8710 }
 0x58e   :  { %v9288_v62 = vsel %vm9280_vm3, %v8709_v41, %v17363_v7  ;;  %v9166_v47 = vsel %vm406_vm2, %v17166_v39, %v8711_v1 }
 0x58f   :  { %v8349_v34 = vmax.f32 %v8199_v18, 0.0  ;;  %10153 = vmatprep.mubr.bf16.mxu0 %v9288_v62 }
 0x590   :  { %v7914_v48 = vpop.f32.mrb[200].mxu1  ;;  %10154 = vmatmul.mubr.bf16.gmra.mrb[136].mxu0 %v9162_v61 }
 0x591   :  { %v8395_v49 = vpack.c.bf16 %v8349_v34, %v8348_v20  ;;  %v12571_v50 = vadd.f32 %v17130_v42, %v7914_v48  ;;  %v7916_v54 = vpop.f32.mrb[201].mxu1 }
 0x592   :  { %v7917_v8 = vpop.f32.mrb[202].mxu1  ;;  %v17369_v32 = vld [vmem:[#allocation3 + $0xc8] sm:$0xff] }
 0x593   :  { %8428 = vst.msk [vmem:[#allocation3 + $0xd0] sm:$0xff] %vm406_vm2, %v8395_v49  ;;  %v8204_v13 = vadd.f32 %v12571_v50, %v19871_v44  ;;  %v12572_v4 = vadd.f32 %v17130_v42, %v7917_v8  ;;  %v7919_v11 = vpop.f32.mrb[203].mxu1  ;;  %8834 = vrot.lane.b32.xlu1 %v17369_v32, %s13913_s3  ;;  %8740 = vrot.lane.b32.xlu0 %v17369_v32, %s13924_s8  ;;  %v19875_v49 = vld [vmem:[#allocation162_spill] sm:$0xff]  ;;  %v19876_v8 = vld [vmem:[#allocation164_spill] sm:$0xff] }
 0x595   :  { %v8207_v29 = vadd.f32 %v12572_v4, %v19872_v22  ;;  %v17379_v25 = vpop.permute.xlu1 %8806  ;;  %v8350_v6 = vmax.f32 %v8204_v13, 0.0  ;;  %v8713_v39 = vpop.permute.xlu0 %8712 }
 0x596   :  { %v9291_v60 = vsel %vm9280_vm3, %v8711_v1, %v17379_v25  ;;  %v9170_v3 = vsel %vm406_vm2, %v17181_v55, %v8713_v39 }
 0x597   :  { %v8351_v23 = vmax.f32 %v8207_v29, 0.0  ;;  %10161 = vmatprep.mubr.bf16.mxu0 %v9291_v60 }
 0x598   :  { %v7922_v33 = vpop.f32.mrb[204].mxu1  ;;  %10162 = vmatmul.mubr.bf16.gmra.mrb[140].mxu0 %v9166_v47 }
 0x599   :  { %v8396_v5 = vpack.c.bf16 %v8351_v23, %v8350_v6  ;;  %v12573_v27 = vadd.f32 %v17130_v42, %v7922_v33  ;;  %v7924_v53 = vpop.f32.mrb[205].mxu1 }
 0x59a   :  { %v7925_v46 = vpop.f32.mrb[206].mxu1  ;;  %v17387_v63 = vld [vmem:[#allocation3 + $0xd0] sm:$0xff] }
 0x59b   :  { %8429 = vst.msk [vmem:[#allocation3 + $0xd8] sm:$0xff] %vm406_vm2, %v8396_v5  ;;  %v8212_v37 = vadd.f32 %v12573_v27, %v19873_v51  ;;  %v12574_v30 = vadd.f32 %v17130_v42, %v7925_v46  ;;  %v7927_v12 = vpop.f32.mrb[207].mxu1  ;;  %8836 = vrot.lane.b32.xlu1 %v17387_v63, %s13913_s3  ;;  %8742 = vrot.lane.b32.xlu0 %v17387_v63, %s13924_s8  ;;  %v19877_v5 = vld [vmem:[#allocation161_spill] sm:$0xff]  ;;  %v19878_v51 = vld [vmem:[#allocation163_spill] sm:$0xff] }
 0x59d   :  { %v8215_v36 = vadd.f32 %v12574_v30, %v19874_v52  ;;  %v17397_v10 = vpop.permute.xlu1 %8808  ;;  %v8352_v24 = vmax.f32 %v8212_v37, 0.0  ;;  %v8715_v55 = vpop.permute.xlu0 %8714 }
 0x59e   :  { %v9294_v45 = vsel %vm9280_vm3, %v8713_v39, %v17397_v10  ;;  %v9174_v22 = vsel %vm406_vm2, %v17195_v16, %v8715_v55 }
 0x59f   :  { %v8353_v41 = vmax.f32 %v8215_v36, 0.0  ;;  %10169 = vmatprep.mubr.bf16.mxu0 %v9294_v45 }
 0x5a0   :  { %v7930_v18 = vpop.f32.mrb[208].mxu1  ;;  %10170 = vmatmul.mubr.bf16.gmra.mrb[144].mxu0 %v9170_v3 }
 0x5a1   :  { %v8397_v62 = vpack.c.bf16 %v8353_v41, %v8352_v24  ;;  %v12575_v20 = vadd.f32 %v17130_v42, %v7930_v18  ;;  %v7932_v34 = vpop.f32.mrb[209].mxu1  ;;  %v13498_v18 = vld [vmem:[#allocation16 + $0xd8] sm:$0xff]  }
 0x5a2   :  { %v7933_v61 = vpop.f32.mrb[210].mxu1  ;;  %v17404_v48 = vld [vmem:[#allocation3 + $0xd8] sm:$0xff]  ;;  %10417 = vmatpush1.bf16.msra.mxu0 %v13498_v18 }
 0x5a3   :  { %8430 = vst.msk [vmem:[#allocation3 + $0xe0] sm:$0xff] %vm406_vm2, %v8397_v62  ;;  %v8220_v50 = vadd.f32 %v12575_v20, %v19875_v49  ;;  %v12576_v54 = vadd.f32 %v17130_v42, %v7933_v61  ;;  %v7935_v28 = vpop.f32.mrb[211].mxu1  ;;  %8838 = vrot.lane.b32.xlu1 %v17404_v48, %s13913_s3  ;;  %8744 = vrot.lane.b32.xlu0 %v17404_v48, %s13924_s8  ;;  %v19879_v34 = vld [vmem:[#allocation166_spill] sm:$0xff] }
 0x5a4   :  { %10418 = vmatprep.subr.bf16.mxu0 %v19440_v15 }
 0x5a5   :  { %v8223_v44 = vadd.f32 %v12576_v54, %v19876_v8  ;;  %v17414_v13 = vpop.permute.xlu1 %8810  ;;  %v8354_v11 = vmax.f32 %v8220_v50, 0.0  ;;  %v8717_v16 = vpop.permute.xlu0 %8716  ;;  %v19880_v50 = vld [vmem:[#allocation168_spill] sm:$0xff] }
 0x5a6   :  { %v9297_v4 = vsel %vm9280_vm3, %v8715_v55, %v17414_v13  ;;  %v9178_v36 = vsel %vm406_vm2, %v17208_v58, %v8717_v16 }
 0x5a7   :  { %v8355_v1 = vmax.f32 %v8223_v44, 0.0  ;;  %10177 = vmatprep.mubr.bf16.mxu0 %v9297_v4 }
 0x5a8   :  { %v7938_v29 = vpop.f32.mrb[212].mxu1  ;;  %10178 = vmatmul.mubr.bf16.gmra.mrb[148].mxu0 %v9174_v22 }
 0x5a9   :  { %v8398_v60 = vpack.c.bf16 %v8355_v1, %v8354_v11  ;;  %v12577_v6 = vadd.f32 %v17130_v42, %v7938_v29  ;;  %v7940_v23 = vpop.f32.mrb[213].mxu1 }
 0x5aa   :  { %v7941_v47 = vpop.f32.mrb[214].mxu1  ;;  %v17422_v33 = vld [vmem:[#allocation3 + $0xe0] sm:$0xff]  ;;  %v19881_v23 = vld [vmem:[#allocation165_spill] sm:$0xff] }
 0x5ab   :  { %8431 = vst.msk [vmem:[#allocation3 + $0xe8] sm:$0xff] %vm406_vm2, %v8398_v60  ;;  %v8228_v27 = vadd.f32 %v12577_v6, %v19877_v5  ;;  %v12578_v53 = vadd.f32 %v17130_v42, %v7941_v47  ;;  %v7943_v46 = vpop.f32.mrb[215].mxu1  ;;  %8840 = vrot.lane.b32.xlu1 %v17422_v33, %s13913_s3  ;;  %8746 = vrot.lane.b32.xlu0 %v17422_v33, %s13924_s8 }
 0x5ad   :  { %v8231_v37 = vadd.f32 %v12578_v53, %v19878_v51  ;;  %v17432_v30 = vpop.permute.xlu1 %8812  ;;  %v8356_v39 = vmax.f32 %v8228_v27, 0.0  ;;  %v8719_v58 = vpop.permute.xlu0 %8718  ;;  %v19882_v53 = vld [vmem:[#allocation167_spill] sm:$0xff] }
 0x5ae   :  { %v9300_v12 = vsel %vm9280_vm3, %v8717_v16, %v17432_v30  ;;  %v9182_v4 = vsel %vm406_vm2, %v17219_v31, %v8719_v58 }
 0x5af   :  { %v8357_v52 = vmax.f32 %v8231_v37, 0.0  ;;  %10185 = vmatprep.mubr.bf16.mxu0 %v9300_v12 }
 0x5b0   :  { %v7946_v45 = vpop.f32.mrb[216].mxu1  ;;  %10186 = vmatmul.mubr.bf16.gmra.mrb[152].mxu0 %v9178_v36  ;;  %v17473_v36 = vld [vmem:[#allocation15] ss:$0 sm:$0xff] }
 0x5b1   :  { %v8399_v24 = vpack.c.bf16 %v8357_v52, %v8356_v39  ;;  %v12579_v41 = vadd.f32 %v17130_v42, %v7946_v45  ;;  %v7948_v3 = vpop.f32.mrb[217].mxu1 }
 0x5b2   :  { %v7949_v62 = vpop.f32.mrb[218].mxu1  ;;  %v17439_v20 = vld [vmem:[#allocation3 + $0xe8] sm:$0xff] }
 0x5b3   :  { %8432 = vst.msk [vmem:[#allocation3 + $0xf0] sm:$0xff] %vm406_vm2, %v8399_v24  ;;  %v8236_v59 = vadd.f32 %v12579_v41, %v19879_v34  ;;  %v12580_v61 = vadd.f32 %v17130_v42, %v7949_v62  ;;  %v7951_v49 = vpop.f32.mrb[219].mxu1  ;;  %8842 = vrot.lane.b32.xlu1 %v17439_v20, %s13913_s3  ;;  %8748 = vrot.lane.b32.xlu0 %v17439_v20, %s13924_s8  ;;  %v13499_v41 = vld [vmem:[#allocation16 + $0xe0] sm:$0xff]   ;;  %v19883_v62 = vld [vmem:[#allocation170_spill] sm:$0xff] }
 0x5b4   :  { %10419 = vmatpush1.bf16.msra.mxu0 %v13499_v41  ;;  %v19884_v49 = vld [vmem:[#allocation172_spill] sm:$0xff] }
 0x5b5   :  { %v8239_v54 = vadd.f32 %v12580_v61, %v19880_v50  ;;  %v17449_v28 = vpop.permute.xlu1 %8814  ;;  %v8358_v8 = vmax.f32 %v8236_v59, 0.0  ;;  %v8721_v31 = vpop.permute.xlu0 %8720  ;;  %10420 = vmatprep.subr.bf16.mxu0 %v19440_v15  ;;  %v13500_v41 = vld [vmem:[#allocation16 + $0xe8] sm:$0xff]  }
 0x5b6   :  { %v9303_v55 = vsel %vm9280_vm3, %v8719_v58, %v17449_v28 }
 0x5b7   :  { %v8359_v44 = vmax.f32 %v8239_v54, 0.0  ;;  %10193 = vmatprep.mubr.bf16.mxu0 %v9303_v55 }
 0x5b8   :  { %v7954_v11 = vpop.f32.mrb[220].mxu1  ;;  %10194 = vmatmul.mubr.bf16.gmra.mrb[156].mxu0 %v9182_v4 }
 0x5b9   :  { %v8400_v1 = vpack.c.bf16 %v8359_v44, %v8358_v8  ;;  %v12581_v22 = vadd.f32 %v17130_v42, %v7954_v11  ;;  %v7956_v29 = vpop.f32.mrb[221].mxu1  ;;  %10421 = vmatpush1.bf16.msra.mxu0 %v13500_v41 }
 0x5ba   :  { %v7957_v60 = vpop.f32.mrb[222].mxu1  ;;  %v17457_v6 = vld [vmem:[#allocation3 + $0xf0] sm:$0xff]  ;;  %10422 = vmatprep.subr.bf16.mxu0 %v19440_v15 }
 0x5bb   :  { %8433 = vst.msk [vmem:[#allocation3 + $0xf8] sm:$0xff] %vm406_vm2, %v8400_v1  ;;  %v8244_v47 = vadd.f32 %v12581_v22, %v19881_v23  ;;  %v12582_v5 = vadd.f32 %v17130_v42, %v7957_v60  ;;  %v7959_v27 = vpop.f32.mrb[223].mxu1  ;;  %8844 = vrot.lane.b32.xlu1 %v17457_v6, %s13913_s3  ;;  %8750 = vrot.lane.b32.xlu0 %v17457_v6, %s13924_s8  ;;  %v19885_v23 = vld [vmem:[#allocation169_spill] sm:$0xff] }
 0x5bc   :  { %v9186_v42 = vsel %vm406_vm2, %v17231_v14, %v8721_v31 }
 0x5bd   :  { %v8247_v46 = vadd.f32 %v12582_v5, %v19882_v53  ;;  %v17467_v16 = vpop.permute.xlu1 %8816  ;;  %v8360_v37 = vmax.f32 %v8244_v47, 0.0  ;;  %v8723_v14 = vpop.permute.xlu0 %8722 }
 0x5be   :  { %v9306_v51 = vsel %vm9280_vm3, %v8721_v31, %v17467_v16  ;;  %v9190_v44 = vsel %vm406_vm2, %v17242_v9, %v8723_v14  ;;  %v19886_v31 = vld [vmem:[#allocation171_spill] sm:$0xff] }
 0x5bf   :  { %v8361_v12 = vmax.f32 %v8247_v46, 0.0  ;;  %10201 = vmatprep.mubr.bf16.mxu0 %v9306_v51 }
 0x5c0   :  { %v7962_v39 = vpop.f32.mrb[224].mxu1  ;;  %10202 = vmatmul.mubr.bf16.gmra.mrb[160].mxu0 %v9186_v42 }
 0x5c1   :  { %v8401_v52 = vpack.c.bf16 %v8361_v12, %v8360_v37  ;;  %v12583_v45 = vadd.f32 %v17473_v36, %v7962_v39  ;;  %v7964_v24 = vpop.f32.mrb[225].mxu1 }
 0x5c2   :  { %v7965_v3 = vpop.f32.mrb[226].mxu1  ;;  %v17476_v18 = vld [vmem:[#allocation3 + $0xf8] sm:$0xff] }
 0x5c3   :  { %8434 = vst.msk [vmem:[#allocation3 + $0x100] sm:$0xff] %vm406_vm2, %v8401_v52  ;;  %v8252_v34 = vadd.f32 %v12583_v45, %v19883_v62  ;;  %v12584_v59 = vadd.f32 %v17473_v36, %v7965_v3  ;;  %v7967_v61 = vpop.f32.mrb[227].mxu1  ;;  %8846 = vrot.lane.b32.xlu1 %v17476_v18, %s13913_s3  ;;  %8752 = vrot.lane.b32.xlu0 %v17476_v18, %s13924_s8 }
 0x5c5   :  { %v8255_v58 = vadd.f32 %v12584_v59, %v19884_v49  ;;  %v17486_v50 = vpop.permute.xlu1 %8818  ;;  %v8362_v55 = vmax.f32 %v8252_v34, 0.0  ;;  %v8725_v9 = vpop.permute.xlu0 %8724  ;;  %v19887_v34 = vld [vmem:[#allocation174_spill] sm:$0xff]  ;;  %v19888_v49 = vld [vmem:[#allocation176_spill] sm:$0xff] }
 0x5c6   :  { %v9309_v54 = vsel %vm9280_vm3, %v8723_v14, %v17486_v50  ;;  %v9194_v42 = vsel %vm406_vm2, %v17254_v43, %v8725_v9 }
 0x5c7   :  { %v8363_v8 = vmax.f32 %v8255_v58, 0.0  ;;  %10209 = vmatprep.mubr.bf16.mxu0 %v9309_v54 }
 0x5c8   :  { %v7970_v4 = vpop.f32.mrb[228].mxu1  ;;  %10210 = vmatmul.mubr.bf16.gmra.mrb[164].mxu0 %v9190_v44 }
 0x5c9   :  { %v8402_v11 = vpack.c.bf16 %v8363_v8, %v8362_v55  ;;  %v12585_v1 = vadd.f32 %v17473_v36, %v7970_v4  ;;  %v7972_v22 = vpop.f32.mrb[229].mxu1 }
 0x5ca   :  { %v7973_v29 = vpop.f32.mrb[230].mxu1  ;;  %v17494_v60 = vld [vmem:[#allocation3 + $0x100] sm:$0xff] }
 0x5cb   :  { %8435 = vst.msk [vmem:[#allocation3 + $0x108] sm:$0xff] %vm406_vm2, %v8402_v11  ;;  %v8260_v47 = vadd.f32 %v12585_v1, %v19885_v23  ;;  %v12586_v5 = vadd.f32 %v17473_v36, %v7973_v29  ;;  %v7975_v27 = vpop.f32.mrb[231].mxu1  ;;  %8848 = vrot.lane.b32.xlu1 %v17494_v60, %s13913_s3  ;;  %8754 = vrot.lane.b32.xlu0 %v17494_v60, %s13924_s8 }
 0x5cd   :  { %v8263_v53 = vadd.f32 %v12586_v5, %v19886_v31  ;;  %v17504_v46 = vpop.permute.xlu1 %8820  ;;  %v8364_v37 = vmax.f32 %v8260_v47, 0.0  ;;  %v8727_v43 = vpop.permute.xlu0 %8726  ;;  %v19889_v5 = vld [vmem:[#allocation173_spill] sm:$0xff] }
 0x5ce   :  { %v9312_v51 = vsel %vm9280_vm3, %v8725_v9, %v17504_v46  ;;  %v9198_v4 = vsel %vm406_vm2, %v17265_v26, %v8727_v43 }
 0x5cf   :  { %v8365_v12 = vmax.f32 %v8263_v53, 0.0  ;;  %10217 = vmatprep.mubr.bf16.mxu0 %v9312_v51  ;;  %v19890_v53 = vld [vmem:[#allocation175_spill] sm:$0xff] }
 0x5d0   :  { %v7978_v39 = vpop.f32.mrb[232].mxu1  ;;  %10218 = vmatmul.mubr.bf16.gmra.mrb[168].mxu0 %v9194_v42 }
 0x5d1   :  { %v8403_v52 = vpack.c.bf16 %v8365_v12, %v8364_v37  ;;  %v12587_v45 = vadd.f32 %v17473_v36, %v7978_v39  ;;  %v7980_v24 = vpop.f32.mrb[233].mxu1 }
 0x5d2   :  { %v7981_v3 = vpop.f32.mrb[234].mxu1  ;;  %v17511_v62 = vld [vmem:[#allocation3 + $0x108] sm:$0xff] }
 0x5d3   :  { %8436 = vst.msk [vmem:[#allocation3 + $0x110] sm:$0xff] %vm406_vm2, %v8403_v52  ;;  %v8268_v59 = vadd.f32 %v12587_v45, %v19887_v34  ;;  %v12588_v61 = vadd.f32 %v17473_v36, %v7981_v3  ;;  %v7983_v14 = vpop.f32.mrb[235].mxu1  ;;  %8850 = vrot.lane.b32.xlu1 %v17511_v62, %s13913_s3  ;;  %8756 = vrot.lane.b32.xlu0 %v17511_v62, %s13924_s8  ;;  %v13501_v34 = vld [vmem:[#allocation16 + $0xf0] sm:$0xff]  }
 0x5d4   :  { %v19891_v14 = vld [vmem:[#allocation178_spill] sm:$0xff]  ;;  %10423 = vmatpush1.bf16.msra.mxu0 %v13501_v34 }
 0x5d5   :  { %v8271_v58 = vadd.f32 %v12588_v61, %v19888_v49  ;;  %v17521_v54 = vpop.permute.xlu1 %8822  ;;  %v8366_v8 = vmax.f32 %v8268_v59, 0.0  ;;  %v8729_v26 = vpop.permute.xlu0 %8728  ;;  %10424 = vmatprep.subr.bf16.mxu0 %v19440_v15 }
 0x5d6   :  { %v9315_v55 = vsel %vm9280_vm3, %v8727_v43, %v17521_v54  ;;  %v9202_v52 = vsel %vm406_vm2, %v17277_v40, %v8729_v26 }
 0x5d7   :  { %v8367_v44 = vmax.f32 %v8271_v58, 0.0  ;;  %10225 = vmatprep.mubr.bf16.mxu0 %v9315_v55  ;;  %v19892_v55 = vld [vmem:[#allocation180_spill] sm:$0xff] }
 0x5d8   :  { %v7986_v11 = vpop.f32.mrb[236].mxu1  ;;  %10226 = vmatmul.mubr.bf16.gmra.mrb[172].mxu0 %v9198_v4 }
 0x5d9   :  { %v8404_v1 = vpack.c.bf16 %v8367_v44, %v8366_v8  ;;  %v12589_v22 = vadd.f32 %v17473_v36, %v7986_v11  ;;  %v7988_v29 = vpop.f32.mrb[237].mxu1 }
 0x5da   :  { %v7989_v23 = vpop.f32.mrb[238].mxu1  ;;  %v17529_v47 = vld [vmem:[#allocation3 + $0x110] sm:$0xff] }
 0x5db   :  { %8437 = vst.msk [vmem:[#allocation3 + $0x118] sm:$0xff] %vm406_vm2, %v8404_v1  ;;  %v8276_v27 = vadd.f32 %v12589_v22, %v19889_v5  ;;  %v12590_v9 = vadd.f32 %v17473_v36, %v7989_v23  ;;  %v7991_v31 = vpop.f32.mrb[239].mxu1  ;;  %8852 = vrot.lane.b32.xlu1 %v17529_v47, %s13913_s3  ;;  %8758 = vrot.lane.b32.xlu0 %v17529_v47, %s13924_s8 }
 0x5dd   :  { %v8279_v51 = vadd.f32 %v12590_v9, %v19890_v53  ;;  %v17539_v37 = vpop.permute.xlu1 %8824  ;;  %v8368_v42 = vmax.f32 %v8276_v27, 0.0  ;;  %v8731_v40 = vpop.permute.xlu0 %8730 }
 0x5de   :  { %v9318_v12 = vsel %vm9280_vm3, %v8729_v26, %v17539_v37  ;;  %v9206_v22 = vsel %vm406_vm2, %v17288_v21, %v8731_v40  ;;  %v19893_v26 = vld [vmem:[#allocation177_spill] sm:$0xff] }
 0x5df   :  { %v8369_v39 = vmax.f32 %v8279_v51, 0.0  ;;  %10233 = vmatprep.mubr.bf16.mxu0 %v9318_v12 }
 0x5e0   :  { %v7994_v45 = vpop.f32.mrb[240].mxu1  ;;  %10234 = vmatmul.mubr.bf16.gmra.mrb[176].mxu0 %v9202_v52 }
 0x5e1   :  { %v8405_v24 = vpack.c.bf16 %v8369_v39, %v8368_v42  ;;  %v12591_v41 = vadd.f32 %v17473_v36, %v7994_v45  ;;  %v7996_v3 = vpop.f32.mrb[241].mxu1  ;;  %v19894_v42 = vld [vmem:[#allocation179_spill] sm:$0xff] }
 0x5e2   :  { %v7997_v59 = vpop.f32.mrb[242].mxu1  ;;  %v17546_v61 = vld [vmem:[#allocation3 + $0x118] sm:$0xff] }
 0x5e3   :  { %8438 = vst.msk [vmem:[#allocation3 + $0x120] sm:$0xff] %vm406_vm2, %v8405_v24  ;;  %v8284_v43 = vadd.f32 %v12591_v41, %v19891_v14  ;;  %v12592_v49 = vadd.f32 %v17473_v36, %v7997_v59  ;;  %v7999_v58 = vpop.f32.mrb[243].mxu1  ;;  %8854 = vrot.lane.b32.xlu1 %v17546_v61, %s13913_s3  ;;  %8760 = vrot.lane.b32.xlu0 %v17546_v61, %s13924_s8 }
 0x5e5   :  { %v8287_v8 = vadd.f32 %v12592_v49, %v19892_v55  ;;  %v17556_v44 = vpop.permute.xlu1 %8826  ;;  %v8370_v11 = vmax.f32 %v8284_v43, 0.0  ;;  %v8733_v21 = vpop.permute.xlu0 %8732  ;;  %v13502_v49 = vld [vmem:[#allocation16 + $0xf8] sm:$0xff]  }
 0x5e6   :  { %v9321_v4 = vsel %vm9280_vm3, %v8731_v40, %v17556_v44  ;;  %v9210_v3 = vsel %vm406_vm2, %v17300_v2, %v8733_v21  ;;  %10425 = vmatpush1.bf16.msra.mxu0 %v13502_v49  ;;  %v19896_v2 = vld [vmem:[#allocation184_spill] sm:$0xff] }
 0x5e7   :  { %v8371_v1 = vmax.f32 %v8287_v8, 0.0  ;;  %10241 = vmatprep.mubr.bf16.mxu0 %v9321_v4  ;;  %v19895_v8 = vld [vmem:[#allocation182_spill] sm:$0xff]  ;;  %10683 = vmatprep.subr.bf16.mxu0 %v19440_v15 }
 0x5e8   :  { %v8002_v29 = vpop.f32.mrb[244].mxu1  ;;  %10242 = vmatmul.mubr.bf16.gmra.mrb[180].mxu0 %v9206_v22 }
 0x5e9   :  { %v8406_v23 = vpack.c.bf16 %v8371_v1, %v8370_v11  ;;  %v12593_v5 = vadd.f32 %v17473_v36, %v8002_v29  ;;  %v8004_v27 = vpop.f32.mrb[245].mxu1 }
 0x5ea   :  { %v8005_v9 = vpop.f32.mrb[246].mxu1  ;;  %v17564_v31 = vld [vmem:[#allocation3 + $0x120] sm:$0xff] }
 0x5eb   :  { %8439 = vst.msk [vmem:[#allocation3 + $0x128] sm:$0xff] %vm406_vm2, %v8406_v23  ;;  %v8292_v53 = vadd.f32 %v12593_v5, %v19893_v26  ;;  %v12594_v51 = vadd.f32 %v17473_v36, %v8005_v9  ;;  %v8007_v12 = vpop.f32.mrb[247].mxu1  ;;  %8856 = vrot.lane.b32.xlu1 %v17564_v31, %s13913_s3  ;;  %8762 = vrot.lane.b32.xlu0 %v17564_v31, %s13924_s8 }
 0x5ed   :  { %v8295_v39 = vadd.f32 %v12594_v51, %v19894_v42  ;;  %v17574_v52 = vpop.permute.xlu1 %8828  ;;  %v8372_v24 = vmax.f32 %v8292_v53, 0.0  ;;  %v8735_v55 = vpop.permute.xlu0 %8734 }
 0x5ee   :  { %v9324_v45 = vsel %vm9280_vm3, %v8733_v21, %v17574_v52  ;;  %v9214_v9 = vsel %vm406_vm2, %v17311_v57, %v8735_v55 }
 0x5ef   :  { %v8373_v41 = vmax.f32 %v8295_v39, 0.0  ;;  %10249 = vmatprep.mubr.bf16.mxu0 %v9324_v45 }
 0x5f0   :  { %v8010_v34 = vpop.f32.mrb[248].mxu1  ;;  %10250 = vmatmul.mubr.bf16.gmra.mrb[184].mxu0 %v9210_v3  ;;  %v19897_v3 = vld [vmem:[#allocation181_spill] sm:$0xff] }
 0x5f1   :  { %v8407_v59 = vpack.c.bf16 %v8373_v41, %v8372_v24  ;;  %v12595_v14 = vadd.f32 %v17473_v36, %v8010_v34  ;;  %v8012_v43 = vpop.f32.mrb[249].mxu1  ;;  %v8737_v26 = vpop.permute.xlu0 %8736  ;;  %v8459_v41 = vld [vmem:[#allocation3 + $0xb0] sm:$0xff] }
 0x5f2   :  { %v8013_v58 = vpop.f32.mrb[250].mxu1  ;;  %v17581_v40 = vld [vmem:[#allocation3 + $0x128] sm:$0xff]  ;;  %v9218_v49 = vsel %vm406_vm2, %v8459_v41, %v8737_v26 }
 0x5f3   :  { %8440 = vst.msk [vmem:[#allocation3 + $0x130] sm:$0xff] %vm406_vm2, %v8407_v59  ;;  %v8300_v4 = vadd.f32 %v12595_v14, %v19895_v8  ;;  %v12596_v11 = vadd.f32 %v17473_v36, %v8013_v58  ;;  %v8015_v1 = vpop.f32.mrb[251].mxu1  ;;  %8858 = vrot.lane.b32.xlu1 %v17581_v40, %s13913_s3  ;;  %8764 = vrot.lane.b32.xlu0 %v17581_v40, %s13924_s8  ;;  %v19898_v14 = vld [vmem:[#allocation183_spill] sm:$0xff] }
 0x5f4   :  { %v17614_v58 = vld [vmem:[#allocation3 + $0x28] sm:$0xff] }
 0x5f5   :  { %v8303_v22 = vadd.f32 %v12596_v11, %v19896_v2  ;;  %v17591_v29 = vpop.permute.xlu1 %8830  ;;  %v8374_v5 = vmax.f32 %v8300_v4, 0.0  ;;  %v17620_v11 = vld [vmem:[#allocation3 + $0x30] sm:$0xff]  ;;  %v8739_v1 = vpop.permute.xlu0 %8738 }
 0x5f6   :  { %v9327_v23 = vsel %vm9280_vm3, %v8735_v55, %v17591_v29 }
 0x5f7   :  { %v8375_v27 = vmax.f32 %v8303_v22, 0.0  ;;  %10257 = vmatprep.mubr.bf16.mxu0 %v9327_v23  ;;  %v8541_v22 = vld [vmem:[#allocation3 + $0x18] sm:$0xff] }
 0x5f8   :  { %v8018_v53 = vpop.f32.mrb[252].mxu1  ;;  %10258 = vmatmul.mubr.bf16.gmra.mrb[188].mxu0 %v9214_v9  ;;  %v17629_v23 = vld [vmem:[#allocation3 + $0x38] sm:$0xff]  ;;  %v17638_v9 = vld [vmem:[#allocation3 + $0x20] sm:$0xff] }
 0x5f9   :  { %v8408_v51 = vpack.c.bf16 %v8375_v27, %v8374_v5  ;;  %v12597_v12 = vadd.f32 %v17473_v36, %v8018_v53  ;;  %v8020_v21 = vpop.f32.mrb[253].mxu1  ;;  %v17599_v42 = vpop.permute.xlu1 %8832  ;;  %v9222_v27 = vsel %vm406_vm2, %v17332_v38, %v8739_v1 }
 0x5fa   :  { %v8021_v39 = vpop.f32.mrb[254].mxu1  ;;  %v17601_v45 = vld [vmem:[#allocation3 + $0x130] sm:$0xff]  ;;  %v9330_v24 = vsel %vm9280_vm3, %v8737_v26, %v17599_v42  ;;  %v17640_v26 = vld [vmem:[#allocation3 + $0x40] sm:$0xff] }
 0x5fb   :  { %8441 = vst.msk [vmem:[#allocation3 + $0x138] sm:$0xff] %vm406_vm2, %v8408_v51  ;;  %v8308_v57 = vadd.f32 %v12597_v12, %v19897_v3  ;;  %v12598_v34 = vadd.f32 %v17473_v36, %v8021_v39  ;;  %v8023_v59 = vpop.f32.mrb[255].mxu1  ;;  %8860 = vrot.lane.b32.xlu1 %v17601_v45, %s13913_s3  ;;  %8766 = vrot.lane.b32.xlu0 %v17601_v45, %s13924_s8  ;;  %v17648_v51 = vld [vmem:[#allocation3 + $0x48] sm:$0xff]  ;;  %v17658_v39 = vld [vmem:[#allocation3 + $0x50] sm:$0xff]  ;;  %v17666_v3 = vld [vmem:[#allocation3 + $0x58] sm:$0xff] }
 0x5fc   :  { %10265 = vmatprep.mubr.bf16.mxu0 %v9330_v24 }
 0x5fd   :  { %v8311_v43 = vadd.f32 %v12598_v34, %v19898_v14  ;;  %v8376_v55 = vmax.f32 %v8308_v57, 0.0  ;;  %v17676_v34 = vld [vmem:[#allocation3 + $0x60] sm:$0xff] }
 0x5ff   :  { %v8377_v8 = vmax.f32 %v8311_v43, 0.0  ;;  %8992 = vrot.lane.b32.xlu0 %v17614_v58, %s13924_s8  ;;  %v17684_v43 = vld [vmem:[#allocation3 + $0x68] sm:$0xff] }
 0x600   :  { %10266 = vmatmul.mubr.bf16.gmra.mrb[192].mxu0 %v9218_v49 }
 0x601   :  { %v8409_v36 = vpack.c.bf16 %v8377_v8, %v8376_v55  ;;  %v17694_v8 = vld [vmem:[#allocation3 + $0x70] sm:$0xff] }
 0x602   :  { %v17618_v4 = vld [vmem:[#allocation3 + $0x138] sm:$0xff] }
 0x603   :  { %8442 = vst.msk [vmem:[#allocation3 + $0x140] sm:$0xff] %vm406_vm2, %v8409_v36  ;;  %8862 = vrot.lane.b32.xlu1 %v17618_v4, %s13913_s3  ;;  %8994 = vrot.lane.b32.xlu0 %v17620_v11, %s13924_s8 }
 0x605   :  { %v17627_v2 = vpop.permute.xlu1 %8834  ;;  %v8741_v53 = vpop.permute.xlu0 %8740 }
 0x606   :  { %v9333_v5 = vsel %vm9280_vm3, %v8739_v1, %v17627_v2  ;;  %v9226_v21 = vsel %vm406_vm2, %v17340_v0, %v8741_v53 }
 0x607   :  { %8896 = vrot.lane.b32.xlu1 %v8541_v22, %s13925_s28  ;;  %8996 = vrot.lane.b32.xlu0 %v17629_v23, %s13924_s8  ;;  %v17702_v22 = vld [vmem:[#allocation3 + $0x78] sm:$0xff] }
 0x608   :  { %10273 = vmatprep.mubr.bf16.mxu0 %v9333_v5 }
 0x609   :  { %10274 = vmatmul.mubr.bf16.gmra.mrb[196].mxu0 %v9222_v27 }
 0x60b   :  { %8898 = vrot.lane.b32.xlu1 %v17638_v9, %s13925_s28  ;;  %8998 = vrot.lane.b32.xlu0 %v17640_v26, %s13924_s8 }
 0x60d   :  { %v17646_v38 = vpop.permute.xlu1 %8836  ;;  %v8743_v24 = vpop.permute.xlu0 %8742 }
 0x60e   :  { %v9336_v12 = vsel %vm9280_vm3, %v8741_v53, %v17646_v38  ;;  %v9230_v0 = vsel %vm406_vm2, %v17369_v32, %v8743_v24 }
 0x60f   :  { %8900 = vrot.lane.b32.xlu1 %v17614_v58, %s13925_s28  ;;  %9000 = vrot.lane.b32.xlu0 %v17648_v51, %s13924_s8 }
 0x610   :  { %10281 = vmatprep.mubr.bf16.mxu0 %v9336_v12 }
 0x611   :  { %10282 = vmatmul.mubr.bf16.gmra.mrb[200].mxu0 %v9226_v21 }
 0x613   :  { %8902 = vrot.lane.b32.xlu1 %v17620_v11, %s13925_s28  ;;  %9002 = vrot.lane.b32.xlu0 %v17658_v39, %s13924_s8 }
 0x615   :  { %v17664_v41 = vpop.permute.xlu1 %8838  ;;  %v8745_v59 = vpop.permute.xlu0 %8744 }
 0x616   :  { %v9339_v57 = vsel %vm9280_vm3, %v8743_v24, %v17664_v41  ;;  %v9234_v55 = vsel %vm406_vm2, %v17387_v63, %v8745_v59 }
 0x617   :  { %8904 = vrot.lane.b32.xlu1 %v17629_v23, %s13925_s28  ;;  %9004 = vrot.lane.b32.xlu0 %v17666_v3, %s13924_s8 }
 0x618   :  { %10289 = vmatprep.mubr.bf16.mxu0 %v9339_v57  ;;  %v17726_v57 = vld [vmem:[#allocation3 + $0x90] sm:$0xff] }
 0x619   :  { %10290 = vmatmul.mubr.bf16.gmra.mrb[204].mxu0 %v9230_v0 }
 0x61b   :  { %8906 = vrot.lane.b32.xlu1 %v17640_v26, %s13925_s28  ;;  %9006 = vrot.lane.b32.xlu0 %v17676_v34, %s13924_s8 }
 0x61d   :  { %v17682_v14 = vpop.permute.xlu1 %8840  ;;  %v8747_v36 = vpop.permute.xlu0 %8746 }
 0x61e   :  { %v9342_v49 = vsel %vm9280_vm3, %v8745_v59, %v17682_v14  ;;  %v9238_v27 = vsel %vm406_vm2, %v17404_v48, %v8747_v36 }
 0x61f   :  { %8908 = vrot.lane.b32.xlu1 %v17648_v51, %s13925_s28  ;;  %9008 = vrot.lane.b32.xlu0 %v17684_v43, %s13924_s8 }
 0x620   :  { %10297 = vmatprep.mubr.bf16.mxu0 %v9342_v49 }
 0x621   :  { %10298 = vmatmul.mubr.bf16.gmra.mrb[208].mxu0 %v9234_v55  ;;  %v17744_v55 = vld [vmem:[#allocation3 + $0xa0] sm:$0xff] }
 0x623   :  { %8910 = vrot.lane.b32.xlu1 %v17658_v39, %s13925_s28  ;;  %9010 = vrot.lane.b32.xlu0 %v17694_v8, %s13924_s8 }
 0x625   :  { %v17700_v1 = vpop.permute.xlu1 %8842  ;;  %v8749_v53 = vpop.permute.xlu0 %8748 }
 0x626   :  { %v9345_v5 = vsel %vm9280_vm3, %v8747_v36, %v17700_v1  ;;  %v9242_v24 = vsel %vm406_vm2, %v17422_v33, %v8749_v53  ;;  %v17746_v36 = vld [vmem:[#allocation3 + $0x80] sm:$0xff] }
 0x627   :  { %8912 = vrot.lane.b32.xlu1 %v17666_v3, %s13925_s28  ;;  %9012 = vrot.lane.b32.xlu0 %v17702_v22, %s13924_s8 }
 0x628   :  { %10305 = vmatprep.mubr.bf16.mxu0 %v9345_v5 }
 0x629   :  { %10306 = vmatmul.mubr.bf16.gmra.mrb[212].mxu0 %v9238_v27 }
 0x62b   :  { %8914 = vrot.lane.b32.xlu1 %v17676_v34, %s13925_s28  ;;  %9014 = vrot.lane.b32.xlu0 %v17323_v17, %s13924_s8  ;;  %v17732_v17 = vld [vmem:[#allocation3 + $0x98] sm:$0xff] }
 0x62d   :  { %v17716_v12 = vpop.permute.xlu1 %8844  ;;  %v8751_v0 = vpop.permute.xlu0 %8750 }
 0x62e   :  { %v9348_v21 = vsel %vm9280_vm3, %v8749_v53, %v17716_v12  ;;  %v9246_v49 = vsel %vm406_vm2, %v17439_v20, %v8751_v0  ;;  %v17754_v53 = vld [vmem:[#allocation3 + $0x88] sm:$0xff] }
 0x62f   :  { %8916 = vrot.lane.b32.xlu1 %v17684_v43, %s13925_s28  ;;  %9016 = vrot.lane.b32.xlu0 %v17338_v19, %s13924_s8 }
 0x630   :  { %10313 = vmatprep.mubr.bf16.mxu0 %v9348_v21 }
 0x631   :  { %10314 = vmatmul.mubr.bf16.gmra.mrb[216].mxu0 %v9242_v24 }
 0x633   :  { %8918 = vrot.lane.b32.xlu1 %v17694_v8, %s13925_s28  ;;  %9018 = vrot.lane.b32.xlu0 %v17726_v57, %s13924_s8 }
 0x635   :  { %v17734_v59 = vpop.permute.xlu1 %8846  ;;  %v8753_v5 = vpop.permute.xlu0 %8752 }
 0x636   :  { %19899 = vst [vmem:[#allocation155_spill] sm:$0xff] %v17734_v59  ;;  %v9351_v19 = vsel %vm9280_vm3, %v8751_v0, %v17734_v59  ;;  %v9250_v24 = vsel %vm406_vm2, %v17457_v6, %v8753_v5 }
 0x637   :  { %8920 = vrot.lane.b32.xlu1 %v17702_v22, %s13925_s28  ;;  %9020 = vrot.lane.b32.xlu0 %v17732_v17, %s13924_s8 }
 0x638   :  { %10321 = vmatprep.mubr.bf16.mxu0 %v9351_v19 }
 0x639   :  { %10322 = vmatmul.mubr.bf16.gmra.mrb[220].mxu0 %v9246_v49 }
 0x63b   :  { %8922 = vrot.lane.b32.xlu1 %v17746_v36, %s13925_s28  ;;  %9022 = vrot.lane.b32.xlu0 %v17744_v55, %s13924_s8 }
 0x63d   :  { %v17752_v27 = vpop.permute.xlu1 %8848  ;;  %v8755_v0 = vpop.permute.xlu0 %8754 }
 0x63e   :  { %19900 = vst [vmem:[#allocation156_spill] sm:$0xff] %v17752_v27  ;;  %v9354_v21 = vsel %vm9280_vm3, %v8753_v5, %v17752_v27  ;;  %v9254_v5 = vsel %vm406_vm2, %v17476_v18, %v8755_v0 }
 0x63f   :  { %8924 = vrot.lane.b32.xlu1 %v17754_v53, %s13925_s28  ;;  %9024 = vrot.lane.b32.xlu0 %v17404_v48, %s13924_s8 }
 0x640   :  { %10329 = vmatprep.mubr.bf16.mxu0 %v9354_v21 }
 0x641   :  { %10330 = vmatmul.mubr.bf16.gmra.mrb[224].mxu0 %v9250_v24 }
 0x643   :  { %8926 = vrot.lane.b32.xlu1 %v17726_v57, %s13925_s28  ;;  %9026 = vrot.lane.b32.xlu0 %v17422_v33, %s13924_s8 }
 0x645   :  { %v17768_v19 = vpop.permute.xlu1 %8850  ;;  %v8757_v21 = vpop.permute.xlu0 %8756 }
 0x646   :  { %19901 = vst [vmem:[#allocation158_spill] sm:$0xff] %v17768_v19  ;;  %v9357_v49 = vsel %vm9280_vm3, %v8755_v0, %v17768_v19  ;;  %v9258_v0 = vsel %vm406_vm2, %v17494_v60, %v8757_v21  ;;  %v18005_v19 = vld [vmem:[#allocation3 + $0xf8] sm:$0xff] }
 0x647   :  { %8928 = vrot.lane.b32.xlu1 %v17369_v32, %s13925_s28  ;;  %9028 = vrot.lane.b32.xlu0 %v17439_v20, %s13924_s8 }
 0x648   :  { %10337 = vmatprep.mubr.bf16.mxu0 %v9357_v49 }
 0x649   :  { %10338 = vmatmul.mubr.bf16.gmra.mrb[228].mxu0 %v9254_v5 }
 0x64b   :  { %8930 = vrot.lane.b32.xlu1 %v17387_v63, %s13925_s28  ;;  %9030 = vrot.lane.b32.xlu0 %v17457_v6, %s13924_s8 }
 0x64d   :  { %v17782_v24 = vpop.permute.xlu1 %8852  ;;  %v8759_v63 = vpop.permute.xlu0 %8758 }
 0x64e   :  { %19902 = vst [vmem:[#allocation160_spill] sm:$0xff] %v17782_v24  ;;  %v9360_v32 = vsel %vm9280_vm3, %v8757_v21, %v17782_v24  ;;  %v9262_v5 = vsel %vm406_vm2, %v17511_v62, %v8759_v63 }
 0x64f   :  { %8932 = vrot.lane.b32.xlu1 %v17404_v48, %s13925_s28  ;;  %9032 = vrot.lane.b32.xlu0 %v17476_v18, %s13924_s8 }
 0x650   :  { %10345 = vmatprep.mubr.bf16.mxu0 %v9360_v32 }
 0x651   :  { %10346 = vmatmul.mubr.bf16.gmra.mrb[232].mxu0 %v9258_v0 }
 0x653   :  { %8934 = vrot.lane.b32.xlu1 %v17422_v33, %s13925_s28  ;;  %9034 = vrot.lane.b32.xlu0 %v17494_v60, %s13924_s8 }
 0x655   :  { %v17796_v49 = vpop.permute.xlu1 %8854  ;;  %v8761_v33 = vpop.permute.xlu0 %8760 }
 0x656   :  { %19903 = vst [vmem:[#allocation157_spill] sm:$0xff] %v17796_v49  ;;  %v9363_v48 = vsel %vm9280_vm3, %v8759_v63, %v17796_v49  ;;  %v9266_v32 = vsel %vm406_vm2, %v17529_v47, %v8761_v33  ;;  %v13504_v49 = vld [vmem:[#allocation16 + $0x108] sm:$0xff]  }
 0x657   :  { %8936 = vrot.lane.b32.xlu1 %v17439_v20, %s13925_s28  ;;  %9036 = vrot.lane.b32.xlu0 %v17511_v62, %s13924_s8 }
 0x658   :  { %10353 = vmatprep.mubr.bf16.mxu0 %v9363_v48 }
 0x659   :  { %10354 = vmatmul.mubr.bf16.gmra.mrb[236].mxu0 %v9262_v5 }
 0x65b   :  { %8938 = vrot.lane.b32.xlu1 %v17457_v6, %s13925_s28  ;;  %9038 = vrot.lane.b32.xlu0 %v17529_v47, %s13924_s8 }
 0x65d   :  { %v17810_v21 = vpop.permute.xlu1 %8856  ;;  %v8763_v6 = vpop.permute.xlu0 %8762 }
 0x65e   :  { %19904 = vst [vmem:[#allocation159_spill] sm:$0xff] %v17810_v21  ;;  %v9366_v20 = vsel %vm9280_vm3, %v8761_v33, %v17810_v21  ;;  %v9270_v63 = vsel %vm406_vm2, %v17546_v61, %v8763_v6  ;;  %v13503_v21 = vld [vmem:[#allocation16 + $0x100] sm:$0xff]  }
 0x65f   :  { %8940 = vrot.lane.b32.xlu1 %v17476_v18, %s13925_s28  ;;  %9040 = vrot.lane.b32.xlu0 %v17546_v61, %s13924_s8 }
 0x660   :  { %10361 = vmatprep.mubr.bf16.mxu0 %v9366_v20 }
 0x661   :  { %10362 = vmatmul.mubr.bf16.gmra.mrb[240].mxu0 %v9266_v32  ;;  %v17850_v32 = vld [vmem:[#allocation3 + $0x140] sm:$0xff] }
 0x663   :  { %8942 = vrot.lane.b32.xlu1 %v17494_v60, %s13925_s28  ;;  %9042 = vrot.lane.b32.xlu0 %v17564_v31, %s13924_s8 }
 0x665   :  { %v17824_v0 = vpop.permute.xlu1 %8858  ;;  %v8765_v60 = vpop.permute.xlu0 %8764 }
 0x666   :  { %19905 = vst [vmem:[#allocation162_spill] sm:$0xff] %v17824_v0  ;;  %v9369_v18 = vsel %vm9280_vm3, %v8763_v6, %v17824_v0  ;;  %v9274_v33 = vsel %vm406_vm2, %v17564_v31, %v8765_v60  ;;  %v17856_v6 = vld [vmem:[#allocation3 + $0x148] sm:$0xff] }
 0x667   :  { %8944 = vrot.lane.b32.xlu1 %v17511_v62, %s13925_s28  ;;  %9044 = vrot.lane.b32.xlu0 %v17581_v40, %s13924_s8 }
 0x668   :  { %10369 = vmatprep.mubr.bf16.mxu0 %v9369_v18 }
 0x669   :  { %10370 = vmatmul.mubr.bf16.gmra.mrb[244].mxu0 %v9270_v63 }
 0x66b   :  { %8946 = vrot.lane.b32.xlu1 %v17529_v47, %s13925_s28  ;;  %9046 = vrot.lane.b32.xlu0 %v17601_v45, %s13924_s8 }
 0x66d   :  { %v17838_v48 = vpop.permute.xlu1 %8860  ;;  %v8767_v5 = vpop.permute.xlu0 %8766 }
 0x66e   :  { %19906 = vst [vmem:[#allocation164_spill] sm:$0xff] %v17838_v48  ;;  %v9372_v62 = vsel %vm9280_vm3, %v8765_v60, %v17838_v48 }
 0x66f   :  { %8948 = vrot.lane.b32.xlu1 %v17546_v61, %s13925_s28  ;;  %9048 = vrot.lane.b32.xlu0 %v17618_v4, %s13924_s8 }
 0x670   :  { %10377 = vmatprep.mubr.bf16.mxu0 %v9372_v62  ;;  %v9278_v62 = vsel %vm406_vm2, %v17581_v40, %v8767_v5 }
 0x671   :  { %10378 = vmatmul.mubr.bf16.gmra.mrb[248].mxu0 %v9274_v33  ;;  %v17848_v20 = vpop.permute.xlu0 %8992  ;;  %v17870_v33 = vld [vmem:[#allocation3 + $0x150] sm:$0xff] }
 0x672   :  { %19907 = vst [vmem:[#allocation161_spill] sm:$0xff] %v17848_v20 }
 0x673   :  { %8950 = vrot.lane.b32.xlu1 %v17564_v31, %s13925_s28  ;;  %9050 = vrot.lane.b32.xlu0 %v17850_v32, %s13924_s8 }
 0x675   :  { %v17858_v18 = vpop.permute.xlu1 %8862  ;;  %v17860_v63 = vpop.permute.xlu0 %8994 }
 0x676   :  { %19908 = vst [vmem:[#allocation163_spill] sm:$0xff] %v17858_v18  ;;  %19909 = vst [vmem:[#allocation166_spill] sm:$0xff] %v17860_v63  ;;  %v9375_v60 = vsel %vm9280_vm3, %v8767_v5, %v17858_v18  ;;  %v9476_v18 = vsel %vm406_vm2, %v17638_v9, %v17848_v20  ;;  %v9480_v20 = vsel %vm406_vm2, %v17614_v58, %v17860_v63  ;;  %v13506_v63 = vld [vmem:[#allocation16 + $0x118] sm:$0xff]  }
 0x677   :  { %8952 = vrot.lane.b32.xlu1 %v17581_v40, %s13925_s28  ;;  %9052 = vrot.lane.b32.xlu0 %v17856_v6, %s13924_s8 }
 0x678   :  { %10385 = vmatprep.mubr.bf16.mxu0 %v9375_v60 }
 0x679   :  { %10386 = vmatmul.mubr.bf16.gmra.mrb[252].mxu0 %v9278_v62  ;;  %v8897_v48 = vpop.permute.xlu1 %8896  ;;  %v17872_v0 = vpop.permute.xlu0 %8996 }
 0x67a   :  { %19910 = vst [vmem:[#allocation168_spill] sm:$0xff] %v17872_v0  ;;  %10426 = vmatprep.mubr.bf16.mxu0 %v9476_v18  ;;  %v9379_v9 = vsel %vm9377_vm4, %v17143_v35, %v8897_v48 }
 0x67b   :  { %8954 = vrot.lane.b32.xlu1 %v17601_v45, %s13925_s28  ;;  %9054 = vrot.lane.b32.xlu0 %v17870_v33, %s13924_s8 }
 0x67d   :  { %v8899_v60 = vpop.permute.xlu1 %8898  ;;  %v17881_v5 = vpop.permute.xlu0 %8998 }
 0x67e   :  { %19911 = vst [vmem:[#allocation165_spill] sm:$0xff] %v17881_v5  ;;  %v9382_v58 = vsel %vm9377_vm4, %v17350_v56, %v8899_v60 }
 0x67f   :  { %8956 = vrot.lane.b32.xlu1 %v17618_v4, %s13925_s28  ;;  %9088 = vrot.lane.b32.xlu0 %v17620_v11, %s13913_s3 }
 0x681   :  { %10427 = vmatmul.mubr.bf16.vlgmr.msra.gmra.mrb[128].mxu0 %v9379_v9  ;;  %v8901_v18 = vpop.permute.xlu1 %8900  ;;  %v17889_v62 = vpop.permute.xlu0 %9000  ;;  %v13505_v9 = vld [vmem:[#allocation16 + $0x110] sm:$0xff]  }
 0x682   :  { %19912 = vst [vmem:[#allocation167_spill] sm:$0xff] %v17889_v62  ;;  %10434 = vmatprep.mubr.bf16.mxu0 %v9480_v20  ;;  %10684 = vmatpush1.bf16.msra.mxu0 %v13503_v21 }
 0x683   :  { %8958 = vrot.lane.b32.xlu1 %v17850_v32, %s13925_s28  ;;  %9092 = vrot.lane.b32.xlu0 %v17640_v26, %s13913_s3 }
 0x684   :  { %10685 = vmatprep.subr.bf16.mxu0 %v19440_v15 }
 0x685   :  { %v8903_v35 = vpop.permute.xlu1 %8902  ;;  %v17899_v48 = vpop.permute.xlu0 %9002 }
 0x686   :  { %19913 = vst [vmem:[#allocation170_spill] sm:$0xff] %v17899_v48  ;;  %10686 = vmatpush1.bf16.msra.mxu0 %v13504_v49  ;;  %v9484_v49 = vsel %vm406_vm2, %v17620_v11, %v17872_v0  ;;  %v9385_v11 = vsel %vm9377_vm4, %v17363_v7, %v8901_v18  ;;  %v13508_v0 = vld [vmem:[#allocation16 + $0x128] sm:$0xff]  }
 0x687   :  { %9090 = vrot.lane.b32.xlu1 %v17629_v23, %s13913_s3  ;;  %9096 = vrot.lane.b32.xlu0 %v17658_v39, %s13913_s3 }
 0x688   :  { %10687 = vmatprep.subr.bf16.mxu0 %v19440_v15 }
 0x689   :  { %10435 = vmatmul.mubr.bf16.gmra.mrb[132].mxu0 %v9382_v58  ;;  %v8905_v21 = vpop.permute.xlu1 %8904  ;;  %v17908_v20 = vpop.permute.xlu0 %9004  ;;  %v13507_v58 = vld [vmem:[#allocation16 + $0x120] sm:$0xff]  }
 0x68a   :  { %19914 = vst [vmem:[#allocation172_spill] sm:$0xff] %v17908_v20  ;;  %10442 = vmatprep.mubr.bf16.mxu0 %v9484_v49  ;;  %10688 = vmatpush1.bf16.msra.mxu0 %v13505_v9 }
 0x68b   :  { %9094 = vrot.lane.b32.xlu1 %v17648_v51, %s13913_s3  ;;  %9100 = vrot.lane.b32.xlu0 %v17676_v34, %s13913_s3 }
 0x68c   :  { %10689 = vmatprep.subr.bf16.mxu0 %v19440_v15 }
 0x68d   :  { %v8907_v56 = vpop.permute.xlu1 %8906  ;;  %v17918_v60 = vpop.permute.xlu0 %9006 }
 0x68e   :  { %19915 = vst [vmem:[#allocation169_spill] sm:$0xff] %v17918_v60  ;;  %10690 = vmatpush1.bf16.msra.mxu0 %v13506_v63  ;;  %v9488_v63 = vsel %vm406_vm2, %v17629_v23, %v17881_v5  ;;  %v9388_v23 = vsel %vm9377_vm4, %v17379_v25, %v8903_v35  ;;  %v17979_v5 = vld [vmem:[#allocation3 + $0xf0] sm:$0xff] }
 0x68f   :  { %9098 = vrot.lane.b32.xlu1 %v17666_v3, %s13913_s3  ;;  %9104 = vrot.lane.b32.xlu0 %v17694_v8, %s13913_s3 }
 0x690   :  { %10691 = vmatprep.subr.bf16.mxu0 %v19440_v15 }
 0x691   :  { %10443 = vmatmul.mubr.bf16.gmra.mrb[136].mxu0 %v9385_v11  ;;  %v8909_v9 = vpop.permute.xlu1 %8908  ;;  %v17927_v49 = vpop.permute.xlu0 %9008 }
 0x692   :  { %19916 = vst [vmem:[#allocation171_spill] sm:$0xff] %v17927_v49  ;;  %10450 = vmatprep.mubr.bf16.mxu0 %v9488_v63  ;;  %10692 = vmatpush1.bf16.msra.mxu0 %v13507_v58  ;;  %v13509_v63 = vld [vmem:[#allocation16 + $0x130] sm:$0xff]  }
 0x693   :  { %9102 = vrot.lane.b32.xlu1 %v17684_v43, %s13913_s3  ;;  %9108 = vrot.lane.b32.xlu0 %v17746_v36, %s13913_s3 }
 0x694   :  { %10693 = vmatprep.subr.bf16.mxu0 %v19440_v15 }
 0x695   :  { %v17937_v7 = vpop.permute.xlu1 %8910  ;;  %v17939_v18 = vpop.permute.xlu0 %9010 }
 0x696   :  { %19917 = vst [vmem:[#allocation174_spill] sm:$0xff] %v17939_v18  ;;  %10694 = vmatpush1.bf16.msra.mxu0 %v13508_v0  ;;  %v9492_v0 = vsel %vm406_vm2, %v17640_v26, %v17889_v62  ;;  %v9391_v26 = vsel %vm9377_vm4, %v17397_v10, %v8905_v21  ;;  %v17988_v21 = vld [vmem:[#allocation3 + $0xe8] sm:$0xff] }
 0x697   :  { %9106 = vrot.lane.b32.xlu1 %v17702_v22, %s13913_s3  ;;  %9112 = vrot.lane.b32.xlu0 %v17726_v57, %s13913_s3 }
 0x698   :  { %10695 = vmatprep.subr.bf16.mxu0 %v19440_v15 }
 0x699   :  { %10451 = vmatmul.mubr.bf16.gmra.mrb[140].mxu0 %v9388_v23  ;;  %v17948_v58 = vpop.permute.xlu1 %8912  ;;  %v17950_v11 = vpop.permute.xlu0 %9012  ;;  %v17963_v23 = vld [vmem:[#allocation3 + $0xe0] sm:$0xff] }
 0x69a   :  { %19918 = vst [vmem:[#allocation176_spill] sm:$0xff] %v17950_v11  ;;  %10458 = vmatprep.mubr.bf16.mxu0 %v9492_v0  ;;  %10696 = vmatpush1.bf16.msra.mxu0 %v13509_v63  ;;  %v9496_v63 = vsel %vm406_vm2, %v17648_v51, %v17899_v48  ;;  %v9394_v51 = vsel %vm9377_vm4, %v17414_v13, %v8907_v56  ;;  %v18015_v56 = vld [vmem:[#allocation3 + $0x108] sm:$0xff] }
 0x69b   :  { %9110 = vrot.lane.b32.xlu1 %v17754_v53, %s13913_s3  ;;  %9116 = vrot.lane.b32.xlu0 %v17744_v55, %s13913_s3  ;;  %v8655_v55 = vld [vmem:[#allocation3 + $0xa8] sm:$0xff]  ;;  %v9500_v48 = vsel %vm406_vm2, %v17658_v39, %v17908_v20  ;;  %19924 = vst [vmem:[#allocation179_spill] sm:$0xff] %v18015_v56  ;;  %v9397_v39 = vsel %vm9377_vm4, %v17432_v30, %v8909_v9 }
 0x69c   :  { %10697 = vmatprep.subr.bf16.mxu0 %v19440_v15  ;;  %v18038_v30 = vld [vmem:[#allocation12] ss:$0 sm:$0xff] }
 0x69d   :  { %v17959_v25 = vpop.permute.xlu1 %8914  ;;  %v17961_v35 = vpop.permute.xlu0 %9014  ;;  %v13510_v9 = vld [vmem:[#allocation16 + $0x138] sm:$0xff]  }
 0x69e   :  { %19919 = vst [vmem:[#allocation173_spill] sm:$0xff] %v17961_v35  ;;  %10698 = vmatpush1.bf16.msra.mxu0 %v13510_v9 }
 0x69f   :  { %9114 = vrot.lane.b32.xlu1 %v17732_v17, %s13913_s3  ;;  %9120 = vrot.lane.b32.xlu0 %v17963_v23, %s13913_s3 }
 0x6a0   :  { %10699 = vmatprep.subr.bf16.mxu0 %v19440_v15 }
 0x6a1   :  { %10459 = vmatmul.mubr.bf16.gmra.mrb[144].mxu0 %v9391_v26  ;;  %v17972_v0 = vpop.permute.xlu1 %8916  ;;  %v17974_v62 = vpop.permute.xlu0 %9016  ;;  %v17990_v26 = vld [vmem:[#allocation3 + $0x100] sm:$0xff] }
 0x6a2   :  { %19920 = vst [vmem:[#allocation175_spill] sm:$0xff] %v17974_v62  ;;  %10466 = vmatprep.mubr.bf16.mxu0 %v9496_v63 }
 0x6a3   :  { %9118 = vrot.lane.b32.xlu1 %v8655_v55, %s13913_s3  ;;  %9124 = vrot.lane.b32.xlu0 %v17979_v5, %s13913_s3 }
 0x6a5   :  { %v17984_v24 = vpop.permute.xlu1 %8918  ;;  %v17986_v10 = vpop.permute.xlu0 %9018 }
 0x6a6   :  { %19921 = vst [vmem:[#allocation178_spill] sm:$0xff] %v17986_v10 }
 0x6a7   :  { %9122 = vrot.lane.b32.xlu1 %v17988_v21, %s13913_s3  ;;  %9128 = vrot.lane.b32.xlu0 %v17990_v26, %s13913_s3 }
 0x6a9   :  { %10467 = vmatmul.mubr.bf16.gmra.mrb[148].mxu0 %v9394_v51  ;;  %v17998_v55 = vpop.permute.xlu1 %8920  ;;  %v18000_v63 = vpop.permute.xlu0 %9020 }
 0x6aa   :  { %19922 = vst [vmem:[#allocation180_spill] sm:$0xff] %v18000_v63  ;;  %10474 = vmatprep.mubr.bf16.mxu0 %v9500_v48 }
 0x6ab   :  { %9126 = vrot.lane.b32.xlu1 %v18005_v19, %s13913_s3  ;;  %9132 = vrot.lane.b32.xlu0 %v17529_v47, %s13913_s3  ;;  %v9504_v47 = vsel %vm406_vm2, %v17666_v3, %v17918_v60  ;;  %v19927_v3 = vld [vmem:[#allocation73_spill] sm:$0xff] }
 0x6ad   :  { %v18011_v27 = vpop.permute.xlu1 %8922  ;;  %v18013_v13 = vpop.permute.xlu0 %9022 }
 0x6ae   :  { %19923 = vst [vmem:[#allocation177_spill] sm:$0xff] %v18013_v13 }
 0x6af   :  { %9130 = vrot.lane.b32.xlu1 %v18015_v56, %s13913_s3  ;;  %9136 = vrot.lane.b32.xlu0 %v17564_v31, %s13913_s3  ;;  %v13511_v56 = vld [vmem:[#allocation16 + $0x140] sm:$0xff]  }
 0x6b0   :  { %10700 = vmatpush1.bf16.msra.mxu0 %v13511_v56 }
 0x6b1   :  { %10475 = vmatmul.mubr.bf16.gmra.mrb[152].mxu0 %v9397_v39  ;;  %v18023_v48 = vpop.permute.xlu1 %8924  ;;  %v18025_v51 = vpop.permute.xlu0 %9024  ;;  %10701 = vmatprep.subr.bf16.mxu0 %v19440_v15 }
 0x6b2   :  { %19925 = vst [vmem:[#allocation182_spill] sm:$0xff] %v18025_v51  ;;  %10482 = vmatprep.mubr.bf16.mxu0 %v9504_v47 }
 0x6b3   :  { %9134 = vrot.lane.b32.xlu1 %v17546_v61, %s13913_s3  ;;  %9140 = vrot.lane.b32.xlu0 %v17601_v45, %s13913_s3  ;;  %v9400_v61 = vsel %vm9377_vm4, %v17449_v28, %v17937_v7  ;;  %v2279_v45 = vadd.f32 %v18038_v30, %v19927_v3  ;;  %v19929_v28 = vld [vmem:[#allocation64_spill] sm:$0xff] }
 0x6b4   :  { %v19931_v3 = vld [vmem:[#allocation80_spill] sm:$0xff] }
 0x6b5   :  { %v18034_v31 = vpop.permute.xlu1 %8926  ;;  %v18036_v20 = vpop.permute.xlu0 %9026  ;;  %v2533_v7 = vmax.f32 %v2279_v45, 0.0  ;;  %v19932_v45 = vld [vmem:[#allocation81_spill] sm:$0xff] }
 0x6b6   :  { %19926 = vst [vmem:[#allocation184_spill] sm:$0xff] %v18036_v20 }
 0x6b7   :  { %9138 = vrot.lane.b32.xlu1 %v17581_v40, %s13913_s3  ;;  %9144 = vrot.lane.b32.xlu0 %v17850_v32, %s13913_s3  ;;  %v9508_v40 = vsel %vm406_vm2, %v17676_v34, %v17927_v49  ;;  %v2287_v32 = vadd.f32 %v19929_v28, %v18038_v30  ;;  %v8671_v34 = vld [vmem:[#allocation3 + $0x158] sm:$0xff]  ;;  %v2295_v28 = vadd.f32 %v18038_v30, %v19932_v45 }
 0x6b9   :  { %10483 = vmatmul.mubr.bf16.gmra.mrb[156].mxu0 %v9400_v61  ;;  %v18049_v39 = vpop.permute.xlu1 %8928  ;;  %v18051_v47 = vpop.permute.xlu0 %9028 }
 0x6ba   :  { %19928 = vst [vmem:[#allocation181_spill] sm:$0xff] %v18051_v47  ;;  %10490 = vmatprep.mubr.bf16.mxu0 %v9508_v40  ;;  %v2282_v40 = vadd.f32 %v18038_v30, %v19931_v3  ;;  %v2537_v3 = vmax.f32 %v2295_v28, 0.0 }
 0x6bb   :  { %9142 = vrot.lane.b32.xlu1 %v17618_v4, %s13913_s3  ;;  %9148 = vrot.lane.b32.xlu0 %v17870_v33, %s13913_s3  ;;  %v9403_v4 = vsel %vm9377_vm4, %v17467_v16, %v17948_v58  ;;  %v2535_v33 = vmax.f32 %v2287_v32, 0.0  ;;  %v19933_v16 = vld [vmem:[#allocation79_spill] sm:$0xff] }
 0x6bc   :  { %v2290_v58 = vadd.f32 %v19933_v16, %v18038_v30  ;;  %v2534_v32 = vmax.f32 %v2282_v40, 0.0  ;;  %v19936_v16 = vld [vmem:[#allocation89_spill] sm:$0xff] }
 0x6bd   :  { %v18063_v9 = vpop.permute.xlu1 %8930  ;;  %v18065_v61 = vpop.permute.xlu0 %9030  ;;  %v2311_v28 = vadd.f32 %v18038_v30, %v19936_v16 }
 0x6be   :  { %19930 = vst [vmem:[#allocation183_spill] sm:$0xff] %v18065_v61 }
 0x6bf   :  { %9146 = vrot.lane.b32.xlu1 %v17856_v6, %s13913_s3  ;;  %11100 = vrot.lane.b32.xlu0 %v2533_v7, %s13926_s29  ;;  %v9512_v6 = vsel %vm406_vm2, %v17684_v43, %v17939_v18  ;;  %v19934_v7 = vld [vmem:[#allocation83_spill] sm:$0xff]  ;;  %v2536_v43 = vmax.f32 %v2290_v58, 0.0  ;;  %v9516_v58 = vsel %vm406_vm2, %v17694_v8, %v17950_v11 }
 0x6c1   :  { %10491 = vmatmul.mubr.bf16.gmra.mrb[160].mxu0 %v9403_v4  ;;  %v18077_v49 = vpop.permute.xlu1 %8932  ;;  %v18079_v60 = vpop.permute.xlu0 %9032  ;;  %v2303_v4 = vadd.f32 %v19934_v7, %v18038_v30 }
 0x6c2   :  { %10498 = vmatprep.mubr.bf16.mxu0 %v9512_v6  ;;  %v19935_v6 = vld [vmem:[#allocation87_spill] sm:$0xff] }
 0x6c3   :  { %9150 = vrot.lane.b32.xlu1 %v8671_v34, %s13913_s3  ;;  %11104 = vrot.lane.b32.xlu0 %v2535_v33, %s13926_s29  ;;  %v9406_v34 = vsel %vm9377_vm4, %v17486_v50, %v17959_v25  ;;  %v2539_v33 = vmax.f32 %v2303_v4, 0.0  ;;  %v2298_v40 = vadd.f32 %v18038_v30, %v19935_v6  ;;  %v19937_v50 = vld [vmem:[#allocation71_spill] sm:$0xff]  ;;  %v19938_v4 = vld [vmem:[#allocation78_spill] sm:$0xff]  ;;  %s13927_s3 = smov 48  }
 0x6c4   :  { %v2306_v25 = vadd.f32 %v19937_v50, %v18038_v30 }
 0x6c5   :  { %v18090_v45 = vpop.permute.xlu1 %8934  ;;  %v18092_v59 = vpop.permute.xlu0 %9034 }
 0x6c6   :  { %v2540_v8 = vmax.f32 %v2306_v25, 0.0  ;;  %v9520_v25 = vsel %vm406_vm2, %v17702_v22, %v17961_v35  ;;  %v9412_v22 = vsel %vm9377_vm4, %v17521_v54, %v17984_v24  ;;  %v19945_v54 = vld [vmem:[#allocation104_spill] sm:$0xff] }
 0x6c7   :  { %11102 = vrot.lane.b32.xlu1 %v2534_v32, %s13926_s29  ;;  %11108 = vrot.lane.b32.xlu0 %v2537_v3, %s13926_s29  ;;  %v2538_v32 = vmax.f32 %v2298_v40, 0.0  ;;  %v2319_v3 = vadd.f32 %v19938_v4, %v18038_v30  ;;  %v19939_v40 = vld [vmem:[#allocation96_spill] sm:$0xff]  ;;  %v2338_v24 = vadd.f32 %v19945_v54, %v18038_v30 }
 0x6c9   :  { %10499 = vmatmul.mubr.bf16.gmra.mrb[164].mxu0 %v9406_v34  ;;  %v18103_v7 = vpop.permute.xlu1 %8936  ;;  %v18105_v18 = vpop.permute.xlu0 %9036  ;;  %v2541_v34 = vmax.f32 %v2311_v28, 0.0  ;;  %v19940_v28 = vld [vmem:[#allocation95_spill] sm:$0xff] }
 0x6ca   :  { %10506 = vmatprep.mubr.bf16.mxu0 %v9516_v58  ;;  %v2314_v58 = vadd.f32 %v18038_v30, %v19939_v40  ;;  %v2327_v50 = vadd.f32 %v18038_v30, %v19940_v28  ;;  %v19944_v28 = vld [vmem:[#allocation103_spill] sm:$0xff] }
 0x6cb   :  { %11106 = vrot.lane.b32.xlu1 %v2536_v43, %s13926_s29  ;;  %11112 = vrot.lane.b32.xlu0 %v2539_v33, %s13926_s29  ;;  %v9409_v43 = vsel %vm9377_vm4, %v17504_v46, %v17972_v0  ;;  %v2543_v33 = vmax.f32 %v2319_v3, 0.0  ;;  %v19941_v46 = vld [vmem:[#allocation94_spill] sm:$0xff] }
 0x6cc   :  { %v2322_v0 = vadd.f32 %v19941_v46, %v18038_v30  ;;  %v2542_v56 = vmax.f32 %v2314_v58, 0.0 }
 0x6cd   :  { %v18116_v6 = vpop.permute.xlu1 %8938  ;;  %v18118_v16 = vpop.permute.xlu0 %9038 }
 0x6ce   :  { %v2544_v15 = vmax.f32 %v2322_v0, 0.0  ;;  %v9524_v0 = vsel %vm406_vm2, %v17746_v36, %v17974_v62  ;;  %v2548_v36 = vmax.f32 %v2338_v24, 0.0  ;;  %v9528_v24 = vsel %vm406_vm2, %v17754_v53, %v17986_v10 }
 0x6cf   :  { %11110 = vrot.lane.b32.xlu1 %v2538_v32, %s13926_s29  ;;  %11116 = vrot.lane.b32.xlu0 %v2541_v34, %s13926_s29  ;;  %v19942_v32 = vld [vmem:[#allocation102_spill] sm:$0xff]  ;;  %v2545_v34 = vmax.f32 %v2327_v50, 0.0  ;;  %v2343_v50 = vadd.f32 %v18038_v30, %v19944_v28  ;;  %v19947_v28 = vld [vmem:[#allocation109_spill] sm:$0xff] }
 0x6d0   :  { %v2335_v3 = vadd.f32 %v19942_v32, %v18038_v30  ;;  %v19946_v32 = vld [vmem:[#allocation97_spill] sm:$0xff] }
 0x6d1   :  { %10507 = vmatmul.mubr.bf16.gmra.mrb[168].mxu0 %v9409_v43  ;;  %v18129_v4 = vpop.permute.xlu1 %8940  ;;  %v18131_v11 = vpop.permute.xlu0 %9040 }
 0x6d2   :  { %10514 = vmatprep.mubr.bf16.mxu0 %v9520_v25 }
 0x6d3   :  { %11114 = vrot.lane.b32.xlu1 %v2540_v8, %s13926_s29  ;;  %11120 = vrot.lane.b32.xlu0 %v2543_v33, %s13926_s29  ;;  %v2547_v8 = vmax.f32 %v2335_v3, 0.0  ;;  %v19943_v33 = vld [vmem:[#allocation88_spill] sm:$0xff]  ;;  %v2351_v3 = vadd.f32 %v19946_v32, %v18038_v30 }
 0x6d4   :  { %v2330_v58 = vadd.f32 %v18038_v30, %v19943_v33 }
 0x6d5   :  { %v18143_v43 = vpop.permute.xlu1 %8942  ;;  %v18145_v40 = vpop.permute.xlu0 %9042 }
 0x6d7   :  { %11118 = vrot.lane.b32.xlu1 %v2542_v56, %s13926_s29  ;;  %11124 = vrot.lane.b32.xlu0 %v2545_v34, %s13926_s29  ;;  %v2546_v56 = vmax.f32 %v2330_v58, 0.0  ;;  %v2549_v34 = vmax.f32 %v2343_v50, 0.0  ;;  %v2346_v58 = vadd.f32 %v18038_v30, %v19947_v28 }
 0x6d9   :  { %10515 = vmatmul.mubr.bf16.gmra.mrb[172].mxu0 %v9412_v22  ;;  %v18156_v25 = vpop.permute.xlu1 %8944  ;;  %v18158_v46 = vpop.permute.xlu0 %9044 }
 0x6da   :  { %10522 = vmatprep.mubr.bf16.mxu0 %v9524_v0  ;;  %v19948_v0 = vld [vmem:[#allocation101_spill] sm:$0xff] }
 0x6db   :  { %11122 = vrot.lane.b32.xlu1 %v2544_v15, %s13926_s29  ;;  %11128 = vrot.lane.b32.xlu0 %v2547_v8, %s13926_s29  ;;  %v9415_v15 = vsel %vm9377_vm4, %v17539_v37, %v17998_v55  ;;  %v2551_v8 = vmax.f32 %v2351_v3, 0.0  ;;  %v2359_v50 = vadd.f32 %v18038_v30, %v19948_v0  ;;  %v19949_v37 = vld [vmem:[#allocation105_spill] sm:$0xff]  ;;  %v19950_v3 = vld [vmem:[#allocation111_spill] sm:$0xff] }
 0x6dc   :  { %v2354_v55 = vadd.f32 %v19949_v37, %v18038_v30  ;;  %v19952_v37 = vld [vmem:[#allocation116_spill] sm:$0xff] }
 0x6dd   :  { %v18169_v22 = vpop.permute.xlu1 %8946  ;;  %v18171_v33 = vpop.permute.xlu0 %9046 }
 0x6de   :  { %v2552_v53 = vmax.f32 %v2354_v55, 0.0  ;;  %v9532_v55 = vsel %vm406_vm2, %v17726_v57, %v18000_v63  ;;  %v9536_v57 = vsel %vm406_vm2, %v17732_v17, %v18013_v13 }
 0x6df   :  { %11126 = vrot.lane.b32.xlu1 %v2546_v56, %s13926_s29  ;;  %11132 = vrot.lane.b32.xlu0 %v2549_v34, %s13926_s29  ;;  %v2550_v56 = vmax.f32 %v2346_v58, 0.0  ;;  %v2367_v34 = vadd.f32 %v19950_v3, %v18038_v30 }
 0x6e1   :  { %10523 = vmatmul.mubr.bf16.gmra.mrb[176].mxu0 %v9415_v15  ;;  %v18182_v54 = vpop.permute.xlu1 %8948  ;;  %v18184_v32 = vpop.permute.xlu0 %9048  ;;  %v2553_v15 = vmax.f32 %v2359_v50, 0.0  ;;  %v2375_v50 = vadd.f32 %v18038_v30, %v19952_v37 }
 0x6e2   :  { %10530 = vmatprep.mubr.bf16.mxu0 %v9528_v24  ;;  %v19951_v24 = vld [vmem:[#allocation114_spill] sm:$0xff] }
 0x6e3   :  { %11130 = vrot.lane.b32.xlu1 %v2548_v36, %s13926_s29  ;;  %11136 = vrot.lane.b32.xlu0 %v2551_v8, %s13926_s29  ;;  %v9418_v36 = vsel %vm9377_vm4, %v17556_v44, %v18011_v27  ;;  %v2555_v8 = vmax.f32 %v2367_v34, 0.0  ;;  %v2362_v58 = vadd.f32 %v18038_v30, %v19951_v24  ;;  %v19953_v44 = vld [vmem:[#allocation113_spill] sm:$0xff]  ;;  %v2557_v24 = vmax.f32 %v2375_v50, 0.0 }
 0x6e4   :  { %v2370_v27 = vadd.f32 %v19953_v44, %v18038_v30 }
 0x6e5   :  { %v18195_v28 = vpop.permute.xlu1 %8950  ;;  %v18197_v0 = vpop.permute.xlu0 %9050  ;;  %v2554_v34 = vmax.f32 %v2362_v58, 0.0 }
 0x6e7   :  { %11134 = vrot.lane.b32.xlu1 %v2550_v56, %s13926_s29  ;;  %11140 = vrot.lane.b32.xlu0 %v2553_v15, %s13926_s29  ;;  %v13512_v56 = vld [vmem:[#allocation16 + $0x148] sm:$0xff]   ;;  %v19954_v15 = vld [vmem:[#allocation115_spill] sm:$0xff] }
 0x6e8   :  { %10702 = vmatpush1.bf16.msra.mxu0 %v13512_v56  ;;  %v19956_v56 = vld [vmem:[#allocation120_spill] sm:$0xff] }
 0x6e9   :  { %10531 = vmatmul.mubr.bf16.gmra.mrb[180].mxu0 %v9418_v36  ;;  %v18208_v3 = vpop.permute.xlu1 %8952  ;;  %v18210_v10 = vpop.permute.xlu0 %9052  ;;  %v2383_v36 = vadd.f32 %v19954_v15, %v18038_v30  ;;  %v2391_v44 = vadd.f32 %v18038_v30, %v19956_v56 }
 0x6ea   :  { %10538 = vmatprep.mubr.bf16.mxu0 %v9532_v55  ;;  %v19955_v55 = vld [vmem:[#allocation118_spill] sm:$0xff] }
 0x6eb   :  { %11138 = vrot.lane.b32.xlu1 %v2552_v53, %s13926_s29  ;;  %11144 = vrot.lane.b32.xlu0 %v2555_v8, %s13926_s29  ;;  %v9421_v53 = vsel %vm9377_vm4, %v17574_v52, %v18023_v48  ;;  %v2556_v8 = vmax.f32 %v2370_v27, 0.0  ;;  %v2559_v58 = vmax.f32 %v2383_v36, 0.0  ;;  %v2378_v50 = vadd.f32 %v18038_v30, %v19955_v55  ;;  %v19957_v52 = vld [vmem:[#allocation117_spill] sm:$0xff]  ;;  %v19958_v27 = vld [vmem:[#allocation119_spill] sm:$0xff] }
 0x6ec   :  { %v2386_v17 = vadd.f32 %v19957_v52, %v18038_v30  ;;  %v2399_v36 = vadd.f32 %v19958_v27, %v18038_v30  ;;  %v19960_v27 = vld [vmem:[#allocation124_spill] sm:$0xff] }
 0x6ed   :  { %v18221_v37 = vpop.permute.xlu1 %8954  ;;  %v18223_v62 = vpop.permute.xlu0 %9054  ;;  %v2558_v48 = vmax.f32 %v2378_v50, 0.0  ;;  %v19959_v50 = vld [vmem:[#allocation122_spill] sm:$0xff] }
 0x6ee   :  { %v2563_v56 = vmax.f32 %v2399_v36, 0.0  ;;  %v2394_v52 = vadd.f32 %v18038_v30, %v19959_v50  ;;  %v19962_v36 = vld [vmem:[#allocation123_spill] sm:$0xff] }
 0x6ef   :  { %11142 = vrot.lane.b32.xlu1 %v2554_v34, %s13926_s29  ;;  %11148 = vrot.lane.b32.xlu0 %v2557_v24, %s13926_s29  ;;  %v2561_v24 = vmax.f32 %v2391_v44, 0.0  ;;  %v2407_v44 = vadd.f32 %v18038_v30, %v19960_v27 }
 0x6f1   :  { %10539 = vmatmul.mubr.bf16.gmra.mrb[184].mxu0 %v9421_v53  ;;  %v18237_v34 = vpop.permute.xlu1 %8956  ;;  %v18239_v15 = vpop.permute.xlu0 %9088 }
 0x6f2   :  { %10546 = vmatprep.mubr.bf16.mxu0 %v9536_v57  ;;  %v2560_v57 = vmax.f32 %v2386_v17, 0.0 }
 0x6f3   :  { %11146 = vrot.lane.b32.xlu1 %v2556_v8, %s13926_s29  ;;  %11152 = vrot.lane.b32.xlu0 %v2559_v58, %s13926_s29  ;;  %v9424_v8 = vsel %vm9377_vm4, %v17591_v29, %v18034_v31  ;;  %v8590_v58 = vld [vmem:[#allocation3 + $0xd0] sm:$0xff] }
 0x6f4   :  { %v9540_v17 = vsel %vm406_vm2, %v8590_v58, %v18025_v51  ;;  %v19961_v29 = vld [vmem:[#allocation121_spill] sm:$0xff] }
 0x6f5   :  { %v18247_v55 = vpop.permute.xlu1 %8958  ;;  %v18249_v53 = vpop.permute.xlu0 %9092  ;;  %v2402_v31 = vadd.f32 %v19961_v29, %v18038_v30 }
 0x6f7   :  { %11150 = vrot.lane.b32.xlu1 %v2558_v48, %s13926_s29  ;;  %11156 = vrot.lane.b32.xlu0 %v2561_v24, %s13926_s29  ;;  %v2562_v48 = vmax.f32 %v2394_v52, 0.0  ;;  %v2415_v24 = vadd.f32 %v19962_v36, %v18038_v30  ;;  %v2564_v58 = vmax.f32 %v2402_v31, 0.0  ;;  %v19963_v52 = vld [vmem:[#allocation126_spill] sm:$0xff]  ;;  %v19964_v36 = vld [vmem:[#allocation128_spill] sm:$0xff] }
 0x6f8   :  { %v2410_v29 = vadd.f32 %v18038_v30, %v19963_v52 }
 0x6f9   :  { %10547 = vmatmul.mubr.bf16.gmra.mrb[188].mxu0 %v9424_v8  ;;  %v18260_v13 = vpop.permute.xlu1 %9090  ;;  %v18262_v63 = vpop.permute.xlu0 %9096  ;;  %v2565_v8 = vmax.f32 %v2407_v44, 0.0  ;;  %v2423_v44 = vadd.f32 %v18038_v30, %v19964_v36 }
 0x6fa   :  { %10554 = vmatprep.mubr.bf16.mxu0 %v9540_v17  ;;  %v2567_v17 = vmax.f32 %v2415_v24, 0.0  ;;  %v19966_v24 = vld [vmem:[#allocation127_spill] sm:$0xff] }
 0x6fb   :  { %11154 = vrot.lane.b32.xlu1 %v2560_v57, %s13926_s29  ;;  %11160 = vrot.lane.b32.xlu0 %v2563_v56, %s13926_s29  ;;  %v9427_v57 = vsel %vm9377_vm4, %v17599_v42, %v18049_v39  ;;  %v8591_v56 = vld [vmem:[#allocation3 + $0xd8] sm:$0xff] }
 0x6fc   :  { %v9544_v31 = vsel %vm406_vm2, %v8591_v56, %v18036_v20  ;;  %v19965_v42 = vld [vmem:[#allocation125_spill] sm:$0xff] }
 0x6fd   :  { %v18272_v50 = vpop.permute.xlu1 %9094  ;;  %v18274_v27 = vpop.permute.xlu0 %9100  ;;  %v2418_v39 = vadd.f32 %v19965_v42, %v18038_v30  ;;  %v19968_v42 = vld [vmem:[#allocation132_spill] sm:$0xff] }
 0x6ff   :  { %11158 = vrot.lane.b32.xlu1 %v2562_v48, %s13926_s29  ;;  %11164 = vrot.lane.b32.xlu0 %v2565_v8, %s13926_s29  ;;  %v2566_v48 = vmax.f32 %v2410_v29, 0.0  ;;  %v2431_v8 = vadd.f32 %v19966_v24, %v18038_v30  ;;  %v2568_v56 = vmax.f32 %v2418_v39, 0.0  ;;  %v9548_v39 = vsel %vm406_vm2, %v17963_v23, %v18051_v47 }
 0x701   :  { %10555 = vmatmul.mubr.bf16.gmra.mrb[192].mxu0 %v9427_v57  ;;  %v18285_v51 = vpop.permute.xlu1 %9098  ;;  %v18287_v35 = vpop.permute.xlu0 %9104  ;;  %v2569_v57 = vmax.f32 %v2423_v44, 0.0  ;;  %v2439_v44 = vadd.f32 %v18038_v30, %v19968_v42 }
 0x702   :  { %10562 = vmatprep.mubr.bf16.mxu0 %v9544_v31  ;;  %v19967_v31 = vld [vmem:[#allocation130_spill] sm:$0xff] }
 0x703   :  { %11162 = vrot.lane.b32.xlu1 %v2564_v58, %s13926_s29  ;;  %11168 = vrot.lane.b32.xlu0 %v2567_v17, %s13926_s29  ;;  %v9430_v58 = vsel %vm9377_vm4, %v17627_v2, %v18063_v9  ;;  %v2571_v17 = vmax.f32 %v2431_v8, 0.0  ;;  %v2426_v29 = vadd.f32 %v18038_v30, %v19967_v31  ;;  %v19969_v2 = vld [vmem:[#allocation129_spill] sm:$0xff]  ;;  %v19970_v8 = vld [vmem:[#allocation131_spill] sm:$0xff] }
 0x704   :  { %v2434_v9 = vadd.f32 %v19969_v2, %v18038_v30  ;;  %v19972_v2 = vld [vmem:[#allocation136_spill] sm:$0xff] }
 0x705   :  { %v18297_v52 = vpop.permute.xlu1 %9102  ;;  %v18299_v36 = vpop.permute.xlu0 %9108 }
 0x706   :  { %v2572_v23 = vmax.f32 %v2434_v9, 0.0  ;;  %v9552_v9 = vsel %vm406_vm2, %v17988_v21, %v18065_v61 }
 0x707   :  { %11166 = vrot.lane.b32.xlu1 %v2566_v48, %s13926_s29  ;;  %11172 = vrot.lane.b32.xlu0 %v2569_v57, %s13926_s29  ;;  %v2570_v48 = vmax.f32 %v2426_v29, 0.0  ;;  %v2447_v57 = vadd.f32 %v19970_v8, %v18038_v30 }
 0x709   :  { %10563 = vmatmul.mubr.bf16.gmra.mrb[196].mxu0 %v9430_v58  ;;  %v18310_v24 = vpop.permute.xlu1 %9106  ;;  %v18312_v20 = vpop.permute.xlu0 %9112  ;;  %v2573_v58 = vmax.f32 %v2439_v44, 0.0  ;;  %v2455_v44 = vadd.f32 %v18038_v30, %v19972_v2 }
 0x70a   :  { %10570 = vmatprep.mubr.bf16.mxu0 %v9548_v39  ;;  %v19971_v39 = vld [vmem:[#allocation134_spill] sm:$0xff] }
 0x70b   :  { %11170 = vrot.lane.b32.xlu1 %v2568_v56, %s13926_s29  ;;  %11176 = vrot.lane.b32.xlu0 %v2571_v17, %s13926_s29  ;;  %v9433_v56 = vsel %vm9377_vm4, %v17646_v38, %v18077_v49  ;;  %v2575_v17 = vmax.f32 %v2447_v57, 0.0  ;;  %v2442_v29 = vadd.f32 %v18038_v30, %v19971_v39  ;;  %v19973_v38 = vld [vmem:[#allocation133_spill] sm:$0xff]  ;;  %v19974_v57 = vld [vmem:[#allocation135_spill] sm:$0xff] }
 0x70c   :  { %v2450_v49 = vadd.f32 %v19973_v38, %v18038_v30  ;;  %v19976_v38 = vld [vmem:[#allocation140_spill] sm:$0xff] }
 0x70d   :  { %v18323_v31 = vpop.permute.xlu1 %9110  ;;  %v18325_v42 = vpop.permute.xlu0 %9116 }
 0x70e   :  { %v2576_v21 = vmax.f32 %v2450_v49, 0.0  ;;  %v9556_v49 = vsel %vm406_vm2, %v17979_v5, %v18079_v60 }
 0x70f   :  { %11174 = vrot.lane.b32.xlu1 %v2570_v48, %s13926_s29  ;;  %11180 = vrot.lane.b32.xlu0 %v2573_v58, %s13926_s29  ;;  %v2574_v48 = vmax.f32 %v2442_v29, 0.0  ;;  %v2463_v58 = vadd.f32 %v19974_v57, %v18038_v30 }
 0x711   :  { %10571 = vmatmul.mubr.bf16.gmra.mrb[200].mxu0 %v9433_v56  ;;  %v18336_v8 = vpop.permute.xlu1 %9114  ;;  %v18338_v47 = vpop.permute.xlu0 %9120  ;;  %v2577_v56 = vmax.f32 %v2455_v44, 0.0  ;;  %v2471_v44 = vadd.f32 %v18038_v30, %v19976_v38 }
 0x712   :  { %10578 = vmatprep.mubr.bf16.mxu0 %v9552_v9  ;;  %v19975_v9 = vld [vmem:[#allocation138_spill] sm:$0xff] }
 0x713   :  { %11178 = vrot.lane.b32.xlu1 %v2572_v23, %s13926_s29  ;;  %11184 = vrot.lane.b32.xlu0 %v2575_v17, %s13926_s29  ;;  %v9436_v23 = vsel %vm9377_vm4, %v17664_v41, %v18090_v45  ;;  %v2579_v17 = vmax.f32 %v2463_v58, 0.0  ;;  %v2458_v29 = vadd.f32 %v18038_v30, %v19975_v9  ;;  %v19977_v41 = vld [vmem:[#allocation137_spill] sm:$0xff]  ;;  %v19978_v58 = vld [vmem:[#allocation139_spill] sm:$0xff] }
 0x714   :  { %v2466_v45 = vadd.f32 %v19977_v41, %v18038_v30  ;;  %v19981_v41 = vld [vmem:[#allocation144_spill] sm:$0xff] }
 0x715   :  { %v18349_v39 = vpop.permute.xlu1 %9118  ;;  %v18351_v2 = vpop.permute.xlu0 %9124 }
 0x716   :  { %v2580_v5 = vmax.f32 %v2466_v45, 0.0  ;;  %v9560_v45 = vsel %vm406_vm2, %v18005_v19, %v18092_v59 }
 0x717   :  { %11182 = vrot.lane.b32.xlu1 %v2574_v48, %s13926_s29  ;;  %11188 = vrot.lane.b32.xlu0 %v2577_v56, %s13926_s29  ;;  %v2578_v48 = vmax.f32 %v2458_v29, 0.0  ;;  %v2479_v56 = vadd.f32 %v19978_v58, %v18038_v30 }
 0x719   :  { %10579 = vmatmul.mubr.bf16.gmra.mrb[204].mxu0 %v9436_v23  ;;  %v18362_v57 = vpop.permute.xlu1 %9122  ;;  %v18364_v61 = vpop.permute.xlu0 %9128  ;;  %v2581_v23 = vmax.f32 %v2471_v44, 0.0  ;;  %v2487_v44 = vadd.f32 %v18038_v30, %v19981_v41 }
 0x71a   :  { %10586 = vmatprep.mubr.bf16.mxu0 %v9556_v49  ;;  %v19980_v49 = vld [vmem:[#allocation142_spill] sm:$0xff] }
 0x71b   :  { %11186 = vrot.lane.b32.xlu1 %v2576_v21, %s13926_s29  ;;  %11192 = vrot.lane.b32.xlu0 %v2579_v17, %s13926_s29  ;;  %v9439_v21 = vsel %vm9377_vm4, %v17682_v14, %v18103_v7  ;;  %v2583_v17 = vmax.f32 %v2479_v56, 0.0  ;;  %v2474_v29 = vadd.f32 %v18038_v30, %v19980_v49  ;;  %v19982_v14 = vld [vmem:[#allocation141_spill] sm:$0xff]  ;;  %v19983_v56 = vld [vmem:[#allocation143_spill] sm:$0xff] }
 0x71c   :  { %v2482_v7 = vadd.f32 %v19982_v14, %v18038_v30  ;;  %v19986_v14 = vld [vmem:[#allocation148_spill] sm:$0xff] }
 0x71d   :  { %v18375_v9 = vpop.permute.xlu1 %9126  ;;  %v18377_v38 = vpop.permute.xlu0 %9132 }
 0x71e   :  { %19979 = vst [vmem:[#allocation73_spill] sm:$0xff] %v18377_v38  ;;  %v2584_v19 = vmax.f32 %v2482_v7, 0.0  ;;  %v9564_v7 = vsel %vm406_vm2, %v17990_v26, %v18105_v18 }
 0x71f   :  { %11190 = vrot.lane.b32.xlu1 %v2578_v48, %s13926_s29  ;;  %11196 = vrot.lane.b32.xlu0 %v2581_v23, %s13926_s29  ;;  %v2582_v48 = vmax.f32 %v2474_v29, 0.0  ;;  %v2495_v23 = vadd.f32 %v19983_v56, %v18038_v30 }
 0x721   :  { %10587 = vmatmul.mubr.bf16.gmra.mrb[208].mxu0 %v9439_v21  ;;  %v18388_v58 = vpop.permute.xlu1 %9130  ;;  %v18390_v38 = vpop.permute.xlu0 %9136  ;;  %v2585_v21 = vmax.f32 %v2487_v44, 0.0  ;;  %v2503_v44 = vadd.f32 %v18038_v30, %v19986_v14 }
 0x722   :  { %10594 = vmatprep.mubr.bf16.mxu0 %v9560_v45  ;;  %v19985_v45 = vld [vmem:[#allocation146_spill] sm:$0xff] }
 0x723   :  { %11194 = vrot.lane.b32.xlu1 %v2580_v5, %s13926_s29  ;;  %11200 = vrot.lane.b32.xlu0 %v2583_v17, %s13926_s29  ;;  %v9442_v5 = vsel %vm9377_vm4, %v17700_v1, %v18116_v6  ;;  %v2587_v17 = vmax.f32 %v2495_v23, 0.0  ;;  %v2490_v29 = vadd.f32 %v18038_v30, %v19985_v45  ;;  %v19987_v1 = vld [vmem:[#allocation145_spill] sm:$0xff]  ;;  %v19988_v23 = vld [vmem:[#allocation147_spill] sm:$0xff] }
 0x724   :  { %v2498_v6 = vadd.f32 %v19987_v1, %v18038_v30  ;;  %v19991_v1 = vld [vmem:[#allocation152_spill] sm:$0xff] }
 0x725   :  { %v18401_v49 = vpop.permute.xlu1 %9134  ;;  %v18403_v41 = vpop.permute.xlu0 %9140 }
 0x726   :  { %19984 = vst [vmem:[#allocation64_spill] sm:$0xff] %v18403_v41  ;;  %v2588_v26 = vmax.f32 %v2498_v6, 0.0 }
 0x727   :  { %11198 = vrot.lane.b32.xlu1 %v2582_v48, %s13926_s29  ;;  %11204 = vrot.lane.b32.xlu0 %v2585_v21, %s13926_s29  ;;  %v2586_v48 = vmax.f32 %v2490_v29, 0.0  ;;  %v2511_v21 = vadd.f32 %v19988_v23, %v18038_v30 }
 0x729   :  { %10595 = vmatmul.mubr.bf16.gmra.mrb[212].mxu0 %v9442_v5  ;;  %v18414_v56 = vpop.permute.xlu1 %9138  ;;  %v18416_v41 = vpop.permute.xlu0 %9144  ;;  %v2589_v5 = vmax.f32 %v2503_v44, 0.0  ;;  %v2519_v44 = vadd.f32 %v18038_v30, %v19991_v1 }
 0x72a   :  { %10602 = vmatprep.mubr.bf16.mxu0 %v9564_v7  ;;  %v19990_v7 = vld [vmem:[#allocation150_spill] sm:$0xff] }
 0x72b   :  { %11202 = vrot.lane.b32.xlu1 %v2584_v19, %s13926_s29  ;;  %11208 = vrot.lane.b32.xlu0 %v2587_v17, %s13926_s29  ;;  %v9445_v19 = vsel %vm9377_vm4, %v17716_v12, %v18129_v4  ;;  %v2591_v17 = vmax.f32 %v2511_v21, 0.0  ;;  %v2506_v29 = vadd.f32 %v18038_v30, %v19990_v7  ;;  %v19995_v12 = vld [vmem:[#allocation149_spill] sm:$0xff]  ;;  %v2593_v7 = vmax.f32 %v2519_v44, 0.0 }
 0x72c   :  { %v2514_v4 = vadd.f32 %v19995_v12, %v18038_v30 }
 0x72d   :  { %v18427_v45 = vpop.permute.xlu1 %9142  ;;  %v18429_v14 = vpop.permute.xlu0 %9148  ;;  %v2590_v21 = vmax.f32 %v2506_v29, 0.0  ;;  %v19998_v29 = vld [vmem:[#allocation154_spill] sm:$0xff] }
 0x72e   :  { %19989 = vst [vmem:[#allocation80_spill] sm:$0xff] %v18429_v14 }
 0x72f   :  { %11206 = vrot.lane.b32.xlu1 %v2586_v48, %s13926_s29  ;;  %11212 = vrot.lane.b32.xlu0 %v2589_v5, %s13926_s29  ;;  %v19994_v48 = vld [vmem:[#allocation179_spill] sm:$0xff] }
 0x730   :  { %v9568_v6 = vsel %vm406_vm2, %v19994_v48, %v18118_v16  ;;  %v19996_v5 = vld [vmem:[#allocation151_spill] sm:$0xff]  ;;  %v8598_v48 = vld [vmem:[#allocation3 + $0x110] sm:$0xff] }
 0x731   :  { %10603 = vmatmul.mubr.bf16.gmra.mrb[216].mxu0 %v9445_v19  ;;  %v18440_v23 = vpop.permute.xlu1 %9146  ;;  %v18442_v14 = vpop.permute.xlu0 %11100  ;;  %v2527_v19 = vadd.f32 %v19996_v5, %v18038_v30 }
 0x732   :  { %19992 = vst [vmem:[#allocation81_spill] sm:$0xff] %v18440_v23  ;;  %19993 = vst [vmem:[#allocation79_spill] sm:$0xff] %v18442_v14  ;;  %10610 = vmatprep.mubr.bf16.mxu0 %v9568_v6  ;;  %v2592_v6 = vmax.f32 %v2514_v4, 0.0  ;;  %v2522_v23 = vadd.f32 %v18038_v30, %v19998_v29 }
 0x733   :  { %11210 = vrot.lane.b32.xlu1 %v2588_v26, %s13926_s29  ;;  %11216 = vrot.lane.b32.xlu0 %v2591_v17, %s13926_s29  ;;  %v19997_v26 = vld [vmem:[#allocation155_spill] sm:$0xff]  ;;  %v2595_v12 = vmax.f32 %v2527_v19, 0.0 }
 0x734   :  { %v9448_v17 = vsel %vm9377_vm4, %v19997_v26, %v18143_v43  ;;  %v19999_v43 = vld [vmem:[#allocation153_spill] sm:$0xff]  ;;  %v2594_v19 = vmax.f32 %v2522_v23, 0.0 }
 0x735   :  { %v18453_v1 = vpop.permute.xlu1 %9150  ;;  %v18455_v14 = vpop.permute.xlu0 %11104  ;;  %v2530_v4 = vadd.f32 %v19999_v43, %v18038_v30 }
 0x737   :  { %11214 = vrot.lane.b32.xlu1 %v2590_v21, %s13926_s29  ;;  %11220 = vrot.lane.b32.xlu0 %v2593_v7, %s13926_s29  ;;  %v9572_v21 = vsel %vm406_vm2, %v8598_v48, %v18131_v11  ;;  %v8599_v48 = vld [vmem:[#allocation3 + $0x118] sm:$0xff] }
 0x738   :  { %v9576_v30 = vsel %vm406_vm2, %v8599_v48, %v18145_v40 }
 0x739   :  { %10611 = vmatmul.mubr.bf16.gmra.mrb[220].mxu0 %v9448_v17  ;;  %v18464_v44 = vpop.permute.xlu1 %11102  ;;  %v18466_v5 = vpop.permute.xlu0 %11108  ;;  %v20001_v17 = vld [vmem:[#allocation156_spill] sm:$0xff] }
 0x73a   :  { %10618 = vmatprep.mubr.bf16.mxu0 %v9572_v21  ;;  %v9451_v29 = vsel %vm9377_vm4, %v20001_v17, %v18156_v25  ;;  %v2596_v21 = vmax.f32 %v2530_v4, 0.0  ;;  %v8600_v4 = vld [vmem:[#allocation3 + $0x120] sm:$0xff] }
 0x73b   :  { %11218 = vrot.lane.b32.xlu1 %v2592_v6, %s13926_s29  ;;  %11224 = vrot.lane.b32.xlu0 %v2595_v12, %s13926_s29  ;;  %v9580_v48 = vsel %vm406_vm2, %v8600_v4, %v18158_v46 }
 0x73d   :  { %v18474_v7 = vpop.permute.xlu1 %11106  ;;  %v18476_v26 = vpop.permute.xlu0 %11112 }
 0x73e   :  { %20000 = vst [vmem:[#allocation83_spill] sm:$0xff] %v18476_v26 }
 0x73f   :  { %11222 = vrot.lane.b32.xlu1 %v2594_v19, %s13926_s29  ;;  %v20006_v19 = vld [vmem:[#allocation158_spill] sm:$0xff] }
 0x740   :  { %v9454_v25 = vsel %vm9377_vm4, %v20006_v19, %v18169_v22 }
 0x741   :  { %10619 = vmatmul.mubr.bf16.gmra.mrb[224].mxu0 %v9451_v29  ;;  %v18482_v6 = vpop.permute.xlu1 %11110  ;;  %v18484_v12 = vpop.permute.xlu0 %11116 }
 0x742   :  { %20002 = vst [vmem:[#allocation87_spill] sm:$0xff] %v18482_v6  ;;  %20003 = vst [vmem:[#allocation89_spill] sm:$0xff] %v18484_v12  ;;  %10626 = vmatprep.mubr.bf16.mxu0 %v9576_v30 }
 0x743   :  { %11226 = vrot.lane.b32.xlu1 %v2596_v21, %s13926_s29 }
 0x745   :  { %v18489_v23 = vpop.permute.xlu1 %11114  ;;  %v18491_v43 = vpop.permute.xlu0 %11120 }
 0x746   :  { %20004 = vst [vmem:[#allocation71_spill] sm:$0xff] %v18489_v23  ;;  %20005 = vst [vmem:[#allocation78_spill] sm:$0xff] %v18491_v43  ;;  %v20011_v43 = vld [vmem:[#allocation160_spill] sm:$0xff] }
 0x747   :  { %v9457_v12 = vsel %vm9377_vm4, %v20011_v43, %v18182_v54  ;;  %v8601_v23 = vld [vmem:[#allocation3 + $0x128] sm:$0xff] }
 0x749   :  { %10627 = vmatmul.mubr.bf16.gmra.mrb[228].mxu0 %v9454_v25  ;;  %v18496_v17 = vpop.permute.xlu1 %11118  ;;  %v18498_v29 = vpop.permute.xlu0 %11124  ;;  %v9584_v25 = vsel %vm406_vm2, %v8601_v23, %v18171_v33 }
 0x74a   :  { %20007 = vst [vmem:[#allocation96_spill] sm:$0xff] %v18496_v17  ;;  %20008 = vst [vmem:[#allocation95_spill] sm:$0xff] %v18498_v29  ;;  %10634 = vmatprep.mubr.bf16.mxu0 %v9580_v48 }
 0x74d   :  { %v18502_v30 = vpop.permute.xlu1 %11122  ;;  %v18504_v21 = vpop.permute.xlu0 %11128 }
 0x74e   :  { %20009 = vst [vmem:[#allocation94_spill] sm:$0xff] %v18502_v30  ;;  %20010 = vst [vmem:[#allocation102_spill] sm:$0xff] %v18504_v21  ;;  %v20016_v21 = vld [vmem:[#allocation157_spill] sm:$0xff] }
 0x74f   :  { %v9460_v29 = vsel %vm9377_vm4, %v20016_v21, %v18195_v28  ;;  %v8602_v30 = vld [vmem:[#allocation3 + $0x130] sm:$0xff] }
 0x750   :  { %v9588_v43 = vsel %vm406_vm2, %v8602_v30, %v18184_v32 }
 0x751   :  { %10635 = vmatmul.mubr.bf16.gmra.mrb[232].mxu0 %v9457_v12  ;;  %v18509_v22 = vpop.permute.xlu1 %11126  ;;  %v18511_v19 = vpop.permute.xlu0 %11132 }
 0x752   :  { %20012 = vst [vmem:[#allocation88_spill] sm:$0xff] %v18509_v22  ;;  %20013 = vst [vmem:[#allocation103_spill] sm:$0xff] %v18511_v19  ;;  %10642 = vmatprep.mubr.bf16.mxu0 %v9584_v25 }
 0x755   :  { %v18515_v4 = vpop.permute.xlu1 %11130  ;;  %v18517_v48 = vpop.permute.xlu0 %11136 }
 0x756   :  { %20014 = vst [vmem:[#allocation104_spill] sm:$0xff] %v18515_v4  ;;  %20015 = vst [vmem:[#allocation97_spill] sm:$0xff] %v18517_v48  ;;  %v20021_v48 = vld [vmem:[#allocation159_spill] sm:$0xff]  ;;  %v8603_v4 = vld [vmem:[#allocation3 + $0x138] sm:$0xff] }
 0x757   :  { %v9463_v19 = vsel %vm9377_vm4, %v20021_v48, %v18208_v3  ;;  %v9592_v21 = vsel %vm406_vm2, %v8603_v4, %v18197_v0 }
 0x759   :  { %10643 = vmatmul.mubr.bf16.gmra.mrb[236].mxu0 %v9460_v29  ;;  %v18522_v54 = vpop.permute.xlu1 %11134  ;;  %v18524_v12 = vpop.permute.xlu0 %11140 }
 0x75a   :  { %20017 = vst [vmem:[#allocation109_spill] sm:$0xff] %v18522_v54  ;;  %20018 = vst [vmem:[#allocation101_spill] sm:$0xff] %v18524_v12  ;;  %10650 = vmatprep.mubr.bf16.mxu0 %v9588_v43  ;;  %v20026_v12 = vld [vmem:[#allocation48_spill] sm:$0xff]  ;;  %v20028_v54 = vld [vmem:[#allocation162_spill] sm:$0xff] }
 0x75b   :  { %v9466_v3 = vsel %vm9377_vm4, %v20028_v54, %v18221_v37 }
 0x75d   :  { %v18528_v23 = vpop.permute.xlu1 %11138  ;;  %v18530_v25 = vpop.permute.xlu0 %11144 }
 0x75e   :  { %20019 = vst [vmem:[#allocation105_spill] sm:$0xff] %v18528_v23  ;;  %20020 = vst [vmem:[#allocation111_spill] sm:$0xff] %v18530_v25  ;;  %v20027_v25 = vld [vmem:[#allocation69_spill] sm:$0xff] }
 0x75f   :  { %v765_v23 = vadd.f32 %v20027_v25, %v20026_v12 }
 0x761   :  { %10651 = vmatmul.mubr.bf16.gmra.mrb[240].mxu0 %v9463_v19  ;;  %v18535_v28 = vpop.permute.xlu1 %11142  ;;  %v18537_v29 = vpop.permute.xlu0 %11148 }
 0x762   :  { %20022 = vst [vmem:[#allocation114_spill] sm:$0xff] %v18535_v28  ;;  %20023 = vst [vmem:[#allocation116_spill] sm:$0xff] %v18537_v29  ;;  %10658 = vmatprep.mubr.bf16.mxu0 %v9592_v21  ;;  %v13676_v29 = vld [vmem:[#allocation3 + $0x140] sm:$0xff]  ;;  %v8605_v28 = vld [vmem:[#allocation3 + $0x148] sm:$0xff] }
 0x763   :  { %v9596_v4 = vsel %vm406_vm2, %v13676_v29, %v18210_v10  ;;  %v20031_v21 = vld [vmem:[#allocation42_spill] sm:$0xff]  ;;  %v9600_v54 = vsel %vm406_vm2, %v8605_v28, %v18223_v62 }
 0x764   :  { %v20039_v28 = vld [vmem:[#allocation46_spill] sm:$0xff] }
 0x765   :  { %v18541_v30 = vpop.permute.xlu1 %11146  ;;  %v18543_v43 = vpop.permute.xlu0 %11152 }
 0x766   :  { %20024 = vst [vmem:[#allocation113_spill] sm:$0xff] %v18541_v30  ;;  %20025 = vst [vmem:[#allocation115_spill] sm:$0xff] %v18543_v43  ;;  %v775_v43 = vadd.f32 %v20031_v21, %v20026_v12  ;;  %v992_v30 = vmax.f32 %v765_v23, 0.0  ;;  %v20036_v23 = vld [vmem:[#allocation164_spill] sm:$0xff] }
 0x767   :  { %v9469_v21 = vsel %vm9377_vm4, %v20036_v23, %v18237_v34 }
 0x769   :  { %10659 = vmatmul.mubr.bf16.gmra.mrb[244].mxu0 %v9466_v3  ;;  %v18550_v19 = vpop.permute.xlu1 %11150  ;;  %v18552_v48 = vpop.permute.xlu0 %11156  ;;  %v996_v3 = vmax.f32 %v775_v43, 0.0 }
 0x76a   :  { %20029 = vst [vmem:[#allocation118_spill] sm:$0xff] %v18550_v19  ;;  %20030 = vst [vmem:[#allocation120_spill] sm:$0xff] %v18552_v48  ;;  %10666 = vmatprep.mubr.bf16.mxu0 %v9596_v4  ;;  %v20034_v48 = vld [vmem:[#allocation54_spill] sm:$0xff] }
 0x76b   :  { %v785_v29 = vadd.f32 %v20034_v48, %v20026_v12  ;;  %v20035_v4 = vld [vmem:[#allocation74_spill] sm:$0xff] }
 0x76c   :  { %v769_v19 = vadd.f32 %v20035_v4, %v20026_v12  ;;  %v20040_v48 = vld [vmem:[#allocation70_spill] sm:$0xff] }
 0x76d   :  { %v18558_v25 = vpop.permute.xlu1 %11154  ;;  %v11161_v22 = vpop.permute.xlu0 %11160  ;;  %v1000_v43 = vmax.f32 %v785_v29, 0.0 }
 0x76e   :  { %20032 = vst [vmem:[#allocation117_spill] sm:$0xff] %v18558_v25  ;;  %v18561_v37 = vsel %vm11548_vm5, %v992_v30, %v11161_v22  ;;  %v779_v30 = vadd.f32 %v20039_v28, %v20026_v12  ;;  %v994_v4 = vmax.f32 %v769_v19, 0.0  ;;  %v20043_v28 = vld [vmem:[#allocation60_spill] sm:$0xff] }
 0x76f   :  { %20033 = vst [vmem:[#allocation119_spill] sm:$0xff] %v18561_v37  ;;  %v795_v37 = vadd.f32 %v20040_v48, %v20026_v12  ;;  %v805_v29 = vadd.f32 %v20043_v28, %v20026_v12 }
 0x771   :  { %10667 = vmatmul.mubr.bf16.gmra.mrb[248].mxu0 %v9469_v21  ;;  %v18572_v25 = vpop.permute.xlu1 %11158  ;;  %v11165_v17 = vpop.permute.xlu0 %11164  ;;  %v998_v21 = vmax.f32 %v779_v30, 0.0 }
 0x772   :  { %20037 = vst [vmem:[#allocation122_spill] sm:$0xff] %v18572_v25  ;;  %v18575_v22 = vsel %vm11548_vm5, %v996_v3, %v11165_v17  ;;  %10674 = vmatprep.mubr.bf16.mxu0 %v9600_v54  ;;  %v20042_v17 = vld [vmem:[#allocation68_spill] sm:$0xff]  ;;  %v1004_v3 = vmax.f32 %v795_v37, 0.0  ;;  %v20047_v37 = vld [vmem:[#allocation77_spill] sm:$0xff] }
 0x773   :  { %20038 = vst [vmem:[#allocation124_spill] sm:$0xff] %v18575_v22  ;;  %v789_v54 = vadd.f32 %v20042_v17, %v20026_v12  ;;  %v20044_v22 = vld [vmem:[#allocation163_spill] sm:$0xff]  ;;  %v799_v30 = vadd.f32 %v20047_v37, %v20026_v12  ;;  %v20048_v17 = vld [vmem:[#allocation76_spill] sm:$0xff]  ;;  %v20051_v37 = vld [vmem:[#allocation98_spill] sm:$0xff] }
 0x774   :  { %v9472_v19 = vsel %vm9377_vm4, %v20044_v22, %v18247_v55  ;;  %v815_v55 = vadd.f32 %v20048_v17, %v20026_v12 }
 0x775   :  { %v11163_v26 = vpop.permute.xlu1 %11162  ;;  %v11169_v6 = vpop.permute.xlu0 %11168 }
 0x776   :  { %v18582_v34 = vsel %vm11548_vm5, %v994_v4, %v11163_v26  ;;  %v18585_v23 = vsel %vm11548_vm5, %v1000_v43, %v11169_v6  ;;  %v1002_v43 = vmax.f32 %v789_v54, 0.0  ;;  %v1008_v4 = vmax.f32 %v805_v29, 0.0  ;;  %v20052_v29 = vld [vmem:[#allocation161_spill] sm:$0xff] }
 0x777   :  { %20041 = vst [vmem:[#allocation121_spill] sm:$0xff] %v18585_v23  ;;  %v825_v54 = vadd.f32 %v20051_v37, %v20026_v12  ;;  %v9603_v17 = vsel %vm9280_vm3, %v20052_v29, %v18239_v15 }
 0x779   :  { %10675 = vmatmul.mubr.bf16.gmra.mrb[252].mxu0 %v9472_v19  ;;  %v11167_v48 = vpop.permute.xlu1 %11166  ;;  %v11173_v25 = vpop.permute.xlu0 %11172 }
 0x77a   :  { %v18595_v26 = vsel %vm11548_vm5, %v998_v21, %v11167_v48  ;;  %v18598_v6 = vsel %vm11548_vm5, %v1004_v3, %v11173_v25  ;;  %12218 = vmatprep.mubr.msk.bf16.mxu0 %vm9377_vm4, %v18239_v15  ;;  %v1006_v25 = vmax.f32 %v799_v30, 0.0  ;;  %v20050_v3 = vld [vmem:[#allocation86_spill] sm:$0xff]  ;;  %v20055_v30 = vld [vmem:[#allocation93_spill] sm:$0xff] }
 0x77b   :  { %20045 = vst [vmem:[#allocation123_spill] sm:$0xff] %v18595_v26  ;;  %20046 = vst [vmem:[#allocation126_spill] sm:$0xff] %v18598_v6  ;;  %v809_v48 = vadd.f32 %v20050_v3, %v20026_v12  ;;  %v1012_v6 = vmax.f32 %v815_v55, 0.0  ;;  %v819_v55 = vadd.f32 %v20055_v30, %v20026_v12  ;;  %v20056_v3 = vld [vmem:[#allocation84_spill] sm:$0xff] }
 0x77c   :  { %v835_v15 = vadd.f32 %v20056_v3, %v20026_v12  ;;  %v20059_v30 = vld [vmem:[#allocation100_spill] sm:$0xff] }
 0x77d   :  { %v11171_v22 = vpop.permute.xlu1 %11170  ;;  %v11177_v28 = vpop.permute.xlu0 %11176 }
 0x77e   :  { %v18607_v19 = vsel %vm11548_vm5, %v1002_v43, %v11171_v22  ;;  %v18610_v21 = vsel %vm11548_vm5, %v1008_v4, %v11177_v28  ;;  %v1010_v22 = vmax.f32 %v809_v48, 0.0  ;;  %v1016_v28 = vmax.f32 %v825_v54, 0.0  ;;  %v20060_v54 = vld [vmem:[#allocation166_spill] sm:$0xff] }
 0x77f   :  { %20049 = vst [vmem:[#allocation128_spill] sm:$0xff] %v18610_v21  ;;  %v845_v48 = vadd.f32 %v20059_v30, %v20026_v12  ;;  %v9606_v3 = vsel %vm9280_vm3, %v20060_v54, %v18260_v13 }
 0x781   :  { %10716 = vmatmul.mubr.bf16.vlgmr.msra.gmra.mrb[128].mxu0 %v9603_v17  ;;  %v11175_v23 = vpop.permute.xlu1 %11174  ;;  %v11181_v26 = vpop.permute.xlu0 %11180 }
 0x782   :  { %v18620_v43 = vsel %vm11548_vm5, %v1006_v25, %v11175_v23  ;;  %v18623_v4 = vsel %vm11548_vm5, %v1012_v6, %v11181_v26  ;;  %12219 = vmatprep.mubr.msk.bf16.mxu0 %vm9377_vm4, %v18260_v13  ;;  %v1014_v26 = vmax.f32 %v819_v55, 0.0  ;;  %v20058_v6 = vld [vmem:[#allocation106_spill] sm:$0xff] }
 0x783   :  { %20053 = vst [vmem:[#allocation125_spill] sm:$0xff] %v18620_v43  ;;  %20054 = vst [vmem:[#allocation127_spill] sm:$0xff] %v18623_v4  ;;  %v829_v25 = vadd.f32 %v20058_v6, %v20026_v12  ;;  %v1020_v4 = vmax.f32 %v835_v15, 0.0  ;;  %v20063_v55 = vld [vmem:[#allocation90_spill] sm:$0xff]  ;;  %v20064_v6 = vld [vmem:[#allocation28_spill] sm:$0xff] }
 0x784   :  { %v839_v15 = vadd.f32 %v20063_v55, %v20026_v12  ;;  %v855_v13 = vadd.f32 %v20064_v6, %v20026_v12  ;;  %v20067_v55 = vld [vmem:[#allocation34_spill] sm:$0xff] }
 0x785   :  { %v11179_v37 = vpop.permute.xlu1 %11178  ;;  %v11185_v29 = vpop.permute.xlu0 %11184 }
 0x786   :  { %v18632_v17 = vsel %vm11548_vm5, %v1010_v22, %v11179_v37  ;;  %v18635_v23 = vsel %vm11548_vm5, %v1016_v28, %v11185_v29  ;;  %v1018_v37 = vmax.f32 %v829_v25, 0.0  ;;  %v1024_v29 = vmax.f32 %v845_v48, 0.0  ;;  %v20068_v48 = vld [vmem:[#allocation168_spill] sm:$0xff] }
 0x787   :  { %20057 = vst [vmem:[#allocation130_spill] sm:$0xff] %v18635_v23  ;;  %v865_v25 = vadd.f32 %v20067_v55, %v20026_v12  ;;  %v9609_v6 = vsel %vm9280_vm3, %v20068_v48, %v18249_v53 }
 0x789   :  { %10724 = vmatmul.mubr.bf16.gmra.mrb[132].mxu0 %v9606_v3  ;;  %v11183_v21 = vpop.permute.xlu1 %11182  ;;  %v11189_v43 = vpop.permute.xlu0 %11188 }
 0x78a   :  { %v18645_v22 = vsel %vm11548_vm5, %v1014_v26, %v11183_v21  ;;  %v18648_v28 = vsel %vm11548_vm5, %v1020_v4, %v11189_v43  ;;  %12220 = vmatprep.mubr.msk.bf16.mxu0 %vm9377_vm4, %v18249_v53  ;;  %v1022_v43 = vmax.f32 %v839_v15, 0.0  ;;  %v20066_v4 = vld [vmem:[#allocation27_spill] sm:$0xff]  ;;  %v20071_v15 = vld [vmem:[#allocation112_spill] sm:$0xff] }
 0x78b   :  { %20061 = vst [vmem:[#allocation132_spill] sm:$0xff] %v18645_v22  ;;  %20062 = vst [vmem:[#allocation129_spill] sm:$0xff] %v18648_v28  ;;  %v849_v26 = vadd.f32 %v20066_v4, %v20026_v12  ;;  %v1028_v28 = vmax.f32 %v855_v13, 0.0  ;;  %v859_v13 = vadd.f32 %v20071_v15, %v20026_v12  ;;  %v20072_v4 = vld [vmem:[#allocation32_spill] sm:$0xff]  ;;  %v20075_v15 = vld [vmem:[#allocation47_spill] sm:$0xff] }
 0x78c   :  { %v875_v53 = vadd.f32 %v20072_v4, %v20026_v12 }
 0x78d   :  { %v11187_v30 = vpop.permute.xlu1 %11186  ;;  %v11193_v54 = vpop.permute.xlu0 %11192 }
 0x78e   :  { %v18657_v3 = vsel %vm11548_vm5, %v1018_v37, %v11187_v30  ;;  %v18660_v21 = vsel %vm11548_vm5, %v1024_v29, %v11193_v54  ;;  %v1026_v30 = vmax.f32 %v849_v26, 0.0  ;;  %v1032_v54 = vmax.f32 %v865_v25, 0.0  ;;  %v20076_v25 = vld [vmem:[#allocation165_spill] sm:$0xff] }
 0x78f   :  { %20065 = vst [vmem:[#allocation131_spill] sm:$0xff] %v18660_v21  ;;  %v885_v26 = vadd.f32 %v20075_v15, %v20026_v12  ;;  %v9612_v4 = vsel %vm9280_vm3, %v20076_v25, %v18272_v50 }
 0x791   :  { %10732 = vmatmul.mubr.bf16.gmra.mrb[136].mxu0 %v9609_v6  ;;  %v11191_v23 = vpop.permute.xlu1 %11190  ;;  %v11197_v22 = vpop.permute.xlu0 %11196 }
 0x792   :  { %v18670_v37 = vsel %vm11548_vm5, %v1022_v43, %v11191_v23  ;;  %v18673_v29 = vsel %vm11548_vm5, %v1028_v28, %v11197_v22  ;;  %12221 = vmatprep.mubr.msk.bf16.mxu0 %vm9377_vm4, %v18272_v50  ;;  %v1030_v22 = vmax.f32 %v859_v13, 0.0  ;;  %v20074_v28 = vld [vmem:[#allocation38_spill] sm:$0xff]  ;;  %v20079_v13 = vld [vmem:[#allocation43_spill] sm:$0xff] }
 0x793   :  { %20069 = vst [vmem:[#allocation134_spill] sm:$0xff] %v18670_v37  ;;  %20070 = vst [vmem:[#allocation136_spill] sm:$0xff] %v18673_v29  ;;  %v869_v43 = vadd.f32 %v20074_v28, %v20026_v12  ;;  %v1036_v29 = vmax.f32 %v875_v53, 0.0  ;;  %v879_v53 = vadd.f32 %v20079_v13, %v20026_v12  ;;  %v20080_v28 = vld [vmem:[#allocation52_spill] sm:$0xff] }
 0x794   :  { %v895_v50 = vadd.f32 %v20080_v28, %v20026_v12  ;;  %v20083_v13 = vld [vmem:[#allocation40_spill] sm:$0xff] }
 0x795   :  { %v11195_v55 = vpop.permute.xlu1 %11194  ;;  %v11201_v48 = vpop.permute.xlu0 %11200 }
 0x796   :  { %v18682_v6 = vsel %vm11548_vm5, %v1026_v30, %v11195_v55  ;;  %v18685_v23 = vsel %vm11548_vm5, %v1032_v54, %v11201_v48  ;;  %v1034_v55 = vmax.f32 %v869_v43, 0.0  ;;  %v1040_v48 = vmax.f32 %v885_v26, 0.0  ;;  %v20084_v26 = vld [vmem:[#allocation167_spill] sm:$0xff] }
 0x797   :  { %20073 = vst [vmem:[#allocation133_spill] sm:$0xff] %v18685_v23  ;;  %v905_v43 = vadd.f32 %v20083_v13, %v20026_v12  ;;  %v9615_v28 = vsel %vm9280_vm3, %v20084_v26, %v18262_v63 }
 0x799   :  { %10740 = vmatmul.mubr.bf16.gmra.mrb[140].mxu0 %v9612_v4  ;;  %v11199_v21 = vpop.permute.xlu1 %11198  ;;  %v11205_v37 = vpop.permute.xlu0 %11204 }
 0x79a   :  { %v18695_v30 = vsel %vm11548_vm5, %v1030_v22, %v11199_v21  ;;  %v18698_v54 = vsel %vm11548_vm5, %v1036_v29, %v11205_v37  ;;  %12222 = vmatprep.mubr.msk.bf16.mxu0 %vm9377_vm4, %v18262_v63  ;;  %v1038_v37 = vmax.f32 %v879_v53, 0.0  ;;  %v20082_v29 = vld [vmem:[#allocation31_spill] sm:$0xff] }
 0x79b   :  { %20077 = vst [vmem:[#allocation135_spill] sm:$0xff] %v18695_v30  ;;  %20078 = vst [vmem:[#allocation138_spill] sm:$0xff] %v18698_v54  ;;  %v889_v22 = vadd.f32 %v20082_v29, %v20026_v12  ;;  %v1044_v54 = vmax.f32 %v895_v50, 0.0  ;;  %v20086_v50 = vld [vmem:[#allocation35_spill] sm:$0xff]  ;;  %v20087_v29 = vld [vmem:[#allocation50_spill] sm:$0xff] }
 0x79c   :  { %v915_v63 = vadd.f32 %v20087_v29, %v20026_v12 }
 0x79d   :  { %v11203_v15 = vpop.permute.xlu1 %11202  ;;  %v11209_v25 = vpop.permute.xlu0 %11208  ;;  %v1042_v53 = vmax.f32 %v889_v22, 0.0 }
 0x79e   :  { %v18707_v4 = vsel %vm11548_vm5, %v1034_v55, %v11203_v15  ;;  %v18710_v21 = vsel %vm11548_vm5, %v1040_v48, %v11209_v25  ;;  %v899_v15 = vadd.f32 %v20086_v50, %v20026_v12  ;;  %v1048_v25 = vmax.f32 %v905_v43, 0.0 }
 0x79f   :  { %20081 = vst [vmem:[#allocation140_spill] sm:$0xff] %v18710_v21  ;;  %v1052_v22 = vmax.f32 %v915_v63, 0.0 }
 0x7a1   :  { %10748 = vmatmul.mubr.bf16.gmra.mrb[144].mxu0 %v9615_v28  ;;  %v11207_v23 = vpop.permute.xlu1 %11206  ;;  %v11213_v30 = vpop.permute.xlu0 %11212 }
 0x7a2   :  { %v18720_v55 = vsel %vm11548_vm5, %v1038_v37, %v11207_v23  ;;  %v18723_v48 = vsel %vm11548_vm5, %v1044_v54, %v11213_v30  ;;  %12223 = vmatprep.mubr.msk.bf16.mxu0 %vm9377_vm4, %v18285_v51  ;;  %v1046_v30 = vmax.f32 %v899_v15, 0.0  ;;  %v20088_v54 = vld [vmem:[#allocation45_spill] sm:$0xff] }
 0x7a3   :  { %20085 = vst [vmem:[#allocation137_spill] sm:$0xff] %v18723_v48  ;;  %v909_v37 = vadd.f32 %v20088_v54, %v20026_v12  ;;  %v20089_v48 = vld [vmem:[#allocation170_spill] sm:$0xff] }
 0x7a4   :  { %v9618_v43 = vsel %vm9280_vm3, %v20089_v48, %v18285_v51  ;;  %v20091_v48 = vld [vmem:[#allocation172_spill] sm:$0xff] }
 0x7a5   :  { %v11211_v13 = vpop.permute.xlu1 %11210  ;;  %v11217_v26 = vpop.permute.xlu0 %11216  ;;  %v1050_v15 = vmax.f32 %v909_v37, 0.0  ;;  %v20092_v37 = vld [vmem:[#allocation169_spill] sm:$0xff] }
 0x7a6   :  { %v18732_v28 = vsel %vm11548_vm5, %v1042_v53, %v11211_v13  ;;  %v18735_v23 = vsel %vm11548_vm5, %v1048_v25, %v11217_v26  ;;  %v20090_v25 = vld [vmem:[#allocation58_spill] sm:$0xff] }
 0x7a7   :  { %v919_v63 = vadd.f32 %v20090_v25, %v20026_v12 }
 0x7a9   :  { %10756 = vmatmul.mubr.bf16.gmra.mrb[148].mxu0 %v9618_v43  ;;  %v11215_v50 = vpop.permute.xlu1 %11214  ;;  %v11221_v29 = vpop.permute.xlu0 %11220  ;;  %v1054_v51 = vmax.f32 %v919_v63, 0.0  ;;  %v9624_v43 = vsel %vm9280_vm3, %v20092_v37, %v18297_v52 }
 0x7aa   :  { %v18743_v21 = vsel %vm11548_vm5, %v1046_v30, %v11215_v50  ;;  %v18746_v53 = vsel %vm11548_vm5, %v1052_v22, %v11221_v29  ;;  %12224 = vmatprep.mubr.msk.bf16.mxu0 %vm9377_vm4, %v18274_v27  ;;  %v9621_v30 = vsel %vm9280_vm3, %v20091_v48, %v18274_v27  ;;  %v20093_v50 = vld [vmem:[#allocation171_spill] sm:$0xff]  ;;  %v20094_v29 = vld [vmem:[#allocation174_spill] sm:$0xff] }
 0x7ab   :  { %v9627_v27 = vsel %vm9280_vm3, %v20093_v50, %v18287_v35 }
 0x7ad   :  { %v11219_v13 = vpop.permute.xlu1 %11218 }
 0x7ae   :  { %v18753_v26 = vsel %vm11548_vm5, %v1050_v15, %v11219_v13  ;;  %v9630_v15 = vsel %vm9280_vm3, %v20094_v29, %v18310_v24 }
 0x7b1   :  { %10764 = vmatmul.mubr.bf16.gmra.mrb[152].mxu0 %v9621_v30  ;;  %v11223_v54 = vpop.permute.xlu1 %11222 }
 0x7b2   :  { %v18759_v22 = vsel %vm11548_vm5, %v1054_v51, %v11223_v54  ;;  %12225 = vmatprep.mubr.msk.bf16.mxu0 %vm9377_vm4, %v18297_v52  ;;  %v20095_v52 = vld [vmem:[#allocation176_spill] sm:$0xff] }
 0x7b3   :  { %v9633_v25 = vsel %vm9280_vm3, %v20095_v52, %v18299_v36  ;;  %v9684_v52 = vsel %vm9280_vm3, %v18171_v33, %v18427_v45  ;;  %v9687_v33 = vsel %vm9280_vm3, %v18184_v32, %v18416_v41 }
 0x7b9   :  { %10772 = vmatmul.mubr.bf16.gmra.mrb[156].mxu0 %v9624_v43 }
 0x7ba   :  { %12226 = vmatprep.mubr.msk.bf16.mxu0 %vm9377_vm4, %v18287_v35  ;;  %v20096_v35 = vld [vmem:[#allocation173_spill] sm:$0xff] }
 0x7bb   :  { %v9636_v63 = vsel %vm9280_vm3, %v20096_v35, %v18323_v31 }
 0x7c1   :  { %10780 = vmatmul.mubr.bf16.gmra.mrb[160].mxu0 %v9627_v27  ;;  %v20105_v27 = vld [vmem:[#allocation73_spill] sm:$0xff] }
 0x7c2   :  { %12227 = vmatprep.mubr.msk.bf16.mxu0 %vm9377_vm4, %v18310_v24  ;;  %v20097_v24 = vld [vmem:[#allocation175_spill] sm:$0xff] }
 0x7c3   :  { %v9639_v13 = vsel %vm9280_vm3, %v20097_v24, %v18312_v20 }
 0x7c9   :  { %10788 = vmatmul.mubr.bf16.gmra.mrb[164].mxu0 %v9630_v15 }
 0x7ca   :  { %12228 = vmatprep.mubr.msk.bf16.mxu0 %vm9377_vm4, %v18299_v36  ;;  %v20098_v36 = vld [vmem:[#allocation178_spill] sm:$0xff] }
 0x7cb   :  { %v9642_v51 = vsel %vm9280_vm3, %v20098_v36, %v18336_v8 }
 0x7d1   :  { %10796 = vmatmul.mubr.bf16.gmra.mrb[168].mxu0 %v9633_v25 }
 0x7d2   :  { %12229 = vmatprep.mubr.msk.bf16.mxu0 %vm9377_vm4, %v18323_v31  ;;  %v20099_v31 = vld [vmem:[#allocation180_spill] sm:$0xff] }
 0x7d3   :  { %v9645_v48 = vsel %vm9280_vm3, %v20099_v31, %v18325_v42  ;;  %v20107_v31 = vld [vmem:[#allocation81_spill] sm:$0xff] }
 0x7d4   :  { %v9690_v32 = vsel %vm9280_vm3, %v18197_v0, %v20107_v31 }
 0x7d9   :  { %10804 = vmatmul.mubr.bf16.gmra.mrb[172].mxu0 %v9636_v63 }
 0x7da   :  { %12230 = vmatprep.mubr.msk.bf16.mxu0 %vm9377_vm4, %v18312_v20  ;;  %v20100_v20 = vld [vmem:[#allocation177_spill] sm:$0xff] }
 0x7db   :  { %v9648_v30 = vsel %vm9280_vm3, %v20100_v20, %v18349_v39 }
 0x7e1   :  { %10812 = vmatmul.mubr.bf16.gmra.mrb[176].mxu0 %v9639_v13 }
 0x7e2   :  { %12231 = vmatprep.mubr.msk.bf16.mxu0 %vm9377_vm4, %v18336_v8  ;;  %v20101_v8 = vld [vmem:[#allocation182_spill] sm:$0xff] }
 0x7e3   :  { %v9651_v54 = vsel %vm9280_vm3, %v20101_v8, %v18338_v47 }
 0x7e9   :  { %10820 = vmatmul.mubr.bf16.gmra.mrb[180].mxu0 %v9642_v51 }
 0x7ea   :  { %12232 = vmatprep.mubr.msk.bf16.mxu0 %vm9377_vm4, %v18325_v42  ;;  %v20102_v42 = vld [vmem:[#allocation184_spill] sm:$0xff] }
 0x7eb   :  { %v9654_v37 = vsel %vm9280_vm3, %v20102_v42, %v18362_v57 }
 0x7f1   :  { %10828 = vmatmul.mubr.bf16.gmra.mrb[184].mxu0 %v9645_v48 }
 0x7f2   :  { %12233 = vmatprep.mubr.msk.bf16.mxu0 %vm9377_vm4, %v18349_v39  ;;  %v20103_v39 = vld [vmem:[#allocation181_spill] sm:$0xff] }
 0x7f3   :  { %v9657_v43 = vsel %vm9280_vm3, %v20103_v39, %v18351_v2  ;;  %v20108_v39 = vld [vmem:[#allocation80_spill] sm:$0xff] }
 0x7f4   :  { %v9693_v0 = vsel %vm9280_vm3, %v18210_v10, %v20108_v39  ;;  %v9696_v10 = vsel %vm9280_vm3, %v18223_v62, %v18453_v1 }
 0x7f9   :  { %10836 = vmatmul.mubr.bf16.gmra.mrb[188].mxu0 %v9648_v30 }
 0x7fa   :  { %12234 = vmatprep.mubr.msk.bf16.mxu0 %vm9377_vm4, %v18338_v47  ;;  %v20104_v47 = vld [vmem:[#allocation183_spill] sm:$0xff] }
 0x7fb   :  { %v9660_v50 = vsel %vm9280_vm3, %v20104_v47, %v18375_v9 }
 0x801   :  { %10844 = vmatmul.mubr.bf16.gmra.mrb[192].mxu0 %v9651_v54 }
 0x802   :  { %12235 = vmatprep.mubr.msk.bf16.mxu0 %vm9377_vm4, %v18362_v57  ;;  %v9663_v57 = vsel %vm9280_vm3, %v18079_v60, %v18364_v61  ;;  %v9672_v60 = vsel %vm9280_vm3, %v18118_v16, %v18401_v49 }
 0x809   :  { %10852 = vmatmul.mubr.bf16.gmra.mrb[196].mxu0 %v9654_v37 }
 0x80a   :  { %12236 = vmatprep.mubr.msk.bf16.mxu0 %vm9377_vm4, %v18351_v2  ;;  %v9666_v2 = vsel %vm9280_vm3, %v18092_v59, %v18388_v58  ;;  %v9675_v59 = vsel %vm9280_vm3, %v18131_v11, %v18390_v38  ;;  %v18863_v11 = vld [vmem:[#allocation18] ss:$0 sm:$0xff] }
 0x811   :  { %10860 = vmatmul.mubr.bf16.gmra.mrb[200].mxu0 %v9657_v43 }
 0x812   :  { %12237 = vmatprep.mubr.msk.bf16.mxu0 %vm9377_vm4, %v18375_v9  ;;  %v9669_v9 = vsel %vm9280_vm3, %v18105_v18, %v20105_v27  ;;  %v9678_v18 = vsel %vm9280_vm3, %v18145_v40, %v18414_v56 }
 0x819   :  { %10868 = vmatmul.mubr.bf16.gmra.mrb[204].mxu0 %v9660_v50 }
 0x81a   :  { %12238 = vmatprep.mubr.msk.bf16.mxu0 %vm9377_vm4, %v18364_v61  ;;  %v20106_v61 = vld [vmem:[#allocation64_spill] sm:$0xff] }
 0x81b   :  { %v9681_v16 = vsel %vm9280_vm3, %v18158_v46, %v20106_v61 }
 0x821   :  { %10876 = vmatmul.mubr.bf16.gmra.mrb[208].mxu0 %v9663_v57 }
 0x822   :  { %12239 = vmatprep.mubr.msk.bf16.mxu0 %vm9377_vm4, %v18388_v58 }
 0x829   :  { %10884 = vmatmul.mubr.bf16.gmra.mrb[212].mxu0 %v9666_v2 }
 0x82a   :  { %12240 = vmatprep.mubr.msk.bf16.mxu0 %vm9377_vm4, %v20105_v27 }
 0x831   :  { %10892 = vmatmul.mubr.bf16.gmra.mrb[216].mxu0 %v9669_v9 }
 0x832   :  { %12241 = vmatprep.mubr.msk.bf16.mxu0 %vm9377_vm4, %v18401_v49 }
 0x839   :  { %10900 = vmatmul.mubr.bf16.gmra.mrb[220].mxu0 %v9672_v60 }
 0x83a   :  { %12242 = vmatprep.mubr.msk.bf16.mxu0 %vm9377_vm4, %v18390_v38 }
 0x841   :  { %10908 = vmatmul.mubr.bf16.gmra.mrb[224].mxu0 %v9675_v59 }
 0x842   :  { %12243 = vmatprep.mubr.msk.bf16.mxu0 %vm9377_vm4, %v18414_v56 }
 0x849   :  { %10916 = vmatmul.mubr.bf16.gmra.mrb[228].mxu0 %v9678_v18 }
 0x84a   :  { %12244 = vmatprep.mubr.msk.bf16.mxu0 %vm9377_vm4, %v20106_v61 }
 0x851   :  { %10924 = vmatmul.mubr.bf16.gmra.mrb[232].mxu0 %v9681_v16 }
 0x852   :  { %12245 = vmatprep.mubr.msk.bf16.mxu0 %vm9377_vm4, %v18427_v45 }
 0x854   :  { %v10717_v38 = vpop.f32.mrb[128].mxu0 }
 0x855   :  { %v12599_v58 = vadd.f32 %v18863_v11, %v10717_v38  ;;  %v10719_v49 = vpop.f32.mrb[129].mxu0 }
 0x856   :  { %v10720_v29 = vpop.f32.mrb[130].mxu0 }
 0x857   :  { %v10972_v40 = vmax.f32 %v12599_v58, 0.0  ;;  %v12600_v56 = vadd.f32 %v18863_v11, %v10720_v29  ;;  %v10722_v15 = vpop.f32.mrb[131].mxu0 }
 0x859   :  { %v10973_v46 = vmax.f32 %v12600_v56, 0.0  ;;  %10932 = vmatmul.mubr.bf16.gmra.mrb[236].mxu0 %v9684_v52  ;;  %11356 = vrot.lane.b32.xlu0 %v10972_v40, %s13927_s3 }
 0x85a   :  { %12246 = vmatprep.mubr.msk.bf16.mxu0 %vm9377_vm4, %v18416_v41 }
 0x85b   :  { %11358 = vrot.lane.b32.xlu1 %v10973_v46, %s13927_s3 }
 0x85c   :  { %v10725_v25 = vpop.f32.mrb[132].mxu0 }
 0x85d   :  { %v12601_v35 = vadd.f32 %v18863_v11, %v10725_v25  ;;  %v10727_v63 = vpop.f32.mrb[133].mxu0 }
 0x85e   :  { %v10728_v24 = vpop.f32.mrb[134].mxu0 }
 0x85f   :  { %v10974_v13 = vmax.f32 %v12601_v35, 0.0  ;;  %v12602_v36 = vadd.f32 %v18863_v11, %v10728_v24  ;;  %v10730_v51 = vpop.f32.mrb[135].mxu0 }
 0x861   :  { %v10975_v45 = vmax.f32 %v12602_v36, 0.0  ;;  %10940 = vmatmul.mubr.bf16.gmra.mrb[240].mxu0 %v9687_v33  ;;  %11360 = vrot.lane.b32.xlu0 %v10974_v13, %s13927_s3 }
 0x862   :  { %12247 = vmatprep.mubr.msk.bf16.mxu0 %vm9377_vm4, %v20107_v31 }
 0x863   :  { %11362 = vrot.lane.b32.xlu1 %v10975_v45, %s13927_s3 }
 0x864   :  { %v10733_v48 = vpop.f32.mrb[136].mxu0 }
 0x865   :  { %v12603_v20 = vadd.f32 %v18863_v11, %v10733_v48  ;;  %v10735_v30 = vpop.f32.mrb[137].mxu0 }
 0x866   :  { %v10736_v8 = vpop.f32.mrb[138].mxu0 }
 0x867   :  { %v10976_v54 = vmax.f32 %v12603_v20, 0.0  ;;  %v12604_v42 = vadd.f32 %v18863_v11, %v10736_v8  ;;  %v10738_v37 = vpop.f32.mrb[139].mxu0 }
 0x869   :  { %v10977_v41 = vmax.f32 %v12604_v42, 0.0  ;;  %10948 = vmatmul.mubr.bf16.gmra.mrb[244].mxu0 %v9690_v32  ;;  %11364 = vrot.lane.b32.xlu0 %v10976_v54, %s13927_s3 }
 0x86a   :  { %12248 = vmatprep.mubr.msk.bf16.mxu0 %vm9377_vm4, %v20108_v39 }
 0x86b   :  { %11366 = vrot.lane.b32.xlu1 %v10977_v41, %s13927_s3 }
 0x86c   :  { %v10741_v43 = vpop.f32.mrb[140].mxu0 }
 0x86d   :  { %v12605_v47 = vadd.f32 %v18863_v11, %v10741_v43  ;;  %v10743_v50 = vpop.f32.mrb[141].mxu0 }
 0x86e   :  { %v10744_v57 = vpop.f32.mrb[142].mxu0 }
 0x86f   :  { %v10978_v2 = vmax.f32 %v12605_v47, 0.0  ;;  %v12606_v27 = vadd.f32 %v18863_v11, %v10744_v57  ;;  %v10746_v9 = vpop.f32.mrb[143].mxu0 }
 0x871   :  { %v10979_v60 = vmax.f32 %v12606_v27, 0.0  ;;  %10956 = vmatmul.mubr.bf16.gmra.mrb[248].mxu0 %v9693_v0  ;;  %11368 = vrot.lane.b32.xlu0 %v10978_v2, %s13927_s3 }
 0x872   :  { %12249 = vmatprep.mubr.msk.bf16.mxu0 %vm9377_vm4, %v18453_v1 }
 0x873   :  { %11370 = vrot.lane.b32.xlu1 %v10979_v60, %s13927_s3 }
 0x874   :  { %v10749_v59 = vpop.f32.mrb[144].mxu0 }
 0x875   :  { %v12607_v18 = vadd.f32 %v18863_v11, %v10749_v59  ;;  %v10751_v61 = vpop.f32.mrb[145].mxu0 }
 0x876   :  { %v10752_v16 = vpop.f32.mrb[146].mxu0 }
 0x877   :  { %v10980_v38 = vmax.f32 %v12607_v18, 0.0  ;;  %v12608_v58 = vadd.f32 %v18863_v11, %v10752_v16  ;;  %v10754_v49 = vpop.f32.mrb[147].mxu0 }
 0x879   :  { %v10981_v29 = vmax.f32 %v12608_v58, 0.0  ;;  %10964 = vmatmul.mubr.bf16.gmra.mrb[252].mxu0 %v9696_v10  ;;  %11372 = vrot.lane.b32.xlu0 %v10980_v38, %s13927_s3 }
 0x87b   :  { %11374 = vrot.lane.b32.xlu1 %v10981_v29, %s13927_s3 }
 0x87c   :  { %v10757_v40 = vpop.f32.mrb[148].mxu0 }
 0x87d   :  { %v12609_v56 = vadd.f32 %v18863_v11, %v10757_v40  ;;  %v10759_v15 = vpop.f32.mrb[149].mxu0 }
 0x87e   :  { %v10760_v52 = vpop.f32.mrb[150].mxu0 }
 0x87f   :  { %v10982_v46 = vmax.f32 %v12609_v56, 0.0  ;;  %v12610_v25 = vadd.f32 %v18863_v11, %v10760_v52  ;;  %v10762_v35 = vpop.f32.mrb[151].mxu0 }
 0x881   :  { %v10983_v63 = vmax.f32 %v12610_v25, 0.0  ;;  %11376 = vrot.lane.b32.xlu0 %v10982_v46, %s13927_s3 }
 0x883   :  { %11378 = vrot.lane.b32.xlu1 %v10983_v63, %s13927_s3 }
 0x884   :  { %v10765_v62 = vpop.f32.mrb[152].mxu0 }
 0x885   :  { %v12611_v1 = vadd.f32 %v18863_v11, %v10765_v62  ;;  %v10767_v24 = vpop.f32.mrb[153].mxu0 }
 0x886   :  { %v10768_v13 = vpop.f32.mrb[154].mxu0 }
 0x887   :  { %v10984_v36 = vmax.f32 %v12611_v1, 0.0  ;;  %v12612_v51 = vadd.f32 %v18863_v11, %v10768_v13  ;;  %v10770_v33 = vpop.f32.mrb[155].mxu0 }
 0x889   :  { %v10985_v45 = vmax.f32 %v12612_v51, 0.0  ;;  %11380 = vrot.lane.b32.xlu0 %v10984_v36, %s13927_s3 }
 0x88b   :  { %11382 = vrot.lane.b32.xlu1 %v10985_v45, %s13927_s3 }
 0x88c   :  { %v10773_v31 = vpop.f32.mrb[156].mxu0 }
 0x88d   :  { %v12613_v48 = vadd.f32 %v18863_v11, %v10773_v31  ;;  %v10775_v20 = vpop.f32.mrb[157].mxu0 }
 0x88e   :  { %v10776_v30 = vpop.f32.mrb[158].mxu0 }
 0x88f   :  { %v10986_v8 = vmax.f32 %v12613_v48, 0.0  ;;  %v12614_v54 = vadd.f32 %v18863_v11, %v10776_v30  ;;  %v10778_v42 = vpop.f32.mrb[159].mxu0 }
 0x891   :  { %v10987_v37 = vmax.f32 %v12614_v54, 0.0  ;;  %11384 = vrot.lane.b32.xlu0 %v10986_v8, %s13927_s3 }
 0x893   :  { %11386 = vrot.lane.b32.xlu1 %v10987_v37, %s13927_s3 }
 0x894   :  { %v10781_v32 = vpop.f32.mrb[160].mxu0 }
 0x895   :  { %v12615_v41 = vadd.f32 %v18863_v11, %v10781_v32  ;;  %v10783_v39 = vpop.f32.mrb[161].mxu0 }
 0x896   :  { %v10784_v43 = vpop.f32.mrb[162].mxu0 }
 0x897   :  { %v10988_v47 = vmax.f32 %v12615_v41, 0.0  ;;  %v12616_v50 = vadd.f32 %v18863_v11, %v10784_v43  ;;  %v10786_v57 = vpop.f32.mrb[163].mxu0 }
 0x899   :  { %v10989_v2 = vmax.f32 %v12616_v50, 0.0  ;;  %11388 = vrot.lane.b32.xlu0 %v10988_v47, %s13927_s3  ;;  %v20109_v47 = vld [vmem:[#allocation53_spill] sm:$0xff] }
 0x89a   :  { %v615_v50 = vadd.f32 %v20109_v47, %v20026_v12 }
 0x89b   :  { %11390 = vrot.lane.b32.xlu1 %v10989_v2, %s13927_s3 }
 0x89c   :  { %v10789_v27 = vpop.f32.mrb[164].mxu0 }
 0x89d   :  { %v12617_v9 = vadd.f32 %v18863_v11, %v10789_v27  ;;  %v10791_v0 = vpop.f32.mrb[165].mxu0 }
 0x89e   :  { %v10792_v60 = vpop.f32.mrb[166].mxu0 }
 0x89f   :  { %v10990_v59 = vmax.f32 %v12617_v9, 0.0  ;;  %v12618_v18 = vadd.f32 %v18863_v11, %v10792_v60  ;;  %v10794_v61 = vpop.f32.mrb[167].mxu0  ;;  %v20110_v9 = vld [vmem:[#allocation61_spill] sm:$0xff]  ;;  %v18949_v60 = vpop.permute.xlu0 %11224 }
 0x8a0   :  { %v619_v0 = vadd.f32 %v20110_v9, %v20026_v12 }
 0x8a1   :  { %v10991_v16 = vmax.f32 %v12618_v18, 0.0  ;;  %11392 = vrot.lane.b32.xlu0 %v10990_v59, %s13927_s3 }
 0x8a3   :  { %11394 = vrot.lane.b32.xlu1 %v10991_v16, %s13927_s3  ;;  %v932_v16 = vmax.f32 %v615_v50, 0.0  ;;  %v20115_v50 = vld [vmem:[#allocation82_spill] sm:$0xff] }
 0x8a4   :  { %v10797_v38 = vpop.f32.mrb[168].mxu0 }
 0x8a5   :  { %v12619_v58 = vadd.f32 %v18863_v11, %v10797_v38  ;;  %v10799_v49 = vpop.f32.mrb[169].mxu0  ;;  %v18952_v38 = vpop.permute.xlu1 %11226 }
 0x8a6   :  { %v10800_v10 = vpop.f32.mrb[170].mxu0  ;;  %v934_v49 = vmax.f32 %v619_v0, 0.0 }
 0x8a7   :  { %v10992_v29 = vmax.f32 %v12619_v58, 0.0  ;;  %v12620_v40 = vadd.f32 %v18863_v11, %v10800_v10  ;;  %v10802_v56 = vpop.f32.mrb[171].mxu0  ;;  %v20111_v10 = vld [vmem:[#allocation79_spill] sm:$0xff] }
 0x8a9   :  { %v10993_v15 = vmax.f32 %v12620_v40, 0.0  ;;  %11396 = vrot.lane.b32.xlu0 %v10992_v29, %s13927_s3  ;;  %v11549_v29 = vsel %vm11548_vm5, %v932_v16, %v20111_v10 }
 0x8ab   :  { %11398 = vrot.lane.b32.xlu1 %v10993_v15, %s13927_s3 }
 0x8ac   :  { %v10805_v52 = vpop.f32.mrb[172].mxu0 }
 0x8ad   :  { %v12621_v46 = vadd.f32 %v18863_v11, %v10805_v52  ;;  %v10807_v25 = vpop.f32.mrb[173].mxu0  ;;  %v20112_v52 = vld [vmem:[#allocation62_spill] sm:$0xff] }
 0x8ae   :  { %v10808_v35 = vpop.f32.mrb[174].mxu0  ;;  %v11550_v25 = vsel %vm11548_vm5, %v934_v49, %v18464_v44  ;;  %v20116_v49 = vld [vmem:[#allocation75_spill] sm:$0xff] }
 0x8af   :  { %v10994_v63 = vmax.f32 %v12621_v46, 0.0  ;;  %v12622_v62 = vadd.f32 %v18863_v11, %v10808_v35  ;;  %v10810_v1 = vpop.f32.mrb[175].mxu0  ;;  %v625_v46 = vadd.f32 %v20112_v52, %v20026_v12  ;;  %v645_v10 = vadd.f32 %v20116_v49, %v20026_v12 }
 0x8b1   :  { %v10995_v24 = vmax.f32 %v12622_v62, 0.0  ;;  %11400 = vrot.lane.b32.xlu0 %v10994_v63, %s13927_s3 }
 0x8b3   :  { %11402 = vrot.lane.b32.xlu1 %v10995_v24, %s13927_s3 }
 0x8b4   :  { %v10813_v13 = vpop.f32.mrb[176].mxu0 }
 0x8b5   :  { %v12623_v36 = vadd.f32 %v18863_v11, %v10813_v13  ;;  %v10815_v51 = vpop.f32.mrb[177].mxu0  ;;  %v20113_v13 = vld [vmem:[#allocation67_spill] sm:$0xff] }
 0x8b6   :  { %v10816_v33 = vpop.f32.mrb[178].mxu0 }
 0x8b7   :  { %v10996_v45 = vmax.f32 %v12623_v36, 0.0  ;;  %v12624_v31 = vadd.f32 %v18863_v11, %v10816_v33  ;;  %v10818_v48 = vpop.f32.mrb[179].mxu0  ;;  %v629_v36 = vadd.f32 %v20113_v13, %v20026_v12 }
 0x8b9   :  { %v10997_v20 = vmax.f32 %v12624_v31, 0.0  ;;  %11404 = vrot.lane.b32.xlu0 %v10996_v45, %s13927_s3  ;;  %v936_v31 = vmax.f32 %v625_v46, 0.0  ;;  %v938_v44 = vmax.f32 %v629_v36, 0.0 }
 0x8bb   :  { %11406 = vrot.lane.b32.xlu1 %v10997_v20, %s13927_s3  ;;  %v11551_v20 = vsel %vm11548_vm5, %v936_v31, %v18455_v14 }
 0x8bc   :  { %v10821_v30 = vpop.f32.mrb[180].mxu0 }
 0x8bd   :  { %v12625_v8 = vadd.f32 %v18863_v11, %v10821_v30  ;;  %v10823_v54 = vpop.f32.mrb[181].mxu0 }
 0x8be   :  { %v10824_v42 = vpop.f32.mrb[182].mxu0 }
 0x8bf   :  { %v10998_v37 = vmax.f32 %v12625_v8, 0.0  ;;  %v12626_v32 = vadd.f32 %v18863_v11, %v10824_v42  ;;  %v10826_v41 = vpop.f32.mrb[183].mxu0  ;;  %v20114_v42 = vld [vmem:[#allocation72_spill] sm:$0xff] }
 0x8c1   :  { %v10999_v39 = vmax.f32 %v12626_v32, 0.0  ;;  %11408 = vrot.lane.b32.xlu0 %v10998_v37, %s13927_s3  ;;  %v635_v37 = vadd.f32 %v20114_v42, %v20026_v12  ;;  %v11552_v32 = vsel %vm11548_vm5, %v938_v44, %v18474_v7  ;;  %v20120_v44 = vld [vmem:[#allocation85_spill] sm:$0xff] }
 0x8c3   :  { %11410 = vrot.lane.b32.xlu1 %v10999_v39, %s13927_s3  ;;  %v940_v0 = vmax.f32 %v635_v37, 0.0 }
 0x8c4   :  { %v10829_v43 = vpop.f32.mrb[184].mxu0 }
 0x8c5   :  { %v12627_v57 = vadd.f32 %v18863_v11, %v10829_v43  ;;  %v10831_v2 = vpop.f32.mrb[185].mxu0 }
 0x8c6   :  { %v10832_v27 = vpop.f32.mrb[186].mxu0 }
 0x8c7   :  { %v11000_v59 = vmax.f32 %v12627_v57, 0.0  ;;  %v12628_v18 = vadd.f32 %v18863_v11, %v10832_v27  ;;  %v10834_v61 = vpop.f32.mrb[187].mxu0  ;;  %v639_v57 = vadd.f32 %v20115_v50, %v20026_v12 }
 0x8c9   :  { %v11001_v58 = vmax.f32 %v12628_v18, 0.0  ;;  %11412 = vrot.lane.b32.xlu0 %v11000_v59, %s13927_s3  ;;  %v942_v7 = vmax.f32 %v639_v57, 0.0  ;;  %v11553_v18 = vsel %vm11548_vm5, %v940_v0, %v18466_v5 }
 0x8cb   :  { %11414 = vrot.lane.b32.xlu1 %v11001_v58, %s13927_s3  ;;  %v11357_v40 = vpop.permute.xlu0 %11356 }
 0x8cc   :  { %v11614_v56 = vsel %vm11613_vm6, %v11549_v29, %v11357_v40  ;;  %v10837_v15 = vpop.f32.mrb[188].mxu0  ;;  %v20117_v29 = vld [vmem:[#allocation87_spill] sm:$0xff] }
 0x8cd   :  { %11678 = vst [vmem:[#allocation19] sm:$0xff] %v11614_v56  ;;  %v12629_v35 = vadd.f32 %v18863_v11, %v10837_v15  ;;  %v10839_v63 = vpop.f32.mrb[189].mxu0  ;;  %v11359_v62 = vpop.permute.xlu1 %11358  ;;  %v11554_v40 = vsel %vm11548_vm5, %v942_v7, %v20117_v29 }
 0x8ce   :  { %v11615_v1 = vsel %vm11613_vm6, %v11550_v25, %v11359_v62  ;;  %v10840_v24 = vpop.f32.mrb[190].mxu0  ;;  %v20118_v25 = vld [vmem:[#allocation66_spill] sm:$0xff] }
 0x8cf   :  { %v11002_v51 = vmax.f32 %v12629_v35, 0.0  ;;  %11679 = vst [vmem:[#allocation19 + $0x8] sm:$0xff] %v11615_v1  ;;  %v12630_v33 = vadd.f32 %v18863_v11, %v10840_v24  ;;  %v10842_v45 = vpop.f32.mrb[191].mxu0  ;;  %v649_v35 = vadd.f32 %v20118_v25, %v20026_v12  ;;  %v944_v24 = vmax.f32 %v645_v10, 0.0 }
 0x8d1   :  { %v11003_v48 = vmax.f32 %v12630_v33, 0.0  ;;  %11416 = vrot.lane.b32.xlu0 %v11002_v51, %s13927_s3  ;;  %v946_v36 = vmax.f32 %v649_v35, 0.0  ;;  %v20119_v51 = vld [vmem:[#allocation83_spill] sm:$0xff] }
 0x8d2   :  { %v11555_v33 = vsel %vm11548_vm5, %v944_v24, %v20119_v51  ;;  %v20127_v24 = vld [vmem:[#allocation78_spill] sm:$0xff] }
 0x8d3   :  { %11418 = vrot.lane.b32.xlu1 %v11003_v48, %s13927_s3  ;;  %v11361_v30 = vpop.permute.xlu0 %11360 }
 0x8d4   :  { %v11616_v8 = vsel %vm11613_vm6, %v11551_v20, %v11361_v30  ;;  %v10845_v54 = vpop.f32.mrb[192].mxu0  ;;  %v655_v20 = vadd.f32 %v20120_v44, %v20026_v12  ;;  %v20121_v30 = vld [vmem:[#allocation71_spill] sm:$0xff] }
 0x8d5   :  { %11680 = vst [vmem:[#allocation19 + $0x10] sm:$0xff] %v11616_v8  ;;  %v12631_v41 = vadd.f32 %v18863_v11, %v10845_v54  ;;  %v10847_v39 = vpop.f32.mrb[193].mxu0  ;;  %v11363_v43 = vpop.permute.xlu1 %11362  ;;  %v11556_v8 = vsel %vm11548_vm5, %v946_v36, %v20121_v30 }
 0x8d6   :  { %v11617_v47 = vsel %vm11613_vm6, %v11552_v32, %v11363_v43  ;;  %v10848_v14 = vpop.f32.mrb[194].mxu0  ;;  %v20122_v39 = vld [vmem:[#allocation91_spill] sm:$0xff]  ;;  %v948_v57 = vmax.f32 %v655_v20, 0.0 }
 0x8d7   :  { %v11004_v2 = vmax.f32 %v12631_v41, 0.0  ;;  %11681 = vst [vmem:[#allocation19 + $0x18] sm:$0xff] %v11617_v47  ;;  %v12632_v27 = vadd.f32 %v18863_v11, %v10848_v14  ;;  %v10850_v9 = vpop.f32.mrb[195].mxu0  ;;  %v659_v43 = vadd.f32 %v20122_v39, %v20026_v12 }
 0x8d8   :  { %v20123_v9 = vld [vmem:[#allocation89_spill] sm:$0xff] }
 0x8d9   :  { %v11005_v59 = vmax.f32 %v12632_v27, 0.0  ;;  %11420 = vrot.lane.b32.xlu0 %v11004_v2, %s13927_s3  ;;  %v950_v27 = vmax.f32 %v659_v43, 0.0  ;;  %v11557_v0 = vsel %vm11548_vm5, %v948_v57, %v20123_v9  ;;  %v20131_v57 = vld [vmem:[#allocation95_spill] sm:$0xff] }
 0x8db   :  { %11422 = vrot.lane.b32.xlu1 %v11005_v59, %s13927_s3  ;;  %v11365_v61 = vpop.permute.xlu0 %11364 }
 0x8dc   :  { %v11618_v16 = vsel %vm11613_vm6, %v11553_v18, %v11365_v61  ;;  %v10853_v58 = vpop.f32.mrb[196].mxu0  ;;  %v20124_v61 = vld [vmem:[#allocation107_spill] sm:$0xff] }
 0x8dd   :  { %11682 = vst [vmem:[#allocation19 + $0x20] sm:$0xff] %v11618_v16  ;;  %v12633_v56 = vadd.f32 %v18863_v11, %v10853_v58  ;;  %v10855_v15 = vpop.f32.mrb[197].mxu0  ;;  %v11367_v52 = vpop.permute.xlu1 %11366  ;;  %v665_v16 = vadd.f32 %v20124_v61, %v20026_v12  ;;  %v20125_v58 = vld [vmem:[#allocation96_spill] sm:$0xff] }
 0x8de   :  { %v11619_v46 = vsel %vm11613_vm6, %v11554_v40, %v11367_v52  ;;  %v10856_v5 = vpop.f32.mrb[198].mxu0  ;;  %v11558_v49 = vsel %vm11548_vm5, %v950_v27, %v20125_v58  ;;  %v20126_v52 = vld [vmem:[#allocation92_spill] sm:$0xff] }
 0x8df   :  { %v11006_v63 = vmax.f32 %v12633_v56, 0.0  ;;  %11683 = vst [vmem:[#allocation19 + $0x28] sm:$0xff] %v11619_v46  ;;  %v12634_v62 = vadd.f32 %v18863_v11, %v10856_v5  ;;  %v10858_v1 = vpop.f32.mrb[199].mxu0  ;;  %v669_v46 = vadd.f32 %v20126_v52, %v20026_v12 }
 0x8e1   :  { %v11007_v13 = vmax.f32 %v12634_v62, 0.0  ;;  %11424 = vrot.lane.b32.xlu0 %v11006_v63, %s13927_s3  ;;  %v952_v63 = vmax.f32 %v665_v16, 0.0  ;;  %v954_v1 = vmax.f32 %v669_v46, 0.0 }
 0x8e3   :  { %11426 = vrot.lane.b32.xlu1 %v11007_v13, %s13927_s3  ;;  %v11369_v45 = vpop.permute.xlu0 %11368  ;;  %v11559_v13 = vsel %vm11548_vm5, %v952_v63, %v20127_v24  ;;  %v20135_v63 = vld [vmem:[#allocation102_spill] sm:$0xff] }
 0x8e4   :  { %v11620_v31 = vsel %vm11613_vm6, %v11555_v33, %v11369_v45  ;;  %v10861_v48 = vpop.f32.mrb[200].mxu0  ;;  %v20128_v45 = vld [vmem:[#allocation99_spill] sm:$0xff] }
 0x8e5   :  { %11684 = vst [vmem:[#allocation19 + $0x30] sm:$0xff] %v11620_v31  ;;  %v12635_v54 = vadd.f32 %v18863_v11, %v10861_v48  ;;  %v10863_v42 = vpop.f32.mrb[201].mxu0  ;;  %v11371_v37 = vpop.permute.xlu1 %11370  ;;  %v675_v31 = vadd.f32 %v20128_v45, %v20026_v12  ;;  %v20129_v48 = vld [vmem:[#allocation94_spill] sm:$0xff] }
 0x8e6   :  { %v11621_v32 = vsel %vm11613_vm6, %v11556_v8, %v11371_v37  ;;  %v10864_v41 = vpop.f32.mrb[202].mxu0  ;;  %v11560_v44 = vsel %vm11548_vm5, %v954_v1, %v20129_v48  ;;  %v20130_v37 = vld [vmem:[#allocation108_spill] sm:$0xff] }
 0x8e7   :  { %v11008_v47 = vmax.f32 %v12635_v54, 0.0  ;;  %11685 = vst [vmem:[#allocation19 + $0x38] sm:$0xff] %v11621_v32  ;;  %v12636_v14 = vadd.f32 %v18863_v11, %v10864_v41  ;;  %v10866_v50 = vpop.f32.mrb[203].mxu0  ;;  %v679_v32 = vadd.f32 %v20130_v37, %v20026_v12 }
 0x8e9   :  { %v11009_v2 = vmax.f32 %v12636_v14, 0.0  ;;  %11428 = vrot.lane.b32.xlu0 %v11008_v47, %s13927_s3  ;;  %v956_v47 = vmax.f32 %v675_v31, 0.0  ;;  %v958_v50 = vmax.f32 %v679_v32, 0.0 }
 0x8eb   :  { %11430 = vrot.lane.b32.xlu1 %v11009_v2, %s13927_s3  ;;  %v11373_v59 = vpop.permute.xlu0 %11372  ;;  %v11561_v2 = vsel %vm11548_vm5, %v956_v47, %v20131_v57  ;;  %v20139_v47 = vld [vmem:[#allocation103_spill] sm:$0xff] }
 0x8ec   :  { %v11622_v7 = vsel %vm11613_vm6, %v11557_v0, %v11373_v59  ;;  %v10869_v18 = vpop.f32.mrb[204].mxu0  ;;  %v20132_v59 = vld [vmem:[#allocation110_spill] sm:$0xff] }
 0x8ed   :  { %11686 = vst [vmem:[#allocation19 + $0x40] sm:$0xff] %v11622_v7  ;;  %v12637_v10 = vadd.f32 %v18863_v11, %v10869_v18  ;;  %v10871_v29 = vpop.f32.mrb[205].mxu0  ;;  %v11375_v40 = vpop.permute.xlu1 %11374  ;;  %v685_v7 = vadd.f32 %v20132_v59, %v20026_v12  ;;  %v20133_v18 = vld [vmem:[#allocation88_spill] sm:$0xff] }
 0x8ee   :  { %v11623_v56 = vsel %vm11613_vm6, %v11558_v49, %v11375_v40  ;;  %v10872_v15 = vpop.f32.mrb[206].mxu0  ;;  %v11562_v61 = vsel %vm11548_vm5, %v958_v50, %v20133_v18  ;;  %v20134_v40 = vld [vmem:[#allocation26_spill] sm:$0xff] }
 0x8ef   :  { %v11010_v5 = vmax.f32 %v12637_v10, 0.0  ;;  %11687 = vst [vmem:[#allocation19 + $0x48] sm:$0xff] %v11623_v56  ;;  %v12638_v25 = vadd.f32 %v18863_v11, %v10872_v15  ;;  %v10874_v35 = vpop.f32.mrb[207].mxu0  ;;  %v689_v56 = vadd.f32 %v20134_v40, %v20026_v12 }
 0x8f1   :  { %v11011_v62 = vmax.f32 %v12638_v25, 0.0  ;;  %11432 = vrot.lane.b32.xlu0 %v11010_v5, %s13927_s3  ;;  %v960_v5 = vmax.f32 %v685_v7, 0.0  ;;  %v962_v35 = vmax.f32 %v689_v56, 0.0 }
 0x8f3   :  { %11434 = vrot.lane.b32.xlu1 %v11011_v62, %s13927_s3  ;;  %v11377_v36 = vpop.permute.xlu0 %11376  ;;  %v11563_v62 = vsel %vm11548_vm5, %v960_v5, %v20135_v63  ;;  %v20143_v5 = vld [vmem:[#allocation97_spill] sm:$0xff] }
 0x8f4   :  { %v11624_v51 = vsel %vm11613_vm6, %v11559_v13, %v11377_v36  ;;  %v10877_v33 = vpop.f32.mrb[208].mxu0  ;;  %v20136_v36 = vld [vmem:[#allocation29_spill] sm:$0xff] }
 0x8f5   :  { %11688 = vst [vmem:[#allocation19 + $0x50] sm:$0xff] %v11624_v51  ;;  %v12639_v20 = vadd.f32 %v18863_v11, %v10877_v33  ;;  %v10879_v30 = vpop.f32.mrb[209].mxu0  ;;  %v11379_v8 = vpop.permute.xlu1 %11378  ;;  %v695_v51 = vadd.f32 %v20136_v36, %v20026_v12  ;;  %v20137_v33 = vld [vmem:[#allocation104_spill] sm:$0xff] }
 0x8f6   :  { %v11625_v54 = vsel %vm11613_vm6, %v11560_v44, %v11379_v8  ;;  %v10880_v42 = vpop.f32.mrb[210].mxu0  ;;  %v11564_v45 = vsel %vm11548_vm5, %v962_v35, %v20137_v33  ;;  %v20138_v8 = vld [vmem:[#allocation33_spill] sm:$0xff] }
 0x8f7   :  { %v11012_v41 = vmax.f32 %v12639_v20, 0.0  ;;  %11689 = vst [vmem:[#allocation19 + $0x58] sm:$0xff] %v11625_v54  ;;  %v12640_v39 = vadd.f32 %v18863_v11, %v10880_v42  ;;  %v10882_v43 = vpop.f32.mrb[211].mxu0  ;;  %v699_v54 = vadd.f32 %v20138_v8, %v20026_v12 }
 0x8f9   :  { %v11013_v14 = vmax.f32 %v12640_v39, 0.0  ;;  %11436 = vrot.lane.b32.xlu0 %v11012_v41, %s13927_s3  ;;  %v964_v41 = vmax.f32 %v695_v51, 0.0  ;;  %v966_v43 = vmax.f32 %v699_v54, 0.0 }
 0x8fb   :  { %11438 = vrot.lane.b32.xlu1 %v11013_v14, %s13927_s3  ;;  %v11381_v27 = vpop.permute.xlu0 %11380  ;;  %v11565_v14 = vsel %vm11548_vm5, %v964_v41, %v20139_v47  ;;  %v20147_v41 = vld [vmem:[#allocation101_spill] sm:$0xff] }
 0x8fc   :  { %v11626_v9 = vsel %vm11613_vm6, %v11561_v2, %v11381_v27  ;;  %v10885_v0 = vpop.f32.mrb[212].mxu0  ;;  %v20140_v27 = vld [vmem:[#allocation36_spill] sm:$0xff] }
 0x8fd   :  { %11690 = vst [vmem:[#allocation19 + $0x60] sm:$0xff] %v11626_v9  ;;  %v12641_v16 = vadd.f32 %v18863_v11, %v10885_v0  ;;  %v10887_v58 = vpop.f32.mrb[213].mxu0  ;;  %v11383_v49 = vpop.permute.xlu1 %11382  ;;  %v705_v9 = vadd.f32 %v20140_v27, %v20026_v12  ;;  %v20141_v0 = vld [vmem:[#allocation109_spill] sm:$0xff] }
 0x8fe   :  { %v11627_v10 = vsel %vm11613_vm6, %v11562_v61, %v11383_v49  ;;  %v10888_v29 = vpop.f32.mrb[214].mxu0  ;;  %v11566_v59 = vsel %vm11548_vm5, %v966_v43, %v20141_v0  ;;  %v20142_v49 = vld [vmem:[#allocation30_spill] sm:$0xff] }
 0x8ff   :  { %v11014_v15 = vmax.f32 %v12641_v16, 0.0  ;;  %11691 = vst [vmem:[#allocation19 + $0x68] sm:$0xff] %v11627_v10  ;;  %v12642_v52 = vadd.f32 %v18863_v11, %v10888_v29  ;;  %v10890_v46 = vpop.f32.mrb[215].mxu0  ;;  %v709_v10 = vadd.f32 %v20142_v49, %v20026_v12 }
 0x901   :  { %v11015_v25 = vmax.f32 %v12642_v52, 0.0  ;;  %11440 = vrot.lane.b32.xlu0 %v11014_v15, %s13927_s3  ;;  %v968_v15 = vmax.f32 %v705_v9, 0.0  ;;  %v970_v46 = vmax.f32 %v709_v10, 0.0 }
 0x903   :  { %11442 = vrot.lane.b32.xlu1 %v11015_v25, %s13927_s3  ;;  %v11385_v1 = vpop.permute.xlu0 %11384  ;;  %v11567_v25 = vsel %vm11548_vm5, %v968_v15, %v20143_v5  ;;  %v20151_v15 = vld [vmem:[#allocation111_spill] sm:$0xff] }
 0x904   :  { %v11628_v24 = vsel %vm11613_vm6, %v11563_v62, %v11385_v1  ;;  %v10893_v13 = vpop.f32.mrb[216].mxu0  ;;  %v20144_v1 = vld [vmem:[#allocation41_spill] sm:$0xff] }
 0x905   :  { %11692 = vst [vmem:[#allocation19 + $0x70] sm:$0xff] %v11628_v24  ;;  %v12643_v31 = vadd.f32 %v18863_v11, %v10893_v13  ;;  %v10895_v48 = vpop.f32.mrb[217].mxu0  ;;  %v11387_v44 = vpop.permute.xlu1 %11386  ;;  %v715_v24 = vadd.f32 %v20144_v1, %v20026_v12  ;;  %v20145_v13 = vld [vmem:[#allocation105_spill] sm:$0xff] }
 0x906   :  { %v11629_v20 = vsel %vm11613_vm6, %v11564_v45, %v11387_v44  ;;  %v10896_v30 = vpop.f32.mrb[218].mxu0  ;;  %v11568_v36 = vsel %vm11548_vm5, %v970_v46, %v20145_v13  ;;  %v20146_v44 = vld [vmem:[#allocation37_spill] sm:$0xff] }
 0x907   :  { %v11016_v42 = vmax.f32 %v12643_v31, 0.0  ;;  %11693 = vst [vmem:[#allocation19 + $0x78] sm:$0xff] %v11629_v20  ;;  %v12644_v37 = vadd.f32 %v18863_v11, %v10896_v30  ;;  %v10898_v32 = vpop.f32.mrb[219].mxu0  ;;  %v719_v20 = vadd.f32 %v20146_v44, %v20026_v12 }
 0x909   :  { %v11017_v39 = vmax.f32 %v12644_v37, 0.0  ;;  %11444 = vrot.lane.b32.xlu0 %v11016_v42, %s13927_s3  ;;  %v972_v42 = vmax.f32 %v715_v24, 0.0  ;;  %v974_v32 = vmax.f32 %v719_v20, 0.0 }
 0x90b   :  { %11446 = vrot.lane.b32.xlu1 %v11017_v39, %s13927_s3  ;;  %v11389_v50 = vpop.permute.xlu0 %11388  ;;  %v11569_v39 = vsel %vm11548_vm5, %v972_v42, %v20147_v41  ;;  %v20155_v42 = vld [vmem:[#allocation116_spill] sm:$0xff] }
 0x90c   :  { %v11630_v57 = vsel %vm11613_vm6, %v11565_v14, %v11389_v50  ;;  %v10901_v2 = vpop.f32.mrb[220].mxu0  ;;  %v20148_v50 = vld [vmem:[#allocation49_spill] sm:$0xff] }
 0x90d   :  { %11694 = vst [vmem:[#allocation19 + $0x80] sm:$0xff] %v11630_v57  ;;  %v12645_v7 = vadd.f32 %v18863_v11, %v10901_v2  ;;  %v10903_v18 = vpop.f32.mrb[221].mxu0  ;;  %v11391_v61 = vpop.permute.xlu1 %11390  ;;  %v725_v57 = vadd.f32 %v20148_v50, %v20026_v12  ;;  %v20149_v2 = vld [vmem:[#allocation114_spill] sm:$0xff] }
 0x90e   :  { %v11631_v16 = vsel %vm11613_vm6, %v11566_v59, %v11391_v61  ;;  %v10904_v58 = vpop.f32.mrb[222].mxu0  ;;  %v11570_v27 = vsel %vm11548_vm5, %v974_v32, %v20149_v2  ;;  %v20150_v61 = vld [vmem:[#allocation39_spill] sm:$0xff] }
 0x90f   :  { %v11018_v29 = vmax.f32 %v12645_v7, 0.0  ;;  %11695 = vst [vmem:[#allocation19 + $0x88] sm:$0xff] %v11631_v16  ;;  %v12646_v40 = vadd.f32 %v18863_v11, %v10904_v58  ;;  %v10906_v56 = vpop.f32.mrb[223].mxu0  ;;  %v729_v16 = vadd.f32 %v20150_v61, %v20026_v12 }
 0x911   :  { %v11019_v52 = vmax.f32 %v12646_v40, 0.0  ;;  %11448 = vrot.lane.b32.xlu0 %v11018_v29, %s13927_s3  ;;  %v976_v29 = vmax.f32 %v725_v57, 0.0  ;;  %v978_v56 = vmax.f32 %v729_v16, 0.0 }
 0x913   :  { %11450 = vrot.lane.b32.xlu1 %v11019_v52, %s13927_s3  ;;  %v11393_v35 = vpop.permute.xlu0 %11392  ;;  %v11571_v52 = vsel %vm11548_vm5, %v976_v29, %v20151_v15  ;;  %v20159_v29 = vld [vmem:[#allocation115_spill] sm:$0xff] }
 0x914   :  { %v11632_v63 = vsel %vm11613_vm6, %v11567_v25, %v11393_v35  ;;  %v10909_v62 = vpop.f32.mrb[224].mxu0  ;;  %v20152_v35 = vld [vmem:[#allocation57_spill] sm:$0xff] }
 0x915   :  { %11696 = vst [vmem:[#allocation19 + $0x90] sm:$0xff] %v11632_v63  ;;  %v12647_v51 = vadd.f32 %v18863_v11, %v10909_v62  ;;  %v10911_v33 = vpop.f32.mrb[225].mxu0  ;;  %v11395_v45 = vpop.permute.xlu1 %11394  ;;  %v735_v63 = vadd.f32 %v20152_v35, %v20026_v12  ;;  %v20153_v62 = vld [vmem:[#allocation113_spill] sm:$0xff] }
 0x916   :  { %v11633_v31 = vsel %vm11613_vm6, %v11568_v36, %v11395_v45  ;;  %v10912_v48 = vpop.f32.mrb[226].mxu0  ;;  %v11572_v1 = vsel %vm11548_vm5, %v978_v56, %v20153_v62  ;;  %v20154_v45 = vld [vmem:[#allocation44_spill] sm:$0xff] }
 0x917   :  { %v11020_v30 = vmax.f32 %v12647_v51, 0.0  ;;  %11697 = vst [vmem:[#allocation19 + $0x98] sm:$0xff] %v11633_v31  ;;  %v12648_v8 = vadd.f32 %v18863_v11, %v10912_v48  ;;  %v10914_v54 = vpop.f32.mrb[227].mxu0  ;;  %v739_v31 = vadd.f32 %v20154_v45, %v20026_v12 }
 0x919   :  { %v11021_v37 = vmax.f32 %v12648_v8, 0.0  ;;  %11452 = vrot.lane.b32.xlu0 %v11020_v30, %s13927_s3  ;;  %v980_v30 = vmax.f32 %v735_v63, 0.0  ;;  %v982_v54 = vmax.f32 %v739_v31, 0.0 }
 0x91b   :  { %11454 = vrot.lane.b32.xlu1 %v11021_v37, %s13927_s3  ;;  %v11397_v43 = vpop.permute.xlu0 %11396  ;;  %v11573_v37 = vsel %vm11548_vm5, %v980_v30, %v20155_v42  ;;  %v20163_v30 = vld [vmem:[#allocation120_spill] sm:$0xff] }
 0x91c   :  { %v11634_v47 = vsel %vm11613_vm6, %v11569_v39, %v11397_v43  ;;  %v10917_v14 = vpop.f32.mrb[228].mxu0  ;;  %v20156_v43 = vld [vmem:[#allocation51_spill] sm:$0xff] }
 0x91d   :  { %11698 = vst [vmem:[#allocation19 + $0xa0] sm:$0xff] %v11634_v47  ;;  %v12649_v9 = vadd.f32 %v18863_v11, %v10917_v14  ;;  %v10919_v0 = vpop.f32.mrb[229].mxu0  ;;  %v11399_v59 = vpop.permute.xlu1 %11398  ;;  %v745_v47 = vadd.f32 %v20156_v43, %v20026_v12  ;;  %v20157_v14 = vld [vmem:[#allocation118_spill] sm:$0xff] }
 0x91e   :  { %v11635_v7 = vsel %vm11613_vm6, %v11570_v27, %v11399_v59  ;;  %v10920_v18 = vpop.f32.mrb[230].mxu0  ;;  %v11574_v50 = vsel %vm11548_vm5, %v982_v54, %v20157_v14  ;;  %v20158_v59 = vld [vmem:[#allocation59_spill] sm:$0xff] }
 0x91f   :  { %v11022_v58 = vmax.f32 %v12649_v9, 0.0  ;;  %11699 = vst [vmem:[#allocation19 + $0xa8] sm:$0xff] %v11635_v7  ;;  %v12650_v49 = vadd.f32 %v18863_v11, %v10920_v18  ;;  %v10922_v10 = vpop.f32.mrb[231].mxu0  ;;  %v749_v7 = vadd.f32 %v20158_v59, %v20026_v12  ;;  %v20165_v59 = vld [vmem:[#allocation119_spill] sm:$0xff] }
 0x921   :  { %v11023_v40 = vmax.f32 %v12650_v49, 0.0  ;;  %11456 = vrot.lane.b32.xlu0 %v11022_v58, %s13927_s3  ;;  %v984_v58 = vmax.f32 %v745_v47, 0.0  ;;  %v986_v10 = vmax.f32 %v749_v7, 0.0 }
 0x923   :  { %11458 = vrot.lane.b32.xlu1 %v11023_v40, %s13927_s3  ;;  %v11401_v46 = vpop.permute.xlu0 %11400  ;;  %v11575_v40 = vsel %vm11548_vm5, %v984_v58, %v20159_v29 }
 0x924   :  { %v11636_v5 = vsel %vm11613_vm6, %v11571_v52, %v11401_v46  ;;  %v10925_v25 = vpop.f32.mrb[232].mxu0  ;;  %v20160_v46 = vld [vmem:[#allocation56_spill] sm:$0xff] }
 0x925   :  { %11700 = vst [vmem:[#allocation19 + $0xb0] sm:$0xff] %v11636_v5  ;;  %v12651_v24 = vadd.f32 %v18863_v11, %v10925_v25  ;;  %v10927_v13 = vpop.f32.mrb[233].mxu0  ;;  %v11403_v36 = vpop.permute.xlu1 %11402  ;;  %v755_v5 = vadd.f32 %v20160_v46, %v20026_v12  ;;  %v20161_v25 = vld [vmem:[#allocation117_spill] sm:$0xff]  ;;  %v20166_v46 = vld [vmem:[#allocation124_spill] sm:$0xff] }
 0x926   :  { %v11637_v51 = vsel %vm11613_vm6, %v11572_v1, %v11403_v36  ;;  %v10928_v33 = vpop.f32.mrb[234].mxu0  ;;  %v11576_v35 = vsel %vm11548_vm5, %v986_v10, %v20161_v25  ;;  %v20162_v36 = vld [vmem:[#allocation65_spill] sm:$0xff] }
 0x927   :  { %v11024_v48 = vmax.f32 %v12651_v24, 0.0  ;;  %11701 = vst [vmem:[#allocation19 + $0xb8] sm:$0xff] %v11637_v51  ;;  %v12652_v44 = vadd.f32 %v18863_v11, %v10928_v33  ;;  %v10930_v20 = vpop.f32.mrb[235].mxu0  ;;  %v759_v51 = vadd.f32 %v20162_v36, %v20026_v12 }
 0x929   :  { %v11025_v8 = vmax.f32 %v12652_v44, 0.0  ;;  %11460 = vrot.lane.b32.xlu0 %v11024_v48, %s13927_s3  ;;  %v988_v48 = vmax.f32 %v755_v5, 0.0  ;;  %v990_v20 = vmax.f32 %v759_v51, 0.0 }
 0x92b   :  { %11462 = vrot.lane.b32.xlu1 %v11025_v8, %s13927_s3  ;;  %v11405_v32 = vpop.permute.xlu0 %11404  ;;  %v11577_v8 = vsel %vm11548_vm5, %v988_v48, %v20163_v30 }
 0x92c   :  { %v11638_v41 = vsel %vm11613_vm6, %v11573_v37, %v11405_v32  ;;  %v10933_v39 = vpop.f32.mrb[236].mxu0  ;;  %v20164_v32 = vld [vmem:[#allocation122_spill] sm:$0xff] }
 0x92d   :  { %11702 = vst [vmem:[#allocation19 + $0xc0] sm:$0xff] %v11638_v41  ;;  %v12653_v57 = vadd.f32 %v18863_v11, %v10933_v39  ;;  %v10935_v2 = vpop.f32.mrb[237].mxu0  ;;  %v11407_v27 = vpop.permute.xlu1 %11406  ;;  %v11578_v41 = vsel %vm11548_vm5, %v990_v20, %v20164_v32 }
 0x92e   :  { %v11639_v9 = vsel %vm11613_vm6, %v11574_v50, %v11407_v27  ;;  %v10936_v0 = vpop.f32.mrb[238].mxu0 }
 0x92f   :  { %v11026_v18 = vmax.f32 %v12653_v57, 0.0  ;;  %11703 = vst [vmem:[#allocation19 + $0xc8] sm:$0xff] %v11639_v9  ;;  %v12654_v61 = vadd.f32 %v18863_v11, %v10936_v0  ;;  %v10938_v16 = vpop.f32.mrb[239].mxu0 }
 0x931   :  { %v11027_v49 = vmax.f32 %v12654_v61, 0.0  ;;  %11464 = vrot.lane.b32.xlu0 %v11026_v18, %s13927_s3 }
 0x933   :  { %11466 = vrot.lane.b32.xlu1 %v11027_v49, %s13927_s3  ;;  %v11409_v56 = vpop.permute.xlu0 %11408 }
 0x934   :  { %v11640_v15 = vsel %vm11613_vm6, %v11575_v40, %v11409_v56  ;;  %v10941_v52 = vpop.f32.mrb[240].mxu0 }
 0x935   :  { %11704 = vst [vmem:[#allocation19 + $0xd0] sm:$0xff] %v11640_v15  ;;  %v12655_v63 = vadd.f32 %v18863_v11, %v10941_v52  ;;  %v10943_v62 = vpop.f32.mrb[241].mxu0  ;;  %v11411_v1 = vpop.permute.xlu1 %11410 }
 0x936   :  { %v11641_v24 = vsel %vm11613_vm6, %v11576_v35, %v11411_v1  ;;  %v10944_v13 = vpop.f32.mrb[242].mxu0  ;;  %v13677_v35 = vld [vmem:[#allocation18] ss:$0 sm:$0xff]  ;;  %v20167_v1 = vld [vmem:[#allocation123_spill] sm:$0xff] }
 0x937   :  { %v11028_v33 = vmax.f32 %v12655_v63, 0.0  ;;  %11705 = vst [vmem:[#allocation19 + $0xd8] sm:$0xff] %v11641_v24  ;;  %v12656_v45 = vadd.f32 %v18863_v11, %v10944_v13  ;;  %v10946_v31 = vpop.f32.mrb[243].mxu0 }
 0x938   :  { %v20168_v31 = vld [vmem:[#allocation121_spill] sm:$0xff] }
 0x939   :  { %v11029_v44 = vmax.f32 %v12656_v45, 0.0  ;;  %11468 = vrot.lane.b32.xlu0 %v11028_v33, %s13927_s3 }
 0x93b   :  { %11470 = vrot.lane.b32.xlu1 %v11029_v44, %s13927_s3  ;;  %v11413_v54 = vpop.permute.xlu0 %11412 }
 0x93c   :  { %v11642_v42 = vsel %vm11613_vm6, %v11577_v8, %v11413_v54  ;;  %v10949_v37 = vpop.f32.mrb[244].mxu0  ;;  %v20169_v8 = vld [vmem:[#allocation126_spill] sm:$0xff] }
 0x93d   :  { %11706 = vst [vmem:[#allocation19 + $0xe0] sm:$0xff] %v11642_v42  ;;  %v12657_v39 = vadd.f32 %v18863_v11, %v10949_v37  ;;  %v10951_v43 = vpop.f32.mrb[245].mxu0  ;;  %v11415_v47 = vpop.permute.xlu1 %11414  ;;  %v20170_v37 = vld [vmem:[#allocation125_spill] sm:$0xff] }
 0x93e   :  { %v11643_v14 = vsel %vm11613_vm6, %v11578_v41, %v11415_v47  ;;  %v10952_v50 = vpop.f32.mrb[246].mxu0 }
 0x93f   :  { %v11030_v57 = vmax.f32 %v12657_v39, 0.0  ;;  %11707 = vst [vmem:[#allocation19 + $0xe8] sm:$0xff] %v11643_v14  ;;  %v12658_v2 = vadd.f32 %v18863_v11, %v10952_v50  ;;  %v10954_v27 = vpop.f32.mrb[247].mxu0  ;;  %v20171_v39 = vld [vmem:[#allocation128_spill] sm:$0xff]  ;;  %v20172_v50 = vld [vmem:[#allocation127_spill] sm:$0xff] }
 0x940   :  { %v20173_v27 = vld [vmem:[#allocation132_spill] sm:$0xff] }
 0x941   :  { %v11031_v9 = vmax.f32 %v12658_v2, 0.0  ;;  %11472 = vrot.lane.b32.xlu0 %v11030_v57, %s13927_s3 }
 0x943   :  { %11474 = vrot.lane.b32.xlu1 %v11031_v9, %s13927_s3  ;;  %v11417_v0 = vpop.permute.xlu0 %11416 }
 0x944   :  { %v11644_v7 = vsel %vm11613_vm6, %v20165_v59, %v11417_v0  ;;  %v10957_v18 = vpop.f32.mrb[248].mxu0  ;;  %v20174_v59 = vld [vmem:[#allocation130_spill] sm:$0xff] }
 0x945   :  { %11708 = vst [vmem:[#allocation19 + $0xf0] sm:$0xff] %v11644_v7  ;;  %v12659_v61 = vadd.f32 %v18863_v11, %v10957_v18  ;;  %v10959_v16 = vpop.f32.mrb[249].mxu0  ;;  %v11419_v58 = vpop.permute.xlu1 %11418 }
 0x946   :  { %v11645_v49 = vsel %vm11613_vm6, %v18582_v34, %v11419_v58  ;;  %v10960_v10 = vpop.f32.mrb[250].mxu0  ;;  %v20175_v16 = vld [vmem:[#allocation129_spill] sm:$0xff] }
 0x947   :  { %v11032_v29 = vmax.f32 %v12659_v61, 0.0  ;;  %11709 = vst [vmem:[#allocation19 + $0xf8] sm:$0xff] %v11645_v49  ;;  %v12660_v40 = vadd.f32 %v18863_v11, %v10960_v10  ;;  %v10962_v56 = vpop.f32.mrb[251].mxu0  ;;  %v20176_v10 = vld [vmem:[#allocation134_spill] sm:$0xff] }
 0x948   :  { %v20177_v56 = vld [vmem:[#allocation131_spill] sm:$0xff] }
 0x949   :  { %v11033_v15 = vmax.f32 %v12660_v40, 0.0  ;;  %11476 = vrot.lane.b32.xlu0 %v11032_v29, %s13927_s3 }
 0x94b   :  { %11478 = vrot.lane.b32.xlu1 %v11033_v15, %s13927_s3  ;;  %v11421_v52 = vpop.permute.xlu0 %11420 }
 0x94c   :  { %v11646_v5 = vsel %vm11613_vm6, %v20166_v46, %v11421_v52  ;;  %v10965_v25 = vpop.f32.mrb[252].mxu0 }
 0x94d   :  { %11710 = vst [vmem:[#allocation19 + $0x100] sm:$0xff] %v11646_v5  ;;  %v12661_v63 = vadd.f32 %v13677_v35, %v10965_v25  ;;  %v10967_v34 = vpop.f32.mrb[253].mxu0  ;;  %v11423_v62 = vpop.permute.xlu1 %11422  ;;  %v20178_v5 = vld [vmem:[#allocation136_spill] sm:$0xff] }
 0x94e   :  { %v11647_v24 = vsel %vm11613_vm6, %v20167_v1, %v11423_v62  ;;  %v10968_v11 = vpop.f32.mrb[254].mxu0  ;;  %v20180_v1 = vld [vmem:[#allocation133_spill] sm:$0xff] }
 0x94f   :  { %v11034_v13 = vmax.f32 %v12661_v63, 0.0  ;;  %11711 = vst [vmem:[#allocation19 + $0x108] sm:$0xff] %v11647_v24  ;;  %v12662_v36 = vadd.f32 %v13677_v35, %v10968_v11  ;;  %v10970_v51 = vpop.f32.mrb[255].mxu0  ;;  %v20179_v63 = vld [vmem:[#allocation135_spill] sm:$0xff] }
 0x951   :  { %v11035_v33 = vmax.f32 %v12662_v36, 0.0  ;;  %11480 = vrot.lane.b32.xlu0 %v11034_v13, %s13927_s3  ;;  %v20181_v36 = vld [vmem:[#allocation138_spill] sm:$0xff] }
 0x953   :  { %11482 = vrot.lane.b32.xlu1 %v11035_v33, %s13927_s3  ;;  %v11425_v45 = vpop.permute.xlu0 %11424 }
 0x954   :  { %v11648_v48 = vsel %vm11613_vm6, %v20168_v31, %v11425_v45 }
 0x955   :  { %11712 = vst [vmem:[#allocation19 + $0x110] sm:$0xff] %v11648_v48  ;;  %v11427_v44 = vpop.permute.xlu1 %11426  ;;  %v20182_v48 = vld [vmem:[#allocation140_spill] sm:$0xff] }
 0x956   :  { %v11649_v20 = vsel %vm11613_vm6, %v18607_v19, %v11427_v44 }
 0x957   :  { %11713 = vst [vmem:[#allocation19 + $0x118] sm:$0xff] %v11649_v20 }
 0x95b   :  { %v11429_v30 = vpop.permute.xlu0 %11428 }
 0x95c   :  { %v11650_v54 = vsel %vm11613_vm6, %v20169_v8, %v11429_v30  ;;  %v20183_v8 = vld [vmem:[#allocation137_spill] sm:$0xff] }
 0x95d   :  { %11714 = vst [vmem:[#allocation19 + $0x120] sm:$0xff] %v11650_v54  ;;  %v11431_v42 = vpop.permute.xlu1 %11430 }
 0x95e   :  { %v11651_v32 = vsel %vm11613_vm6, %v20170_v37, %v11431_v42 }
 0x95f   :  { %11715 = vst [vmem:[#allocation19 + $0x128] sm:$0xff] %v11651_v32 }
 0x963   :  { %v11433_v41 = vpop.permute.xlu0 %11432 }
 0x964   :  { %v11652_v43 = vsel %vm11613_vm6, %v20171_v39, %v11433_v41 }
 0x965   :  { %11716 = vst [vmem:[#allocation19 + $0x130] sm:$0xff] %v11652_v43  ;;  %v11435_v47 = vpop.permute.xlu1 %11434 }
 0x966   :  { %v11653_v19 = vsel %vm11613_vm6, %v18632_v17, %v11435_v47  ;;  %v20184_v47 = vld [vmem:[#allocation63_spill] sm:$0xff] }
 0x967   :  { %11717 = vst [vmem:[#allocation19 + $0x138] sm:$0xff] %v11653_v19  ;;  %v925_v19 = vadd.f32 %v20184_v47, %v20026_v12 }
 0x96b   :  { %v11437_v14 = vpop.permute.xlu0 %11436 }
 0x96c   :  { %v11654_v57 = vsel %vm11613_vm6, %v20172_v50, %v11437_v14 }
 0x96d   :  { %11718 = vst [vmem:[#allocation19 + $0x140] sm:$0xff] %v11654_v57  ;;  %v11439_v2 = vpop.permute.xlu1 %11438  ;;  %v1056_v57 = vmax.f32 %v925_v19, 0.0 }
 0x96e   :  { %v11655_v9 = vsel %vm11613_vm6, %v20173_v27, %v11439_v2 }
 0x96f   :  { %11719 = vst [vmem:[#allocation19 + $0x148] sm:$0xff] %v11655_v9  ;;  %v11611_v2 = vsel %vm11548_vm5, %v1056_v57, %v18949_v60 }
 0x973   :  { %v11441_v0 = vpop.permute.xlu0 %11440 }
 0x974   :  { %v11656_v7 = vsel %vm11613_vm6, %v20174_v59, %v11441_v0 }
 0x975   :  { %11720 = vst [vmem:[#allocation19 + $0x150] sm:$0xff] %v11656_v7  ;;  %v11443_v18 = vpop.permute.xlu1 %11442 }
 0x976   :  { %v11657_v17 = vsel %vm11613_vm6, %v18657_v3, %v11443_v18 }
 0x977   :  { %11721 = vst [vmem:[#allocation19 + $0x158] sm:$0xff] %v11657_v17 }
 0x97b   :  { %v11445_v61 = vpop.permute.xlu0 %11444 }
 0x97c   :  { %v11658_v58 = vsel %vm11613_vm6, %v20175_v16, %v11445_v61 }
 0x97d   :  { %11722 = vst [vmem:[#allocation19 + $0x160] sm:$0xff] %v11658_v58  ;;  %v11447_v49 = vpop.permute.xlu1 %11446 }
 0x97e   :  { %v11659_v29 = vsel %vm11613_vm6, %v20176_v10, %v11447_v49 }
 0x97f   :  { %11723 = vst [vmem:[#allocation19 + $0x168] sm:$0xff] %v11659_v29 }
 0x983   :  { %v11449_v40 = vpop.permute.xlu0 %11448 }
 0x984   :  { %v11660_v15 = vsel %vm11613_vm6, %v20177_v56, %v11449_v40 }
 0x985   :  { %11724 = vst [vmem:[#allocation19 + $0x170] sm:$0xff] %v11660_v15  ;;  %v11451_v52 = vpop.permute.xlu1 %11450 }
 0x986   :  { %v11661_v3 = vsel %vm11613_vm6, %v18682_v6, %v11451_v52 }
 0x987   :  { %11725 = vst [vmem:[#allocation19 + $0x178] sm:$0xff] %v11661_v3 }
 0x98b   :  { %v11453_v46 = vpop.permute.xlu0 %11452 }
 0x98c   :  { %v11662_v25 = vsel %vm11613_vm6, %v20178_v5, %v11453_v46 }
 0x98d   :  { %11726 = vst [vmem:[#allocation19 + $0x180] sm:$0xff] %v11662_v25  ;;  %v11455_v35 = vpop.permute.xlu1 %11454 }
 0x98e   :  { %v11663_v34 = vsel %vm11613_vm6, %v20179_v63, %v11455_v35 }
 0x98f   :  { %11727 = vst [vmem:[#allocation19 + $0x188] sm:$0xff] %v11663_v34 }
 0x993   :  { %v11457_v62 = vpop.permute.xlu0 %11456 }
 0x994   :  { %v11664_v24 = vsel %vm11613_vm6, %v20180_v1, %v11457_v62 }
 0x995   :  { %11728 = vst [vmem:[#allocation19 + $0x190] sm:$0xff] %v11664_v24  ;;  %v11459_v11 = vpop.permute.xlu1 %11458 }
 0x996   :  { %v11665_v6 = vsel %vm11613_vm6, %v18707_v4, %v11459_v11 }
 0x997   :  { %11729 = vst [vmem:[#allocation19 + $0x198] sm:$0xff] %v11665_v6 }
 0x99b   :  { %v11461_v13 = vpop.permute.xlu0 %11460 }
 0x99c   :  { %v11666_v51 = vsel %vm11613_vm6, %v20181_v36, %v11461_v13 }
 0x99d   :  { %11730 = vst [vmem:[#allocation19 + $0x1a0] sm:$0xff] %v11666_v51  ;;  %v11463_v33 = vpop.permute.xlu1 %11462 }
 0x99e   :  { %v11667_v45 = vsel %vm11613_vm6, %v18720_v55, %v11463_v33 }
 0x99f   :  { %11731 = vst [vmem:[#allocation19 + $0x1a8] sm:$0xff] %v11667_v45 }
 0x9a3   :  { %v11465_v31 = vpop.permute.xlu0 %11464 }
 0x9a4   :  { %v11668_v44 = vsel %vm11613_vm6, %v20182_v48, %v11465_v31 }
 0x9a5   :  { %11732 = vst [vmem:[#allocation19 + $0x1b0] sm:$0xff] %v11668_v44  ;;  %v11467_v20 = vpop.permute.xlu1 %11466 }
 0x9a6   :  { %v11669_v4 = vsel %vm11613_vm6, %v18732_v28, %v11467_v20 }
 0x9a7   :  { %11733 = vst [vmem:[#allocation19 + $0x1b8] sm:$0xff] %v11669_v4 }
 0x9ab   :  { %v11469_v30 = vpop.permute.xlu0 %11468 }
 0x9ac   :  { %v11670_v54 = vsel %vm11613_vm6, %v20183_v8, %v11469_v30 }
 0x9ad   :  { %11734 = vst [vmem:[#allocation19 + $0x1c0] sm:$0xff] %v11670_v54  ;;  %v11471_v42 = vpop.permute.xlu1 %11470 }
 0x9ae   :  { %v11671_v55 = vsel %vm11613_vm6, %v18743_v21, %v11471_v42 }
 0x9af   :  { %11735 = vst [vmem:[#allocation19 + $0x1c8] sm:$0xff] %v11671_v55 }
 0x9b3   :  { %v11473_v37 = vpop.permute.xlu0 %11472 }
 0x9b4   :  { %v11672_v32 = vsel %vm11613_vm6, %v18735_v23, %v11473_v37  ;;  %v20185_v23 = vld [vmem:[#allocation55_spill] sm:$0xff] }
 0x9b5   :  { %11736 = vst [vmem:[#allocation19 + $0x1d0] sm:$0xff] %v11672_v32  ;;  %v11475_v41 = vpop.permute.xlu1 %11474  ;;  %v929_v50 = vadd.f32 %v20185_v23, %v20026_v12 }
 0x9b6   :  { %v11673_v28 = vsel %vm11613_vm6, %v18753_v26, %v11475_v41 }
 0x9b7   :  { %11737 = vst [vmem:[#allocation19 + $0x1d8] sm:$0xff] %v11673_v28  ;;  %v1058_v26 = vmax.f32 %v929_v50, 0.0 }
 0x9b9   :  { %v11612_v9 = vsel %vm11548_vm5, %v1058_v26, %v18952_v38 }
 0x9bb   :  { %v11477_v39 = vpop.permute.xlu0 %11476 }
 0x9bc   :  { %v11674_v43 = vsel %vm11613_vm6, %v18746_v53, %v11477_v39 }
 0x9bd   :  { %11738 = vst [vmem:[#allocation19 + $0x1e0] sm:$0xff] %v11674_v43  ;;  %v11479_v21 = vpop.permute.xlu1 %11478 }
 0x9be   :  { %v11675_v14 = vsel %vm11613_vm6, %v18759_v22, %v11479_v21 }
 0x9bf   :  { %11739 = vst [vmem:[#allocation19 + $0x1e8] sm:$0xff] %v11675_v14 }
 0x9c3   :  { %v11481_v53 = vpop.permute.xlu0 %11480 }
 0x9c4   :  { %v11676_v27 = vsel %vm11613_vm6, %v11611_v2, %v11481_v53 }
 0x9c5   :  { %11740 = vst [vmem:[#allocation19 + $0x1f0] sm:$0xff] %v11676_v27  ;;  %v11483_v0 = vpop.permute.xlu1 %11482 }
 0x9c6   :  { %v11677_v22 = vsel %vm11613_vm6, %v11612_v9, %v11483_v0 }
 0x9c7   :  { %11741 = vst [vmem:[#allocation19 + $0x1f8] sm:$0xff] %v11677_v22 }
 0x9c8   :  { %13887 = shalt.err (!%p13884_p6)
}
 0x9c9   :  { %s13888_s13 = scalar_lea.hbm %s19266_s9, 8192 }
 0x9ca   :  { %p13889_p7 = scmp.ne.s32.totalorder %s19266_s9, %s13888_s13  ;;  %p13892_p8 = scmp.lt.u32.totalorder %s13888_s13, %s19266_s9 }
 0x9cc   :  { %p13894_p9 = pnand %p13892_p8, %p13889_p7 }
 0x9ce   :  { %13897 = shalt.err (!%p13894_p9)
}
 0x9cf   :  { %11753 = dma.vmem_to_hbm [thread:$0]  %s11748_s10, 8192, %s19266_s9, [#allocation6], %s13917_s7, %s13917_s7, %s13918_s12  }
 0x9d0   :  { %13908 = dma.done.wait [#allocation6], 8192  }
 0x9d1   :  { %13909 = vsyncadd [#allocation6], 4294959104 }
 0x9d2   :  { %11757 = vsyncpa [#allocation5], 1 }
 0x9d3   :  { %11758 = vsyncpa [#allocation8], 1 }
 0x9d4   :  { %11759 = vsyncpa [#allocation11], 1 }
 0x9d5   :  { %11760 = vsyncpa [#allocation14], 1 }
 0x9d6   :  { %11761 = vsyncpa [#allocation17], 1 }
 0x9d7   :  { %11762 = vsyncpa [#allocation6], 1 }

</bundles_post_ra>
